<compile_context>
chip_gen: v5e
topology: v5e:2x2
jax: 0.10.0
libtpu: 0.0.40
codegen_flags: <defaults>
</compile_context>

<pallas_src>
import numpy as np
import jax
import jax.numpy as jnp
from jax import lax
from jax.experimental import pallas as pl
from jax.experimental.pallas import tpu as pltpu

# ----------------------------- config (small, deterministic) -----------------------------
B = 2
H = W = 8                  # input_resolution
C = 32                     # dim
DEPTH = 2                  # one regular + one shifted block
NH = 2                     # num_heads
HEAD_DIM = C // NH
WS = 4                     # window_size
MLP_RATIO = 2.0
HIDDEN = int(C * MLP_RATIO)
L_TOK = H * W              # 64 tokens
L_OUT = 4 * L_TOK          # 256 tokens after x2 upsample
C_OUT = C // 2             # 16 output channels

# packed block-weight buffer (DEPTH, C, WBLK_W) column offsets
OFF_QKV = 0
OFF_PROJ = 3 * C                   # 96
OFF_FC1 = OFF_PROJ + C             # 128
OFF_FC2T = OFF_FC1 + HIDDEN        # 192
WBLK_W = OFF_FC2T + HIDDEN         # 256

# packed vector buffer (N_VROWS, 128) row indices
VROWS_PER_BLK = 8
R_N1G, R_N1B, R_N2G, R_N2B, R_BQKV, R_BPROJ, R_BFC1, R_BFC2 = range(8)
R_B1UP = DEPTH * VROWS_PER_BLK     # 16
R_ALPHA = R_B1UP + 1               # 17
N_VROWS = R_ALPHA + 1              # 18

# packed upsample-weight buffer (WUP_ROWS, WUP_COLS) row offsets
R_W1UP = 0                         # rows [0,32): merged first 1x1 convs (C, 3C)
R_WBT = C                          # rows [32,48): (b2_w @ conv_bot)^T            (16, C)
R_VGT = R_WBT + C_OUT              # rows [48,112): V_g^T stacked, g=0..3         (64, 2C)
WUP_ROWS = R_VGT + 4 * C_OUT       # 112
WUP_COLS = 3 * C                   # 96

# ----------------------------- static (numpy, build-time) operators -----------------------------

def build_rel_index(ws):
    coords = np.stack(np.meshgrid(np.arange(ws), np.arange(ws), indexing="ij"))
    cf = coords.reshape(2, -1)
    rel = (cf[:, :, None] - cf[:, None, :]).transpose(1, 2, 0).astype(np.int64)
    rel[:, :, 0] += ws - 1
    rel[:, :, 1] += ws - 1
    rel[:, :, 0] *= 2 * ws - 1
    return rel.sum(-1)                                  # (ws*ws, ws*ws)


def build_block_bias_struct(h, w, ws, shift):
    """(L,L) structures in raster-token order that fold roll + window partition + shift mask."""
    L = h * w
    rel_small = build_rel_index(ws)
    hh, ww = np.meshgrid(np.arange(h), np.arange(w), indexing="ij")
    hr = (hh - shift) % h                               # rolled coordinates of each token
    wr = (ww - shift) % w
    wid = ((hr // ws) * (w // ws) + (wr // ws)).reshape(-1)       # rolled-window id
    nin = ((hr % ws) * ws + (wr % ws)).reshape(-1)                # within-window flat index
    same = (wid[:, None] == wid[None, :])
    rel_full = rel_small[nin[:, None], nin[None, :]].astype(np.int32)
    if shift > 0:
        img = np.zeros((h, w), np.float32)
        cnt = 0
        for hs in (slice(0, -ws), slice(-ws, -shift), slice(-shift, None)):
            for wsl in (slice(0, -ws), slice(-ws, -shift), slice(-shift, None)):
                img[hs, wsl] = cnt
                cnt += 1
        reg = img[hr, wr].reshape(-1)                   # region id evaluated at rolled coords
        sm = np.where(reg[:, None] != reg[None, :], -100.0, 0.0).astype(np.float32)
    else:
        sm = np.zeros((L, L), np.float32)
    mask_add = np.where(same, sm, -1e9).astype(np.float32)
    return rel_full, same.astype(np.float32), mask_add


def build_pixel_shuffle_ops(h, w, r, cout):
    """S_g (r*r, h*r*w*r, h*w): row placement;  C_g (r*r, cout*r*r, cout): channel selection."""
    S = np.zeros((r * r, h * r * w * r, h * w), np.float32)
    Cm = np.zeros((r * r, cout * r * r, cout), np.float32)
    for ho in range(h * r):
        for wo in range(w * r):
            q = ho * (w * r) + wo
            g = (ho % r) * r + (wo % r)
            S[g, q, (ho // r) * w + (wo // r)] = 1.0
    for g in range(r * r):
        for c in range(cout):
            Cm[g, c * r * r + g, c] = 1.0
    return S, Cm


def bilinear_matrix(S, factor=2):
    # PyTorch bilinear, align_corners=False: src = max(0, (i+0.5)/f - 0.5)
    U = np.zeros((S * factor, S), np.float32)
    for i in range(S * factor):
        src = max((i + 0.5) / factor - 0.5, 0.0)
        i0 = min(int(np.floor(src)), S - 1)
        i1 = min(i0 + 1, S - 1)
        w1 = src - i0
        U[i, i0] += 1.0 - w1
        U[i, i1] += w1
    return U


BIAS_STRUCT = tuple(build_block_bias_struct(H, W, WS, 0 if i % 2 == 0 else WS // 2)
                    for i in range(DEPTH))
SG_NP, CM_NP = build_pixel_shuffle_ops(H, W, 2, C_OUT)                        # (4,256,64), (4,64,16)
U2_NP = np.kron(bilinear_matrix(H), bilinear_matrix(W)).astype(np.float32)    # (256, 64)
# single (320, 256) constant operator: [U2 | S_0 | S_1 | S_2 | S_3]^T
MCAT_T_NP = np.concatenate([U2_NP.T] + [SG_NP[g].T for g in range(4)], axis=0).astype(np.float32)

# ----------------------------- the fused Pallas kernel -----------------------------

def _fused_kernel(x_ref, vec_ref, wblk_ref, bias_ref, wup_ref, mcat_ref, o_ref):
    f32 = jnp.float32
    BB = x_ref.shape[0]                                 # batch elements handled by this grid step

    def layer_norm(v, g, b):
        mu = jnp.mean(v, axis=-1, keepdims=True)
        d = v - mu
        var = jnp.mean(d * d, axis=-1, keepdims=True)
        return d * lax.rsqrt(var + 1e-5) * g + b

    def gelu(v):
        # TODO(synk): PyTorch nn.GELU default is the exact erf form; tanh form used here so the
        # transcendental lands in the EUP slot (~1e-3-level deviation).
        return 0.5 * v * (1.0 + jnp.tanh(0.7978845608028654 * (v + 0.044715 * v * v * v)))

    def vrow(r, width):
        return vec_ref[r:r + 1, 0:width]                # (1, width): broadcasts over token rows

    x = x_ref[...].reshape(BB * L_TOK, C)               # fold batch into the M dim

    # ---- DEPTH SwinTransformerBlocks (shift/window structure folded into the additive bias) ----
    for blk in range(DEPTH):
        r0 = blk * VROWS_PER_BLK
        bias_blk = bias_ref[blk].astype(f32)            # (L, NH*L), per-head biases lane-packed

        xn = layer_norm(x, vrow(r0 + R_N1G, C), vrow(r0 + R_N1B, C))
        qkv = jnp.dot(xn, wblk_ref[blk, :, OFF_QKV:OFF_QKV + 3 * C],
                      preferred_element_type=f32) + vrow(r0 + R_BQKV, 3 * C)  # (M, 3C), q pre-scaled
        wproj = wblk_ref[blk, :, OFF_PROJ:OFF_PROJ + C]                        # (C, C)

        attn_rows = []
        for b in range(BB):
            qkv_b = qkv[b * L_TOK:(b + 1) * L_TOK]
            heads = []
            for h in range(NH):
                q = qkv_b[:, h * HEAD_DIM:(h + 1) * HEAD_DIM]
                k = qkv_b[:, C + h * HEAD_DIM:C + (h + 1) * HEAD_DIM]
                v = qkv_b[:, 2 * C + h * HEAD_DIM:2 * C + (h + 1) * HEAD_DIM]
                s = lax.dot_general(q, k, (((1,), (1,)), ((), ())),
                                    preferred_element_type=f32)                # (L, L)
                s = s + bias_blk[:, h * L_TOK:(h + 1) * L_TOK]
                s = s - jnp.max(s, axis=-1, keepdims=True)
                p = jnp.exp(s)
                p = p * pl.reciprocal(jnp.sum(p, axis=-1, keepdims=True), approx=True)
                heads.append(jnp.dot(p, v, preferred_element_type=f32))        # (L, D)
            o_cat = jnp.concatenate(heads, axis=-1)                            # (L, C) head-major
            attn_rows.append(jnp.dot(o_cat, wproj, preferred_element_type=f32))  # one proj matmul
        attn = attn_rows[0] if BB == 1 else jnp.concatenate(attn_rows, axis=0)
        x = x + attn + vrow(r0 + R_BPROJ, C)            # drop_path(0.0) == identity

        xn2 = layer_norm(x, vrow(r0 + R_N2G, C), vrow(r0 + R_N2B, C))
        h1 = gelu(jnp.dot(xn2, wblk_ref[blk, :, OFF_FC1:OFF_FC1 + HIDDEN],
                          preferred_element_type=f32) + vrow(r0 + R_BFC1, HIDDEN))
        x = x + lax.dot_general(h1, wblk_ref[blk, :, OFF_FC2T:OFF_FC2T + HIDDEN],
                                (((1,), (1,)), ((), ())),
                                preferred_element_type=f32) + vrow(r0 + R_BFC2, C)

    # ---- UpSample(factor=2): merged first 1x1 convs + fused PReLU, single deep tail matmul ----
    y = jnp.dot(x, wup_ref[R_W1UP:R_W1UP + C, 0:3 * C],
                preferred_element_type=f32) + vrow(R_B1UP, 3 * C)              # (M, 3C)
    alpha = vrow(R_ALPHA, 3 * C)
    y = jnp.where(y >= 0.0, y, y * alpha)                                      # both PReLUs fused

    wbT = wup_ref[R_WBT:R_WBT + C_OUT, 0:C]                                    # (16, C)
    mcatT = mcat_ref[...]                                                      # (320, 256) bf16
    for b in range(BB):
        yb = y[b * L_TOK:(b + 1) * L_TOK]
        t_act = yb[:, 0:2 * C]                          # pixel-shuffle branch input (L, 2C)
        s_act = yb[:, 2 * C:3 * C]                      # bilinear branch input      (L, C)
        # 5 independent transposed dots (MXU trans_b path, no activation transpose needed)
        pieces = [lax.dot_general(wbT, s_act, (((1,), (1,)), ((), ())),
                                  preferred_element_type=f32)]                 # (16, 64)
        for g in range(4):
            vgT = wup_ref[R_VGT + g * C_OUT:R_VGT + (g + 1) * C_OUT, 0:2 * C]  # (16, 2C)
            pieces.append(lax.dot_general(vgT, t_act, (((1,), (1,)), ((), ())),
                                          preferred_element_type=f32))         # (16, 64)
        zT = jnp.concatenate(pieces, axis=-1).astype(mcatT.dtype)              # (16, 320)
        # one deep, lane-dense matmul: out^T = zT @ McatT  -> (16, 256), unmasked store
        o_ref[b] = jnp.dot(zT, mcatT, preferred_element_type=f32)

# ----------------------------- operand packing + forward -----------------------------

def pack_operands(params):
    f32 = jnp.float32
    blocks = params["blocks"]
    up = params["up"]
    scale = HEAD_DIM ** -0.5
    qcol_scale = jnp.concatenate([jnp.full((C,), scale, f32), jnp.ones((2 * C,), f32)])

    def vrow(v):
        v = jnp.asarray(v, f32).reshape(-1)
        return jnp.pad(v, (0, 128 - v.shape[0]))

    rows, wblk_list, bias_list = [], [], []
    for b, (rel_full, same, mask_add) in zip(blocks, BIAS_STRUCT):
        rows += [vrow(b["norm1_g"]), vrow(b["norm1_b"]),
                 vrow(b["norm2_g"]), vrow(b["norm2_b"]),
                 vrow(b["qkv_b"] * qcol_scale), vrow(b["proj_b"]),
                 vrow(b["fc1_b"]), vrow(b["fc2_b"])]
        wblk_list.append(jnp.concatenate(
            [b["qkv_w"] * qcol_scale[None, :], b["proj_w"], b["fc1_w"], b["fc2_w"].T],
            axis=1))                                                            # (C, 256)
        per_head = (b["rel_tab"][rel_full].transpose(2, 0, 1) * same[None]
                    + mask_add[None])                                           # (NH, L, L)
        bias_list.append(jnp.concatenate([per_head[h] for h in range(NH)], axis=-1))
    rows += [vrow(jnp.concatenate([jnp.zeros((2 * C,), f32), up["b1_b"]])),
             vrow(jnp.concatenate([jnp.full((2 * C,), up["prelu_p"], f32),
                                   jnp.full((C,), up["prelu_b"], f32)]))]
    vecs = jnp.stack(rows).astype(f32)                                          # (18, 128)
    wblk = jnp.stack(wblk_list).astype(f32)                                     # (DEPTH, C, 256)
    bias = jnp.stack(bias_list).astype(jnp.bfloat16)                            # (DEPTH, L, NH*L)

    # UpSample weights: merged first convs, folded tail operators (transposed form)
    conv_top = up["conv_w"][:C_OUT]
    conv_bot = up["conv_w"][C_OUT:]
    w1up = jnp.concatenate([up["p1_w"], up["b1_w"]], axis=1)                    # (C, 3C)
    wbT = jnp.pad((up["b2_w"] @ conv_bot).T, ((0, 0), (0, WUP_COLS - C)))       # (16, 96)
    vg = jnp.einsum("gab,bc,cd->gad", jnp.asarray(CM_NP), up["p2_w"], conv_top)  # (4, 2C, 16)
    vgT = jnp.pad(vg.transpose(0, 2, 1).reshape(4 * C_OUT, 2 * C),
                  ((0, 0), (0, WUP_COLS - 2 * C)))                              # (64, 96)
    wup = jnp.concatenate([w1up, wbT, vgT], axis=0).astype(f32)                 # (112, 96)
    mcatT = jnp.asarray(MCAT_T_NP, jnp.bfloat16)                                # (320, 256)
    return [vecs, wblk, bias, wup, mcatT]


def _batch_block(total_b):
    # v7x has 2 TensorCores: one batch element per grid step so the cores split the batch.
    # v5e/v6e (single TC): fold the whole batch into one grid step (no per-step overhead, M=128).
    try:
        dk = jax.devices()[0].device_kind.lower()
        if "v7" in dk:
            return 1
    except Exception:
        pass
    return total_b


@jax.jit
def forward(x, params):
    ops = pack_operands(params)
    bx = x.shape[0]
    bb = _batch_block(bx)
    const_specs = [pl.BlockSpec(o.shape, lambda g, _n=o.ndim: (0,) * _n) for o in ops]
    out_t = pl.pallas_call(
        _fused_kernel,
        out_shape=jax.ShapeDtypeStruct((bx, C_OUT, L_OUT), jnp.float32),
        grid=(bx // bb,),
        in_specs=[pl.BlockSpec((bb, L_TOK, C), lambda g: (g, 0, 0))] + const_specs,
        out_specs=pl.BlockSpec((bb, C_OUT, L_OUT), lambda g: (g, 0, 0)),
        compiler_params=pltpu.CompilerParams(dimension_semantics=("parallel",)),
    )(x.astype(jnp.float32), *ops)
    # kernel writes lane-dense (B, C/2, 4L); present the module layout (B, 4L, C/2) here
    return jnp.transpose(out_t, (0, 2, 1))

# ----------------------------- deterministic params -----------------------------

def init_params(key):
    keys = list(jax.random.split(key, 32))
    kit = iter(keys)

    def nrm(shape, std=0.02):
        return std * jax.random.normal(next(kit), shape, jnp.float32)

    blocks = []
    for _ in range(DEPTH):
        blocks.append(dict(
            norm1_g=jnp.ones((C,), jnp.float32), norm1_b=jnp.zeros((C,), jnp.float32),
            qkv_w=nrm((C, 3 * C)), qkv_b=jnp.zeros((3 * C,), jnp.float32),
            rel_tab=nrm(((2 * WS - 1) ** 2, NH)),
            proj_w=nrm((C, C)), proj_b=jnp.zeros((C,), jnp.float32),
            norm2_g=jnp.ones((C,), jnp.float32), norm2_b=jnp.zeros((C,), jnp.float32),
            fc1_w=nrm((C, HIDDEN)), fc1_b=jnp.zeros((HIDDEN,), jnp.float32),
            fc2_w=nrm((HIDDEN, C)), fc2_b=jnp.zeros((C,), jnp.float32),
        ))
    up = dict(
        conv_w=nrm((C, C_OUT)),
        p1_w=nrm((C, 2 * C)), prelu_p=jnp.asarray(0.25, jnp.float32),
        p2_w=nrm((C_OUT, C_OUT)),
        b1_w=nrm((C, C)), b1_b=jnp.zeros((C,), jnp.float32),
        prelu_b=jnp.asarray(0.25, jnp.float32), b2_w=nrm((C, C_OUT)),
    )
    return dict(blocks=blocks, up=up)

# ----------------------------- main -----------------------------

if __name__ == "__main__":
    params = init_params(jax.random.PRNGKey(1))
    x = jax.random.normal(jax.random.PRNGKey(0), (B, H * W, C), jnp.float32)

    out = jax.block_until_ready(forward(x, params))

    assert out.shape == (B, 4 * H * W, C // 2), out.shape
    assert bool(jnp.all(jnp.isfinite(out)))
    print("KERNEL_OK")
</pallas_src>

<mosaic_0001>
module attributes {stable_mosaic.version = 11 : i64} {
  func.func @_fused_kernel(%arg0: i32, %arg1: memref<2x64x32xf32, #tpu.memory_space<vmem>>, %arg2: memref<18x128xf32, #tpu.memory_space<vmem>>, %arg3: memref<2x32x256xf32, #tpu.memory_space<vmem>>, %arg4: memref<2x64x128xbf16, #tpu.memory_space<vmem>>, %arg5: memref<112x96xf32, #tpu.memory_space<vmem>>, %arg6: memref<320x256xbf16, #tpu.memory_space<vmem>>, %arg7: memref<2x16x256xf32, #tpu.memory_space<vmem>>) attributes {dimension_semantics = [#tpu.dimension_semantics<parallel>], iteration_bounds = array<i64: 1>, scalar_prefetch = 0 : i64, scratch_operands = 0 : i64, tpu.core_type = #tpu.core_type<tc>, window_params = [{transform_indices = @transform_0, window_bounds = array<i64: 2, 64, 32>}, {pipeline_mode = #tpu.pipeline_mode<synchronous>, transform_indices = @transform_1, window_bounds = array<i64: 18, 128>}, {pipeline_mode = #tpu.pipeline_mode<synchronous>, transform_indices = @transform_2, window_bounds = array<i64: 2, 32, 256>}, {pipeline_mode = #tpu.pipeline_mode<synchronous>, transform_indices = @transform_3, window_bounds = array<i64: 2, 64, 128>}, {pipeline_mode = #tpu.pipeline_mode<synchronous>, transform_indices = @transform_4, window_bounds = array<i64: 112, 96>}, {pipeline_mode = #tpu.pipeline_mode<synchronous>, transform_indices = @transform_5, window_bounds = array<i64: 320, 256>}, {transform_indices = @transform_6, window_bounds = array<i64: 2, 16, 256>}]} {
    %c0 = arith.constant 0 : index
    %c0_0 = arith.constant 0 : index
    %c0_1 = arith.constant 0 : index
    %0 = vector.load %arg1[%c0, %c0_0, %c0_1] : memref<2x64x32xf32, #tpu.memory_space<vmem>>, vector<2x64x32xf32>
    %1 = vector.shape_cast %0 : vector<2x64x32xf32> to vector<128x32xf32>
    %c0_2 = arith.constant 0 : index
    %c0_3 = arith.constant 0 : index
    %c0_4 = arith.constant 0 : index
    %2 = vector.load %arg4[%c0_2, %c0_3, %c0_4] : memref<2x64x128xbf16, #tpu.memory_space<vmem>>, vector<1x64x128xbf16>
    %3 = vector.shape_cast %2 : vector<1x64x128xbf16> to vector<64x128xbf16>
    %4 = arith.extf %3 : vector<64x128xbf16> to vector<64x128xf32>
    %c0_5 = arith.constant 0 : index
    %c0_6 = arith.constant 0 : index
    %5 = vector.load %arg2[%c0_5, %c0_6] : memref<18x128xf32, #tpu.memory_space<vmem>>, vector<1x32xf32>
    %c1 = arith.constant 1 : index
    %c0_7 = arith.constant 0 : index
    %6 = vector.load %arg2[%c1, %c0_7] : memref<18x128xf32, #tpu.memory_space<vmem>>, vector<1x32xf32>
    %cst = arith.constant dense<0.000000e+00> : vector<128xf32>
    %7 = vector.multi_reduction <add>, %1, %cst [1] : vector<128x32xf32> to vector<128xf32>
    %8 = vector.shape_cast %7 : vector<128xf32> to vector<128x1xf32>
    %cst_8 = arith.constant 3.200000e+01 : f32
    %9 = vector.broadcast %cst_8 : f32 to vector<128x1xf32>
    %10 = arith.divf %8, %9 : vector<128x1xf32>
    %11 = vector.broadcast %10 : vector<128x1xf32> to vector<128x32xf32>
    %12 = arith.subf %1, %11 : vector<128x32xf32>
    %13 = arith.mulf %12, %12 : vector<128x32xf32>
    %cst_9 = arith.constant dense<0.000000e+00> : vector<128xf32>
    %14 = vector.multi_reduction <add>, %13, %cst_9 [1] : vector<128x32xf32> to vector<128xf32>
    %15 = vector.shape_cast %14 : vector<128xf32> to vector<128x1xf32>
    %cst_10 = arith.constant 3.200000e+01 : f32
    %16 = vector.broadcast %cst_10 : f32 to vector<128x1xf32>
    %17 = arith.divf %15, %16 : vector<128x1xf32>
    %cst_11 = arith.constant 9.99999974E-6 : f32
    %18 = vector.broadcast %cst_11 : f32 to vector<128x1xf32>
    %19 = arith.addf %17, %18 : vector<128x1xf32>
    %20 = math.rsqrt %19 : vector<128x1xf32>
    %21 = vector.broadcast %20 : vector<128x1xf32> to vector<128x32xf32>
    %22 = arith.mulf %12, %21 : vector<128x32xf32>
    %23 = vector.broadcast %5 : vector<1x32xf32> to vector<128x32xf32>
    %24 = arith.mulf %22, %23 : vector<128x32xf32>
    %25 = vector.broadcast %6 : vector<1x32xf32> to vector<128x32xf32>
    %26 = arith.addf %24, %25 : vector<128x32xf32>
    %c0_12 = arith.constant 0 : index
    %c0_13 = arith.constant 0 : index
    %c0_14 = arith.constant 0 : index
    %27 = vector.load %arg3[%c0_12, %c0_13, %c0_14] : memref<2x32x256xf32, #tpu.memory_space<vmem>>, vector<1x32x96xf32>
    %28 = vector.shape_cast %27 : vector<1x32x96xf32> to vector<32x96xf32>
    %cst_15 = arith.constant dense<0.000000e+00> : vector<128x96xf32>
    %29 = tpu.matmul %26, %28, %cst_15 {dimension_numbers = #tpu.dot_dimension_numbers<[1], [0], [0], [1], [0, 0, 1, 1], [], []>} : vector<128x32xf32>, vector<32x96xf32>, vector<128x96xf32> -> vector<128x96xf32>
    %c4 = arith.constant 4 : index
    %c0_16 = arith.constant 0 : index
    %30 = vector.load %arg2[%c4, %c0_16] : memref<18x128xf32, #tpu.memory_space<vmem>>, vector<1x96xf32>
    %31 = vector.broadcast %30 : vector<1x96xf32> to vector<128x96xf32>
    %32 = arith.addf %29, %31 : vector<128x96xf32>
    %c0_17 = arith.constant 0 : index
    %c0_18 = arith.constant 0 : index
    %c96 = arith.constant 96 : index
    %33 = vector.load %arg3[%c0_17, %c0_18, %c96] : memref<2x32x256xf32, #tpu.memory_space<vmem>>, vector<1x32x32xf32>
    %34 = vector.shape_cast %33 : vector<1x32x32xf32> to vector<32x32xf32>
    %35 = vector.extract_strided_slice %32 {offsets = [0, 0], sizes = [64, 96], strides = [1, 1]} : vector<128x96xf32> to vector<64x96xf32>
    %36 = vector.extract_strided_slice %35 {offsets = [0, 0], sizes = [64, 16], strides = [1, 1]} : vector<64x96xf32> to vector<64x16xf32>
    %37 = vector.extract_strided_slice %35 {offsets = [0, 32], sizes = [64, 16], strides = [1, 1]} : vector<64x96xf32> to vector<64x16xf32>
    %38 = vector.extract_strided_slice %35 {offsets = [0, 64], sizes = [64, 16], strides = [1, 1]} : vector<64x96xf32> to vector<64x16xf32>
    %cst_19 = arith.constant dense<0.000000e+00> : vector<64x64xf32>
    %39 = tpu.matmul %36, %37, %cst_19 {dimension_numbers = #tpu.dot_dimension_numbers<[1], [1], [0], [0], [0, 0, 1, 0], [], []>} : vector<64x16xf32>, vector<64x16xf32>, vector<64x64xf32> -> vector<64x64xf32>
    %40 = vector.extract_strided_slice %4 {offsets = [0, 0], sizes = [64, 64], strides = [1, 1]} : vector<64x128xf32> to vector<64x64xf32>
    %41 = arith.addf %39, %40 : vector<64x64xf32>
    %cst_20 = arith.constant dense<0xFF800000> : vector<64xf32>
    %42 = vector.multi_reduction <maximumf>, %41, %cst_20 [1] : vector<64x64xf32> to vector<64xf32>
    %43 = vector.shape_cast %42 : vector<64xf32> to vector<64x1xf32>
    %44 = vector.broadcast %43 : vector<64x1xf32> to vector<64x64xf32>
    %45 = arith.subf %41, %44 : vector<64x64xf32>
    %46 = math.exp %45 : vector<64x64xf32>
    %cst_21 = arith.constant dense<0.000000e+00> : vector<64xf32>
    %47 = vector.multi_reduction <add>, %46, %cst_21 [1] : vector<64x64xf32> to vector<64xf32>
    %48 = vector.shape_cast %47 : vector<64xf32> to vector<64x1xf32>
    %49 = tpu.reciprocal %48 {approx = true} : vector<64x1xf32> -> vector<64x1xf32>
    %50 = vector.broadcast %49 : vector<64x1xf32> to vector<64x64xf32>
    %51 = arith.mulf %46, %50 : vector<64x64xf32>
    %cst_22 = arith.constant dense<0.000000e+00> : vector<64x16xf32>
    %52 = tpu.matmul %51, %38, %cst_22 {dimension_numbers = #tpu.dot_dimension_numbers<[1], [0], [0], [1], [0, 0, 1, 1], [], []>} : vector<64x64xf32>, vector<64x16xf32>, vector<64x16xf32> -> vector<64x16xf32>
    %53 = vector.extract_strided_slice %35 {offsets = [0, 16], sizes = [64, 16], strides = [1, 1]} : vector<64x96xf32> to vector<64x16xf32>
    %54 = vector.extract_strided_slice %35 {offsets = [0, 48], sizes = [64, 16], strides = [1, 1]} : vector<64x96xf32> to vector<64x16xf32>
    %55 = vector.extract_strided_slice %35 {offsets = [0, 80], sizes = [64, 16], strides = [1, 1]} : vector<64x96xf32> to vector<64x16xf32>
    %cst_23 = arith.constant dense<0.000000e+00> : vector<64x64xf32>
    %56 = tpu.matmul %53, %54, %cst_23 {dimension_numbers = #tpu.dot_dimension_numbers<[1], [1], [0], [0], [0, 0, 1, 0], [], []>} : vector<64x16xf32>, vector<64x16xf32>, vector<64x64xf32> -> vector<64x64xf32>
    %57 = vector.extract_strided_slice %4 {offsets = [0, 64], sizes = [64, 64], strides = [1, 1]} : vector<64x128xf32> to vector<64x64xf32>
    %58 = arith.addf %56, %57 : vector<64x64xf32>
    %cst_24 = arith.constant dense<0xFF800000> : vector<64xf32>
    %59 = vector.multi_reduction <maximumf>, %58, %cst_24 [1] : vector<64x64xf32> to vector<64xf32>
    %60 = vector.shape_cast %59 : vector<64xf32> to vector<64x1xf32>
    %61 = vector.broadcast %60 : vector<64x1xf32> to vector<64x64xf32>
    %62 = arith.subf %58, %61 : vector<64x64xf32>
    %63 = math.exp %62 : vector<64x64xf32>
    %cst_25 = arith.constant dense<0.000000e+00> : vector<64xf32>
    %64 = vector.multi_reduction <add>, %63, %cst_25 [1] : vector<64x64xf32> to vector<64xf32>
    %65 = vector.shape_cast %64 : vector<64xf32> to vector<64x1xf32>
    %66 = tpu.reciprocal %65 {approx = true} : vector<64x1xf32> -> vector<64x1xf32>
    %67 = vector.broadcast %66 : vector<64x1xf32> to vector<64x64xf32>
    %68 = arith.mulf %63, %67 : vector<64x64xf32>
    %cst_26 = arith.constant dense<0.000000e+00> : vector<64x16xf32>
    %69 = tpu.matmul %68, %55, %cst_26 {dimension_numbers = #tpu.dot_dimension_numbers<[1], [0], [0], [1], [0, 0, 1, 1], [], []>} : vector<64x64xf32>, vector<64x16xf32>, vector<64x16xf32> -> vector<64x16xf32>
    %70 = tpu.concatenate %52, %69 in 1 : vector<64x16xf32>, vector<64x16xf32> -> vector<64x32xf32>
    %cst_27 = arith.constant dense<0.000000e+00> : vector<64x32xf32>
    %71 = tpu.matmul %70, %34, %cst_27 {dimension_numbers = #tpu.dot_dimension_numbers<[1], [0], [0], [1], [0, 0, 1, 1], [], []>} : vector<64x32xf32>, vector<32x32xf32>, vector<64x32xf32> -> vector<64x32xf32>
    %72 = vector.extract_strided_slice %32 {offsets = [64, 0], sizes = [64, 96], strides = [1, 1]} : vector<128x96xf32> to vector<64x96xf32>
    %73 = vector.extract_strided_slice %72 {offsets = [0, 0], sizes = [64, 16], strides = [1, 1]} : vector<64x96xf32> to vector<64x16xf32>
    %74 = vector.extract_strided_slice %72 {offsets = [0, 32], sizes = [64, 16], strides = [1, 1]} : vector<64x96xf32> to vector<64x16xf32>
    %75 = vector.extract_strided_slice %72 {offsets = [0, 64], sizes = [64, 16], strides = [1, 1]} : vector<64x96xf32> to vector<64x16xf32>
    %cst_28 = arith.constant dense<0.000000e+00> : vector<64x64xf32>
    %76 = tpu.matmul %73, %74, %cst_28 {dimension_numbers = #tpu.dot_dimension_numbers<[1], [1], [0], [0], [0, 0, 1, 0], [], []>} : vector<64x16xf32>, vector<64x16xf32>, vector<64x64xf32> -> vector<64x64xf32>
    %77 = vector.extract_strided_slice %4 {offsets = [0, 0], sizes = [64, 64], strides = [1, 1]} : vector<64x128xf32> to vector<64x64xf32>
    %78 = arith.addf %76, %77 : vector<64x64xf32>
    %cst_29 = arith.constant dense<0xFF800000> : vector<64xf32>
    %79 = vector.multi_reduction <maximumf>, %78, %cst_29 [1] : vector<64x64xf32> to vector<64xf32>
    %80 = vector.shape_cast %79 : vector<64xf32> to vector<64x1xf32>
    %81 = vector.broadcast %80 : vector<64x1xf32> to vector<64x64xf32>
    %82 = arith.subf %78, %81 : vector<64x64xf32>
    %83 = math.exp %82 : vector<64x64xf32>
    %cst_30 = arith.constant dense<0.000000e+00> : vector<64xf32>
    %84 = vector.multi_reduction <add>, %83, %cst_30 [1] : vector<64x64xf32> to vector<64xf32>
    %85 = vector.shape_cast %84 : vector<64xf32> to vector<64x1xf32>
    %86 = tpu.reciprocal %85 {approx = true} : vector<64x1xf32> -> vector<64x1xf32>
    %87 = vector.broadcast %86 : vector<64x1xf32> to vector<64x64xf32>
    %88 = arith.mulf %83, %87 : vector<64x64xf32>
    %cst_31 = arith.constant dense<0.000000e+00> : vector<64x16xf32>
    %89 = tpu.matmul %88, %75, %cst_31 {dimension_numbers = #tpu.dot_dimension_numbers<[1], [0], [0], [1], [0, 0, 1, 1], [], []>} : vector<64x64xf32>, vector<64x16xf32>, vector<64x16xf32> -> vector<64x16xf32>
    %90 = vector.extract_strided_slice %72 {offsets = [0, 16], sizes = [64, 16], strides = [1, 1]} : vector<64x96xf32> to vector<64x16xf32>
    %91 = vector.extract_strided_slice %72 {offsets = [0, 48], sizes = [64, 16], strides = [1, 1]} : vector<64x96xf32> to vector<64x16xf32>
    %92 = vector.extract_strided_slice %72 {offsets = [0, 80], sizes = [64, 16], strides = [1, 1]} : vector<64x96xf32> to vector<64x16xf32>
    %cst_32 = arith.constant dense<0.000000e+00> : vector<64x64xf32>
    %93 = tpu.matmul %90, %91, %cst_32 {dimension_numbers = #tpu.dot_dimension_numbers<[1], [1], [0], [0], [0, 0, 1, 0], [], []>} : vector<64x16xf32>, vector<64x16xf32>, vector<64x64xf32> -> vector<64x64xf32>
    %94 = vector.extract_strided_slice %4 {offsets = [0, 64], sizes = [64, 64], strides = [1, 1]} : vector<64x128xf32> to vector<64x64xf32>
    %95 = arith.addf %93, %94 : vector<64x64xf32>
    %cst_33 = arith.constant dense<0xFF800000> : vector<64xf32>
    %96 = vector.multi_reduction <maximumf>, %95, %cst_33 [1] : vector<64x64xf32> to vector<64xf32>
    %97 = vector.shape_cast %96 : vector<64xf32> to vector<64x1xf32>
    %98 = vector.broadcast %97 : vector<64x1xf32> to vector<64x64xf32>
    %99 = arith.subf %95, %98 : vector<64x64xf32>
    %100 = math.exp %99 : vector<64x64xf32>
    %cst_34 = arith.constant dense<0.000000e+00> : vector<64xf32>
    %101 = vector.multi_reduction <add>, %100, %cst_34 [1] : vector<64x64xf32> to vector<64xf32>
    %102 = vector.shape_cast %101 : vector<64xf32> to vector<64x1xf32>
    %103 = tpu.reciprocal %102 {approx = true} : vector<64x1xf32> -> vector<64x1xf32>
    %104 = vector.broadcast %103 : vector<64x1xf32> to vector<64x64xf32>
    %105 = arith.mulf %100, %104 : vector<64x64xf32>
    %cst_35 = arith.constant dense<0.000000e+00> : vector<64x16xf32>
    %106 = tpu.matmul %105, %92, %cst_35 {dimension_numbers = #tpu.dot_dimension_numbers<[1], [0], [0], [1], [0, 0, 1, 1], [], []>} : vector<64x64xf32>, vector<64x16xf32>, vector<64x16xf32> -> vector<64x16xf32>
    %107 = tpu.concatenate %89, %106 in 1 : vector<64x16xf32>, vector<64x16xf32> -> vector<64x32xf32>
    %cst_36 = arith.constant dense<0.000000e+00> : vector<64x32xf32>
    %108 = tpu.matmul %107, %34, %cst_36 {dimension_numbers = #tpu.dot_dimension_numbers<[1], [0], [0], [1], [0, 0, 1, 1], [], []>} : vector<64x32xf32>, vector<32x32xf32>, vector<64x32xf32> -> vector<64x32xf32>
    %109 = tpu.concatenate %71, %108 in 0 : vector<64x32xf32>, vector<64x32xf32> -> vector<128x32xf32>
    %110 = arith.addf %1, %109 : vector<128x32xf32>
    %c5 = arith.constant 5 : index
    %c0_37 = arith.constant 0 : index
    %111 = vector.load %arg2[%c5, %c0_37] : memref<18x128xf32, #tpu.memory_space<vmem>>, vector<1x32xf32>
    %112 = vector.broadcast %111 : vector<1x32xf32> to vector<128x32xf32>
    %113 = arith.addf %110, %112 : vector<128x32xf32>
    %c2 = arith.constant 2 : index
    %c0_38 = arith.constant 0 : index
    %114 = vector.load %arg2[%c2, %c0_38] : memref<18x128xf32, #tpu.memory_space<vmem>>, vector<1x32xf32>
    %c3 = arith.constant 3 : index
    %c0_39 = arith.constant 0 : index
    %115 = vector.load %arg2[%c3, %c0_39] : memref<18x128xf32, #tpu.memory_space<vmem>>, vector<1x32xf32>
    %cst_40 = arith.constant dense<0.000000e+00> : vector<128xf32>
    %116 = vector.multi_reduction <add>, %113, %cst_40 [1] : vector<128x32xf32> to vector<128xf32>
    %117 = vector.shape_cast %116 : vector<128xf32> to vector<128x1xf32>
    %cst_41 = arith.constant 3.200000e+01 : f32
    %118 = vector.broadcast %cst_41 : f32 to vector<128x1xf32>
    %119 = arith.divf %117, %118 : vector<128x1xf32>
    %120 = vector.broadcast %119 : vector<128x1xf32> to vector<128x32xf32>
    %121 = arith.subf %113, %120 : vector<128x32xf32>
    %122 = arith.mulf %121, %121 : vector<128x32xf32>
    %cst_42 = arith.constant dense<0.000000e+00> : vector<128xf32>
    %123 = vector.multi_reduction <add>, %122, %cst_42 [1] : vector<128x32xf32> to vector<128xf32>
    %124 = vector.shape_cast %123 : vector<128xf32> to vector<128x1xf32>
    %cst_43 = arith.constant 3.200000e+01 : f32
    %125 = vector.broadcast %cst_43 : f32 to vector<128x1xf32>
    %126 = arith.divf %124, %125 : vector<128x1xf32>
    %cst_44 = arith.constant 9.99999974E-6 : f32
    %127 = vector.broadcast %cst_44 : f32 to vector<128x1xf32>
    %128 = arith.addf %126, %127 : vector<128x1xf32>
    %129 = math.rsqrt %128 : vector<128x1xf32>
    %130 = vector.broadcast %129 : vector<128x1xf32> to vector<128x32xf32>
    %131 = arith.mulf %121, %130 : vector<128x32xf32>
    %132 = vector.broadcast %114 : vector<1x32xf32> to vector<128x32xf32>
    %133 = arith.mulf %131, %132 : vector<128x32xf32>
    %134 = vector.broadcast %115 : vector<1x32xf32> to vector<128x32xf32>
    %135 = arith.addf %133, %134 : vector<128x32xf32>
    %c0_45 = arith.constant 0 : index
    %c0_46 = arith.constant 0 : index
    %c128 = arith.constant 128 : index
    %136 = vector.load %arg3[%c0_45, %c0_46, %c128] : memref<2x32x256xf32, #tpu.memory_space<vmem>>, vector<1x32x64xf32>
    %137 = vector.shape_cast %136 : vector<1x32x64xf32> to vector<32x64xf32>
    %cst_47 = arith.constant dense<0.000000e+00> : vector<128x64xf32>
    %138 = tpu.matmul %135, %137, %cst_47 {dimension_numbers = #tpu.dot_dimension_numbers<[1], [0], [0], [1], [0, 0, 1, 1], [], []>} : vector<128x32xf32>, vector<32x64xf32>, vector<128x64xf32> -> vector<128x64xf32>
    %c6 = arith.constant 6 : index
    %c0_48 = arith.constant 0 : index
    %139 = vector.load %arg2[%c6, %c0_48] : memref<18x128xf32, #tpu.memory_space<vmem>>, vector<1x64xf32>
    %140 = vector.broadcast %139 : vector<1x64xf32> to vector<128x64xf32>
    %141 = arith.addf %138, %140 : vector<128x64xf32>
    %cst_49 = arith.constant 5.000000e-01 : f32
    %142 = vector.broadcast %cst_49 : f32 to vector<128x64xf32>
    %143 = arith.mulf %142, %141 : vector<128x64xf32>
    %cst_50 = arith.constant 4.471500e-02 : f32
    %144 = vector.broadcast %cst_50 : f32 to vector<128x64xf32>
    %145 = arith.mulf %144, %141 : vector<128x64xf32>
    %146 = arith.mulf %145, %141 : vector<128x64xf32>
    %147 = arith.mulf %146, %141 : vector<128x64xf32>
    %148 = arith.addf %141, %147 : vector<128x64xf32>
    %cst_51 = arith.constant 0.797884583 : f32
    %149 = vector.broadcast %cst_51 : f32 to vector<128x64xf32>
    %150 = arith.mulf %149, %148 : vector<128x64xf32>
    %151 = math.tanh %150 : vector<128x64xf32>
    %cst_52 = arith.constant 1.000000e+00 : f32
    %152 = vector.broadcast %cst_52 : f32 to vector<128x64xf32>
    %153 = arith.addf %152, %151 : vector<128x64xf32>
    %154 = arith.mulf %143, %153 : vector<128x64xf32>
    %c0_53 = arith.constant 0 : index
    %c0_54 = arith.constant 0 : index
    %c192 = arith.constant 192 : index
    %155 = vector.load %arg3[%c0_53, %c0_54, %c192] : memref<2x32x256xf32, #tpu.memory_space<vmem>>, vector<1x32x64xf32>
    %156 = vector.shape_cast %155 : vector<1x32x64xf32> to vector<32x64xf32>
    %cst_55 = arith.constant dense<0.000000e+00> : vector<128x32xf32>
    %157 = tpu.matmul %154, %156, %cst_55 {dimension_numbers = #tpu.dot_dimension_numbers<[1], [1], [0], [0], [0, 0, 1, 0], [], []>} : vector<128x64xf32>, vector<32x64xf32>, vector<128x32xf32> -> vector<128x32xf32>
    %158 = arith.addf %113, %157 : vector<128x32xf32>
    %c7 = arith.constant 7 : index
    %c0_56 = arith.constant 0 : index
    %159 = vector.load %arg2[%c7, %c0_56] : memref<18x128xf32, #tpu.memory_space<vmem>>, vector<1x32xf32>
    %160 = vector.broadcast %159 : vector<1x32xf32> to vector<128x32xf32>
    %161 = arith.addf %158, %160 : vector<128x32xf32>
    %c1_57 = arith.constant 1 : index
    %c0_58 = arith.constant 0 : index
    %c0_59 = arith.constant 0 : index
    %162 = vector.load %arg4[%c1_57, %c0_58, %c0_59] : memref<2x64x128xbf16, #tpu.memory_space<vmem>>, vector<1x64x128xbf16>
    %163 = vector.shape_cast %162 : vector<1x64x128xbf16> to vector<64x128xbf16>
    %164 = arith.extf %163 : vector<64x128xbf16> to vector<64x128xf32>
    %c8 = arith.constant 8 : index
    %c0_60 = arith.constant 0 : index
    %165 = vector.load %arg2[%c8, %c0_60] : memref<18x128xf32, #tpu.memory_space<vmem>>, vector<1x32xf32>
    %c9 = arith.constant 9 : index
    %c0_61 = arith.constant 0 : index
    %166 = vector.load %arg2[%c9, %c0_61] : memref<18x128xf32, #tpu.memory_space<vmem>>, vector<1x32xf32>
    %cst_62 = arith.constant dense<0.000000e+00> : vector<128xf32>
    %167 = vector.multi_reduction <add>, %161, %cst_62 [1] : vector<128x32xf32> to vector<128xf32>
    %168 = vector.shape_cast %167 : vector<128xf32> to vector<128x1xf32>
    %cst_63 = arith.constant 3.200000e+01 : f32
    %169 = vector.broadcast %cst_63 : f32 to vector<128x1xf32>
    %170 = arith.divf %168, %169 : vector<128x1xf32>
    %171 = vector.broadcast %170 : vector<128x1xf32> to vector<128x32xf32>
    %172 = arith.subf %161, %171 : vector<128x32xf32>
    %173 = arith.mulf %172, %172 : vector<128x32xf32>
    %cst_64 = arith.constant dense<0.000000e+00> : vector<128xf32>
    %174 = vector.multi_reduction <add>, %173, %cst_64 [1] : vector<128x32xf32> to vector<128xf32>
    %175 = vector.shape_cast %174 : vector<128xf32> to vector<128x1xf32>
    %cst_65 = arith.constant 3.200000e+01 : f32
    %176 = vector.broadcast %cst_65 : f32 to vector<128x1xf32>
    %177 = arith.divf %175, %176 : vector<128x1xf32>
    %cst_66 = arith.constant 9.99999974E-6 : f32
    %178 = vector.broadcast %cst_66 : f32 to vector<128x1xf32>
    %179 = arith.addf %177, %178 : vector<128x1xf32>
    %180 = math.rsqrt %179 : vector<128x1xf32>
    %181 = vector.broadcast %180 : vector<128x1xf32> to vector<128x32xf32>
    %182 = arith.mulf %172, %181 : vector<128x32xf32>
    %183 = vector.broadcast %165 : vector<1x32xf32> to vector<128x32xf32>
    %184 = arith.mulf %182, %183 : vector<128x32xf32>
    %185 = vector.broadcast %166 : vector<1x32xf32> to vector<128x32xf32>
    %186 = arith.addf %184, %185 : vector<128x32xf32>
    %c1_67 = arith.constant 1 : index
    %c0_68 = arith.constant 0 : index
    %c0_69 = arith.constant 0 : index
    %187 = vector.load %arg3[%c1_67, %c0_68, %c0_69] : memref<2x32x256xf32, #tpu.memory_space<vmem>>, vector<1x32x96xf32>
    %188 = vector.shape_cast %187 : vector<1x32x96xf32> to vector<32x96xf32>
    %cst_70 = arith.constant dense<0.000000e+00> : vector<128x96xf32>
    %189 = tpu.matmul %186, %188, %cst_70 {dimension_numbers = #tpu.dot_dimension_numbers<[1], [0], [0], [1], [0, 0, 1, 1], [], []>} : vector<128x32xf32>, vector<32x96xf32>, vector<128x96xf32> -> vector<128x96xf32>
    %c12 = arith.constant 12 : index
    %c0_71 = arith.constant 0 : index
    %190 = vector.load %arg2[%c12, %c0_71] : memref<18x128xf32, #tpu.memory_space<vmem>>, vector<1x96xf32>
    %191 = vector.broadcast %190 : vector<1x96xf32> to vector<128x96xf32>
    %192 = arith.addf %189, %191 : vector<128x96xf32>
    %c1_72 = arith.constant 1 : index
    %c0_73 = arith.constant 0 : index
    %c96_74 = arith.constant 96 : index
    %193 = vector.load %arg3[%c1_72, %c0_73, %c96_74] : memref<2x32x256xf32, #tpu.memory_space<vmem>>, vector<1x32x32xf32>
    %194 = vector.shape_cast %193 : vector<1x32x32xf32> to vector<32x32xf32>
    %195 = vector.extract_strided_slice %192 {offsets = [0, 0], sizes = [64, 96], strides = [1, 1]} : vector<128x96xf32> to vector<64x96xf32>
    %196 = vector.extract_strided_slice %195 {offsets = [0, 0], sizes = [64, 16], strides = [1, 1]} : vector<64x96xf32> to vector<64x16xf32>
    %197 = vector.extract_strided_slice %195 {offsets = [0, 32], sizes = [64, 16], strides = [1, 1]} : vector<64x96xf32> to vector<64x16xf32>
    %198 = vector.extract_strided_slice %195 {offsets = [0, 64], sizes = [64, 16], strides = [1, 1]} : vector<64x96xf32> to vector<64x16xf32>
    %cst_75 = arith.constant dense<0.000000e+00> : vector<64x64xf32>
    %199 = tpu.matmul %196, %197, %cst_75 {dimension_numbers = #tpu.dot_dimension_numbers<[1], [1], [0], [0], [0, 0, 1, 0], [], []>} : vector<64x16xf32>, vector<64x16xf32>, vector<64x64xf32> -> vector<64x64xf32>
    %200 = vector.extract_strided_slice %164 {offsets = [0, 0], sizes = [64, 64], strides = [1, 1]} : vector<64x128xf32> to vector<64x64xf32>
    %201 = arith.addf %199, %200 : vector<64x64xf32>
    %cst_76 = arith.constant dense<0xFF800000> : vector<64xf32>
    %202 = vector.multi_reduction <maximumf>, %201, %cst_76 [1] : vector<64x64xf32> to vector<64xf32>
    %203 = vector.shape_cast %202 : vector<64xf32> to vector<64x1xf32>
    %204 = vector.broadcast %203 : vector<64x1xf32> to vector<64x64xf32>
    %205 = arith.subf %201, %204 : vector<64x64xf32>
    %206 = math.exp %205 : vector<64x64xf32>
    %cst_77 = arith.constant dense<0.000000e+00> : vector<64xf32>
    %207 = vector.multi_reduction <add>, %206, %cst_77 [1] : vector<64x64xf32> to vector<64xf32>
    %208 = vector.shape_cast %207 : vector<64xf32> to vector<64x1xf32>
    %209 = tpu.reciprocal %208 {approx = true} : vector<64x1xf32> -> vector<64x1xf32>
    %210 = vector.broadcast %209 : vector<64x1xf32> to vector<64x64xf32>
    %211 = arith.mulf %206, %210 : vector<64x64xf32>
    %cst_78 = arith.constant dense<0.000000e+00> : vector<64x16xf32>
    %212 = tpu.matmul %211, %198, %cst_78 {dimension_numbers = #tpu.dot_dimension_numbers<[1], [0], [0], [1], [0, 0, 1, 1], [], []>} : vector<64x64xf32>, vector<64x16xf32>, vector<64x16xf32> -> vector<64x16xf32>
    %213 = vector.extract_strided_slice %195 {offsets = [0, 16], sizes = [64, 16], strides = [1, 1]} : vector<64x96xf32> to vector<64x16xf32>
    %214 = vector.extract_strided_slice %195 {offsets = [0, 48], sizes = [64, 16], strides = [1, 1]} : vector<64x96xf32> to vector<64x16xf32>
    %215 = vector.extract_strided_slice %195 {offsets = [0, 80], sizes = [64, 16], strides = [1, 1]} : vector<64x96xf32> to vector<64x16xf32>
    %cst_79 = arith.constant dense<0.000000e+00> : vector<64x64xf32>
    %216 = tpu.matmul %213, %214, %cst_79 {dimension_numbers = #tpu.dot_dimension_numbers<[1], [1], [0], [0], [0, 0, 1, 0], [], []>} : vector<64x16xf32>, vector<64x16xf32>, vector<64x64xf32> -> vector<64x64xf32>
    %217 = vector.extract_strided_slice %164 {offsets = [0, 64], sizes = [64, 64], strides = [1, 1]} : vector<64x128xf32> to vector<64x64xf32>
    %218 = arith.addf %216, %217 : vector<64x64xf32>
    %cst_80 = arith.constant dense<0xFF800000> : vector<64xf32>
    %219 = vector.multi_reduction <maximumf>, %218, %cst_80 [1] : vector<64x64xf32> to vector<64xf32>
    %220 = vector.shape_cast %219 : vector<64xf32> to vector<64x1xf32>
    %221 = vector.broadcast %220 : vector<64x1xf32> to vector<64x64xf32>
    %222 = arith.subf %218, %221 : vector<64x64xf32>
    %223 = math.exp %222 : vector<64x64xf32>
    %cst_81 = arith.constant dense<0.000000e+00> : vector<64xf32>
    %224 = vector.multi_reduction <add>, %223, %cst_81 [1] : vector<64x64xf32> to vector<64xf32>
    %225 = vector.shape_cast %224 : vector<64xf32> to vector<64x1xf32>
    %226 = tpu.reciprocal %225 {approx = true} : vector<64x1xf32> -> vector<64x1xf32>
    %227 = vector.broadcast %226 : vector<64x1xf32> to vector<64x64xf32>
    %228 = arith.mulf %223, %227 : vector<64x64xf32>
    %cst_82 = arith.constant dense<0.000000e+00> : vector<64x16xf32>
    %229 = tpu.matmul %228, %215, %cst_82 {dimension_numbers = #tpu.dot_dimension_numbers<[1], [0], [0], [1], [0, 0, 1, 1], [], []>} : vector<64x64xf32>, vector<64x16xf32>, vector<64x16xf32> -> vector<64x16xf32>
    %230 = tpu.concatenate %212, %229 in 1 : vector<64x16xf32>, vector<64x16xf32> -> vector<64x32xf32>
    %cst_83 = arith.constant dense<0.000000e+00> : vector<64x32xf32>
    %231 = tpu.matmul %230, %194, %cst_83 {dimension_numbers = #tpu.dot_dimension_numbers<[1], [0], [0], [1], [0, 0, 1, 1], [], []>} : vector<64x32xf32>, vector<32x32xf32>, vector<64x32xf32> -> vector<64x32xf32>
    %232 = vector.extract_strided_slice %192 {offsets = [64, 0], sizes = [64, 96], strides = [1, 1]} : vector<128x96xf32> to vector<64x96xf32>
    %233 = vector.extract_strided_slice %232 {offsets = [0, 0], sizes = [64, 16], strides = [1, 1]} : vector<64x96xf32> to vector<64x16xf32>
    %234 = vector.extract_strided_slice %232 {offsets = [0, 32], sizes = [64, 16], strides = [1, 1]} : vector<64x96xf32> to vector<64x16xf32>
    %235 = vector.extract_strided_slice %232 {offsets = [0, 64], sizes = [64, 16], strides = [1, 1]} : vector<64x96xf32> to vector<64x16xf32>
    %cst_84 = arith.constant dense<0.000000e+00> : vector<64x64xf32>
    %236 = tpu.matmul %233, %234, %cst_84 {dimension_numbers = #tpu.dot_dimension_numbers<[1], [1], [0], [0], [0, 0, 1, 0], [], []>} : vector<64x16xf32>, vector<64x16xf32>, vector<64x64xf32> -> vector<64x64xf32>
    %237 = vector.extract_strided_slice %164 {offsets = [0, 0], sizes = [64, 64], strides = [1, 1]} : vector<64x128xf32> to vector<64x64xf32>
    %238 = arith.addf %236, %237 : vector<64x64xf32>
    %cst_85 = arith.constant dense<0xFF800000> : vector<64xf32>
    %239 = vector.multi_reduction <maximumf>, %238, %cst_85 [1] : vector<64x64xf32> to vector<64xf32>
    %240 = vector.shape_cast %239 : vector<64xf32> to vector<64x1xf32>
    %241 = vector.broadcast %240 : vector<64x1xf32> to vector<64x64xf32>
    %242 = arith.subf %238, %241 : vector<64x64xf32>
    %243 = math.exp %242 : vector<64x64xf32>
    %cst_86 = arith.constant dense<0.000000e+00> : vector<64xf32>
    %244 = vector.multi_reduction <add>, %243, %cst_86 [1] : vector<64x64xf32> to vector<64xf32>
    %245 = vector.shape_cast %244 : vector<64xf32> to vector<64x1xf32>
    %246 = tpu.reciprocal %245 {approx = true} : vector<64x1xf32> -> vector<64x1xf32>
    %247 = vector.broadcast %246 : vector<64x1xf32> to vector<64x64xf32>
    %248 = arith.mulf %243, %247 : vector<64x64xf32>
    %cst_87 = arith.constant dense<0.000000e+00> : vector<64x16xf32>
    %249 = tpu.matmul %248, %235, %cst_87 {dimension_numbers = #tpu.dot_dimension_numbers<[1], [0], [0], [1], [0, 0, 1, 1], [], []>} : vector<64x64xf32>, vector<64x16xf32>, vector<64x16xf32> -> vector<64x16xf32>
    %250 = vector.extract_strided_slice %232 {offsets = [0, 16], sizes = [64, 16], strides = [1, 1]} : vector<64x96xf32> to vector<64x16xf32>
    %251 = vector.extract_strided_slice %232 {offsets = [0, 48], sizes = [64, 16], strides = [1, 1]} : vector<64x96xf32> to vector<64x16xf32>
    %252 = vector.extract_strided_slice %232 {offsets = [0, 80], sizes = [64, 16], strides = [1, 1]} : vector<64x96xf32> to vector<64x16xf32>
    %cst_88 = arith.constant dense<0.000000e+00> : vector<64x64xf32>
    %253 = tpu.matmul %250, %251, %cst_88 {dimension_numbers = #tpu.dot_dimension_numbers<[1], [1], [0], [0], [0, 0, 1, 0], [], []>} : vector<64x16xf32>, vector<64x16xf32>, vector<64x64xf32> -> vector<64x64xf32>
    %254 = vector.extract_strided_slice %164 {offsets = [0, 64], sizes = [64, 64], strides = [1, 1]} : vector<64x128xf32> to vector<64x64xf32>
    %255 = arith.addf %253, %254 : vector<64x64xf32>
    %cst_89 = arith.constant dense<0xFF800000> : vector<64xf32>
    %256 = vector.multi_reduction <maximumf>, %255, %cst_89 [1] : vector<64x64xf32> to vector<64xf32>
    %257 = vector.shape_cast %256 : vector<64xf32> to vector<64x1xf32>
    %258 = vector.broadcast %257 : vector<64x1xf32> to vector<64x64xf32>
    %259 = arith.subf %255, %258 : vector<64x64xf32>
    %260 = math.exp %259 : vector<64x64xf32>
    %cst_90 = arith.constant dense<0.000000e+00> : vector<64xf32>
    %261 = vector.multi_reduction <add>, %260, %cst_90 [1] : vector<64x64xf32> to vector<64xf32>
    %262 = vector.shape_cast %261 : vector<64xf32> to vector<64x1xf32>
    %263 = tpu.reciprocal %262 {approx = true} : vector<64x1xf32> -> vector<64x1xf32>
    %264 = vector.broadcast %263 : vector<64x1xf32> to vector<64x64xf32>
    %265 = arith.mulf %260, %264 : vector<64x64xf32>
    %cst_91 = arith.constant dense<0.000000e+00> : vector<64x16xf32>
    %266 = tpu.matmul %265, %252, %cst_91 {dimension_numbers = #tpu.dot_dimension_numbers<[1], [0], [0], [1], [0, 0, 1, 1], [], []>} : vector<64x64xf32>, vector<64x16xf32>, vector<64x16xf32> -> vector<64x16xf32>
    %267 = tpu.concatenate %249, %266 in 1 : vector<64x16xf32>, vector<64x16xf32> -> vector<64x32xf32>
    %cst_92 = arith.constant dense<0.000000e+00> : vector<64x32xf32>
    %268 = tpu.matmul %267, %194, %cst_92 {dimension_numbers = #tpu.dot_dimension_numbers<[1], [0], [0], [1], [0, 0, 1, 1], [], []>} : vector<64x32xf32>, vector<32x32xf32>, vector<64x32xf32> -> vector<64x32xf32>
    %269 = tpu.concatenate %231, %268 in 0 : vector<64x32xf32>, vector<64x32xf32> -> vector<128x32xf32>
    %270 = arith.addf %161, %269 : vector<128x32xf32>
    %c13 = arith.constant 13 : index
    %c0_93 = arith.constant 0 : index
    %271 = vector.load %arg2[%c13, %c0_93] : memref<18x128xf32, #tpu.memory_space<vmem>>, vector<1x32xf32>
    %272 = vector.broadcast %271 : vector<1x32xf32> to vector<128x32xf32>
    %273 = arith.addf %270, %272 : vector<128x32xf32>
    %c10 = arith.constant 10 : index
    %c0_94 = arith.constant 0 : index
    %274 = vector.load %arg2[%c10, %c0_94] : memref<18x128xf32, #tpu.memory_space<vmem>>, vector<1x32xf32>
    %c11 = arith.constant 11 : index
    %c0_95 = arith.constant 0 : index
    %275 = vector.load %arg2[%c11, %c0_95] : memref<18x128xf32, #tpu.memory_space<vmem>>, vector<1x32xf32>
    %cst_96 = arith.constant dense<0.000000e+00> : vector<128xf32>
    %276 = vector.multi_reduction <add>, %273, %cst_96 [1] : vector<128x32xf32> to vector<128xf32>
    %277 = vector.shape_cast %276 : vector<128xf32> to vector<128x1xf32>
    %cst_97 = arith.constant 3.200000e+01 : f32
    %278 = vector.broadcast %cst_97 : f32 to vector<128x1xf32>
    %279 = arith.divf %277, %278 : vector<128x1xf32>
    %280 = vector.broadcast %279 : vector<128x1xf32> to vector<128x32xf32>
    %281 = arith.subf %273, %280 : vector<128x32xf32>
    %282 = arith.mulf %281, %281 : vector<128x32xf32>
    %cst_98 = arith.constant dense<0.000000e+00> : vector<128xf32>
    %283 = vector.multi_reduction <add>, %282, %cst_98 [1] : vector<128x32xf32> to vector<128xf32>
    %284 = vector.shape_cast %283 : vector<128xf32> to vector<128x1xf32>
    %cst_99 = arith.constant 3.200000e+01 : f32
    %285 = vector.broadcast %cst_99 : f32 to vector<128x1xf32>
    %286 = arith.divf %284, %285 : vector<128x1xf32>
    %cst_100 = arith.constant 9.99999974E-6 : f32
    %287 = vector.broadcast %cst_100 : f32 to vector<128x1xf32>
    %288 = arith.addf %286, %287 : vector<128x1xf32>
    %289 = math.rsqrt %288 : vector<128x1xf32>
    %290 = vector.broadcast %289 : vector<128x1xf32> to vector<128x32xf32>
    %291 = arith.mulf %281, %290 : vector<128x32xf32>
    %292 = vector.broadcast %274 : vector<1x32xf32> to vector<128x32xf32>
    %293 = arith.mulf %291, %292 : vector<128x32xf32>
    %294 = vector.broadcast %275 : vector<1x32xf32> to vector<128x32xf32>
    %295 = arith.addf %293, %294 : vector<128x32xf32>
    %c1_101 = arith.constant 1 : index
    %c0_102 = arith.constant 0 : index
    %c128_103 = arith.constant 128 : index
    %296 = vector.load %arg3[%c1_101, %c0_102, %c128_103] : memref<2x32x256xf32, #tpu.memory_space<vmem>>, vector<1x32x64xf32>
    %297 = vector.shape_cast %296 : vector<1x32x64xf32> to vector<32x64xf32>
    %cst_104 = arith.constant dense<0.000000e+00> : vector<128x64xf32>
    %298 = tpu.matmul %295, %297, %cst_104 {dimension_numbers = #tpu.dot_dimension_numbers<[1], [0], [0], [1], [0, 0, 1, 1], [], []>} : vector<128x32xf32>, vector<32x64xf32>, vector<128x64xf32> -> vector<128x64xf32>
    %c14 = arith.constant 14 : index
    %c0_105 = arith.constant 0 : index
    %299 = vector.load %arg2[%c14, %c0_105] : memref<18x128xf32, #tpu.memory_space<vmem>>, vector<1x64xf32>
    %300 = vector.broadcast %299 : vector<1x64xf32> to vector<128x64xf32>
    %301 = arith.addf %298, %300 : vector<128x64xf32>
    %cst_106 = arith.constant 5.000000e-01 : f32
    %302 = vector.broadcast %cst_106 : f32 to vector<128x64xf32>
    %303 = arith.mulf %302, %301 : vector<128x64xf32>
    %cst_107 = arith.constant 4.471500e-02 : f32
    %304 = vector.broadcast %cst_107 : f32 to vector<128x64xf32>
    %305 = arith.mulf %304, %301 : vector<128x64xf32>
    %306 = arith.mulf %305, %301 : vector<128x64xf32>
    %307 = arith.mulf %306, %301 : vector<128x64xf32>
    %308 = arith.addf %301, %307 : vector<128x64xf32>
    %cst_108 = arith.constant 0.797884583 : f32
    %309 = vector.broadcast %cst_108 : f32 to vector<128x64xf32>
    %310 = arith.mulf %309, %308 : vector<128x64xf32>
    %311 = math.tanh %310 : vector<128x64xf32>
    %cst_109 = arith.constant 1.000000e+00 : f32
    %312 = vector.broadcast %cst_109 : f32 to vector<128x64xf32>
    %313 = arith.addf %312, %311 : vector<128x64xf32>
    %314 = arith.mulf %303, %313 : vector<128x64xf32>
    %c1_110 = arith.constant 1 : index
    %c0_111 = arith.constant 0 : index
    %c192_112 = arith.constant 192 : index
    %315 = vector.load %arg3[%c1_110, %c0_111, %c192_112] : memref<2x32x256xf32, #tpu.memory_space<vmem>>, vector<1x32x64xf32>
    %316 = vector.shape_cast %315 : vector<1x32x64xf32> to vector<32x64xf32>
    %cst_113 = arith.constant dense<0.000000e+00> : vector<128x32xf32>
    %317 = tpu.matmul %314, %316, %cst_113 {dimension_numbers = #tpu.dot_dimension_numbers<[1], [1], [0], [0], [0, 0, 1, 0], [], []>} : vector<128x64xf32>, vector<32x64xf32>, vector<128x32xf32> -> vector<128x32xf32>
    %318 = arith.addf %273, %317 : vector<128x32xf32>
    %c15 = arith.constant 15 : index
    %c0_114 = arith.constant 0 : index
    %319 = vector.load %arg2[%c15, %c0_114] : memref<18x128xf32, #tpu.memory_space<vmem>>, vector<1x32xf32>
    %320 = vector.broadcast %319 : vector<1x32xf32> to vector<128x32xf32>
    %321 = arith.addf %318, %320 : vector<128x32xf32>
    %c0_115 = arith.constant 0 : index
    %c0_116 = arith.constant 0 : index
    %322 = vector.load %arg5[%c0_115, %c0_116] : memref<112x96xf32, #tpu.memory_space<vmem>>, vector<32x96xf32>
    %cst_117 = arith.constant dense<0.000000e+00> : vector<128x96xf32>
    %323 = tpu.matmul %321, %322, %cst_117 {dimension_numbers = #tpu.dot_dimension_numbers<[1], [0], [0], [1], [0, 0, 1, 1], [], []>} : vector<128x32xf32>, vector<32x96xf32>, vector<128x96xf32> -> vector<128x96xf32>
    %c16 = arith.constant 16 : index
    %c0_118 = arith.constant 0 : index
    %324 = vector.load %arg2[%c16, %c0_118] : memref<18x128xf32, #tpu.memory_space<vmem>>, vector<1x96xf32>
    %325 = vector.broadcast %324 : vector<1x96xf32> to vector<128x96xf32>
    %326 = arith.addf %323, %325 : vector<128x96xf32>
    %c17 = arith.constant 17 : index
    %c0_119 = arith.constant 0 : index
    %327 = vector.load %arg2[%c17, %c0_119] : memref<18x128xf32, #tpu.memory_space<vmem>>, vector<1x96xf32>
    %cst_120 = arith.constant 0.000000e+00 : f32
    %328 = vector.broadcast %cst_120 : f32 to vector<128x96xf32>
    %329 = arith.cmpf oge, %326, %328 : vector<128x96xf32>
    %330 = vector.broadcast %327 : vector<1x96xf32> to vector<128x96xf32>
    %331 = arith.mulf %326, %330 : vector<128x96xf32>
    %332 = arith.select %329, %326, %331 : vector<128x96xi1>, vector<128x96xf32>
    %c32 = arith.constant 32 : index
    %c0_121 = arith.constant 0 : index
    %333 = vector.load %arg5[%c32, %c0_121] : memref<112x96xf32, #tpu.memory_space<vmem>>, vector<16x32xf32>
    %c0_122 = arith.constant 0 : index
    %c0_123 = arith.constant 0 : index
    %334 = vector.load %arg6[%c0_122, %c0_123] : memref<320x256xbf16, #tpu.memory_space<vmem>>, vector<320x256xbf16>
    %335 = vector.extract_strided_slice %332 {offsets = [0, 0], sizes = [64, 96], strides = [1, 1]} : vector<128x96xf32> to vector<64x96xf32>
    %336 = vector.extract_strided_slice %335 {offsets = [0, 0], sizes = [64, 64], strides = [1, 1]} : vector<64x96xf32> to vector<64x64xf32>
    %337 = vector.extract_strided_slice %335 {offsets = [0, 64], sizes = [64, 32], strides = [1, 1]} : vector<64x96xf32> to vector<64x32xf32>
    %cst_124 = arith.constant dense<0.000000e+00> : vector<16x64xf32>
    %338 = tpu.matmul %333, %337, %cst_124 {dimension_numbers = #tpu.dot_dimension_numbers<[1], [1], [0], [0], [0, 0, 1, 0], [], []>} : vector<16x32xf32>, vector<64x32xf32>, vector<16x64xf32> -> vector<16x64xf32>
    %c48 = arith.constant 48 : index
    %c0_125 = arith.constant 0 : index
    %339 = vector.load %arg5[%c48, %c0_125] : memref<112x96xf32, #tpu.memory_space<vmem>>, vector<16x64xf32>
    %cst_126 = arith.constant dense<0.000000e+00> : vector<16x64xf32>
    %340 = tpu.matmul %339, %336, %cst_126 {dimension_numbers = #tpu.dot_dimension_numbers<[1], [1], [0], [0], [0, 0, 1, 0], [], []>} : vector<16x64xf32>, vector<64x64xf32>, vector<16x64xf32> -> vector<16x64xf32>
    %c64 = arith.constant 64 : index
    %c0_127 = arith.constant 0 : index
    %341 = vector.load %arg5[%c64, %c0_127] : memref<112x96xf32, #tpu.memory_space<vmem>>, vector<16x64xf32>
    %cst_128 = arith.constant dense<0.000000e+00> : vector<16x64xf32>
    %342 = tpu.matmul %341, %336, %cst_128 {dimension_numbers = #tpu.dot_dimension_numbers<[1], [1], [0], [0], [0, 0, 1, 0], [], []>} : vector<16x64xf32>, vector<64x64xf32>, vector<16x64xf32> -> vector<16x64xf32>
    %c80 = arith.constant 80 : index
    %c0_129 = arith.constant 0 : index
    %343 = vector.load %arg5[%c80, %c0_129] : memref<112x96xf32, #tpu.memory_space<vmem>>, vector<16x64xf32>
    %cst_130 = arith.constant dense<0.000000e+00> : vector<16x64xf32>
    %344 = tpu.matmul %343, %336, %cst_130 {dimension_numbers = #tpu.dot_dimension_numbers<[1], [1], [0], [0], [0, 0, 1, 0], [], []>} : vector<16x64xf32>, vector<64x64xf32>, vector<16x64xf32> -> vector<16x64xf32>
    %c96_131 = arith.constant 96 : index
    %c0_132 = arith.constant 0 : index
    %345 = vector.load %arg5[%c96_131, %c0_132] : memref<112x96xf32, #tpu.memory_space<vmem>>, vector<16x64xf32>
    %cst_133 = arith.constant dense<0.000000e+00> : vector<16x64xf32>
    %346 = tpu.matmul %345, %336, %cst_133 {dimension_numbers = #tpu.dot_dimension_numbers<[1], [1], [0], [0], [0, 0, 1, 0], [], []>} : vector<16x64xf32>, vector<64x64xf32>, vector<16x64xf32> -> vector<16x64xf32>
    %347 = tpu.concatenate %338, %340, %342, %344, %346 in 1 : vector<16x64xf32>, vector<16x64xf32>, vector<16x64xf32>, vector<16x64xf32>, vector<16x64xf32> -> vector<16x320xf32>
    %348 = arith.truncf %347 : vector<16x320xf32> to vector<16x320xbf16>
    %cst_134 = arith.constant dense<0.000000e+00> : vector<16x256xf32>
    %349 = tpu.matmul %348, %334, %cst_134 {dimension_numbers = #tpu.dot_dimension_numbers<[1], [0], [0], [1], [0, 0, 1, 1], [], []>} : vector<16x320xbf16>, vector<320x256xbf16>, vector<16x256xf32> -> vector<16x256xf32>
    %c0_135 = arith.constant 0 : index
    %c0_136 = arith.constant 0 : index
    %c0_137 = arith.constant 0 : index
    %350 = vector.load %arg7[%c0_135, %c0_136, %c0_137] : memref<2x16x256xf32, #tpu.memory_space<vmem>>, vector<1x16x256xf32>
    %351 = vector.shape_cast %350 : vector<1x16x256xf32> to vector<16x256xf32>
    %352 = vector.shape_cast %349 : vector<16x256xf32> to vector<1x16x256xf32>
    tpu.vector_store %arg7[%c0_135, %c0_136, %c0_137], %352 {strides = array<i32>} : memref<2x16x256xf32, #tpu.memory_space<vmem>>, vector<1x16x256xf32>,
    %353 = vector.extract_strided_slice %332 {offsets = [64, 0], sizes = [64, 96], strides = [1, 1]} : vector<128x96xf32> to vector<64x96xf32>
    %354 = vector.extract_strided_slice %353 {offsets = [0, 0], sizes = [64, 64], strides = [1, 1]} : vector<64x96xf32> to vector<64x64xf32>
    %355 = vector.extract_strided_slice %353 {offsets = [0, 64], sizes = [64, 32], strides = [1, 1]} : vector<64x96xf32> to vector<64x32xf32>
    %cst_138 = arith.constant dense<0.000000e+00> : vector<16x64xf32>
    %356 = tpu.matmul %333, %355, %cst_138 {dimension_numbers = #tpu.dot_dimension_numbers<[1], [1], [0], [0], [0, 0, 1, 0], [], []>} : vector<16x32xf32>, vector<64x32xf32>, vector<16x64xf32> -> vector<16x64xf32>
    %c48_139 = arith.constant 48 : index
    %c0_140 = arith.constant 0 : index
    %357 = vector.load %arg5[%c48_139, %c0_140] : memref<112x96xf32, #tpu.memory_space<vmem>>, vector<16x64xf32>
    %cst_141 = arith.constant dense<0.000000e+00> : vector<16x64xf32>
    %358 = tpu.matmul %357, %354, %cst_141 {dimension_numbers = #tpu.dot_dimension_numbers<[1], [1], [0], [0], [0, 0, 1, 0], [], []>} : vector<16x64xf32>, vector<64x64xf32>, vector<16x64xf32> -> vector<16x64xf32>
    %c64_142 = arith.constant 64 : index
    %c0_143 = arith.constant 0 : index
    %359 = vector.load %arg5[%c64_142, %c0_143] : memref<112x96xf32, #tpu.memory_space<vmem>>, vector<16x64xf32>
    %cst_144 = arith.constant dense<0.000000e+00> : vector<16x64xf32>
    %360 = tpu.matmul %359, %354, %cst_144 {dimension_numbers = #tpu.dot_dimension_numbers<[1], [1], [0], [0], [0, 0, 1, 0], [], []>} : vector<16x64xf32>, vector<64x64xf32>, vector<16x64xf32> -> vector<16x64xf32>
    %c80_145 = arith.constant 80 : index
    %c0_146 = arith.constant 0 : index
    %361 = vector.load %arg5[%c80_145, %c0_146] : memref<112x96xf32, #tpu.memory_space<vmem>>, vector<16x64xf32>
    %cst_147 = arith.constant dense<0.000000e+00> : vector<16x64xf32>
    %362 = tpu.matmul %361, %354, %cst_147 {dimension_numbers = #tpu.dot_dimension_numbers<[1], [1], [0], [0], [0, 0, 1, 0], [], []>} : vector<16x64xf32>, vector<64x64xf32>, vector<16x64xf32> -> vector<16x64xf32>
    %c96_148 = arith.constant 96 : index
    %c0_149 = arith.constant 0 : index
    %363 = vector.load %arg5[%c96_148, %c0_149] : memref<112x96xf32, #tpu.memory_space<vmem>>, vector<16x64xf32>
    %cst_150 = arith.constant dense<0.000000e+00> : vector<16x64xf32>
    %364 = tpu.matmul %363, %354, %cst_150 {dimension_numbers = #tpu.dot_dimension_numbers<[1], [1], [0], [0], [0, 0, 1, 0], [], []>} : vector<16x64xf32>, vector<64x64xf32>, vector<16x64xf32> -> vector<16x64xf32>
    %365 = tpu.concatenate %356, %358, %360, %362, %364 in 1 : vector<16x64xf32>, vector<16x64xf32>, vector<16x64xf32>, vector<16x64xf32>, vector<16x64xf32> -> vector<16x320xf32>
    %366 = arith.truncf %365 : vector<16x320xf32> to vector<16x320xbf16>
    %cst_151 = arith.constant dense<0.000000e+00> : vector<16x256xf32>
    %367 = tpu.matmul %366, %334, %cst_151 {dimension_numbers = #tpu.dot_dimension_numbers<[1], [0], [0], [1], [0, 0, 1, 1], [], []>} : vector<16x320xbf16>, vector<320x256xbf16>, vector<16x256xf32> -> vector<16x256xf32>
    %c1_152 = arith.constant 1 : index
    %c0_153 = arith.constant 0 : index
    %c0_154 = arith.constant 0 : index
    %368 = vector.load %arg7[%c1_152, %c0_153, %c0_154] : memref<2x16x256xf32, #tpu.memory_space<vmem>>, vector<1x16x256xf32>
    %369 = vector.shape_cast %368 : vector<1x16x256xf32> to vector<16x256xf32>
    %370 = vector.shape_cast %367 : vector<16x256xf32> to vector<1x16x256xf32>
    tpu.vector_store %arg7[%c1_152, %c0_153, %c0_154], %370 {strides = array<i32>} : memref<2x16x256xf32, #tpu.memory_space<vmem>>, vector<1x16x256xf32>,
    return
  }
  func.func @transform_0(%arg0: i32) -> (i32, i32, i32) {
    %c0_i32 = arith.constant 0 : i32
    %c0_i32_0 = arith.constant 0 : i32
    %c0_i32_1 = arith.constant 0 : i32
    return %arg0, %c0_i32, %c0_i32_0 : i32, i32, i32
  }
  func.func @transform_1(%arg0: i32) -> (i32, i32) {
    %c0_i32 = arith.constant 0 : i32
    %c0_i32_0 = arith.constant 0 : i32
    %c0_i32_1 = arith.constant 0 : i32
    return %c0_i32, %c0_i32_0 : i32, i32
  }
  func.func @transform_2(%arg0: i32) -> (i32, i32, i32) {
    %c0_i32 = arith.constant 0 : i32
    %c0_i32_0 = arith.constant 0 : i32
    %c0_i32_1 = arith.constant 0 : i32
    %c0_i32_2 = arith.constant 0 : i32
    return %c0_i32, %c0_i32_0, %c0_i32_1 : i32, i32, i32
  }
  func.func @transform_3(%arg0: i32) -> (i32, i32, i32) {
    %c0_i32 = arith.constant 0 : i32
    %c0_i32_0 = arith.constant 0 : i32
    %c0_i32_1 = arith.constant 0 : i32
    %c0_i32_2 = arith.constant 0 : i32
    return %c0_i32, %c0_i32_0, %c0_i32_1 : i32, i32, i32
  }
  func.func @transform_4(%arg0: i32) -> (i32, i32) {
    %c0_i32 = arith.constant 0 : i32
    %c0_i32_0 = arith.constant 0 : i32
    %c0_i32_1 = arith.constant 0 : i32
    return %c0_i32, %c0_i32_0 : i32, i32
  }
  func.func @transform_5(%arg0: i32) -> (i32, i32) {
    %c0_i32 = arith.constant 0 : i32
    %c0_i32_0 = arith.constant 0 : i32
    %c0_i32_1 = arith.constant 0 : i32
    return %c0_i32, %c0_i32_0 : i32, i32
  }
  func.func @transform_6(%arg0: i32) -> (i32, i32, i32) {
    %c0_i32 = arith.constant 0 : i32
    %c0_i32_0 = arith.constant 0 : i32
    %c0_i32_1 = arith.constant 0 : i32
    return %arg0, %c0_i32, %c0_i32_0 : i32, i32, i32
  }
}

</mosaic_0001>

<bundles_post_ra>
// kernel: forward.1
= control target key start
LH: loop header
LB: loop body
LE: loop exit
PB: predicated region body
PF: predicated region fallthrough
CT: control target
= control target key end

     0   :  { %vm59_vm0 = vcmask 261120   ;;  %s12379_s0 = inlined_call_operand.vmem [shape: f32[2,64,32], index: 0, kind: input, shape index: {}]   ;;  %s12380_s1 = inlined_call_operand.vmem [shape: f32[18,128], index: 1, kind: input, shape index: {}]   ;;  %s12381_s2 = inlined_call_operand.vmem [shape: f32[2,32,256], index: 2, kind: input, shape index: {}]   ;;  %s12382_s3 = inlined_call_operand.vmem [shape: bf16[2,64,128], index: 3, kind: input, shape index: {}]   ;;  %s12383_s4 = inlined_call_operand.vmem [shape: f32[112,96], index: 4, kind: input, shape index: {}]   ;;  %s12384_s5 = inlined_call_operand.vmem [shape: bf16[320,256], index: 5, kind: input, shape index: {}]   ;;  %s12385_s6 = inlined_call_operand.hbm [shape: f32[2,16,256], index: 6, kind: output, shape index: {}]  }
   0x1   :  { %v29_v0 = vld [vmem:[%s12379_s0 + $0x20] sm:$0xff]  ;;  %v27_v1 = vld [vmem:[%s12379_s0 + $0x10] sm:$0xff]  ;;  %v30_v6 = vld [vmem:[%s12379_s0 + $0x28] sm:$0xff] }
   0x2   :  { %v25_v2 = vld [vmem:[%s12379_s0] sm:$0xff]  ;;  %v72_v3 = vsel %vm59_vm0, %v29_v0, 0.0  ;;  %v66_v4 = vsel %vm59_vm0, %v27_v1, 0.0  ;;  %v28_v7 = vld [vmem:[%s12379_s0 + $0x18] sm:$0xff]  ;;  %v75_v8 = vsel %vm59_vm0, %v30_v6, 0.0  ;;  %v26_v9 = vld [vmem:[%s12379_s0 + $0x8] sm:$0xff] }
   0x3   :  { %v60_v5 = vsel %vm59_vm0, %v25_v2, 0.0  ;;  %73 = vadd.xlane.f32.xlu2 %v72_v3  ;;  %67 = vadd.xlane.f32.xlu1 %v66_v4  ;;  %v69_v10 = vsel %vm59_vm0, %v28_v7, 0.0  ;;  %v63_v11 = vsel %vm59_vm0, %v26_v9, 0.0 }
   0x4   :  { %61 = vadd.xlane.f32.xlu0 %v60_v5 }
   0x5   :  { %11 = vsyncpa [#allocation3], 0  ;;  %v31_v12 = vld [vmem:[%s12379_s0 + $0x30] sm:$0xff]  ;;  %v8105_v14 = vmov 32.0   ;;  %v32_v40 = vld [vmem:[%s12379_s0 + $0x38] sm:$0xff]  ;;  %s8106_s19 = smov 96  }
   0x6   :  { %v78_v13 = vsel %vm59_vm0, %v31_v12, 0.0  ;;  %7600 = vrcp.f32 %v8105_v14  ;;  %v81_v45 = vsel %vm59_vm0, %v32_v40, 0.0  ;;  %v8222_v53 = vld [vmem:[%s12379_s0 + $0x40] sm:$0xff]  ;;  %v8235_v59 = vld [vmem:[%s12379_s0 + $0x58] sm:$0xff]  ;;  %v8243_v62 = vld [vmem:[%s12381_s2 + $0x30] sm:$0xff]  ;;  %s8107_s20 = smov 80  }
   0x7   :  { %v84_v54 = vsel %vm59_vm0, %v8222_v53, 0.0  ;;  %v93_v60 = vsel %vm59_vm0, %v8235_v59, 0.0  ;;  %519 = vmatpush.msra.mxu0 %v8243_v62  ;;  %v8249_v63 = vld [vmem:[%s12381_s2 + $0x20] sm:$0xff]  ;;  %v8267_v3 = vld [vmem:[%s12379_s0 + $0x50] sm:$0xff]  ;;  %s8108_s21 = smov 112   ;;  %s8109_s26 = smov 64  }
   0x8   :  { %s8110_s29 = smov 48   ;;  %s8111_s8 = smov 32  }
   0x9   :  { %520 = vmatpush.msra.mxu0 %v8249_v63  ;;  %s8112_s9 = smov 16   ;;  %s6601_s17 = sshll.u32 %s12385_s6, 4  ;;  %s6602_s17 = int_to_ptr.hbm [resolvable:$true] %s6601_s17 }
   0xa   :  { %s8114_s18 = smov 256  }
   0xb   :  { %76 = vadd.xlane.f32.xlu2 %v75_v8  ;;  %70 = vadd.xlane.f32.xlu1 %v69_v10 }
   0xc   :  { %64 = vadd.xlane.f32.xlu0 %v63_v11  ;;  %v7601_v15 = vpop.eup %7600 }
   0xd   :  { %v109_v16 = vmul.f32 32.0, %v7601_v15  ;;  %vm113_vm1 = vweird.f32 %v7601_v15 }
   0xf   :  { %v110_v17 = vsub.f32 1.0, %v109_v16 }
  0x11   :  { %v111_v18 = vmul.f32 %v7601_v15, %v110_v17 }
  0x13   :  { %79 = vadd.xlane.f32.xlu1 %v78_v13  ;;  %v112_v19 = vadd.f32 %v7601_v15, %v111_v18 }
  0x15   :  { %v8178_v20 = vsel %vm113_vm1, %v7601_v15, %v112_v19 }
  0x16   :  { %12426 = vst [vmem:[#allocation5_spill] sm:$0xff] %v8178_v20 }
  0x76   :  { %v74_v21 = vpop.xlane.xlu2 %73  ;;  %v68_v22 = vpop.xlane.xlu1 %67 }
  0x77   :  { %v117_v23 = vmul.f32 %v8178_v20, %v68_v22  ;;  %v62_v24 = vpop.xlane.xlu0 %61  ;;  %v119_v36 = vmul.f32 %v8178_v20, %v74_v21 }
  0x78   :  { %v115_v25 = vmul.f32 %v8178_v20, %v62_v24 }
  0x79   :  { %v8182_v26 = vsub.f32 %v27_v1, %v117_v23  ;;  %v8205_v43 = vsub.f32 %v29_v0, %v119_v36  ;;  %v8255_v0 = vld [vmem:[%s12381_s2 + $0x10] sm:$0xff]  ;;  %v8261_v1 = vld [vmem:[%s12381_s2] sm:$0xff]  ;;  %v8297_v36 = vld [vmem:[%s12379_s0 + $0x48] sm:$0xff] }
  0x7a   :  { %v8184_v27 = vsub.f32 %v25_v2, %v115_v25  ;;  %521 = vmatpush.msra.mxu0 %v8255_v0 }
  0x7b   :  { %v149_v28 = vmul.f32 %v8182_v26, %v8182_v26  ;;  %v151_v51 = vmul.f32 %v8205_v43, %v8205_v43 }
  0x7c   :  { %v147_v29 = vmul.f32 %v8184_v27, %v8184_v27  ;;  %522 = vmatpush.msra.mxu0 %v8261_v1 }
  0x7d   :  { %v169_v30 = vsel %vm59_vm0, %v149_v28, 0.0  ;;  %v175_v56 = vsel %vm59_vm0, %v151_v51, 0.0 }
  0x7e   :  { %v77_v31 = vpop.xlane.xlu2 %76  ;;  %170 = vadd.xlane.f32.xlu1 %v169_v30  ;;  %v163_v32 = vsel %vm59_vm0, %v147_v29, 0.0  ;;  %v71_v33 = vpop.xlane.xlu1 %70 }
  0x7f   :  { %v120_v34 = vmul.f32 %v8178_v20, %v77_v31  ;;  %164 = vadd.xlane.f32.xlu0 %v163_v32  ;;  %v65_v35 = vpop.xlane.xlu0 %64  ;;  %v118_v38 = vmul.f32 %v8178_v20, %v71_v33 }
  0x80   :  { %v116_v37 = vmul.f32 %v8178_v20, %v65_v35 }
  0x81   :  { %v8196_v39 = vsub.f32 %v30_v6, %v120_v34  ;;  %v8207_v44 = vsub.f32 %v28_v7, %v118_v38  ;;  %v90_v6 = vsel %vm59_vm0, %v8267_v3, 0.0 }
  0x82   :  { %v8201_v41 = vsub.f32 %v26_v9, %v116_v37 }
  0x83   :  { %v152_v42 = vmul.f32 %v8196_v39, %v8196_v39  ;;  %v150_v52 = vmul.f32 %v8207_v44, %v8207_v44 }
  0x84   :  { %v148_v46 = vmul.f32 %v8201_v41, %v8201_v41 }
  0x85   :  { %v178_v47 = vsel %vm59_vm0, %v152_v42, 0.0  ;;  %v172_v57 = vsel %vm59_vm0, %v150_v52, 0.0 }
  0x86   :  { %179 = vadd.xlane.f32.xlu1 %v178_v47  ;;  %v166_v48 = vsel %vm59_vm0, %v148_v46, 0.0  ;;  %v80_v49 = vpop.xlane.xlu1 %79 }
  0x87   :  { %82 = vadd.xlane.f32.xlu0 %v81_v45  ;;  %167 = vadd.xlane.f32.xlu2 %v166_v48  ;;  %v121_v50 = vmul.f32 %v8178_v20, %v80_v49  ;;  %v87_v48 = vsel %vm59_vm0, %v8297_v36, 0.0  ;;  %v8307_v49 = vld [vmem:[%s12380_s1] ss:$0 sm:$0xff] }
  0x89   :  { %v8226_v55 = vsub.f32 %v31_v12, %v121_v50 }
  0x8b   :  { %v153_v58 = vmul.f32 %v8226_v55, %v8226_v55 }
  0x8d   :  { %v181_v61 = vsel %vm59_vm0, %v153_v58, 0.0 }
  0x8e   :  { %85 = vadd.xlane.f32.xlu1 %v84_v54 }
  0x8f   :  { %176 = vadd.xlane.f32.xlu0 %v175_v56  ;;  %173 = vadd.xlane.f32.xlu2 %v172_v57  ;;  %v8316_v56 = vld [vmem:[%s12380_s1 + $0x1] ss:$0 sm:$0xff] }
  0x96   :  { %94 = vadd.xlane.f32.xlu1 %v93_v60 }
  0x97   :  { %182 = vadd.xlane.f32.xlu2 %v181_v61 }
  0x9f   :  { %91 = vadd.xlane.f32.xlu2 %v90_v6 }
  0xf1   :  { %v171_v2 = vpop.xlane.xlu1 %170 }
  0xf2   :  { %v213_v4 = vmul.f32 %v171_v2, %v8178_v20  ;;  %v165_v5 = vpop.xlane.xlu0 %164 }
  0xf3   :  { %v211_v7 = vmul.f32 %v165_v5, %v8178_v20 }
  0xf4   :  { %v8273_v8 = vadd.f32 1e-05, %v213_v4 }
  0xf5   :  { %v227_v9 = vadd.f32 1e-05, %v211_v7 }
  0xf6   :  { %7602 = vrsqrt.f32 %v8273_v8  ;;  %vm269_vm7 = vweird.f32 %v8273_v8 }
  0xf7   :  { %7604 = vrsqrt.f32 %v227_v9  ;;  %vm249_vm3 = vweird.f32 %v227_v9 }
  0xf9   :  { %v180_v25 = vpop.xlane.xlu1 %179 }
  0xfa   :  { %v168_v11 = vpop.xlane.xlu2 %167  ;;  %v83_v12 = vpop.xlane.xlu0 %82  ;;  %v216_v38 = vmul.f32 %v180_v25, %v8178_v20 }
  0xfb   :  { %v212_v13 = vmul.f32 %v168_v11, %v8178_v20  ;;  %v122_v14 = vmul.f32 %v8178_v20, %v83_v12 }
  0xfc   :  { %v8280_v15 = vpop.eup %7602  ;;  %v8310_v52 = vadd.f32 1e-05, %v216_v38 }
  0xfd   :  { %v7605_v16 = vpop.eup %7604  ;;  %v228_v17 = vadd.f32 1e-05, %v212_v13  ;;  %v8282_v18 = vsub.f32 %v32_v40, %v122_v14  ;;  %v264_v19 = vmul.f32 %v8280_v15, %v8273_v8  ;;  %vm270_vm8 = vweird.f32 %v8280_v15 }
  0xfe   :  { %v244_v21 = vmul.f32 %v7605_v16, %v227_v9  ;;  %vm250_vm2 = vweird.f32 %v7605_v16  ;;  %vm8330_vm10 = vmor %vm269_vm7, %vm270_vm8 }
  0xff   :  { %7606 = vrsqrt.f32 %v228_v17  ;;  %v154_v22 = vmul.f32 %v8282_v18, %v8282_v18  ;;  %v265_v29 = vmul.f32 %v8280_v15, %v264_v19  ;;  %vm251_vm4 = vmor %vm249_vm3, %vm250_vm2  ;;  %vm259_vm5 = vweird.f32 %v228_v17 }
 0x100   :  { %v245_v23 = vmul.f32 %v7605_v16, %v244_v21  ;;  %vm299_vm2 = vweird.f32 %v8310_v52 }
 0x101   :  { %v184_v28 = vsel %vm59_vm0, %v154_v22, 0.0  ;;  %v266_v42 = vmul.f32 0.5, %v265_v29 }
 0x102   :  { %v246_v30 = vmul.f32 0.5, %v245_v23  ;;  %v174_v31 = vpop.xlane.xlu2 %173  ;;  %185 = vadd.xlane.f32.xlu0 %v184_v28  ;;  %v177_v32 = vpop.xlane.xlu0 %176 }
 0x103   :  { %v214_v33 = vmul.f32 %v174_v31, %v8178_v20  ;;  %v215_v34 = vmul.f32 %v177_v32, %v8178_v20  ;;  %v267_v57 = vsub.f32 1.5, %v266_v42 }
 0x104   :  { %v247_v35 = vsub.f32 1.5, %v246_v30 }
 0x105   :  { %v7607_v37 = vpop.eup %7606  ;;  %v230_v40 = vadd.f32 1e-05, %v214_v33  ;;  %v8300_v47 = vadd.f32 1e-05, %v215_v34  ;;  %v268_v9 = vmul.f32 %v8280_v15, %v267_v57 }
 0x106   :  { %v248_v45 = vmul.f32 %v7605_v16, %v247_v35  ;;  %v254_v46 = vmul.f32 %v7607_v37, %v228_v17  ;;  %vm260_vm6 = vweird.f32 %v7607_v37 }
 0x107   :  { %7608 = vrsqrt.f32 %v230_v40  ;;  %vm261_vm9 = vmor %vm259_vm5, %vm260_vm6  ;;  %v272_v25 = vsel %vm8330_vm10, %v8280_v15, %v268_v9  ;;  %vm279_vm11 = vweird.f32 %v230_v40  ;;  %vm289_vm14 = vweird.f32 %v8300_v47 }
 0x108   :  { %v255_v50 = vmul.f32 %v7607_v37, %v254_v46  ;;  %7610 = vrsqrt.f32 %v8300_v47  ;;  %v252_v51 = vsel %vm251_vm4, %v7605_v16, %v248_v45  ;;  %v405_v32 = vmul.f32 %v272_v25, %v8182_v26 }
 0x109   :  { %v403_v54 = vmul.f32 %v252_v51, %v8184_v27  ;;  %v8324_v27 = vld [vmem:[%s12379_s0 + $0x60] sm:$0xff]  ;;  %7612 = vrsqrt.f32 %v8310_v52  ;;  %v86_v51 = vpop.xlane.xlu1 %85 }
 0x10a   :  { %v256_v58 = vmul.f32 0.5, %v255_v50  ;;  %v183_v60 = vpop.xlane.xlu2 %182  ;;  %88 = vadd.xlane.f32.xlu0 %v87_v48  ;;  %v96_v14 = vsel %vm59_vm0, %v8324_v27, 0.0  ;;  %v422_v15 = vmul.f32 %v8307_v49, %v405_v32 }
 0x10b   :  { %v420_v61 = vmul.f32 %v8307_v49, %v403_v54  ;;  %v217_v5 = vmul.f32 %v183_v60, %v8178_v20  ;;  %v123_v54 = vmul.f32 %v8178_v20, %v86_v51 }
 0x10c   :  { %v257_v2 = vsub.f32 1.5, %v256_v58  ;;  %v439_v42 = vadd.f32 %v8316_v56, %v422_v15 }
 0x10d   :  { %v7609_v4 = vpop.eup %7608  ;;  %v437_v6 = vadd.f32 %v8316_v56, %v420_v61  ;;  %v8338_v19 = vadd.f32 1e-05, %v217_v5  ;;  %v8379_v5 = vsub.f32 %v8222_v53, %v123_v54 }
 0x10e   :  { %v7611_v7 = vpop.eup %7610  ;;  %v258_v8 = vmul.f32 %v7607_v37, %v257_v2  ;;  %v274_v11 = vmul.f32 %v7609_v4, %v230_v40  ;;  %vm280_vm12 = vweird.f32 %v7609_v4 }
 0x10f   :  { %v284_v13 = vmul.f32 %v7611_v7, %v8300_v47  ;;  %6613 = vmatmul.msk.f32.vlgmr.msra.gmra.mxu0 %vm59_vm0, %v437_v6  ;;  %v7613_v28 = vpop.eup %7612  ;;  %7614 = vrsqrt.f32 %v8338_v19  ;;  %vm281_vm13 = vmor %vm279_vm11, %vm280_vm12  ;;  %vm290_vm15 = vweird.f32 %v7611_v7  ;;  %v8363_v47 = vld [vmem:[%s12379_s0 + $0x78] sm:$0xff]  ;;  %v155_v6 = vmul.f32 %v8379_v5, %v8379_v5 }
 0x110   :  { %v275_v16 = vmul.f32 %v7609_v4, %v274_v11  ;;  %v262_v17 = vsel %vm261_vm9, %v7607_v37, %v258_v8  ;;  %vm8355_vm1 = vmor %vm289_vm14, %vm290_vm15  ;;  %v105_v57 = vsel %vm59_vm0, %v8363_v47, 0.0  ;;  %vm300_vm3 = vweird.f32 %v7613_v28 }
 0x111   :  { %v404_v21 = vmul.f32 %v262_v17, %v8201_v41  ;;  %v285_v23 = vmul.f32 %v7611_v7, %v284_v13  ;;  %v294_v41 = vmul.f32 %v7613_v28, %v8310_v52  ;;  %v187_v13 = vsel %vm59_vm0, %v155_v6, 0.0  ;;  %vm301_vm4 = vmor %vm299_vm2, %vm300_vm3 }
 0x112   :  { %v276_v22 = vmul.f32 0.5, %v275_v16  ;;  %97 = vadd.xlane.f32.xlu0 %v96_v14  ;;  %188 = vadd.xlane.f32.xlu2 %v187_v13  ;;  %vm309_vm5 = vweird.f32 %v8338_v19 }
 0x113   :  { %v421_v29 = vmul.f32 %v8307_v49, %v404_v21  ;;  %v286_v34 = vmul.f32 0.5, %v285_v23  ;;  %v295_v35 = vmul.f32 %v7613_v28, %v294_v41 }
 0x114   :  { %v277_v30 = vsub.f32 1.5, %v276_v22 }
 0x115   :  { %v438_v31 = vadd.f32 %v8316_v56, %v421_v29  ;;  %v287_v37 = vsub.f32 1.5, %v286_v34  ;;  %v7615_v40 = vpop.eup %7614  ;;  %v296_v45 = vmul.f32 0.5, %v295_v35  ;;  %v92_v34 = vpop.xlane.xlu2 %91 }
 0x116   :  { %v278_v33 = vmul.f32 %v7609_v4, %v277_v30  ;;  %v304_v48 = vmul.f32 %v7615_v40, %v8338_v19  ;;  %vm310_vm6 = vweird.f32 %v7615_v40 }
 0x117   :  { %6614 = vmatmul.msk.f32.gmra.mxu0 %vm59_vm0, %v438_v31  ;;  %v288_v46 = vmul.f32 %v7611_v7, %v287_v37  ;;  %v297_v61 = vsub.f32 1.5, %v296_v45  ;;  %vm311_vm7 = vmor %vm309_vm5, %vm310_vm6  ;;  %v8410_v31 = vld [vmem:[%s12379_s0 + $0x70] sm:$0xff]  ;;  %v125_v37 = vmul.f32 %v8178_v20, %v92_v34 }
 0x118   :  { %v282_v38 = vsel %vm281_vm13, %v7609_v4, %v278_v33  ;;  %v305_v2 = vmul.f32 %v7615_v40, %v304_v48  ;;  %v102_v32 = vsel %vm59_vm0, %v8410_v31, 0.0 }
 0x119   :  { %v406_v26 = vmul.f32 %v282_v38, %v8207_v44  ;;  %v8368_v44 = vld [vmem:[%s12379_s0 + $0x68] sm:$0xff]  ;;  %v292_v4 = vsel %vm8355_vm1, %v7611_v7, %v288_v46  ;;  %v298_v11 = vmul.f32 %v7613_v28, %v297_v61  ;;  %v95_v7 = vpop.xlane.xlu1 %94 }
 0x11a   :  { %v99_v58 = vsel %vm59_vm0, %v8368_v44, 0.0  ;;  %106 = vadd.xlane.f32.xlu0 %v105_v57  ;;  %v407_v8 = vmul.f32 %v292_v4, %v8205_v43  ;;  %v306_v12 = vmul.f32 0.5, %v305_v2  ;;  %v126_v53 = vmul.f32 %v8178_v20, %v95_v7 }
 0x11b   :  { %v423_v60 = vmul.f32 %v8307_v49, %v406_v26  ;;  %100 = vadd.xlane.f32.xlu1 %v99_v58  ;;  %v302_v16 = vsel %vm301_vm4, %v7613_v28, %v298_v11  ;;  %v8421_v26 = vsub.f32 %v8267_v3, %v125_v37  ;;  %v8432_v3 = vld [vmem:[%s12380_s1 + $0x4] ss:$0 sm:$0xff] }
 0x11c   :  { %v424_v52 = vmul.f32 %v8307_v49, %v407_v8  ;;  %v307_v14 = vsub.f32 1.5, %v306_v12  ;;  %v8391_v17 = vsub.f32 %v8235_v59, %v126_v53  ;;  %v408_v22 = vmul.f32 %v302_v16, %v8196_v39 }
 0x11d   :  { %v440_v9 = vadd.f32 %v8316_v56, %v423_v60  ;;  %v157_v54 = vmul.f32 %v8421_v26, %v8421_v26 }
 0x11e   :  { %v158_v43 = vmul.f32 %v8391_v17, %v8391_v17  ;;  %v441_v21 = vadd.f32 %v8316_v56, %v424_v52  ;;  %v308_v23 = vmul.f32 %v7615_v40, %v307_v14  ;;  %v425_v59 = vmul.f32 %v8307_v49, %v408_v22 }
 0x11f   :  { %6615 = vmatmul.msk.f32.gmra.mxu0 %vm59_vm0, %v439_v42  ;;  %v193_v60 = vsel %vm59_vm0, %v157_v54, 0.0 }
 0x120   :  { %v196_v25 = vsel %vm59_vm0, %v158_v43, 0.0  ;;  %v312_v28 = vsel %vm311_vm7, %v7615_v40, %v308_v23  ;;  %v442_v19 = vadd.f32 %v8316_v56, %v425_v59 }
 0x121   :  { %v409_v29 = vmul.f32 %v312_v28, %v8226_v55 }
 0x122   :  { %197 = vadd.xlane.f32.xlu0 %v196_v25 }
 0x123   :  { %v426_v30 = vmul.f32 %v8307_v49, %v409_v29  ;;  %103 = vadd.xlane.f32.xlu1 %v102_v32 }
 0x125   :  { %v443_v39 = vadd.f32 %v8316_v56, %v426_v30 }
 0x127   :  { %6616 = vmatmul.msk.f32.gmra.mxu0 %vm59_vm0, %v440_v9 }
 0x12f   :  { %6617 = vmatmul.msk.f32.gmra.mxu0 %vm59_vm0, %v441_v21 }
 0x137   :  { %6618 = vmatmul.msk.f32.gmra.mxu0 %vm59_vm0, %v442_v19 }
 0x13f   :  { %6619 = vmatmul.msk.f32.gmra.mxu0 %vm59_vm0, %v443_v39 }
 0x175   :  { %v186_v41 = vpop.xlane.xlu0 %185 }
 0x176   :  { %v218_v55 = vmul.f32 %v186_v41, %v8178_v20 }
 0x178   :  { %v234_v33 = vadd.f32 1e-05, %v218_v55 }
 0x17a   :  { %7616 = vrsqrt.f32 %v234_v33  ;;  %vm319_vm9 = vweird.f32 %v234_v33 }
 0x17d   :  { %v89_v15 = vpop.xlane.xlu0 %88 }
 0x17e   :  { %v124_v35 = vmul.f32 %v8178_v20, %v89_v15 }
 0x180   :  { %v7617_v38 = vpop.eup %7616  ;;  %v8418_v40 = vsub.f32 %v8297_v36, %v124_v35 }
 0x181   :  { %v314_v42 = vmul.f32 %v7617_v38, %v234_v33  ;;  %vm320_vm8 = vweird.f32 %v7617_v38 }
 0x182   :  { %v156_v45 = vmul.f32 %v8418_v40, %v8418_v40  ;;  %vm321_vm10 = vmor %vm319_vm9, %vm320_vm8 }
 0x183   :  { %v315_v46 = vmul.f32 %v7617_v38, %v314_v42 }
 0x184   :  { %v190_v48 = vsel %vm59_vm0, %v156_v45, 0.0 }
 0x185   :  { %v316_v50 = vmul.f32 0.5, %v315_v46  ;;  %191 = vadd.xlane.f32.xlu1 %v190_v48  ;;  %v98_v51 = vpop.xlane.xlu0 %97  ;;  %v189_v7 = vpop.xlane.xlu2 %188 }
 0x186   :  { %v127_v57 = vmul.f32 %v8178_v20, %v98_v51  ;;  %v219_v53 = vmul.f32 %v189_v7, %v8178_v20 }
 0x187   :  { %v317_v36 = vsub.f32 1.5, %v316_v50 }
 0x188   :  { %v8436_v61 = vsub.f32 %v8324_v27, %v127_v57  ;;  %v235_v16 = vadd.f32 1e-05, %v219_v53 }
 0x189   :  { %v318_v58 = vmul.f32 %v7617_v38, %v317_v36 }
 0x18a   :  { %v159_v11 = vmul.f32 %v8436_v61, %v8436_v61  ;;  %7618 = vrsqrt.f32 %v235_v16  ;;  %vm329_vm11 = vweird.f32 %v235_v16 }
 0x18b   :  { %v322_v2 = vsel %vm321_vm10, %v7617_v38, %v318_v58 }
 0x18c   :  { %v524_v4 = vpop.f32.mrf.mxu0  ;;  %v410_v6 = vmul.f32 %v322_v2, %v8282_v18  ;;  %v199_v12 = vsel %vm59_vm0, %v159_v11, 0.0 }
 0x18d   :  { %v8440_v9 = vadd.f32 %v8432_v3, %v524_v4  ;;  %194 = vadd.xlane.f32.xlu1 %v193_v60  ;;  %v107_v42 = vpop.xlane.xlu0 %106 }
 0x18e   :  { %v427_v8 = vmul.f32 %v8307_v49, %v410_v6  ;;  %v8501_v35 = vpop.xlane.xlu1 %100  ;;  %v130_v48 = vmul.f32 %v8178_v20, %v107_v42 }
 0x18f   :  { %580 = vrot.lane.b32.xlu2 %v8440_v9, %s8106_s19 }
 0x190   :  { %v444_v27 = vadd.f32 %v8316_v56, %v427_v8  ;;  %v7619_v21 = vpop.eup %7618  ;;  %v8512_v51 = vsub.f32 %v8363_v47, %v130_v48 }
 0x191   :  { %v324_v23 = vmul.f32 %v7619_v21, %v235_v16  ;;  %vm330_vm12 = vweird.f32 %v7619_v21 }
 0x192   :  { %6620 = vmatmul.msk.f32.gmra.mxu0 %vm59_vm0, %v444_v27  ;;  %vm331_vm13 = vmor %vm329_vm11, %vm330_vm12  ;;  %v162_v36 = vmul.f32 %v8512_v51, %v8512_v51  ;;  %vm596_vm11 = vcmask 130048  }
 0x193   :  { %v325_v25 = vmul.f32 %v7619_v21, %v324_v23 }
 0x194   :  { %v527_v18 = vpop.f32.mrf.mxu0 }
 0x195   :  { %v8451_v13 = vadd.f32 %v8432_v3, %v527_v18  ;;  %200 = vadd.xlane.f32.xlu1 %v199_v12  ;;  %v326_v59 = vmul.f32 0.5, %v325_v25  ;;  %v198_v54 = vpop.xlane.xlu0 %197 }
 0x196   :  { %v104_v37 = vpop.xlane.xlu1 %103  ;;  %v222_v57 = vmul.f32 %v198_v54, %v8178_v20 }
 0x197   :  { %582 = vrot.lane.b32.xlu0 %v8451_v13, %s8106_s19  ;;  %v327_v19 = vsub.f32 1.5, %v326_v59  ;;  %v129_v38 = vmul.f32 %v8178_v20, %v104_v37 }
 0x198   :  { %v238_v58 = vadd.f32 1e-05, %v222_v57 }
 0x199   :  { %v328_v30 = vmul.f32 %v7619_v21, %v327_v19  ;;  %v8505_v45 = vsub.f32 %v8410_v31, %v129_v38  ;;  %v208_v31 = vsel %vm59_vm0, %v162_v36, 0.0 }
 0x19a   :  { %7620 = vrsqrt.f32 %v238_v58  ;;  %vm359_vm4 = vweird.f32 %v238_v58 }
 0x19b   :  { %v332_v39 = vsel %vm331_vm13, %v7619_v21, %v328_v30  ;;  %v161_v46 = vmul.f32 %v8505_v45, %v8505_v45 }
 0x19c   :  { %v530_v52 = vpop.f32.mrf.mxu0  ;;  %v411_v32 = vmul.f32 %v332_v39, %v8379_v5 }
 0x19d   :  { %v8457_v14 = vadd.f32 %v8432_v3, %v530_v52  ;;  %v205_v50 = vsel %vm59_vm0, %v161_v46, 0.0 }
 0x19e   :  { %v428_v41 = vmul.f32 %v8307_v49, %v411_v32 }
 0x19f   :  { %868 = vrot.lane.b32.xlu2 %v8457_v14, %s8107_s20  ;;  %584 = vrot.lane.b32.xlu0 %v8457_v14, %s8106_s19 }
 0x1a0   :  { %v445_v34 = vadd.f32 %v8316_v56, %v428_v41  ;;  %v8519_v6 = vpop.eup %7620 }
 0x1a1   :  { %v354_v27 = vmul.f32 %v8519_v6, %v238_v58  ;;  %vm360_vm5 = vweird.f32 %v8519_v6 }
 0x1a2   :  { %6621 = vmatmul.msk.f32.gmra.mxu0 %vm59_vm0, %v445_v34  ;;  %v7278_v34 = vld [vmem:[%s12382_s3] sm:$0xff]   ;;  %vm8549_vm7 = vmor %vm359_vm4, %vm360_vm5 }
 0x1a3   :  { %v355_v53 = vmul.f32 %v8519_v6, %v354_v27  ;;  %v8542_v46 = vunpack.c.h.bf16 %v7278_v34 }
 0x1a4   :  { %v533_v43 = vpop.f32.mrf.mxu0 }
 0x1a5   :  { %v8464_v22 = vadd.f32 %v8432_v3, %v533_v43  ;;  %v356_v25 = vmul.f32 0.5, %v355_v53 }
 0x1a7   :  { %870 = vrot.lane.b32.xlu2 %v8464_v22, %s8107_s20  ;;  %586 = vrot.lane.b32.xlu0 %v8464_v22, %s8106_s19  ;;  %v357_v32 = vsub.f32 1.5, %v356_v25 }
 0x1a9   :  { %v358_v54 = vmul.f32 %v8519_v6, %v357_v32  ;;  %v128_v32 = vmul.f32 %v8178_v20, %v8501_v35 }
 0x1ab   :  { %v362_v58 = vsel %vm8549_vm7, %v8519_v6, %v358_v54 }
 0x1ac   :  { %v536_v28 = vpop.f32.mrf.mxu0  ;;  %v414_v53 = vmul.f32 %v362_v58, %v8391_v17 }
 0x1ad   :  { %v8471_v29 = vadd.f32 %v8432_v3, %v536_v28 }
 0x1af   :  { %588 = vrot.lane.b32.xlu1 %v8471_v29, %s8106_s19 }
 0x1b4   :  { %v539_v55 = vpop.f32.mrf.mxu0 }
 0x1b5   :  { %v8478_v33 = vadd.f32 %v8432_v3, %v539_v55 }
 0x1b7   :  { %874 = vrot.lane.b32.xlu2 %v8478_v33, %s8107_s20  ;;  %590 = vrot.lane.b32.xlu0 %v8478_v33, %s8106_s19  ;;  %v8565_v27 = vpack.i.bf16 %v8471_v29, %v8478_v33 }
 0x1b8   :  { %872 = vrot.lane.b32.xlu1 %v8471_v29, %s8107_s20 }
 0x1bc   :  { %v542_v5 = vpop.f32.mrf.mxu0 }
 0x1bd   :  { %v8489_v15 = vadd.f32 %v8432_v3, %v542_v5 }
 0x1bf   :  { %866 = vrot.lane.b32.xlu0 %v8451_v13, %s8107_s20 }
 0x1c0   :  { %592 = vrot.lane.b32.xlu1 %v8489_v15, %s8106_s19 }
 0x1c7   :  { %848 = vrot.lane.b32.xlu0 %v8440_v9, %s8108_s21 }
 0x1c8   :  { %876 = vrot.lane.b32.xlu1 %v8489_v15, %s8107_s20 }
 0x1d0   :  { %864 = vrot.lane.b32.xlu1 %v8440_v9, %s8107_s20 }
 0x1e9   :  { %v581_v54 = vpop.permute.xlu2 %580 }
 0x1f1   :  { %206 = vadd.xlane.f32.xlu0 %v205_v50 }
 0x1f8   :  { %v192_v60 = vpop.xlane.xlu1 %191 }
 0x1f9   :  { %v220_v2 = vmul.f32 %v192_v60, %v8178_v20 }
 0x1fa   :  { %209 = vadd.xlane.f32.xlu1 %v208_v31 }
 0x1fb   :  { %v236_v4 = vadd.f32 1e-05, %v220_v2 }
 0x1fd   :  { %7622 = vrsqrt.f32 %v236_v4  ;;  %vm339_vm14 = vweird.f32 %v236_v4 }
 0x200   :  { %v195_v47 = vpop.xlane.xlu1 %194 }
 0x201   :  { %v221_v8 = vmul.f32 %v195_v47, %v8178_v20  ;;  %v7309_v47 = vld [vmem:[%s12382_s3 + $0x8] sm:$0xff]  }
 0x203   :  { %v7623_v11 = vpop.eup %7622  ;;  %v237_v12 = vadd.f32 1e-05, %v221_v8 }
 0x204   :  { %v334_v18 = vmul.f32 %v7623_v11, %v236_v4  ;;  %vm340_vm15 = vweird.f32 %v7623_v11 }
 0x205   :  { %7624 = vrsqrt.f32 %v237_v12  ;;  %854 = vrot.lane.b32.xlu0 %v8464_v22, %s8108_s21  ;;  %vm341_vm1 = vmor %vm339_vm14, %vm340_vm15  ;;  %vm349_vm2 = vweird.f32 %v237_v12 }
 0x206   :  { %v335_v7 = vmul.f32 %v7623_v11, %v334_v18  ;;  %v8568_v18 = vunpack.c.l.bf16 %v7309_v47 }
 0x208   :  { %v336_v52 = vmul.f32 0.5, %v335_v7  ;;  %v201_v16 = vpop.xlane.xlu1 %200 }
 0x209   :  { %v223_v43 = vmul.f32 %v201_v16, %v8178_v20  ;;  %v7310_v16 = vld [vmem:[%s12382_s3 + $0x10] sm:$0xff]  }
 0x20a   :  { %v337_v21 = vsub.f32 1.5, %v336_v52 }
 0x20b   :  { %v7625_v23 = vpop.eup %7624  ;;  %v239_v59 = vadd.f32 1e-05, %v223_v43  ;;  %v8581_v43 = vunpack.c.l.bf16 %v7310_v16 }
 0x20c   :  { %v338_v28 = vmul.f32 %v7623_v11, %v337_v21  ;;  %v344_v19 = vmul.f32 %v7625_v23, %v237_v12  ;;  %vm350_vm3 = vweird.f32 %v7625_v23 }
 0x20d   :  { %7626 = vrsqrt.f32 %v239_v59  ;;  %vm351_vm6 = vmor %vm349_vm2, %vm350_vm3  ;;  %vm369_vm8 = vweird.f32 %v239_v59 }
 0x20e   :  { %v345_v30 = vmul.f32 %v7625_v23, %v344_v19  ;;  %v342_v39 = vsel %vm341_vm1, %v7623_v11, %v338_v28 }
 0x20f   :  { %v545_v41 = vpop.f32.mrf.mxu0  ;;  %v412_v55 = vmul.f32 %v342_v39, %v8418_v40  ;;  %v8540_v40 = vunpack.c.l.bf16 %v7278_v34 }
 0x210   :  { %v346_v5 = vmul.f32 0.5, %v345_v30  ;;  %v8532_v37 = vadd.f32 %v8432_v3, %v545_v41  ;;  %v7362_v30 = vpack.i.bf16 %v8451_v13, %v8457_v14  ;;  %v8600_v41 = vunpack.c.h.bf16 %v7310_v16 }
 0x211   :  { %v429_v38 = vmul.f32 %v8307_v49, %v412_v55  ;;  %v7342_v2 = vpack.i.bf16 %v8542_v46, %v8540_v40 }
 0x212   :  { %v347_v42 = vsub.f32 1.5, %v346_v5  ;;  %878 = vrot.lane.b32.xlu0 %v8532_v37, %s8107_s20  ;;  %594 = vrot.lane.b32.xlu2 %v8532_v37, %s8106_s19  ;;  %v7367_v55 = vpack.i.bf16 %v8600_v41, %v8440_v9  ;;  %v7387_v5 = vpack.i.bf16 %v8440_v9, %v8451_v13 }
 0x213   :  { %v7627_v48 = vpop.eup %7626  ;;  %860 = vrot.lane.b32.xlu1 %v8489_v15, %s8108_s21  ;;  %v446_v50 = vadd.f32 %v8316_v56, %v429_v38  ;;  %v583_v38 = vpop.permute.xlu0 %582 }
 0x214   :  { %v348_v57 = vmul.f32 %v7625_v23, %v347_v42  ;;  %v364_v36 = vmul.f32 %v7627_v48, %v239_v59  ;;  %vm370_vm9 = vweird.f32 %v7627_v48  ;;  %v7357_v59 = vpack.i.bf16 %v8464_v22, %v8581_v43 }
 0x215   :  { %6622 = vmatmul.msk.f32.gmra.mxu0 %vm59_vm0, %v446_v50  ;;  %vm371_vm10 = vmor %vm369_vm8, %vm370_vm9 }
 0x216   :  { %v365_v60 = vmul.f32 %v7627_v48, %v364_v36  ;;  %v352_v4 = vsel %vm351_vm6, %v7625_v23, %v348_v57  ;;  %v431_v23 = vmul.f32 %v8307_v49, %v414_v53  ;;  %v869_v36 = vpop.permute.xlu2 %868  ;;  %vm670_vm6 = vcmask 523264  }
 0x217   :  { %v413_v8 = vmul.f32 %v352_v4, %v8421_v26  ;;  %v8571_v26 = vunpack.c.h.bf16 %v7309_v47 }
 0x218   :  { %v366_v11 = vmul.f32 0.5, %v365_v60  ;;  %v448_v17 = vadd.f32 %v8316_v56, %v431_v23  ;;  %v7382_v23 = vpack.i.bf16 %v8457_v14, %v8464_v22 }
 0x219   :  { %v430_v12 = vmul.f32 %v8307_v49, %v413_v8  ;;  %v7347_v21 = vpack.i.bf16 %v8571_v26, %v8568_v18 }
 0x21a   :  { %v367_v7 = vsub.f32 1.5, %v366_v11  ;;  %7343 = vrot.lane.b32.xlu0 %v7342_v2, %s8109_s26  ;;  %v7311_v11 = vld [vmem:[%s12382_s3 + $0x18] sm:$0xff]  }
 0x21b   :  { %7353 = vrot.lane.b32.xlu1 %v8565_v27, %s8109_s26  ;;  %v447_v6 = vadd.f32 %v8316_v56, %v430_v12  ;;  %v8634_v58 = vunpack.c.l.bf16 %v7311_v11  ;;  %v8636_v12 = vunpack.c.h.bf16 %v7311_v11 }
 0x21c   :  { %v368_v52 = vmul.f32 %v7627_v48, %v367_v7 }
 0x21d   :  { %6623 = vmatmul.msk.f32.gmra.mxu0 %vm59_vm0, %v447_v6  ;;  %v7372_v53 = vpack.i.bf16 %v8636_v12, %v8634_v58 }
 0x21e   :  { %v372_v25 = vsel %vm371_vm10, %v7627_v48, %v368_v52  ;;  %v585_v48 = vpop.permute.xlu0 %584  ;;  %v871_v60 = vpop.permute.xlu2 %870 }
 0x21f   :  { %v415_v28 = vmul.f32 %v372_v25, %v8436_v61  ;;  %v8604_v61 = vsub.f32 %v8368_v44, %v128_v32  ;;  %v7397_v44 = vpack.i.bf16 %v8489_v15, %v8532_v37  ;;  %v548_v42 = vpop.f32.mrf.mxu0 }
 0x220   :  { %v8619_v50 = vadd.f32 %v8432_v3, %v548_v42 }
 0x221   :  { %v432_v19 = vmul.f32 %v8307_v49, %v415_v28  ;;  %v160_v34 = vmul.f32 %v8604_v61, %v8604_v61  ;;  %v589_v2 = vpop.permute.xlu1 %588 }
 0x222   :  { %7348 = vrot.lane.b32.xlu0 %v7347_v21, %s8109_s26 }
 0x223   :  { %7358 = vrot.lane.b32.xlu1 %v7357_v59, %s8109_s26  ;;  %v449_v39 = vadd.f32 %v8316_v56, %v432_v19  ;;  %v202_v35 = vsel %vm59_vm0, %v160_v34, 0.0 }
 0x225   :  { %6624 = vmatmul.msk.f32.gmra.mxu0 %vm59_vm0, %v448_v17 }
 0x226   :  { %v587_v57 = vpop.permute.xlu0 %586  ;;  %v875_v47 = vpop.permute.xlu2 %874 }
 0x22a   :  { %7363 = vrot.lane.b32.xlu0 %v7362_v30, %s8109_s26  ;;  %v873_v8 = vpop.permute.xlu1 %872 }
 0x22d   :  { %6625 = vmatmul.msk.f32.gmra.mxu0 %vm59_vm0, %v449_v39 }
 0x22e   :  { %v591_v31 = vpop.permute.xlu0 %590 }
 0x232   :  { %7368 = vrot.lane.b32.xlu0 %v7367_v55, %s8109_s26  ;;  %v593_v52 = vpop.permute.xlu1 %592 }
 0x236   :  { %v867_v4 = vpop.permute.xlu0 %866 }
 0x23a   :  { %7388 = vrot.lane.b32.xlu0 %v7387_v5, %s8110_s29  ;;  %v877_v59 = vpop.permute.xlu1 %876 }
 0x23b   :  { %203 = vadd.xlane.f32.xlu2 %v202_v35 }
 0x23e   :  { %v849_v7 = vpop.permute.xlu0 %848 }
 0x242   :  { %7398 = vrot.lane.b32.xlu0 %v7397_v44, %s8110_s29 }
 0x24a   :  { %1291 = vrot.lane.b32.xlu0 %v8619_v50, %s8106_s19 }
 0x253   :  { %850 = vrot.lane.b32.xlu2 %v8451_v13, %s8108_s21 }
 0x25b   :  { %852 = vrot.lane.b32.xlu2 %v8457_v14, %s8108_s21 }
 0x263   :  { %856 = vrot.lane.b32.xlu2 %v8471_v29, %s8108_s21 }
 0x264   :  { %v207_v16 = vpop.xlane.xlu0 %206 }
 0x265   :  { %v225_v19 = vmul.f32 %v207_v16, %v8178_v20 }
 0x26b   :  { %858 = vrot.lane.b32.xlu2 %v8478_v33, %s8108_s21 }
 0x26c   :  { %v595_v6 = vpop.permute.xlu2 %594 }
 0x26d   :  { %6629 = vmatpush.xpose.msk.msra.mxu1 %vm596_vm11, %v595_v6 }
 0x271   :  { %6630 = vmatpush.xpose.msk.msra.mxu1 %vm596_vm11, %v593_v52 }
 0x273   :  { %7373 = vrot.lane.b32.xlu2 %v7372_v53, %s8109_s26 }
 0x275   :  { %6631 = vmatpush.xpose.msk.msra.mxu1 %vm596_vm11, %v591_v31 }
 0x277   :  { %v8647_v21 = vpop.permute.xlu0 %854 }
 0x279   :  { %6632 = vmatpush.xpose.msk.msra.mxu1 %vm596_vm11, %v589_v2 }
 0x27b   :  { %7378 = vrot.lane.b32.xlu2 %v8565_v27, %s8110_s29 }
 0x27d   :  { %6633 = vmatpush.xpose.msk.msra.mxu1 %vm596_vm11, %v587_v57 }
 0x281   :  { %6634 = vmatpush.xpose.msk.msra.mxu1 %vm596_vm11, %v585_v48 }
 0x283   :  { %7383 = vrot.lane.b32.xlu2 %v7382_v23, %s8110_s29 }
 0x284   :  { %v879_v25 = vpop.permute.xlu0 %878 }
 0x285   :  { %6635 = vmatpush.xpose.msk.msra.mxu1 %vm596_vm11, %v583_v38  ;;  %6653 = vmatpush.xpose.msk.msra.mxu3 %vm596_vm11, %v879_v25 }
 0x289   :  { %6636 = vmatpush.xpose.msk.msra.mxu1 %vm596_vm11, %v581_v54  ;;  %6654 = vmatpush.xpose.msk.msra.mxu3 %vm596_vm11, %v877_v59 }
 0x28b   :  { %862 = vrot.lane.b32.xlu2 %v8532_v37, %s8108_s21 }
 0x28c   :  { %6637 = vmatmul.msk.f32.vlgmr.msra.gmra.mxu1 %vm596_vm11, %v8440_v9 }
 0x28d   :  { %6655 = vmatpush.xpose.msk.msra.mxu3 %vm596_vm11, %v875_v47 }
 0x291   :  { %6656 = vmatpush.xpose.msk.msra.mxu3 %vm596_vm11, %v873_v8 }
 0x292   :  { %v551_v27 = vpop.f32.mrf.mxu0 }
 0x293   :  { %v8665_v17 = vadd.f32 %v8432_v3, %v551_v27  ;;  %7393 = vrot.lane.b32.xlu2 %v7397_v44, %s8109_s26 }
 0x294   :  { %6638 = vmatmul.msk.f32.gmra.mxu1 %vm596_vm11, %v8451_v13  ;;  %v865_v13 = vpop.permute.xlu1 %864 }
 0x295   :  { %1293 = vrot.lane.b32.xlu0 %v8665_v17, %s8106_s19  ;;  %6657 = vmatpush.xpose.msk.msra.mxu3 %vm596_vm11, %v871_v60 }
 0x299   :  { %6658 = vmatpush.xpose.msk.msra.mxu3 %vm596_vm11, %v869_v36 }
 0x29a   :  { %v554_v9 = vpop.f32.mrf.mxu0 }
 0x29b   :  { %v8675_v28 = vadd.f32 %v8432_v3, %v554_v9 }
 0x29c   :  { %6639 = vmatmul.msk.f32.gmra.mxu1 %vm596_vm11, %v8457_v14  ;;  %v241_v14 = vadd.f32 1e-05, %v225_v19  ;;  %v210_v32 = vpop.xlane.xlu1 %209 }
 0x29d   :  { %1577 = vrot.lane.b32.xlu2 %v8675_v28, %s8107_s20  ;;  %1295 = vrot.lane.b32.xlu1 %v8675_v28, %s8106_s19  ;;  %v226_v55 = vmul.f32 %v210_v32, %v8178_v20  ;;  %v8730_v32 = vpop.permute.xlu0 %7343 }
 0x29e   :  { %6659 = vmatpush.xpose.msk.msra.mxu3 %vm596_vm11, %v867_v4  ;;  %7628 = vrsqrt.f32 %v241_v14  ;;  %vm389_vm12 = vweird.f32 %v241_v14  ;;  %12435 = vst [vmem:[#allocation6_spill] sm:$0xff] %v8730_v32 }
 0x29f   :  { %v242_v35 = vadd.f32 1e-05, %v226_v55 }
 0x2a1   :  { %7630 = vrsqrt.f32 %v242_v35  ;;  %vm399_vm3 = vweird.f32 %v242_v35 }
 0x2a2   :  { %6660 = vmatpush.xpose.msk.msra.mxu3 %vm596_vm11, %v865_v13  ;;  %v557_v30 = vpop.f32.mrf.mxu0 }
 0x2a3   :  { %v8687_v39 = vadd.f32 %v8432_v3, %v557_v30 }
 0x2a4   :  { %6640 = vmatmul.msk.f32.gmra.mxu1 %vm596_vm11, %v8464_v22  ;;  %v7629_v38 = vpop.eup %7628 }
 0x2a5   :  { %6661 = vmatmul.msk.f32.vlgmr.msra.gmra.mxu3 %vm596_vm11, %v849_v7  ;;  %1297 = vrot.lane.b32.xlu1 %v8687_v39, %s8106_s19  ;;  %v384_v48 = vmul.f32 %v7629_v38, %v241_v14  ;;  %vm390_vm13 = vweird.f32 %v7629_v38 }
 0x2a6   :  { %vm8713_vm15 = vmor %vm389_vm12, %vm390_vm13 }
 0x2a7   :  { %v7631_v57 = vpop.eup %7630 }
 0x2a8   :  { %v394_v60 = vmul.f32 %v7631_v57, %v242_v35  ;;  %vm400_vm4 = vweird.f32 %v7631_v57 }
 0x2a9   :  { %vm401_vm5 = vmor %vm399_vm3, %vm400_vm4 }
 0x2aa   :  { %v560_v34 = vpop.f32.mrf.mxu0  ;;  %v395_v8 = vmul.f32 %v7631_v57, %v394_v60 }
 0x2ab   :  { %v8696_v5 = vadd.f32 %v8432_v3, %v560_v34 }
 0x2ac   :  { %6641 = vmatmul.msk.f32.gmra.mxu1 %vm596_vm11, %v8471_v29  ;;  %v385_v29 = vmul.f32 %v7629_v38, %v384_v48  ;;  %v396_v52 = vmul.f32 0.5, %v395_v8 }
 0x2ad   :  { %1299 = vrot.lane.b32.xlu2 %v8696_v5, %s8106_s19  ;;  %1579 = vrot.lane.b32.xlu1 %v8687_v39, %s8107_s20 }
 0x2ae   :  { %v204_v22 = vpop.xlane.xlu2 %203  ;;  %v386_v31 = vmul.f32 0.5, %v385_v29  ;;  %v397_v25 = vsub.f32 1.5, %v396_v52 }
 0x2af   :  { %v224_v44 = vmul.f32 %v204_v22, %v8178_v20  ;;  %v8740_v22 = vpop.permute.xlu0 %7348 }
 0x2b0   :  { %v387_v47 = vsub.f32 1.5, %v386_v31  ;;  %12437 = vst [vmem:[#allocation8_spill] sm:$0xff] %v8740_v22 }
 0x2b1   :  { %v240_v42 = vadd.f32 1e-05, %v224_v44 }
 0x2b2   :  { %v388_v6 = vmul.f32 %v7629_v38, %v387_v47 }
 0x2b3   :  { %7632 = vrsqrt.f32 %v240_v42  ;;  %vm379_vm1 = vweird.f32 %v240_v42 }
 0x2b4   :  { %6642 = vmatmul.msk.f32.gmra.mxu1 %vm596_vm11, %v8478_v33  ;;  %v392_v27 = vsel %vm8713_vm15, %v7629_v38, %v388_v6  ;;  %v861_v38 = vpop.permute.xlu1 %860 }
 0x2b5   :  { %1581 = vrot.lane.b32.xlu2 %v8696_v5, %s8107_s20  ;;  %v417_v19 = vmul.f32 %v392_v27, %v8505_v45 }
 0x2b6   :  { %v851_v54 = vpop.permute.xlu2 %850 }
 0x2b7   :  { %6662 = vmatmul.msk.f32.gmra.mxu3 %vm596_vm11, %v851_v54 }
 0x2b9   :  { %v7633_v36 = vpop.eup %7632 }
 0x2ba   :  { %v374_v2 = vmul.f32 %v7633_v36, %v240_v42  ;;  %vm380_vm14 = vweird.f32 %v7633_v36  ;;  %v7364_v42 = vpop.permute.xlu0 %7363 }
 0x2bb   :  { %vm381_vm2 = vmor %vm379_vm1, %vm380_vm14  ;;  %v7365_v47 = vunpack.i.l.bf16 %v7364_v42 }
 0x2bc   :  { %v375_v4 = vmul.f32 %v7633_v36, %v374_v2  ;;  %6643 = vmatmul.msk.f32.gmra.mxu1 %vm596_vm11, %v8489_v15 }
 0x2be   :  { %v376_v11 = vmul.f32 0.5, %v375_v4  ;;  %v853_v33 = vpop.permute.xlu2 %852 }
 0x2bf   :  { %6663 = vmatmul.msk.f32.gmra.mxu3 %vm596_vm11, %v853_v33 }
 0x2c0   :  { %v377_v7 = vsub.f32 1.5, %v376_v11  ;;  %v7366_v11 = vunpack.i.h.bf16 %v7364_v42 }
 0x2c2   :  { %v378_v16 = vmul.f32 %v7633_v36, %v377_v7  ;;  %v8744_v29 = vpop.permute.xlu0 %7368 }
 0x2c3   :  { %12438 = vst [vmem:[#allocation9_spill] sm:$0xff] %v8744_v29  ;;  %v7370_v33 = vunpack.i.l.bf16 %v8744_v29 }
 0x2c4   :  { %6644 = vmatmul.msk.f32.gmra.mxu1 %vm596_vm11, %v8532_v37  ;;  %v382_v15 = vsel %vm381_vm2, %v7633_v36, %v378_v16  ;;  %v398_v37 = vmul.f32 %v7631_v57, %v397_v25 }
 0x2c5   :  { %v416_v23 = vmul.f32 %v382_v15, %v8604_v61  ;;  %v434_v61 = vmul.f32 %v8307_v49, %v417_v19 }
 0x2c6   :  { %v857_v59 = vpop.permute.xlu2 %856  ;;  %v402_v14 = vsel %vm401_vm5, %v7631_v57, %v398_v37 }
 0x2c7   :  { %6664 = vmatmul.msk.f32.gmra.mxu3 %vm596_vm11, %v8647_v21  ;;  %v433_v9 = vmul.f32 %v8307_v49, %v416_v23  ;;  %v451_v21 = vadd.f32 %v8316_v56, %v434_v61  ;;  %v418_v55 = vmul.f32 %v402_v14, %v8512_v51 }
 0x2c9   :  { %v450_v13 = vadd.f32 %v8316_v56, %v433_v9  ;;  %v435_v45 = vmul.f32 %v8307_v49, %v418_v55  ;;  %v7354_v49 = vpop.permute.xlu1 %7353 }
 0x2ca   :  { %v7389_v36 = vpop.permute.xlu0 %7388  ;;  %v7355_v31 = vunpack.i.l.bf16 %v7354_v49  ;;  %v7356_v2 = vunpack.i.h.bf16 %v7354_v49  ;;  %v12392_v49 = vunpack.i.h.bf16 %v8730_v32 }
 0x2cb   :  { %6626 = vmatmul.msk.f32.gmra.mxu0 %vm59_vm0, %v450_v13  ;;  %v452_v35 = vadd.f32 %v8316_v56, %v435_v45  ;;  %v7390_v23 = vunpack.i.l.bf16 %v7389_v36  ;;  %v7391_v25 = vunpack.i.h.bf16 %v7389_v36 }
 0x2ce   :  { %v859_v30 = vpop.permute.xlu2 %858 }
 0x2cf   :  { %6665 = vmatmul.msk.f32.gmra.mxu3 %vm596_vm11, %v857_v59 }
 0x2d1   :  { %v8747_v60 = vpop.permute.xlu1 %7358 }
 0x2d2   :  { %12439 = vst [vmem:[#allocation10_spill] sm:$0xff] %v8747_v60  ;;  %v7361_v4 = vunpack.i.h.bf16 %v8747_v60  ;;  %v7399_v8 = vpop.permute.xlu0 %7398 }
 0x2d3   :  { %6627 = vmatmul.msk.f32.gmra.mxu0 %vm59_vm0, %v451_v21  ;;  %v7400_v7 = vunpack.i.l.bf16 %v7399_v8  ;;  %v7401_v6 = vunpack.i.h.bf16 %v7399_v8 }
 0x2d6   :  { %v8736_v34 = vpop.permute.xlu2 %7373 }
 0x2d7   :  { %12436 = vst [vmem:[#allocation7_spill] sm:$0xff] %v8736_v34  ;;  %6666 = vmatmul.msk.f32.gmra.mxu3 %vm596_vm11, %v859_v30 }
 0x2db   :  { %6628 = vmatmul.msk.f32.gmra.mxu0 %vm59_vm0, %v452_v35 }
 0x2de   :  { %v7379_v44 = vpop.permute.xlu2 %7378 }
 0x2df   :  { %6667 = vmatmul.msk.f32.gmra.mxu3 %vm596_vm11, %v861_v38  ;;  %v7380_v53 = vunpack.i.l.bf16 %v7379_v44  ;;  %v7381_v52 = vunpack.i.h.bf16 %v7379_v44  ;;  %v12393_v38 = vunpack.i.l.bf16 %v8730_v32 }
 0x2e6   :  { %v7384_v51 = vpop.permute.xlu2 %7383 }
 0x2e7   :  { %v7385_v16 = vunpack.i.l.bf16 %v7384_v51  ;;  %v7386_v15 = vunpack.i.h.bf16 %v7384_v51 }
 0x2ee   :  { %v863_v48 = vpop.permute.xlu2 %862 }
 0x2ef   :  { %6668 = vmatmul.msk.f32.gmra.mxu3 %vm596_vm11, %v863_v48 }
 0x2f6   :  { %v7394_v54 = vpop.permute.xlu2 %7393 }
 0x2f7   :  { %v7395_v57 = vunpack.i.l.bf16 %v7394_v54  ;;  %v7396_v56 = vunpack.i.h.bf16 %v7394_v54 }
 0x2f9   :  { %815 = vmatpush.msra.mxu2 %v7395_v57 }
 0x2fb   :  { %816 = vmatpush.msra.mxu2 %v7396_v56 }
 0x2fd   :  { %817 = vmatpush.msra.mxu2 %v7355_v31 }
 0x2ff   :  { %818 = vmatpush.msra.mxu2 %v7356_v2 }
 0x301   :  { %819 = vmatpush.msra.mxu2 %v7361_v4 }
 0x303   :  { %820 = vmatpush.msra.mxu2 %v7365_v47 }
 0x305   :  { %821 = vmatpush.msra.mxu2 %v7366_v11 }
 0x307   :  { %822 = vmatpush.msra.mxu2 %v7370_v33 }
 0x309   :  { %1129 = vmatpush.msrb.mxu2 %v7400_v7  ;;  %v646_v30 = vpop.f32.mrf.mxu1  ;;  %v12390_v7 = vunpack.i.l.bf16 %v8740_v22 }
 0x30a   :  { %v8785_v21 = vadd.f32 %v8540_v40, %v646_v30 }
 0x30b   :  { %1130 = vmatpush.msrb.mxu2 %v7401_v6 }
 0x30c   :  { %v671_v55 = vsel %vm670_vm6, %v8785_v21, -inf }
 0x30d   :  { %1131 = vmatpush.msrb.mxu2 %v7380_v53 }
 0x30f   :  { %1132 = vmatpush.msrb.mxu2 %v7381_v52 }
 0x311   :  { %1133 = vmatpush.msrb.mxu2 %v7385_v16  ;;  %v649_v45 = vpop.f32.mrf.mxu1  ;;  %v1296_v16 = vpop.permute.xlu1 %1295 }
 0x312   :  { %v8798_v54 = vadd.f32 %v8542_v46, %v649_v45  ;;  %v12387_v45 = vunpack.i.l.bf16 %v8747_v60 }
 0x313   :  { %1134 = vmatpush.msrb.mxu2 %v7386_v15 }
 0x314   :  { %v674_v31 = vsel %vm670_vm6, %v8798_v54, -inf }
 0x315   :  { %1135 = vmatpush.msrb.mxu2 %v7390_v23 }
 0x317   :  { %1136 = vmatpush.msrb.mxu2 %v7391_v25  ;;  %v12388_v25 = vunpack.i.h.bf16 %v8740_v22 }
 0x319   :  { %v652_v42 = vpop.f32.mrf.mxu1 }
 0x31a   :  { %v8814_v47 = vadd.f32 %v8568_v18, %v652_v42  ;;  %v8847_v42 = vpop.permute.xlu2 %1577 }
 0x31c   :  { %v677_v6 = vsel %vm670_vm6, %v8814_v47, -inf }
 0x321   :  { %v655_v36 = vpop.f32.mrf.mxu1 }
 0x322   :  { %v8811_v4 = vadd.f32 %v8571_v26, %v655_v36 }
 0x324   :  { %v680_v8 = vsel %vm670_vm6, %v8811_v4, -inf }
 0x328   :  { %v961_v61 = vpop.f32.mrf.mxu3 }
 0x329   :  { %v8792_v44 = vadd.f32 %v12393_v38, %v961_v61  ;;  %v658_v11 = vpop.f32.mrf.mxu1 }
 0x32a   :  { %v8822_v53 = vadd.f32 %v8581_v43, %v658_v11 }
 0x32b   :  { %v985_v48 = vsel %vm670_vm6, %v8792_v44, -inf }
 0x32c   :  { %v683_v15 = vsel %vm670_vm6, %v8822_v53, -inf }
 0x331   :  { %v661_v61 = vpop.f32.mrf.mxu1 }
 0x332   :  { %v8861_v11 = vadd.f32 %v8600_v41, %v661_v61 }
 0x339   :  { %v664_v36 = vpop.f32.mrf.mxu1 }
 0x348   :  { %v563_v59 = vpop.f32.mrf.mxu0 }
 0x349   :  { %v8752_v27 = vadd.f32 %v8432_v3, %v563_v59  ;;  %v12386_v59 = vunpack.i.h.bf16 %v8736_v34 }
 0x34b   :  { %1301 = vrot.lane.b32.xlu2 %v8752_v27, %s8106_s19  ;;  %1583 = vrot.lane.b32.xlu1 %v8752_v27, %s8107_s20 }
 0x350   :  { %v566_v9 = vpop.f32.mrf.mxu0 }
 0x351   :  { %v8759_v13 = vadd.f32 %v8432_v3, %v566_v9 }
 0x353   :  { %1585 = vrot.lane.b32.xlu2 %v8759_v13, %s8107_s20  ;;  %1303 = vrot.lane.b32.xlu1 %v8759_v13, %s8106_s19 }
 0x358   :  { %v569_v19 = vpop.f32.mrf.mxu0 }
 0x359   :  { %v8766_v37 = vadd.f32 %v8432_v3, %v569_v19  ;;  %v964_v3 = vpop.f32.mrf.mxu3 }
 0x35a   :  { %v8802_v57 = vadd.f32 %v12392_v49, %v964_v3 }
 0x35b   :  { %1305 = vrot.lane.b32.xlu0 %v8766_v37, %s8106_s19  ;;  %1557 = vrot.lane.b32.xlu2 %v8619_v50, %s8108_s21 }
 0x35c   :  { %1587 = vrot.lane.b32.xlu1 %v8766_v37, %s8107_s20  ;;  %v988_v2 = vsel %vm670_vm6, %v8802_v57, -inf }
 0x361   :  { %v967_v14 = vpop.f32.mrf.mxu3 }
 0x362   :  { %v8826_v52 = vadd.f32 %v12390_v7, %v967_v14  ;;  %v1298_v14 = vpop.permute.xlu1 %1297 }
 0x363   :  { %1561 = vrot.lane.b32.xlu2 %v8675_v28, %s8108_s21 }
 0x364   :  { %1573 = vrot.lane.b32.xlu1 %v8619_v50, %s8107_s20  ;;  %v991_v9 = vsel %vm670_vm6, %v8826_v52, -inf }
 0x369   :  { %v970_v35 = vpop.f32.mrf.mxu3 }
 0x36a   :  { %v8840_v3 = vadd.f32 %v12388_v25, %v970_v35  ;;  %v1292_v35 = vpop.permute.xlu0 %1291 }
 0x36b   :  { %1565 = vrot.lane.b32.xlu2 %v8696_v5, %s8108_s21 }
 0x36c   :  { %1559 = vrot.lane.b32.xlu1 %v8665_v17, %s8108_s21 }
 0x371   :  { %v973_v51 = vpop.f32.mrf.mxu3 }
 0x374   :  { %1563 = vrot.lane.b32.xlu1 %v8687_v39, %s8108_s21 }
 0x379   :  { %v976_v56 = vpop.f32.mrf.mxu3 }
 0x381   :  { %v979_v33 = vpop.f32.mrf.mxu3 }
 0x385   :  { %672 = vmax.xlane.f32.xlu0 %v671_v55  ;;  %v994_v55 = vsel %vm670_vm6, %v8840_v3, -inf }
 0x389   :  { %v982_v23 = vpop.f32.mrf.mxu3 }
 0x38a   :  { %v8836_v19 = vadd.f32 %v12386_v59, %v982_v23  ;;  %v1294_v23 = vpop.permute.xlu0 %1293 }
 0x38c   :  { %v1006_v30 = vsel %vm670_vm6, %v8836_v19, -inf }
 0x394   :  { %986 = vmax.xlane.f32.xlu2 %v985_v48  ;;  %v8851_v48 = vadd.f32 %v12387_v45, %v973_v51  ;;  %v667_v45 = vpop.f32.mrf.mxu1 }
 0x399   :  { %1575 = vrot.lane.b32.xlu0 %v8665_v17, %s8107_s20 }
 0x39c   :  { %675 = vmax.xlane.f32.xlu2 %v674_v31  ;;  %v997_v31 = vsel %vm670_vm6, %v8851_v48, -inf }
 0x39e   :  { %989 = vmax.xlane.f32.xlu1 %v988_v2  ;;  %v8856_v2 = vadd.f32 %v8634_v58, %v664_v36 }
 0x3a0   :  { %v689_v51 = vsel %vm670_vm6, %v8856_v2, -inf }
 0x3a4   :  { %681 = vmax.xlane.f32.xlu2 %v680_v8  ;;  %v8858_v8 = vpop.permute.xlu1 %1579 }
 0x3a6   :  { %678 = vmax.xlane.f32.xlu1 %v677_v6  ;;  %v12389_v6 = vunpack.i.l.bf16 %v8736_v34 }
 0x3ac   :  { %684 = vmax.xlane.f32.xlu2 %v683_v15  ;;  %v1300_v15 = vpop.permute.xlu2 %1299 }
 0x3ae   :  { %992 = vmax.xlane.f32.xlu1 %v991_v9  ;;  %v686_v9 = vsel %vm670_vm6, %v8861_v11, -inf }
 0x3b4   :  { %1007 = vmax.xlane.f32.xlu2 %v1006_v30  ;;  %v8870_v30 = vadd.f32 %v12389_v6, %v979_v33 }
 0x3b6   :  { %995 = vmax.xlane.f32.xlu1 %v994_v55  ;;  %v12391_v55 = vunpack.i.h.bf16 %v8744_v29 }
 0x3b8   :  { %v8877_v36 = vadd.f32 %v12391_v55, %v976_v56 }
 0x3ba   :  { %v1000_v33 = vsel %vm670_vm6, %v8877_v36, -inf }
 0x3bd   :  { %v8873_v61 = vpop.permute.xlu1 %1583 }
 0x3be   :  { %998 = vmax.xlane.f32.xlu1 %v997_v31  ;;  %v1003_v31 = vsel %vm670_vm6, %v8870_v30, -inf }
 0x3c3   :  { %690 = vmax.xlane.f32.xlu0 %v689_v51  ;;  %v8881_v51 = vpop.permute.xlu2 %1581 }
 0x3c5   :  { %v1304_v25 = vpop.permute.xlu1 %1303 }
 0x3c6   :  { %687 = vmax.xlane.f32.xlu1 %v686_v9  ;;  %v8887_v9 = vadd.f32 %v8636_v12, %v667_v45 }
 0x3cb   :  { %1004 = vmax.xlane.f32.xlu0 %v1003_v31  ;;  %v1302_v56 = vpop.permute.xlu2 %1301  ;;  %v692_v31 = vsel %vm670_vm6, %v8887_v9, -inf }
 0x3cd   :  { %v1306_v59 = vpop.permute.xlu0 %1305 }
 0x3ce   :  { %1001 = vmax.xlane.f32.xlu1 %v1000_v33  ;;  %6685 = vmatpush.xpose.msk.msrb.mxu3 %vm596_vm11, %v1306_v59  ;;  %v8902_v59 = vpop.permute.xlu1 %1587 }
 0x3d2   :  { %6686 = vmatpush.xpose.msk.msrb.mxu3 %vm596_vm11, %v1304_v25 }
 0x3d3   :  { %v8895_v33 = vpop.permute.xlu2 %1585 }
 0x3d6   :  { %693 = vmax.xlane.f32.xlu1 %v692_v31  ;;  %6687 = vmatpush.xpose.msk.msrb.mxu3 %vm596_vm11, %v1302_v56 }
 0x3da   :  { %6688 = vmatpush.xpose.msk.msrb.mxu3 %vm596_vm11, %v1300_v15  ;;  %v8908_v15 = vpop.permute.xlu1 %1573 }
 0x3db   :  { %v8900_v25 = vpop.permute.xlu2 %1557 }
 0x3de   :  { %6689 = vmatpush.xpose.msk.msrb.mxu3 %vm596_vm11, %v1298_v14 }
 0x3e2   :  { %6690 = vmatpush.xpose.msk.msrb.mxu3 %vm596_vm11, %v1296_v16  ;;  %v8917_v56 = vpop.permute.xlu1 %1559 }
 0x3e3   :  { %v8906_v45 = vpop.permute.xlu2 %1561 }
 0x3e6   :  { %6691 = vmatpush.xpose.msk.msrb.mxu3 %vm596_vm11, %v1294_v23 }
 0x3ea   :  { %6692 = vmatpush.xpose.msk.msrb.mxu3 %vm596_vm11, %v1292_v35 }
 0x3eb   :  { %v8915_v35 = vpop.permute.xlu2 %1565 }
 0x3ec   :  { %12440 = vst [vmem:[#allocation11_spill] sm:$0xff] %v8915_v35 }
 0x3ed   :  { %6693 = vmatmul.msk.f32.vlgmr.msrb.gmra.mxu3 %vm596_vm11, %v8619_v50 }
 0x3f5   :  { %6694 = vmatmul.msk.f32.gmra.mxu3 %vm596_vm11, %v8665_v17 }
 0x3f8   :  { %v673_v14 = vpop.xlane.xlu0 %672 }
 0x3f9   :  { %v695_v16 = vsub.f32 %v8785_v21, %v673_v14  ;;  %v8926_v14 = vpop.permute.xlu1 %1563 }
 0x3fa   :  { %12441 = vst [vmem:[#allocation12_spill] sm:$0xff] %v8926_v14 }
 0x3fb   :  { %v703_v23 = vmul.f32 1.442695, %v695_v16 }
 0x3fd   :  { %7634 = vpow2.f32 %v703_v23  ;;  %6695 = vmatmul.msk.f32.gmra.mxu3 %vm596_vm11, %v8675_v28 }
 0x403   :  { %v8919_v31 = vpop.eup %7634 }
 0x404   :  { %v719_v6 = vsel %vm670_vm6, %v8919_v31, 0.0 }
 0x405   :  { %6696 = vmatmul.msk.f32.gmra.mxu3 %vm596_vm11, %v8687_v39  ;;  %720 = vadd.xlane.f32.xlu2 %v719_v6 }
 0x407   :  { %v987_v7 = vpop.xlane.xlu2 %986 }
 0x408   :  { %v1009_v21 = vsub.f32 %v8792_v44, %v987_v7 }
 0x40a   :  { %v1017_v16 = vmul.f32 1.442695, %v1009_v21 }
 0x40c   :  { %7636 = vpow2.f32 %v1017_v16 }
 0x40d   :  { %6697 = vmatmul.msk.f32.gmra.mxu3 %vm596_vm11, %v8696_v5 }
 0x40f   :  { %v676_v23 = vpop.xlane.xlu2 %675 }
 0x410   :  { %v696_v55 = vsub.f32 %v8798_v54, %v676_v23 }
 0x411   :  { %v990_v49 = vpop.xlane.xlu1 %989 }
 0x412   :  { %v8931_v38 = vpop.eup %7636  ;;  %v705_v24 = vmul.f32 1.442695, %v696_v55  ;;  %v1010_v10 = vsub.f32 %v8802_v57, %v990_v49 }
 0x413   :  { %v1033_v6 = vsel %vm670_vm6, %v8931_v38, 0.0 }
 0x414   :  { %7638 = vpow2.f32 %v705_v24  ;;  %v1019_v44 = vmul.f32 1.442695, %v1010_v10  ;;  %1034 = vadd.xlane.f32.xlu1 %v1033_v6 }
 0x415   :  { %6698 = vmatmul.msk.f32.gmra.mxu3 %vm596_vm11, %v8752_v27 }
 0x416   :  { %7640 = vpow2.f32 %v1019_v44 }
 0x417   :  { %v682_v7 = vpop.xlane.xlu2 %681 }
 0x419   :  { %v679_v21 = vpop.xlane.xlu1 %678 }
 0x41a   :  { %v8938_v16 = vpop.eup %7638  ;;  %v697_v54 = vsub.f32 %v8814_v47, %v679_v21 }
 0x41b   :  { %v722_v55 = vsel %vm670_vm6, %v8938_v16, 0.0 }
 0x41c   :  { %v8943_v49 = vpop.eup %7640  ;;  %v707_v57 = vmul.f32 1.442695, %v697_v54  ;;  %723 = vadd.xlane.f32.xlu2 %v722_v55 }
 0x41d   :  { %6699 = vmatmul.msk.f32.gmra.mxu3 %vm596_vm11, %v8759_v13  ;;  %v1036_v10 = vsel %vm670_vm6, %v8943_v49, 0.0 }
 0x41e   :  { %7642 = vpow2.f32 %v707_v57  ;;  %1037 = vadd.xlane.f32.xlu1 %v1036_v10 }
 0x41f   :  { %v685_v24 = vpop.xlane.xlu2 %684 }
 0x420   :  { %v699_v23 = vsub.f32 %v8822_v53, %v685_v24  ;;  %v8966_v24 = vpop.permute.xlu0 %1575 }
 0x421   :  { %v993_v55 = vpop.xlane.xlu1 %992 }
 0x422   :  { %v711_v6 = vmul.f32 1.442695, %v699_v23  ;;  %v698_v23 = vsub.f32 %v8811_v4, %v682_v7 }
 0x424   :  { %v8950_v47 = vpop.eup %7642  ;;  %7644 = vpow2.f32 %v711_v6  ;;  %v1011_v6 = vsub.f32 %v8826_v52, %v993_v55 }
 0x425   :  { %6700 = vmatmul.msk.f32.gmra.mxu3 %vm596_vm11, %v8766_v37  ;;  %v725_v44 = vsel %vm670_vm6, %v8950_v47, 0.0 }
 0x426   :  { %726 = vadd.xlane.f32.xlu0 %v725_v44  ;;  %v709_v44 = vmul.f32 1.442695, %v698_v23 }
 0x428   :  { %7646 = vpow2.f32 %v709_v44 }
 0x429   :  { %v996_v53 = vpop.xlane.xlu1 %995 }
 0x42a   :  { %v8956_v21 = vpop.eup %7644  ;;  %v1012_v60 = vsub.f32 %v8840_v3, %v996_v53 }
 0x42b   :  { %v731_v54 = vsel %vm670_vm6, %v8956_v21, 0.0 }
 0x42c   :  { %732 = vadd.xlane.f32.xlu2 %v731_v54  ;;  %v1021_v54 = vmul.f32 1.442695, %v1011_v6  ;;  %v1023_v29 = vmul.f32 1.442695, %v1012_v60 }
 0x42e   :  { %7648 = vpow2.f32 %v1021_v54  ;;  %v8973_v35 = vpop.eup %7646 }
 0x42f   :  { %7650 = vpow2.f32 %v1023_v29  ;;  %v728_v3 = vsel %vm670_vm6, %v8973_v35, 0.0 }
 0x431   :  { %v999_v57 = vpop.xlane.xlu1 %998 }
 0x432   :  { %v1013_v4 = vsub.f32 %v8851_v48, %v999_v57 }
 0x434   :  { %v8976_v7 = vpop.eup %7648  ;;  %v1025_v53 = vmul.f32 1.442695, %v1013_v4 }
 0x436   :  { %v691_v34 = vpop.xlane.xlu0 %690 }
 0x437   :  { %1569 = vrot.lane.b32.xlu1 %v8759_v13, %s8108_s21  ;;  %v701_v22 = vsub.f32 %v8856_v2, %v691_v34 }
 0x439   :  { %v688_v10 = vpop.xlane.xlu1 %687  ;;  %v715_v14 = vmul.f32 1.442695, %v701_v22  ;;  %v8983_v22 = vpop.eup %7650 }
 0x43a   :  { %1567 = vrot.lane.b32.xlu0 %v8752_v27, %s8108_s21  ;;  %v1042_v48 = vsel %vm670_vm6, %v8983_v22, 0.0 }
 0x43b   :  { %7652 = vpow2.f32 %v715_v14 }
 0x441   :  { %v1002_v20 = vpop.xlane.xlu1 %1001  ;;  %v8986_v60 = vpop.eup %7652 }
 0x442   :  { %v1014_v32 = vsub.f32 %v8877_v36, %v1002_v20  ;;  %v1039_v20 = vsel %vm670_vm6, %v8976_v7, 0.0 }
 0x444   :  { %1571 = vrot.lane.b32.xlu2 %v8766_v37, %s8108_s21  ;;  %v1027_v52 = vmul.f32 1.442695, %v1014_v32  ;;  %v700_v32 = vsub.f32 %v8861_v11, %v688_v10  ;;  %v1008_v11 = vpop.xlane.xlu2 %1007 }
 0x446   :  { %7654 = vpow2.f32 %v1027_v52  ;;  %v713_v36 = vmul.f32 1.442695, %v700_v32 }
 0x447   :  { %7656 = vpow2.f32 %v1025_v53 }
 0x449   :  { %v694_v55 = vpop.xlane.xlu1 %693 }
 0x44a   :  { %v702_v34 = vsub.f32 %v8887_v9, %v694_v55  ;;  %v737_v9 = vsel %vm670_vm6, %v8986_v60, 0.0 }
 0x44c   :  { %v717_v29 = vmul.f32 1.442695, %v702_v34  ;;  %v8990_v2 = vpop.eup %7654 }
 0x44d   :  { %v1048_v14 = vsel %vm670_vm6, %v8990_v2, 0.0  ;;  %v8996_v57 = vpop.eup %7656 }
 0x44e   :  { %7658 = vpow2.f32 %v717_v29  ;;  %v1045_v23 = vsel %vm670_vm6, %v8996_v57, 0.0 }
 0x44f   :  { %7660 = vpow2.f32 %v713_v36 }
 0x454   :  { %v9002_v6 = vpop.eup %7658 }
 0x455   :  { %v740_v44 = vsel %vm670_vm6, %v9002_v6, 0.0  ;;  %v9006_v54 = vpop.eup %7660 }
 0x456   :  { %v734_v52 = vsel %vm670_vm6, %v9006_v54, 0.0 }
 0x461   :  { %729 = vadd.xlane.f32.xlu1 %v728_v3 }
 0x464   :  { %1040 = vadd.xlane.f32.xlu0 %v1039_v20  ;;  %v12442_v20 = vpack.i.bf16 %v8249_v63, %v8243_v62 }
 0x469   :  { %1043 = vadd.xlane.f32.xlu1 %v1042_v48 }
 0x46c   :  { %738 = vadd.xlane.f32.xlu0 %v737_v9 }
 0x46d   :  { %1049 = vadd.xlane.f32.xlu2 %v1048_v14 }
 0x470   :  { %v8998_v10 = vpop.f32.mrf.mxu3 }
 0x471   :  { %1046 = vadd.xlane.f32.xlu1 %v1045_v23 }
 0x475   :  { %741 = vadd.xlane.f32.xlu2 %v740_v44 }
 0x478   :  { %v1359_v4 = vpop.f32.mrf.mxu3  ;;  %v721_v55 = vpop.xlane.xlu2 %720 }
 0x479   :  { %v9011_v3 = vadd.f32 %v8542_v46, %v1359_v4  ;;  %735 = vadd.xlane.f32.xlu1 %v734_v52  ;;  %7662 = vrcp.f32 %v721_v55 }
 0x47b   :  { %v1383_v53 = vsel %vm670_vm6, %v9011_v3, -inf }
 0x47d   :  { %1384 = vmax.xlane.f32.xlu2 %v1383_v53  ;;  %v9095_v53 = vpack.i.bf16 %v8696_v5, %v8752_v27 }
 0x47f   :  { %v7663_v34 = vpop.eup %7662 }
 0x480   :  { %7403 = vrot.lane.b32.xlu0 %v12442_v20, %s8111_s8  ;;  %v1362_v32 = vpop.f32.mrf.mxu3  ;;  %v751_v29 = vmul.f32 %v7663_v34, %v8919_v31  ;;  %v1005_v31 = vpop.xlane.xlu0 %1004 }
 0x482   :  { %6645 = vmatmul.msk.f32.vlgmr.msra.gmra.mxu2 %vm670_vm6, %v751_v29 }
 0x483   :  { %6709 = vmatpush.xpose.msk.msra.mxu2 %vm596_vm11, %v8902_v59 }
 0x487   :  { %6710 = vmatpush.xpose.msk.msra.mxu2 %vm596_vm11, %v8895_v33  ;;  %v12443_v33 = vpack.i.bf16 %v8261_v1, %v8255_v0  ;;  %v1035_v4 = vpop.xlane.xlu1 %1034 }
 0x488   :  { %v1365_v46 = vpop.f32.mrf.mxu3 }
 0x489   :  { %v9026_v48 = vadd.f32 %v8571_v26, %v1365_v46 }
 0x48b   :  { %6711 = vmatpush.xpose.msk.msra.mxu2 %vm596_vm11, %v8873_v61  ;;  %v1389_v62 = vsel %vm670_vm6, %v9026_v48, -inf }
 0x48c   :  { %1390 = vmax.xlane.f32.xlu2 %v1389_v62 }
 0x48f   :  { %6712 = vmatpush.xpose.msk.msra.mxu2 %vm596_vm11, %v8881_v51  ;;  %v724_v63 = vpop.xlane.xlu2 %723  ;;  %v1015_v51 = vsub.f32 %v8870_v30, %v1005_v31 }
 0x490   :  { %7664 = vrcp.f32 %v724_v63  ;;  %v1368_v59 = vpop.f32.mrf.mxu3 }
 0x491   :  { %v1029_v1 = vmul.f32 1.442695, %v1015_v51 }
 0x492   :  { %7408 = vrot.lane.b32.xlu1 %v12443_v33, %s8111_s8 }
 0x493   :  { %6713 = vmatpush.xpose.msk.msra.mxu2 %vm596_vm11, %v8858_v8  ;;  %v1016_v8 = vsub.f32 %v8836_v19, %v1008_v11  ;;  %v9067_v19 = vpack.i.bf16 %v8675_v28, %v8687_v39  ;;  %v9076_v11 = vadd.f32 %v8568_v18, %v1362_v32  ;;  %v9083_v28 = vadd.f32 %v8581_v43, %v1368_v59 }
 0x494   :  { %v9091_v18 = vpack.i.bf16 %v8759_v13, %v8766_v37 }
 0x495   :  { %v1031_v30 = vmul.f32 1.442695, %v1016_v8  ;;  %v1386_v52 = vsel %vm670_vm6, %v9076_v11, -inf  ;;  %v1392_v39 = vsel %vm670_vm6, %v9083_v28, -inf }
 0x496   :  { %v7665_v26 = vpop.eup %7664 }
 0x497   :  { %6714 = vmatpush.xpose.msk.msra.mxu2 %vm596_vm11, %v8847_v42  ;;  %v752_v61 = vmul.f32 %v7665_v26, %v8938_v16 }
 0x498   :  { %v1371_v36 = vpop.f32.mrf.mxu3 }
 0x499   :  { %v9045_v9 = vadd.f32 %v8600_v41, %v1371_v36  ;;  %v727_v14 = vpop.xlane.xlu0 %726  ;;  %6646 = vmatmul.msk.f32.gmra.mxu2 %vm670_vm6, %v752_v61 }
 0x49a   :  { %7666 = vrcp.f32 %v727_v14 }
 0x49b   :  { %6715 = vmatpush.xpose.msk.msra.mxu2 %vm596_vm11, %v8966_v24  ;;  %v1395_v0 = vsel %vm670_vm6, %v9045_v9, -inf  ;;  %7668 = vpow2.f32 %v1029_v1 }
 0x49c   :  { %1396 = vmax.xlane.f32.xlu2 %v1395_v0  ;;  %7670 = vpow2.f32 %v1031_v30 }
 0x49f   :  { %6716 = vmatpush.xpose.msk.msra.mxu2 %vm596_vm11, %v8908_v15  ;;  %v733_v43 = vpop.xlane.xlu2 %732 }
 0x4a0   :  { %v7667_v42 = vpop.eup %7666  ;;  %v1374_v59 = vpop.f32.mrf.mxu3 }
 0x4a1   :  { %v753_v41 = vmul.f32 %v7667_v42, %v8950_v47  ;;  %v9057_v16 = vpop.eup %7668  ;;  %v9073_v47 = vadd.f32 %v8540_v40, %v8998_v10  ;;  %v1038_v40 = vpop.xlane.xlu1 %1037  ;;  %v9112_v0 = vadd.f32 %v8634_v58, %v1374_v59 }
 0x4a2   :  { %v1051_v24 = vsel %vm670_vm6, %v9057_v16, 0.0  ;;  %v9061_v23 = vpop.eup %7670 }
 0x4a3   :  { %6647 = vmatmul.msk.f32.gmra.mxu2 %vm670_vm6, %v753_v41  ;;  %v1054_v15 = vsel %vm670_vm6, %v9061_v23, 0.0  ;;  %v1380_v44 = vsel %vm670_vm6, %v9073_v47, -inf }
 0x4a7   :  { %v9106_v46 = vpop.permute.xlu2 %1571 }
 0x4a9   :  { %v9087_v10 = vpop.permute.xlu1 %1569 }
 0x4aa   :  { %1052 = vadd.xlane.f32.xlu0 %v1051_v24 }
 0x4ac   :  { %v9101_v34 = vpop.permute.xlu0 %1567 }
 0x4b2   :  { %1055 = vadd.xlane.f32.xlu0 %v1054_v15 }
 0x4b4   :  { %7423 = vrot.lane.b32.xlu2 %v9067_v19, %s8109_s26 }
 0x4ba   :  { %1381 = vmax.xlane.f32.xlu0 %v1380_v44 }
 0x4bc   :  { %1387 = vmax.xlane.f32.xlu1 %v1386_v52 }
 0x4c2   :  { %1393 = vmax.xlane.f32.xlu0 %v1392_v39 }
 0x4d4   :  { %v730_v55 = vpop.xlane.xlu1 %729 }
 0x4d5   :  { %7672 = vrcp.f32 %v730_v55  ;;  %7413 = vrot.lane.b32.xlu1 %v9091_v18, %s8109_s26 }
 0x4d6   :  { %7418 = vrot.lane.b32.xlu0 %v9095_v53, %s8109_s26  ;;  %7674 = vrcp.f32 %v733_v43 }
 0x4d7   :  { %v1041_v37 = vpop.xlane.xlu0 %1040 }
 0x4db   :  { %v7673_v20 = vpop.eup %7672 }
 0x4dc   :  { %v1044_v32 = vpop.xlane.xlu1 %1043  ;;  %v754_v13 = vmul.f32 %v7673_v20, %v8973_v35  ;;  %v7675_v5 = vpop.eup %7674 }
 0x4dd   :  { %v755_v29 = vmul.f32 %v7675_v5, %v8956_v21  ;;  %v1377_v21 = vpop.f32.mrf.mxu3 }
 0x4de   :  { %6648 = vmatmul.msk.f32.gmra.mxu2 %vm670_vm6, %v754_v13  ;;  %v9115_v1 = vadd.f32 %v8636_v12, %v1377_v21 }
 0x4df   :  { %v739_v62 = vpop.xlane.xlu0 %738 }
 0x4e0   :  { %v1050_v31 = vpop.xlane.xlu2 %1049  ;;  %v1401_v8 = vsel %vm670_vm6, %v9115_v1, -inf }
 0x4e4   :  { %v1047_v27 = vpop.xlane.xlu1 %1046 }
 0x4e6   :  { %6649 = vmatmul.msk.f32.gmra.mxu2 %vm670_vm6, %v755_v29 }
 0x4e8   :  { %v742_v36 = vpop.xlane.xlu2 %741 }
 0x4ec   :  { %v736_v63 = vpop.xlane.xlu1 %735 }
 0x4ed   :  { %7676 = vrcp.f32 %v736_v63 }
 0x4ee   :  { %7678 = vrcp.f32 %v739_v62 }
 0x4ef   :  { %7680 = vrcp.f32 %v742_v36 }
 0x4f0   :  { %7682 = vrcp.f32 %v1035_v4  ;;  %v1385_v43 = vpop.xlane.xlu2 %1384 }
 0x4f1   :  { %7684 = vrcp.f32 %v1038_v40 }
 0x4f2   :  { %v7404_v33 = vpop.permute.xlu0 %7403  ;;  %7686 = vrcp.f32 %v1041_v37  ;;  %v1405_v37 = vsub.f32 %v9011_v3, %v1385_v43 }
 0x4f3   :  { %v7677_v26 = vpop.eup %7676  ;;  %v7405_v35 = vunpack.i.l.bf16 %v7404_v33  ;;  %v7406_v61 = vunpack.i.h.bf16 %v7404_v33  ;;  %7688 = vrcp.f32 %v1044_v32 }
 0x4f4   :  { %v756_v51 = vmul.f32 %v7677_v26, %v9006_v54  ;;  %v7679_v14 = vpop.eup %7678  ;;  %v1398_v54 = vsel %vm670_vm6, %v9112_v0, -inf  ;;  %7690 = vrcp.f32 %v1047_v27  ;;  %v1414_v63 = vmul.f32 1.442695, %v1405_v37 }
 0x4f5   :  { %1254 = vmatpush.msrb.mxu1 %v7405_v35  ;;  %1915 = vmatpush.msra.mxu3 %v7405_v35  ;;  %v757_v42 = vmul.f32 %v7679_v14, %v8986_v60  ;;  %v7681_v41 = vpop.eup %7680  ;;  %7692 = vrcp.f32 %v1050_v31 }
 0x4f6   :  { %6650 = vmatmul.msk.f32.gmra.mxu2 %vm670_vm6, %v756_v51  ;;  %v758_v58 = vmul.f32 %v7681_v41, %v9002_v6  ;;  %v7683_v60 = vpop.eup %7682  ;;  %v9131_v6 = vpack.i.bf16 %v8619_v50, %v8665_v17 }
 0x4f7   :  { %1255 = vmatpush.msrb.mxu1 %v7406_v61  ;;  %1916 = vmatpush.msra.mxu3 %v7406_v61  ;;  %v1065_v15 = vmul.f32 %v7683_v60, %v8931_v38  ;;  %v7685_v44 = vpop.eup %7684 }
 0x4f8   :  { %v1066_v4 = vmul.f32 %v7685_v44, %v8943_v49  ;;  %v7687_v52 = vpop.eup %7686 }
 0x4f9   :  { %v1067_v39 = vmul.f32 %v7687_v52, %v8976_v7  ;;  %v7689_v40 = vpop.eup %7688 }
 0x4fa   :  { %v1068_v49 = vmul.f32 %v7689_v40, %v8983_v22  ;;  %v7691_v50 = vpop.eup %7690  ;;  %v12444_v40 = vld [vmem:[#allocation12_spill] sm:$0xff] }
 0x4fb   :  { %v1069_v17 = vmul.f32 %v7691_v50, %v8996_v57  ;;  %v7693_v27 = vpop.eup %7692 }
 0x4fc   :  { %v1070_v57 = vmul.f32 %v7693_v27, %v8990_v2 }
 0x4fe   :  { %6651 = vmatmul.msk.f32.gmra.mxu2 %vm670_vm6, %v757_v42 }
 0x4ff   :  { %1399 = vmax.xlane.f32.xlu1 %v1398_v54  ;;  %v1391_v7 = vpop.xlane.xlu2 %1390 }
 0x500   :  { %1402 = vmax.xlane.f32.xlu0 %v1401_v8  ;;  %v1407_v29 = vsub.f32 %v9026_v48, %v1391_v7 }
 0x504   :  { %v7409_v30 = vpop.permute.xlu1 %7408 }
 0x505   :  { %v7410_v12 = vunpack.i.l.bf16 %v7409_v30  ;;  %v7411_v24 = vunpack.i.h.bf16 %v7409_v30  ;;  %v9173_v60 = vpop.f32.mrf.mxu2 }
 0x506   :  { %6652 = vmatmul.msk.f32.gmra.mxu2 %vm670_vm6, %v758_v58 }
 0x507   :  { %1256 = vmatpush.msrb.mxu1 %v7410_v12  ;;  %1917 = vmatpush.msra.mxu3 %v7410_v12 }
 0x509   :  { %1257 = vmatpush.msrb.mxu1 %v7411_v24  ;;  %1918 = vmatpush.msra.mxu3 %v7411_v24 }
 0x50e   :  { %6669 = vmatmul.msk.f32.vlgmr.msrb.gmra.mxu2 %vm670_vm6, %v1065_v15 }
 0x50f   :  { %v1397_v51 = vpop.xlane.xlu2 %1396 }
 0x510   :  { %v1409_v14 = vsub.f32 %v9045_v9, %v1397_v51 }
 0x512   :  { %v1422_v54 = vmul.f32 1.442695, %v1409_v14 }
 0x516   :  { %6670 = vmatmul.msk.f32.gmra.mxu2 %vm670_vm6, %v1066_v4 }
 0x518   :  { %7428 = vrot.lane.b32.xlu1 %v9131_v6, %s8109_s26 }
 0x51d   :  { %v1053_v38 = vpop.xlane.xlu0 %1052 }
 0x51e   :  { %6671 = vmatmul.msk.f32.gmra.mxu2 %vm670_vm6, %v1067_v39 }
 0x525   :  { %v1056_v55 = vpop.xlane.xlu0 %1055 }
 0x526   :  { %6672 = vmatmul.msk.f32.gmra.mxu2 %vm670_vm6, %v1068_v49 }
 0x52d   :  { %v1382_v20 = vpop.xlane.xlu0 %1381 }
 0x52e   :  { %v1404_v32 = vsub.f32 %v9073_v47, %v1382_v20  ;;  %6673 = vmatmul.msk.f32.gmra.mxu2 %vm670_vm6, %v1069_v17  ;;  %v1418_v47 = vmul.f32 1.442695, %v1407_v29 }
 0x52f   :  { %v1388_v13 = vpop.xlane.xlu1 %1387 }
 0x530   :  { %v1412_v5 = vmul.f32 1.442695, %v1404_v32  ;;  %v1406_v22 = vsub.f32 %v9076_v11, %v1388_v13 }
 0x532   :  { %7694 = vpow2.f32 %v1412_v5  ;;  %v1416_v62 = vmul.f32 1.442695, %v1406_v22 }
 0x533   :  { %7696 = vrcp.f32 %v1053_v38  ;;  %v9181_v38 = vpop.f32.mrf.mxu2 }
 0x534   :  { %7698 = vpow2.f32 %v1416_v62 }
 0x535   :  { %v1394_v59 = vpop.xlane.xlu0 %1393  ;;  %7700 = vpow2.f32 %v1414_v63 }
 0x536   :  { %6674 = vmatmul.msk.f32.gmra.mxu2 %vm670_vm6, %v1070_v57  ;;  %7702 = vpow2.f32 %v1418_v47  ;;  %v1408_v48 = vsub.f32 %v9083_v28, %v1394_v59 }
 0x537   :  { %7704 = vrcp.f32 %v1056_v55  ;;  %v12445_v55 = vld [vmem:[#allocation11_spill] sm:$0xff] }
 0x538   :  { %v9147_v31 = vpop.eup %7694  ;;  %v1420_v61 = vmul.f32 1.442695, %v1408_v48 }
 0x539   :  { %v7697_v3 = vpop.eup %7696  ;;  %v1428_v11 = vsel %vm670_vm6, %v9147_v31, 0.0 }
 0x53a   :  { %v9151_v33 = vpop.eup %7698  ;;  %1429 = vadd.xlane.f32.xlu2 %v1428_v11  ;;  %v1071_v26 = vmul.f32 %v7697_v3, %v9057_v16  ;;  %7706 = vpow2.f32 %v1420_v61 }
 0x53b   :  { %v1434_v2 = vsel %vm670_vm6, %v9151_v33, 0.0  ;;  %v9157_v35 = vpop.eup %7700  ;;  %7708 = vpow2.f32 %v1422_v54 }
 0x53c   :  { %1435 = vadd.xlane.f32.xlu0 %v1434_v2  ;;  %v9160_v21 = vpop.eup %7702  ;;  %v1431_v28 = vsel %vm670_vm6, %v9157_v35, 0.0 }
 0x53d   :  { %v7705_v36 = vpop.eup %7704  ;;  %v1437_v42 = vsel %vm670_vm6, %v9160_v21, 0.0 }
 0x53e   :  { %6675 = vmatmul.msk.f32.gmra.mxu2 %vm670_vm6, %v1071_v26  ;;  %v1072_v16 = vmul.f32 %v7705_v36, %v9061_v23  ;;  %v7424_v23 = vpop.permute.xlu2 %7423 }
 0x53f   :  { %v7425_v4 = vunpack.i.l.bf16 %v7424_v23  ;;  %v7426_v52 = vunpack.i.h.bf16 %v7424_v23 }
 0x540   :  { %v9169_v41 = vpop.eup %7706 }
 0x541   :  { %v1440_v9 = vsel %vm670_vm6, %v9169_v41, 0.0  ;;  %v9177_v44 = vpop.eup %7708 }
 0x542   :  { %1432 = vadd.xlane.f32.xlu2 %v1431_v28  ;;  %v1443_v39 = vsel %vm670_vm6, %v9177_v44, 0.0 }
 0x544   :  { %1438 = vadd.xlane.f32.xlu0 %v1437_v42 }
 0x546   :  { %6676 = vmatmul.msk.f32.gmra.mxu2 %vm670_vm6, %v1072_v16 }
 0x547   :  { %v7414_v8 = vpop.permute.xlu1 %7413 }
 0x548   :  { %v7415_v58 = vunpack.i.l.bf16 %v7414_v8  ;;  %v7419_v30 = vpop.permute.xlu0 %7418  ;;  %v7416_v12 = vunpack.i.h.bf16 %v7414_v8 }
 0x549   :  { %v7420_v24 = vunpack.i.l.bf16 %v7419_v30  ;;  %v7421_v15 = vunpack.i.h.bf16 %v7419_v30 }
 0x54a   :  { %1524 = vmatpush.msrb.mxu0 %v7415_v58 }
 0x54c   :  { %1525 = vmatpush.msrb.mxu0 %v7416_v12  ;;  %1441 = vadd.xlane.f32.xlu0 %v1440_v9 }
 0x54e   :  { %1526 = vmatpush.msrb.mxu0 %v7420_v24  ;;  %6717 = vmatmul.msk.f32.vlgmr.msra.gmra.mxu2 %vm596_vm11, %v8900_v25  ;;  %v9187_v25 = vpop.f32.mrf.mxu2  ;;  %v12446_v24 = vld [vmem:[#allocation6_spill] sm:$0xff] }
 0x54f   :  { %v12447_v23 = vunpack.i.l.bf16 %v12446_v24 }
 0x550   :  { %1527 = vmatpush.msrb.mxu0 %v7421_v15 }
 0x552   :  { %1528 = vmatpush.msrb.mxu0 %v7425_v4 }
 0x554   :  { %1444 = vadd.xlane.f32.xlu0 %v1443_v39  ;;  %1529 = vmatpush.msrb.mxu0 %v7426_v52 }
 0x556   :  { %6718 = vmatmul.msk.f32.gmra.mxu2 %vm596_vm11, %v8917_v56 }
 0x55e   :  { %6719 = vmatmul.msk.f32.gmra.mxu2 %vm596_vm11, %v8906_v45 }
 0x561   :  { %v9191_v49 = vpop.f32.mrf.mxu2 }
 0x566   :  { %6720 = vmatmul.msk.f32.gmra.mxu2 %vm596_vm11, %v12444_v40 }
 0x569   :  { %v9195_v43 = vpop.f32.mrf.mxu2 }
 0x56e   :  { %6721 = vmatmul.msk.f32.gmra.mxu2 %vm596_vm11, %v12445_v55 }
 0x572   :  { %v1400_v50 = vpop.xlane.xlu1 %1399 }
 0x573   :  { %v1410_v17 = vsub.f32 %v9112_v0, %v1400_v50  ;;  %v1403_v27 = vpop.xlane.xlu0 %1402 }
 0x575   :  { %v1424_v20 = vmul.f32 1.442695, %v1410_v17 }
 0x576   :  { %6722 = vmatmul.msk.f32.gmra.mxu2 %vm596_vm11, %v9101_v34 }
 0x577   :  { %7710 = vpow2.f32 %v1424_v20 }
 0x579   :  { %v9200_v45 = vpop.f32.mrf.mxu2 }
 0x57d   :  { %v9202_v56 = vpop.eup %7710 }
 0x57e   :  { %6723 = vmatmul.msk.f32.gmra.mxu2 %vm596_vm11, %v9087_v10  ;;  %v1446_v32 = vsel %vm670_vm6, %v9202_v56, 0.0 }
 0x57f   :  { %1447 = vadd.xlane.f32.xlu1 %v1446_v32  ;;  %v12449_v32 = vld [vmem:[#allocation9_spill] sm:$0xff] }
 0x581   :  { %v9208_v7 = vpop.f32.mrf.mxu2 }
 0x586   :  { %6724 = vmatmul.msk.f32.gmra.mxu2 %vm596_vm11, %v9106_v46  ;;  %v1411_v46 = vsub.f32 %v9115_v1, %v1403_v27 }
 0x588   :  { %v1426_v62 = vmul.f32 1.442695, %v1411_v46  ;;  %v12453_v46 = vld [vmem:[#allocation7_spill] sm:$0xff] }
 0x589   :  { %v9212_v0 = vpop.f32.mrf.mxu2 }
 0x58a   :  { %v7429_v34 = vpop.permute.xlu1 %7428 }
 0x58b   :  { %v7430_v13 = vunpack.i.l.bf16 %v7429_v34  ;;  %v7431_v37 = vunpack.i.h.bf16 %v7429_v34  ;;  %v12450_v34 = vunpack.i.h.bf16 %v12449_v32 }
 0x58d   :  { %1530 = vmatpush.msrb.mxu0 %v7430_v13 }
 0x58f   :  { %1531 = vmatpush.msrb.mxu0 %v7431_v37 }
 0x591   :  { %v1138_v5 = vpop.f32.mrf.mxu2 }
 0x592   :  { %1170 = vrot.lane.b32.xlu2 %v1138_v5, %s8112_s9  ;;  %v12451_v5 = vld [vmem:[#allocation8_spill] sm:$0xff] }
 0x599   :  { %v1141_v10 = vpop.f32.mrf.mxu2 }
 0x59a   :  { %1172 = vrot.lane.b32.xlu1 %v1141_v10, %s8112_s9  ;;  %v12452_v10 = vunpack.i.l.bf16 %v12451_v5 }
 0x5a1   :  { %v1144_v22 = vpop.f32.mrf.mxu2 }
 0x5a2   :  { %1174 = vrot.lane.b32.xlu1 %v1144_v22, %s8112_s9 }
 0x5a9   :  { %v1147_v29 = vpop.f32.mrf.mxu2 }
 0x5aa   :  { %1176 = vrot.lane.b32.xlu0 %v1147_v29, %s8112_s9  ;;  %v12454_v29 = vunpack.i.l.bf16 %v12453_v46 }
 0x5ad   :  { %v1430_v63 = vpop.xlane.xlu2 %1429 }
 0x5ae   :  { %7712 = vrcp.f32 %v1430_v63 }
 0x5af   :  { %7714 = vpow2.f32 %v1426_v62  ;;  %v1436_v47 = vpop.xlane.xlu0 %1435 }
 0x5b1   :  { %v1150_v57 = vpop.f32.mrf.mxu2 }
 0x5b4   :  { %v7713_v59 = vpop.eup %7712 }
 0x5b5   :  { %v1433_v3 = vpop.xlane.xlu2 %1432  ;;  %v1460_v11 = vmul.f32 %v7713_v59, %v9147_v31  ;;  %v9220_v48 = vpop.eup %7714 }
 0x5b6   :  { %7716 = vrcp.f32 %v1433_v3  ;;  %v1449_v1 = vsel %vm670_vm6, %v9220_v48, 0.0 }
 0x5b7   :  { %6701 = vmatmul.msk.f32.vlgmr.msrb.gmra.mxu0 %vm670_vm6, %v1460_v11  ;;  %7718 = vrcp.f32 %v1436_v47  ;;  %v1439_v61 = vpop.xlane.xlu0 %1438 }
 0x5b8   :  { %7720 = vrcp.f32 %v1439_v61 }
 0x5b9   :  { %v1153_v2 = vpop.f32.mrf.mxu2 }
 0x5ba   :  { %1180 = vrot.lane.b32.xlu1 %v1153_v2, %s8112_s9  ;;  %v12456_v2 = vld [vmem:[#allocation10_spill] sm:$0xff] }
 0x5bb   :  { %1450 = vadd.xlane.f32.xlu2 %v1449_v1  ;;  %v12457_v1 = vunpack.i.l.bf16 %v12456_v2 }
 0x5bc   :  { %v7717_v26 = vpop.eup %7716 }
 0x5bd   :  { %v1461_v51 = vmul.f32 %v7717_v26, %v9157_v35  ;;  %v7719_v36 = vpop.eup %7718 }
 0x5be   :  { %v1462_v28 = vmul.f32 %v7719_v36, %v9151_v33  ;;  %v7721_v16 = vpop.eup %7720 }
 0x5bf   :  { %6702 = vmatmul.msk.f32.gmra.mxu0 %vm670_vm6, %v1461_v51  ;;  %v1442_v14 = vpop.xlane.xlu0 %1441  ;;  %v1463_v54 = vmul.f32 %v7721_v16, %v9160_v21 }
 0x5c0   :  { %7722 = vrcp.f32 %v1442_v14 }
 0x5c1   :  { %v1156_v31 = vpop.f32.mrf.mxu2 }
 0x5c2   :  { %1182 = vrot.lane.b32.xlu1 %v1156_v31, %s8112_s9 }
 0x5c6   :  { %v7723_v58 = vpop.eup %7722 }
 0x5c7   :  { %6703 = vmatmul.msk.f32.gmra.mxu0 %vm670_vm6, %v1462_v28  ;;  %v1445_v35 = vpop.xlane.xlu0 %1444  ;;  %v1464_v33 = vmul.f32 %v7723_v58, %v9169_v41  ;;  %v12458_v28 = vunpack.i.h.bf16 %v12453_v46 }
 0x5c8   :  { %7724 = vrcp.f32 %v1445_v35 }
 0x5c9   :  { %v1159_v42 = vpop.f32.mrf.mxu2 }
 0x5ca   :  { %1184 = vrot.lane.b32.xlu0 %v1159_v42, %s8112_s9 }
 0x5ce   :  { %v7725_v12 = vpop.eup %7724 }
 0x5cf   :  { %6704 = vmatmul.msk.f32.gmra.mxu0 %vm670_vm6, %v1463_v54  ;;  %v1465_v9 = vmul.f32 %v7725_v12, %v9177_v44 }
 0x5d1   :  { %v1638_v8 = vpop.f32.mrf.mxu2 }
 0x5d2   :  { %v9243_v15 = vadd.f32 %v12447_v23, %v1638_v8 }
 0x5d3   :  { %1178 = vrot.lane.b32.xlu2 %v1150_v57, %s8112_s9  ;;  %v12455_v57 = vunpack.i.h.bf16 %v12451_v5 }
 0x5d4   :  { %v1662_v41 = vsel %vm670_vm6, %v9243_v15, -inf }
 0x5d7   :  { %6705 = vmatmul.msk.f32.gmra.mxu0 %vm670_vm6, %v1464_v33 }
 0x5d9   :  { %v1641_v30 = vpop.f32.mrf.mxu2 }
 0x5db   :  { %7438 = vrot.lane.b32.xlu2 %v9095_v53, %s8110_s29  ;;  %v12448_v53 = vunpack.i.h.bf16 %v12446_v24 }
 0x5dd   :  { %v9252_v44 = vadd.f32 %v12448_v53, %v1641_v30 }
 0x5df   :  { %6706 = vmatmul.msk.f32.gmra.mxu0 %vm670_vm6, %v1465_v9  ;;  %v1665_v50 = vsel %vm670_vm6, %v9252_v44, -inf }
 0x5e1   :  { %v1644_v21 = vpop.f32.mrf.mxu2 }
 0x5e2   :  { %v9266_v22 = vadd.f32 %v12452_v10, %v1644_v21 }
 0x5e4   :  { %v1668_v63 = vsel %vm670_vm6, %v9266_v22, -inf }
 0x5e9   :  { %v1647_v4 = vpop.f32.mrf.mxu2 }
 0x5ea   :  { %v9280_v47 = vadd.f32 %v12455_v57, %v1647_v4 }
 0x5ec   :  { %1663 = vmax.xlane.f32.xlu1 %v1662_v41  ;;  %v1171_v52 = vpop.permute.xlu2 %1170  ;;  %v1671_v59 = vsel %vm670_vm6, %v9280_v47, -inf }
 0x5ed   :  { %v1194_v39 = vsel %vm596_vm11, %v9173_v60, %v1171_v52 }
 0x5ee   :  { %6677 = vmatmul.msk.f32.vlgmr.msrb.gmra.mxu1 %vm59_vm0, %v1194_v39 }
 0x5f1   :  { %v1650_v40 = vpop.f32.mrf.mxu2 }
 0x5f2   :  { %v1448_v55 = vpop.xlane.xlu1 %1447  ;;  %v9289_v26 = vadd.f32 %v12457_v1, %v1650_v40  ;;  %v8051_v1 = vld [vmem:[%s12379_s0 + $0x10] sm:$0xff] }
 0x5f3   :  { %7726 = vrcp.f32 %v1448_v55 }
 0x5f4   :  { %1666 = vmax.xlane.f32.xlu0 %v1665_v50 }
 0x5f9   :  { %v7727_v17 = vpop.eup %7726  ;;  %v1653_v20 = vpop.f32.mrf.mxu2 }
 0x5fa   :  { %v9258_v13 = vadd.f32 %v12450_v34, %v1653_v20  ;;  %v1466_v60 = vmul.f32 %v7727_v17, %v9202_v56 }
 0x5fc   :  { %6707 = vmatmul.msk.f32.gmra.mxu0 %vm670_vm6, %v1466_v60  ;;  %v1677_v37 = vsel %vm670_vm6, %v9258_v13, -inf }
 0x5fd   :  { %1678 = vmax.xlane.f32.xlu0 %v1677_v37 }
 0x601   :  { %v1656_v27 = vpop.f32.mrf.mxu2 }
 0x602   :  { %v9270_v62 = vadd.f32 %v12454_v29, %v1656_v27 }
 0x604   :  { %1669 = vmax.xlane.f32.xlu2 %v1668_v63  ;;  %v1680_v56 = vsel %vm670_vm6, %v9270_v62, -inf }
 0x605   :  { %7433 = vrot.lane.b32.xlu1 %v9091_v18, %s8110_s29  ;;  %1681 = vmax.xlane.f32.xlu0 %v1680_v56  ;;  %v1674_v18 = vsel %vm670_vm6, %v9289_v26, -inf }
 0x609   :  { %v1659_v36 = vpop.f32.mrf.mxu2 }
 0x60a   :  { %v9301_v14 = vadd.f32 %v12458_v28, %v1659_v36 }
 0x60c   :  { %v1173_v3 = vpop.permute.xlu1 %1172  ;;  %1672 = vmax.xlane.f32.xlu2 %v1671_v59 }
 0x60d   :  { %v1195_v11 = vsel %vm596_vm11, %v9181_v38, %v1173_v3 }
 0x60e   :  { %6678 = vmatmul.msk.f32.gmra.mxu1 %vm59_vm0, %v1195_v11 }
 0x614   :  { %v1175_v61 = vpop.permute.xlu1 %1174  ;;  %1675 = vmax.xlane.f32.xlu2 %v1674_v18 }
 0x615   :  { %v1196_v51 = vsel %vm596_vm11, %v9187_v25, %v1175_v61  ;;  %v1683_v25 = vsel %vm670_vm6, %v9301_v14, -inf }
 0x616   :  { %6679 = vmatmul.msk.f32.gmra.mxu1 %vm59_vm0, %v1196_v51 }
 0x61c   :  { %v1177_v31 = vpop.permute.xlu0 %1176 }
 0x61d   :  { %v1197_v38 = vsel %vm596_vm11, %v9191_v49, %v1177_v31 }
 0x61e   :  { %6680 = vmatmul.msk.f32.gmra.mxu1 %vm59_vm0, %v1197_v38 }
 0x62c   :  { %7448 = vrot.lane.b32.xlu2 %v9131_v6, %s8110_s29  ;;  %v1181_v8 = vpop.permute.xlu1 %1180 }
 0x62d   :  { %v1199_v6 = vsel %vm596_vm11, %v9200_v45, %v1181_v8 }
 0x62e   :  { %v1451_v42 = vpop.xlane.xlu2 %1450 }
 0x62f   :  { %7728 = vrcp.f32 %v1451_v42  ;;  %1684 = vmax.xlane.f32.xlu1 %v1683_v25 }
 0x634   :  { %v1183_v58 = vpop.permute.xlu1 %1182 }
 0x635   :  { %v7729_v16 = vpop.eup %7728  ;;  %v1200_v33 = vsel %vm596_vm11, %v9208_v7, %v1183_v58  ;;  %v8053_v58 = vld [vmem:[%s12379_s0 + $0x8] sm:$0xff] }
 0x636   :  { %v1179_v54 = vpop.permute.xlu2 %1178  ;;  %v1467_v49 = vmul.f32 %v7729_v16, %v9220_v48 }
 0x637   :  { %v1198_v35 = vsel %vm596_vm11, %v9195_v43, %v1179_v54 }
 0x638   :  { %6681 = vmatmul.msk.f32.gmra.mxu1 %vm59_vm0, %v1198_v35  ;;  %6708 = vmatmul.msk.f32.gmra.mxu0 %vm670_vm6, %v1467_v49 }
 0x63c   :  { %v1185_v48 = vpop.permute.xlu0 %1184 }
 0x63d   :  { %v1201_v43 = vsel %vm596_vm11, %v9212_v0, %v1185_v48 }
 0x63e   :  { %v7439_v4 = vpop.permute.xlu2 %7438 }
 0x63f   :  { %v7440_v17 = vunpack.i.l.bf16 %v7439_v4  ;;  %v7441_v32 = vunpack.i.h.bf16 %v7439_v4 }
 0x640   :  { %6682 = vmatmul.msk.f32.gmra.mxu1 %vm59_vm0, %v1199_v6 }
 0x648   :  { %6683 = vmatmul.msk.f32.gmra.mxu1 %vm59_vm0, %v1200_v33 }
 0x650   :  { %6684 = vmatmul.msk.f32.gmra.mxu1 %vm59_vm0, %v1201_v43 }
 0x65f   :  { %v1664_v30 = vpop.xlane.xlu1 %1663 }
 0x660   :  { %v1686_v12 = vsub.f32 %v9243_v15, %v1664_v30 }
 0x662   :  { %v1694_v9 = vmul.f32 1.442695, %v1686_v12 }
 0x664   :  { %7730 = vpow2.f32 %v1694_v9 }
 0x667   :  { %v1667_v45 = vpop.xlane.xlu0 %1666 }
 0x668   :  { %v1687_v21 = vsub.f32 %v9252_v44, %v1667_v45  ;;  %v8054_v45 = vld [vmem:[%s12379_s0 + $0x20] sm:$0xff] }
 0x66a   :  { %v9323_v24 = vpop.eup %7730  ;;  %v1696_v23 = vmul.f32 1.442695, %v1687_v21 }
 0x66b   :  { %v1710_v7 = vsel %vm670_vm6, %v9323_v24, 0.0  ;;  %v1259_v37 = vpop.f32.mrf.mxu1 }
 0x66c   :  { %7732 = vpow2.f32 %v1696_v23  ;;  %1711 = vadd.xlane.f32.xlu0 %v1710_v7 }
 0x670   :  { %v1679_v0 = vpop.xlane.xlu0 %1678 }
 0x671   :  { %v1691_v41 = vsub.f32 %v9258_v13, %v1679_v0  ;;  %v8055_v0 = vld [vmem:[%s12379_s0 + $0x28] sm:$0xff] }
 0x672   :  { %v9328_v52 = vpop.eup %7732 }
 0x673   :  { %v1704_v15 = vmul.f32 1.442695, %v1691_v41  ;;  %v1713_v39 = vsel %vm670_vm6, %v9328_v52, 0.0 }
 0x674   :  { %1714 = vadd.xlane.f32.xlu2 %v1713_v39 }
 0x675   :  { %7734 = vpow2.f32 %v1704_v15 }
 0x677   :  { %v7434_v53 = vpop.permute.xlu1 %7433  ;;  %v1670_v44 = vpop.xlane.xlu2 %1669 }
 0x678   :  { %v7435_v40 = vunpack.i.l.bf16 %v7434_v53  ;;  %v7436_v55 = vunpack.i.h.bf16 %v7434_v53  ;;  %v1688_v11 = vsub.f32 %v9266_v22, %v1670_v44  ;;  %v1682_v51 = vpop.xlane.xlu0 %1681 }
 0x679   :  { %v1692_v38 = vsub.f32 %v9270_v62, %v1682_v51 }
 0x67a   :  { %1806 = vmatpush.msra.mxu0 %v7435_v40  ;;  %7316 = vmatpush.msra.mxu1 %v7435_v40  ;;  %v1698_v61 = vmul.f32 1.442695, %v1688_v11  ;;  %v8056_v40 = vld [vmem:[%s12379_s0 + $0x30] sm:$0xff] }
 0x67b   :  { %v9332_v50 = vpop.eup %7734  ;;  %v1706_v42 = vmul.f32 1.442695, %v1692_v38 }
 0x67c   :  { %1807 = vmatpush.msra.mxu0 %v7436_v55  ;;  %7317 = vmatpush.msra.mxu1 %v7436_v55  ;;  %v1725_v20 = vsel %vm670_vm6, %v9332_v50, 0.0 }
 0x67d   :  { %1726 = vadd.xlane.f32.xlu2 %v1725_v20 }
 0x67e   :  { %1808 = vmatpush.msra.mxu0 %v7440_v17  ;;  %7318 = vmatpush.msra.mxu1 %v7440_v17 }
 0x67f   :  { %v1673_v34 = vpop.xlane.xlu2 %1672 }
 0x680   :  { %v1689_v13 = vsub.f32 %v9280_v47, %v1673_v34  ;;  %7443 = vrot.lane.b32.xlu0 %v9067_v19, %s8110_s29  ;;  %1809 = vmatpush.msra.mxu0 %v7441_v32  ;;  %v8050_v19 = vld [vmem:[%s12379_s0] sm:$0xff] }
 0x681   :  { %7319 = vmatpush.msra.mxu1 %v7441_v32  ;;  %v1944_v57 = vadd.f32 %v8050_v19, %v1259_v37  ;;  %v9352_v47 = vld [vmem:[%s12380_s1 + $0x5] ss:$0 sm:$0xff] }
 0x682   :  { %v1700_v60 = vmul.f32 1.442695, %v1689_v13 }
 0x683   :  { %v9357_v3 = vadd.f32 %v9352_v47, %v1944_v57 }
 0x684   :  { %7736 = vpow2.f32 %v1700_v60 }
 0x685   :  { %v1980_v18 = vsel %vm59_vm0, %v9357_v3, 0.0 }
 0x687   :  { %v1676_v5 = vpop.xlane.xlu2 %1675 }
 0x688   :  { %v1690_v10 = vsub.f32 %v9289_v26, %v1676_v5 }
 0x68a   :  { %v9340_v27 = vpop.eup %7736  ;;  %v1702_v46 = vmul.f32 1.442695, %v1690_v10 }
 0x68b   :  { %v1719_v29 = vsel %vm670_vm6, %v9340_v27, 0.0  ;;  %v1262_v63 = vpop.f32.mrf.mxu1 }
 0x68c   :  { %7738 = vpow2.f32 %v1702_v46  ;;  %1720 = vadd.xlane.f32.xlu1 %v1719_v29  ;;  %v1945_v33 = vadd.f32 %v8053_v58, %v1262_v63 }
 0x68d   :  { %7740 = vpow2.f32 %v1698_v61 }
 0x68e   :  { %v9394_v30 = vadd.f32 %v9352_v47, %v1945_v33 }
 0x68f   :  { %v7449_v32 = vpop.permute.xlu2 %7448 }
 0x690   :  { %v1983_v23 = vsel %vm59_vm0, %v9394_v30, 0.0  ;;  %v7450_v29 = vunpack.i.l.bf16 %v7449_v32  ;;  %v7451_v63 = vunpack.i.h.bf16 %v7449_v32 }
 0x692   :  { %v9344_v56 = vpop.eup %7738 }
 0x693   :  { %v1722_v59 = vsel %vm670_vm6, %v9344_v56, 0.0  ;;  %v1265_v2 = vpop.f32.mrf.mxu1  ;;  %v9372_v16 = vpop.eup %7740 }
 0x694   :  { %1723 = vadd.xlane.f32.xlu1 %v1722_v59  ;;  %v1946_v26 = vadd.f32 %v8051_v1, %v1265_v2  ;;  %v1716_v54 = vsel %vm670_vm6, %v9372_v16, 0.0  ;;  %v12459_v1 = vld [vmem:[#allocation5_spill] sm:$0xff] }
 0x696   :  { %v9366_v31 = vadd.f32 %v9352_v47, %v1946_v26 }
 0x698   :  { %v1986_v28 = vsel %vm59_vm0, %v9366_v31, 0.0 }
 0x69b   :  { %v1268_v49 = vpop.f32.mrf.mxu1 }
 0x69c   :  { %1981 = vadd.xlane.f32.xlu1 %v1980_v18 }
 0x6a2   :  { %v1685_v36 = vpop.xlane.xlu1 %1684 }
 0x6a3   :  { %v1693_v22 = vsub.f32 %v9301_v14, %v1685_v36  ;;  %v8052_v14 = vld [vmem:[%s12379_s0 + $0x18] sm:$0xff] }
 0x6a4   :  { %1987 = vadd.xlane.f32.xlu1 %v1986_v28  ;;  %v1947_v8 = vadd.f32 %v8052_v14, %v1268_v49 }
 0x6a5   :  { %v1708_v25 = vmul.f32 1.442695, %v1693_v22 }
 0x6a6   :  { %v9391_v43 = vadd.f32 %v9352_v47, %v1947_v8 }
 0x6a7   :  { %7742 = vpow2.f32 %v1708_v25 }
 0x6a8   :  { %7744 = vpow2.f32 %v1706_v42  ;;  %v1989_v9 = vsel %vm59_vm0, %v9391_v43, 0.0 }
 0x6aa   :  { %1717 = vadd.xlane.f32.xlu0 %v1716_v54 }
 0x6ad   :  { %v9376_v35 = vpop.eup %7742 }
 0x6ae   :  { %v9378_v62 = vpop.eup %7744  ;;  %v1731_v6 = vsel %vm670_vm6, %v9376_v35, 0.0 }
 0x6af   :  { %1732 = vadd.xlane.f32.xlu2 %v1731_v6  ;;  %v1728_v48 = vsel %vm670_vm6, %v9378_v62, 0.0 }
 0x6b2   :  { %1729 = vadd.xlane.f32.xlu0 %v1728_v48 }
 0x6b5   :  { %v1271_v12 = vpop.f32.mrf.mxu1 }
 0x6b6   :  { %v1948_v21 = vadd.f32 %v8054_v45, %v1271_v12 }
 0x6b7   :  { %1990 = vadd.xlane.f32.xlu2 %v1989_v9 }
 0x6b8   :  { %v9404_v7 = vadd.f32 %v9352_v47, %v1948_v21 }
 0x6ba   :  { %1984 = vadd.xlane.f32.xlu0 %v1983_v23  ;;  %v1992_v39 = vsel %vm59_vm0, %v9404_v7, 0.0 }
 0x6bd   :  { %v1274_v4 = vpop.f32.mrf.mxu1 }
 0x6be   :  { %v1949_v41 = vadd.f32 %v8055_v0, %v1274_v4  ;;  %v9454_v4 = vpop.f32.mrf.mxu0 }
 0x6c0   :  { %v9410_v15 = vadd.f32 %v9352_v47, %v1949_v41 }
 0x6c2   :  { %1993 = vadd.xlane.f32.xlu0 %v1992_v39  ;;  %v1995_v53 = vsel %vm59_vm0, %v9410_v15, 0.0 }
 0x6c3   :  { %1996 = vadd.xlane.f32.xlu1 %v1995_v53 }
 0x6c5   :  { %v1277_v44 = vpop.f32.mrf.mxu1 }
 0x6c6   :  { %v1950_v55 = vadd.f32 %v8056_v40, %v1277_v44 }
 0x6c8   :  { %v9420_v17 = vadd.f32 %v9352_v47, %v1950_v55 }
 0x6ca   :  { %v1998_v20 = vsel %vm59_vm0, %v9420_v17, 0.0 }
 0x6cb   :  { %1999 = vadd.xlane.f32.xlu0 %v1998_v20 }
 0x6cd   :  { %v1280_v61 = vpop.f32.mrf.mxu1 }
 0x6df   :  { %v1712_v34 = vpop.xlane.xlu0 %1711 }
 0x6e0   :  { %7746 = vrcp.f32 %v1712_v34 }
 0x6e6   :  { %v7747_v10 = vpop.eup %7746 }
 0x6e7   :  { %v1715_v13 = vpop.xlane.xlu2 %1714  ;;  %v1742_v19 = vmul.f32 %v7747_v10, %v9323_v24 }
 0x6e8   :  { %7748 = vrcp.f32 %v1715_v13 }
 0x6ee   :  { %v7749_v46 = vpop.eup %7748 }
 0x6ef   :  { %v1743_v57 = vmul.f32 %v7749_v46, %v9328_v52  ;;  %v8057_v52 = vld [vmem:[%s12379_s0 + $0x38] sm:$0xff] }
 0x6f0   :  { %v1951_v51 = vadd.f32 %v8057_v52, %v1280_v61  ;;  %v1727_v25 = vpop.xlane.xlu2 %1726 }
 0x6f2   :  { %v7444_v60 = vpop.permute.xlu0 %7443  ;;  %v9440_v28 = vadd.f32 %v9352_v47, %v1951_v51 }
 0x6f3   :  { %v7445_v37 = vunpack.i.l.bf16 %v7444_v60  ;;  %v7446_v5 = vunpack.i.h.bf16 %v7444_v60  ;;  %v9476_v60 = vpop.f32.mrf.mxu0 }
 0x6f4   :  { %v2001_v14 = vsel %vm59_vm0, %v9440_v28, 0.0 }
 0x6f5   :  { %1810 = vmatpush.msra.mxu0 %v7445_v37  ;;  %7320 = vmatpush.msra.mxu1 %v7445_v37 }
 0x6f7   :  { %1811 = vmatpush.msra.mxu0 %v7446_v5  ;;  %7321 = vmatpush.msra.mxu1 %v7446_v5 }
 0x6f9   :  { %1812 = vmatpush.msra.mxu0 %v7450_v29  ;;  %7322 = vmatpush.msra.mxu1 %v7450_v29 }
 0x6fb   :  { %1813 = vmatpush.msra.mxu0 %v7451_v63  ;;  %7323 = vmatpush.msra.mxu1 %v7451_v63 }
 0x6fc   :  { %6725 = vmatmul.msk.f32.vlgmr.msra.gmra.mxu0 %vm670_vm6, %v1742_v19  ;;  %6726 = vmatmul.msk.f32.vlgmr.msra.gmra.mxu1 %vm670_vm6, %v1743_v57 }
 0x6ff   :  { %v1721_v59 = vpop.xlane.xlu1 %1720 }
 0x707   :  { %v1724_v11 = vpop.xlane.xlu1 %1723 }
 0x70f   :  { %v1982_v2 = vpop.xlane.xlu1 %1981 }
 0x710   :  { %v2028_v26 = vmul.f32 %v1982_v2, %v12459_v1 }
 0x712   :  { %v9430_v18 = vsub.f32 %v9357_v3, %v2028_v26  ;;  %v9494_v26 = vpop.f32.mrf.mxu0 }
 0x714   :  { %v2060_v24 = vmul.f32 %v9430_v18, %v9430_v18 }
 0x716   :  { %v2076_v38 = vsel %vm59_vm0, %v2060_v24, 0.0 }
 0x717   :  { %2077 = vadd.xlane.f32.xlu2 %v2076_v38  ;;  %v1988_v36 = vpop.xlane.xlu1 %1987 }
 0x718   :  { %v2030_v22 = vmul.f32 %v1988_v36, %v12459_v1 }
 0x71a   :  { %v9443_v42 = vsub.f32 %v9366_v31, %v2030_v22  ;;  %v9501_v51 = vpop.f32.mrf.mxu0 }
 0x71c   :  { %v2062_v54 = vmul.f32 %v9443_v42, %v9443_v42 }
 0x71d   :  { %v1718_v49 = vpop.xlane.xlu0 %1717 }
 0x71e   :  { %7750 = vrcp.f32 %v1718_v49  ;;  %v2082_v8 = vsel %vm59_vm0, %v2062_v54, 0.0 }
 0x71f   :  { %2002 = vadd.xlane.f32.xlu2 %v2001_v14  ;;  %2083 = vadd.xlane.f32.xlu0 %v2082_v8  ;;  %7752 = vrcp.f32 %v1721_v59  ;;  %v9524_v14 = vld [vmem:[%s12381_s2 + $0x28] sm:$0xff]  ;;  %v9530_v8 = vld [vmem:[%s12381_s2 + $0x18] sm:$0xff] }
 0x720   :  { %7754 = vrcp.f32 %v1724_v11 }
 0x721   :  { %7756 = vrcp.f32 %v1727_v25 }
 0x722   :  { %v1733_v6 = vpop.xlane.xlu2 %1732  ;;  %v9505_v36 = vpop.f32.mrf.mxu0 }
 0x724   :  { %v7751_v58 = vpop.eup %7750 }
 0x725   :  { %v1730_v33 = vpop.xlane.xlu0 %1729  ;;  %v1744_v48 = vmul.f32 %v7751_v58, %v9372_v16  ;;  %v7753_v12 = vpop.eup %7752 }
 0x726   :  { %v1745_v21 = vmul.f32 %v7753_v12, %v9340_v27  ;;  %v7755_v16 = vpop.eup %7754  ;;  %7758 = vrcp.f32 %v1730_v33 }
 0x727   :  { %6727 = vmatmul.msk.f32.gmra.mxu1 %vm670_vm6, %v1744_v48  ;;  %v1746_v40 = vmul.f32 %v7755_v16, %v9344_v56  ;;  %v7757_v5 = vpop.eup %7756  ;;  %7760 = vrcp.f32 %v1733_v6  ;;  %v9536_v6 = vld [vmem:[%s12381_s2 + $0x8] sm:$0xff] }
 0x728   :  { %v1747_v19 = vmul.f32 %v7757_v5, %v9332_v50 }
 0x72a   :  { %v1991_v9 = vpop.xlane.xlu2 %1990  ;;  %v9507_v22 = vpop.f32.mrf.mxu0 }
 0x72b   :  { %v2031_v0 = vmul.f32 %v1991_v9, %v12459_v1 }
 0x72c   :  { %v7759_v2 = vpop.eup %7758 }
 0x72d   :  { %v1985_v45 = vpop.xlane.xlu0 %1984  ;;  %v9464_v53 = vsub.f32 %v9391_v43, %v2031_v0  ;;  %v1748_v50 = vmul.f32 %v7759_v2, %v9378_v62  ;;  %v7761_v52 = vpop.eup %7760 }
 0x72e   :  { %v2029_v23 = vmul.f32 %v1985_v45, %v12459_v1  ;;  %v1749_v38 = vmul.f32 %v7761_v52, %v9376_v35  ;;  %v9518_v35 = vld [vmem:[%s12381_s2 + $0x38] sm:$0xff] }
 0x72f   :  { %6728 = vmatmul.msk.f32.gmra.mxu1 %vm670_vm6, %v1745_v21  ;;  %v2063_v13 = vmul.f32 %v9464_v53, %v9464_v53  ;;  %2432 = vmatpush.msrb.mxu0 %v9518_v35 }
 0x730   :  { %v9459_v41 = vsub.f32 %v9394_v30, %v2029_v23 }
 0x731   :  { %v2085_v29 = vsel %vm59_vm0, %v2063_v13, 0.0  ;;  %2433 = vmatpush.msrb.mxu0 %v9524_v14 }
 0x732   :  { %v2061_v39 = vmul.f32 %v9459_v41, %v9459_v41  ;;  %v9509_v25 = vpop.f32.mrf.mxu0 }
 0x733   :  { %2434 = vmatpush.msrb.mxu0 %v9530_v8 }
 0x734   :  { %v2079_v27 = vsel %vm59_vm0, %v2061_v39, 0.0 }
 0x735   :  { %v1994_v44 = vpop.xlane.xlu0 %1993  ;;  %2080 = vadd.xlane.f32.xlu1 %v2079_v27  ;;  %2435 = vmatpush.msrb.mxu0 %v9536_v6 }
 0x736   :  { %v2032_v55 = vmul.f32 %v1994_v44, %v12459_v1  ;;  %v1997_v20 = vpop.xlane.xlu1 %1996 }
 0x737   :  { %v2033_v32 = vmul.f32 %v1997_v20, %v12459_v1  ;;  %6729 = vmatmul.msk.f32.gmra.mxu1 %vm670_vm6, %v1746_v40 }
 0x738   :  { %v9472_v34 = vsub.f32 %v9404_v7, %v2032_v55 }
 0x739   :  { %v9479_v37 = vsub.f32 %v9410_v15, %v2033_v32  ;;  %v9551_v32 = vld [vmem:[%s12380_s1 + $0x2] ss:$0 sm:$0xff] }
 0x73a   :  { %v2064_v56 = vmul.f32 %v9472_v34, %v9472_v34  ;;  %v9511_v54 = vpop.f32.mrf.mxu0 }
 0x73b   :  { %v2065_v10 = vmul.f32 %v9479_v37, %v9479_v37 }
 0x73c   :  { %v2088_v46 = vsel %vm59_vm0, %v2064_v56, 0.0  ;;  %v9556_v56 = vld [vmem:[%s12380_s1 + $0x3] ss:$0 sm:$0xff] }
 0x73d   :  { %2089 = vadd.xlane.f32.xlu2 %v2088_v46  ;;  %2086 = vadd.xlane.f32.xlu1 %v2085_v29  ;;  %v2091_v63 = vsel %vm59_vm0, %v2065_v10, 0.0 }
 0x73e   :  { %v2000_v57 = vpop.xlane.xlu0 %1999  ;;  %2092 = vadd.xlane.f32.xlu0 %v2091_v63 }
 0x73f   :  { %v2034_v59 = vmul.f32 %v2000_v57, %v12459_v1  ;;  %6730 = vmatmul.msk.f32.gmra.mxu1 %vm670_vm6, %v1747_v19 }
 0x741   :  { %v9492_v11 = vsub.f32 %v9420_v17, %v2034_v59 }
 0x743   :  { %v2066_v61 = vmul.f32 %v9492_v11, %v9492_v11 }
 0x745   :  { %v2094_v24 = vsel %vm59_vm0, %v2066_v61, 0.0 }
 0x746   :  { %2095 = vadd.xlane.f32.xlu1 %v2094_v24 }
 0x747   :  { %6731 = vmatmul.msk.f32.gmra.mxu1 %vm670_vm6, %v1748_v50 }
 0x74f   :  { %6732 = vmatmul.msk.f32.gmra.mxu1 %vm670_vm6, %v1749_v38 }
 0x779   :  { %v1815_v49 = vpop.f32.mrf.mxu0  ;;  %v1818_v62 = vpop.f32.mrf.mxu1 }
 0x77a   :  { %1849 = vrot.lane.b32.xlu1 %v1818_v62, %s8112_s9  ;;  %1847 = vrot.lane.b32.xlu0 %v1815_v49, %s8112_s9 }
 0x78a   :  { %v2078_v58 = vpop.xlane.xlu2 %2077 }
 0x78b   :  { %v2124_v33 = vmul.f32 %v2078_v58, %v12459_v1 }
 0x78d   :  { %v2140_v48 = vadd.f32 1e-05, %v2124_v33 }
 0x78f   :  { %7762 = vrsqrt.f32 %v2140_v48  ;;  %vm2162_vm8 = vweird.f32 %v2140_v48 }
 0x792   :  { %v2003_v12 = vpop.xlane.xlu2 %2002  ;;  %v2084_v39 = vpop.xlane.xlu0 %2083 }
 0x793   :  { %v2035_v9 = vmul.f32 %v2003_v12, %v12459_v1  ;;  %v2126_v40 = vmul.f32 %v2084_v39, %v12459_v1 }
 0x795   :  { %v7763_v45 = vpop.eup %7762  ;;  %v9542_v21 = vsub.f32 %v9440_v28, %v2035_v9  ;;  %v2142_v13 = vadd.f32 1e-05, %v2126_v40 }
 0x796   :  { %v2157_v23 = vmul.f32 %v7763_v45, %v2140_v48  ;;  %vm2163_vm7 = vweird.f32 %v7763_v45 }
 0x797   :  { %v2067_v0 = vmul.f32 %v9542_v21, %v9542_v21  ;;  %vm2164_vm9 = vmor %vm2162_vm8, %vm2163_vm7  ;;  %7764 = vrsqrt.f32 %v2142_v13  ;;  %vm2182_vm15 = vweird.f32 %v2142_v13 }
 0x798   :  { %v2158_v16 = vmul.f32 %v7763_v45, %v2157_v23 }
 0x799   :  { %v2097_v27 = vsel %vm59_vm0, %v2067_v0, 0.0 }
 0x79a   :  { %v2159_v44 = vmul.f32 0.5, %v2158_v16  ;;  %2098 = vadd.xlane.f32.xlu2 %v2097_v27 }
 0x79c   :  { %v2160_v55 = vsub.f32 1.5, %v2159_v44 }
 0x79d   :  { %v7765_v57 = vpop.eup %7764 }
 0x79e   :  { %v2161_v20 = vmul.f32 %v7763_v45, %v2160_v55  ;;  %v2177_v61 = vmul.f32 %v7765_v57, %v2142_v13  ;;  %vm2183_vm12 = vweird.f32 %v7765_v57 }
 0x79f   :  { %vm2184_vm1 = vmor %vm2182_vm15, %vm2183_vm12 }
 0x7a0   :  { %v2165_v5 = vsel %vm2164_vm9, %v7763_v45, %v2161_v20  ;;  %v2178_v50 = vmul.f32 %v7765_v57, %v2177_v61 }
 0x7a1   :  { %v2316_v10 = vmul.f32 %v2165_v5, %v9430_v18 }
 0x7a2   :  { %v2179_v9 = vmul.f32 0.5, %v2178_v50 }
 0x7a3   :  { %v2333_v46 = vmul.f32 %v9551_v32, %v2316_v10 }
 0x7a4   :  { %v1821_v29 = vpop.f32.mrf.mxu1  ;;  %v2180_v39 = vsub.f32 1.5, %v2179_v9 }
 0x7a5   :  { %v2350_v63 = vadd.f32 %v9556_v56, %v2333_v46 }
 0x7a6   :  { %v2181_v10 = vmul.f32 %v7765_v57, %v2180_v39 }
 0x7a7   :  { %6741 = vmatmul.msk.f32.vlgmr.msrb.gmra.mxu0 %vm59_vm0, %v2350_v63 }
 0x7a8   :  { %v2081_v19 = vpop.xlane.xlu1 %2080 }
 0x7a9   :  { %v2125_v59 = vmul.f32 %v2081_v19, %v12459_v1 }
 0x7ab   :  { %v2141_v2 = vadd.f32 1e-05, %v2125_v59 }
 0x7ac   :  { %v1824_v24 = vpop.f32.mrf.mxu1 }
 0x7ad   :  { %7766 = vrsqrt.f32 %v2141_v2  ;;  %1853 = vrot.lane.b32.xlu0 %v1824_v24, %s8112_s9  ;;  %vm2172_vm13 = vweird.f32 %v2141_v2 }
 0x7b0   :  { %v2087_v18 = vpop.xlane.xlu1 %2086  ;;  %v2090_v52 = vpop.xlane.xlu2 %2089 }
 0x7b1   :  { %v2127_v38 = vmul.f32 %v2087_v18, %v12459_v1  ;;  %v2128_v49 = vmul.f32 %v2090_v52, %v12459_v1  ;;  %v2093_v62 = vpop.xlane.xlu0 %2092  ;;  %v2185_v18 = vsel %vm2184_vm1, %v7765_v57, %v2181_v10 }
 0x7b2   :  { %1851 = vrot.lane.b32.xlu2 %v1821_v29, %s8112_s9  ;;  %v2129_v12 = vmul.f32 %v2093_v62, %v12459_v1 }
 0x7b3   :  { %v7767_v58 = vpop.eup %7766  ;;  %v2143_v33 = vadd.f32 1e-05, %v2127_v38  ;;  %v9567_v48 = vadd.f32 1e-05, %v2128_v49 }
 0x7b4   :  { %v2167_v45 = vmul.f32 %v7767_v58, %v2141_v2  ;;  %v1827_v23 = vpop.f32.mrf.mxu1  ;;  %v9572_v16 = vadd.f32 1e-05, %v2129_v12  ;;  %vm2173_vm10 = vweird.f32 %v7767_v58  ;;  %v2318_v12 = vmul.f32 %v2185_v18, %v9443_v42 }
 0x7b5   :  { %7768 = vrsqrt.f32 %v2143_v33  ;;  %1855 = vrot.lane.b32.xlu0 %v1827_v23, %s8112_s9  ;;  %vm2174_vm14 = vmor %vm2172_vm13, %vm2173_vm10  ;;  %vm2192_vm3 = vweird.f32 %v2143_v33  ;;  %vm2202_vm7 = vweird.f32 %v9567_v48 }
 0x7b6   :  { %v2168_v0 = vmul.f32 %v7767_v58, %v2167_v45  ;;  %7770 = vrsqrt.f32 %v9567_v48  ;;  %v2335_v42 = vmul.f32 %v9551_v32, %v2318_v12  ;;  %vm2212_vm10 = vweird.f32 %v9572_v16 }
 0x7b7   :  { %7772 = vrsqrt.f32 %v9572_v16 }
 0x7b8   :  { %v2169_v27 = vmul.f32 0.5, %v2168_v0 }
 0x7b9   :  { %v2096_v44 = vpop.xlane.xlu1 %2095 }
 0x7ba   :  { %v2170_v40 = vsub.f32 1.5, %v2169_v27  ;;  %v2130_v20 = vmul.f32 %v2096_v44, %v12459_v1  ;;  %v2352_v44 = vadd.f32 %v9556_v56, %v2335_v42 }
 0x7bb   :  { %v7769_v55 = vpop.eup %7768 }
 0x7bc   :  { %v7771_v5 = vpop.eup %7770  ;;  %v2171_v46 = vmul.f32 %v7767_v58, %v2170_v40  ;;  %v2187_v29 = vmul.f32 %v7769_v55, %v2143_v33  ;;  %v1830_v63 = vpop.f32.mrf.mxu1  ;;  %v2146_v50 = vadd.f32 1e-05, %v2130_v20  ;;  %vm2193_vm2 = vweird.f32 %v7769_v55 }
 0x7bd   :  { %v2197_v19 = vmul.f32 %v7771_v5, %v9567_v48  ;;  %1857 = vrot.lane.b32.xlu1 %v1830_v63, %s8112_s9  ;;  %v7773_v49 = vpop.eup %7772  ;;  %vm2194_vm4 = vmor %vm2192_vm3, %vm2193_vm2  ;;  %vm2203_vm5 = vweird.f32 %v7771_v5 }
 0x7be   :  { %v2175_v59 = vsel %vm2174_vm14, %v7767_v58, %v2171_v46  ;;  %v2188_v61 = vmul.f32 %v7769_v55, %v2187_v29  ;;  %7774 = vrsqrt.f32 %v2146_v50  ;;  %v2207_v45 = vmul.f32 %v7773_v49, %v9572_v16  ;;  %vm2204_vm8 = vmor %vm2202_vm7, %vm2203_vm5 }
 0x7bf   :  { %v2317_v24 = vmul.f32 %v2175_v59, %v9459_v41  ;;  %v2198_v38 = vmul.f32 %v7771_v5, %v2197_v19  ;;  %vm2213_vm9 = vweird.f32 %v7773_v49  ;;  %vm2222_vm14 = vweird.f32 %v2146_v50 }
 0x7c0   :  { %v2189_v52 = vmul.f32 0.5, %v2188_v61  ;;  %v2208_v0 = vmul.f32 %v7773_v49, %v2207_v45  ;;  %vm2214_vm12 = vmor %vm2212_vm10, %vm2213_vm9 }
 0x7c1   :  { %v2334_v2 = vmul.f32 %v9551_v32, %v2317_v24  ;;  %v2199_v58 = vmul.f32 0.5, %v2198_v38 }
 0x7c2   :  { %v2190_v62 = vsub.f32 1.5, %v2189_v52  ;;  %v2209_v20 = vmul.f32 0.5, %v2208_v0 }
 0x7c3   :  { %v2351_v9 = vadd.f32 %v9556_v56, %v2334_v2  ;;  %v2200_v57 = vsub.f32 1.5, %v2199_v58 }
 0x7c4   :  { %v2191_v13 = vmul.f32 %v7769_v55, %v2190_v62  ;;  %v1833_v23 = vpop.f32.mrf.mxu1  ;;  %v7775_v39 = vpop.eup %7774  ;;  %v2210_v33 = vsub.f32 1.5, %v2209_v20 }
 0x7c5   :  { %1859 = vrot.lane.b32.xlu2 %v1833_v23, %s8112_s9  ;;  %6742 = vmatmul.msk.f32.gmra.mxu0 %vm59_vm0, %v2351_v9  ;;  %v2201_v40 = vmul.f32 %v7771_v5, %v2200_v57  ;;  %v2217_v10 = vmul.f32 %v7775_v39, %v2146_v50  ;;  %vm2223_vm13 = vweird.f32 %v7775_v39 }
 0x7c6   :  { %2639 = vrot.lane.b32.xlu1 %v9518_v35, %s8109_s26  ;;  %v2195_v41 = vsel %vm2194_vm4, %v7769_v55, %v2191_v13  ;;  %v2211_v19 = vmul.f32 %v7773_v49, %v2210_v33  ;;  %vm2224_vm15 = vmor %vm2222_vm14, %vm2223_vm13 }
 0x7c7   :  { %v2319_v27 = vmul.f32 %v2195_v41, %v9464_v53  ;;  %v2205_v35 = vsel %vm2204_vm8, %v7771_v5, %v2201_v40  ;;  %v2218_v55 = vmul.f32 %v7775_v39, %v2217_v10 }
 0x7c8   :  { %v2320_v29 = vmul.f32 %v2205_v35, %v9472_v34 }
 0x7c9   :  { %v2336_v53 = vmul.f32 %v9551_v32, %v2319_v27  ;;  %v2219_v59 = vmul.f32 0.5, %v2218_v55 }
 0x7cb   :  { %v2353_v63 = vadd.f32 %v9556_v56, %v2336_v53  ;;  %v2220_v48 = vsub.f32 1.5, %v2219_v59 }
 0x7cc   :  { %v1836_v46 = vpop.f32.mrf.mxu1 }
 0x7cd   :  { %6743 = vmatmul.msk.f32.gmra.mxu0 %vm59_vm0, %v2352_v44  ;;  %1861 = vrot.lane.b32.xlu0 %v1836_v46, %s8112_s9  ;;  %v2221_v61 = vmul.f32 %v7775_v39, %v2220_v48 }
 0x7ce   :  { %2633 = vrot.lane.b32.xlu1 %v9536_v6, %s8109_s26  ;;  %2637 = vrot.lane.b32.xlu2 %v9524_v14, %s8109_s26  ;;  %v2337_v14 = vmul.f32 %v9551_v32, %v2320_v29  ;;  %v2215_v6 = vsel %vm2214_vm12, %v7773_v49, %v2211_v19 }
 0x7cf   :  { %v2321_v5 = vmul.f32 %v2215_v6, %v9479_v37 }
 0x7d0   :  { %v2354_v34 = vadd.f32 %v9556_v56, %v2337_v14 }
 0x7d1   :  { %v2338_v24 = vmul.f32 %v9551_v32, %v2321_v5 }
 0x7d3   :  { %v2355_v18 = vadd.f32 %v9556_v56, %v2338_v24 }
 0x7d5   :  { %6744 = vmatmul.msk.f32.gmra.mxu0 %vm59_vm0, %v2353_v63  ;;  %2635 = vrot.lane.b32.xlu0 %v9530_v8, %s8109_s26  ;;  %v2225_v8 = vsel %vm2224_vm15, %v7775_v39, %v2221_v61  ;;  %v9633_v39 = vld [vmem:[%s12380_s1 + $0x6] ss:$0 sm:$0xff] }
 0x7d6   :  { %v2322_v16 = vmul.f32 %v2225_v8, %v9492_v11 }
 0x7d8   :  { %v2339_v52 = vmul.f32 %v9551_v32, %v2322_v16 }
 0x7da   :  { %v2356_v37 = vadd.f32 %v9556_v56, %v2339_v52 }
 0x7dd   :  { %6745 = vmatmul.msk.f32.gmra.mxu0 %vm59_vm0, %v2354_v34 }
 0x7e5   :  { %6746 = vmatmul.msk.f32.gmra.mxu0 %vm59_vm0, %v2355_v18 }
 0x7ec   :  { %v1848_v38 = vpop.permute.xlu0 %1847  ;;  %v1850_v50 = vpop.permute.xlu1 %1849 }
 0x7ed   :  { %v1871_v49 = vsel %vm596_vm11, %v9454_v4, %v1848_v38  ;;  %6747 = vmatmul.msk.f32.gmra.mxu0 %vm59_vm0, %v2356_v37  ;;  %v1872_v11 = vsel %vm596_vm11, %v9476_v60, %v1850_v50 }
 0x7ee   :  { %6733 = vmatmul.msk.f32.vlgmr.msra.gmra.mxu3 %vm59_vm0, %v1871_v49 }
 0x7f6   :  { %6734 = vmatmul.msk.f32.gmra.mxu3 %vm59_vm0, %v1872_v11 }
 0x80d   :  { %v2099_v2 = vpop.xlane.xlu2 %2098 }
 0x80e   :  { %v2131_v62 = vmul.f32 %v2099_v2, %v12459_v1 }
 0x810   :  { %v2147_v12 = vadd.f32 1e-05, %v2131_v62 }
 0x812   :  { %7776 = vrsqrt.f32 %v2147_v12  ;;  %vm2232_vm2 = vweird.f32 %v2147_v12 }
 0x815   :  { %v1852_v9 = vpop.permute.xlu2 %1851 }
 0x816   :  { %v1873_v13 = vsel %vm596_vm11, %v9494_v26, %v1852_v9 }
 0x817   :  { %6735 = vmatmul.msk.f32.gmra.mxu3 %vm59_vm0, %v1873_v13 }
 0x818   :  { %v7777_v4 = vpop.eup %7776 }
 0x819   :  { %v2227_v58 = vmul.f32 %v7777_v4, %v2147_v12  ;;  %vm2233_vm1 = vweird.f32 %v7777_v4 }
 0x81a   :  { %vm2234_vm3 = vmor %vm2232_vm2, %vm2233_vm1 }
 0x81b   :  { %v2228_v45 = vmul.f32 %v7777_v4, %v2227_v58 }
 0x81d   :  { %v2229_v23 = vmul.f32 0.5, %v2228_v45 }
 0x81f   :  { %v2230_v42 = vsub.f32 1.5, %v2229_v23  ;;  %v1854_v60 = vpop.permute.xlu0 %1853  ;;  %v1860_v33 = vpop.permute.xlu2 %1859 }
 0x820   :  { %v1874_v41 = vsel %vm596_vm11, %v9501_v51, %v1854_v60 }
 0x821   :  { %v2231_v57 = vmul.f32 %v7777_v4, %v2230_v42  ;;  %6736 = vmatmul.msk.f32.gmra.mxu3 %vm59_vm0, %v1874_v41 }
 0x823   :  { %v2235_v0 = vsel %vm2234_vm3, %v7777_v4, %v2231_v57 }
 0x824   :  { %v2323_v26 = vmul.f32 %v2235_v0, %v9542_v21  ;;  %v2437_v27 = vpop.f32.mrf.mxu0 }
 0x825   :  { %v2438_v20 = vadd.f32 %v9633_v39, %v2437_v27 }
 0x826   :  { %v2340_v44 = vmul.f32 %v9551_v32, %v2323_v26 }
 0x827   :  { %v1856_v40 = vpop.permute.xlu0 %1855  ;;  %v2501_v21 = vmul.f32 0.044715, %v2438_v20  ;;  %v2485_v52 = vmul.f32 0.5, %v2438_v20 }
 0x828   :  { %v1875_v51 = vsel %vm596_vm11, %v9505_v36, %v1856_v40  ;;  %v2357_v10 = vadd.f32 %v9556_v56, %v2340_v44  ;;  %v1877_v36 = vsel %vm596_vm11, %v9509_v25, %v1860_v33  ;;  %v2638_v19 = vpop.permute.xlu2 %2637 }
 0x829   :  { %6737 = vmatmul.msk.f32.gmra.mxu3 %vm59_vm0, %v1875_v51  ;;  %v2517_v53 = vmul.f32 %v2501_v21, %v2438_v20 }
 0x82a   :  { %6748 = vmatmul.msk.f32.gmra.mxu0 %vm59_vm0, %v2357_v10 }
 0x82b   :  { %v2533_v55 = vmul.f32 %v2517_v53, %v2438_v20 }
 0x82d   :  { %v2549_v29 = vadd.f32 %v2533_v55, %v2438_v20 }
 0x82f   :  { %v1858_v46 = vpop.permute.xlu1 %1857  ;;  %v2565_v59 = vmul.f32 0.7978846, %v2549_v29 }
 0x830   :  { %v1876_v35 = vsel %vm596_vm11, %v9507_v22, %v1858_v46 }
 0x831   :  { %6738 = vmatmul.msk.f32.gmra.mxu3 %vm59_vm0, %v1876_v35  ;;  %7778 = vtanh.f32 %v2565_v59 }
 0x837   :  { %v7779_v5 = vpop.eup %7778 }
 0x838   :  { %v2640_v63 = vpop.permute.xlu1 %2639  ;;  %v2597_v24 = vadd.f32 1.0, %v7779_v5 }
 0x839   :  { %6739 = vmatmul.msk.f32.gmra.mxu3 %vm59_vm0, %v1877_v36  ;;  %6757 = vmatpush.xpose.msk.msrb.mxu2 %vm670_vm6, %v2640_v63 }
 0x83d   :  { %6758 = vmatpush.xpose.msk.msrb.mxu2 %vm670_vm6, %v2638_v19 }
 0x83f   :  { %v1862_v14 = vpop.permute.xlu0 %1861 }
 0x840   :  { %v1878_v22 = vsel %vm596_vm11, %v9511_v54, %v1862_v14  ;;  %v2634_v8 = vpop.permute.xlu1 %2633  ;;  %v2613_v54 = vmul.f32 %v2597_v24, %v2485_v52 }
 0x841   :  { %6740 = vmatmul.msk.f32.gmra.mxu3 %vm59_vm0, %v1878_v22 }
 0x842   :  { %v2440_v6 = vpop.f32.mrf.mxu0 }
 0x843   :  { %v2441_v48 = vadd.f32 %v9633_v39, %v2440_v6 }
 0x845   :  { %v2502_v25 = vmul.f32 0.044715, %v2441_v48  ;;  %v2486_v45 = vmul.f32 0.5, %v2441_v48 }
 0x847   :  { %v2518_v34 = vmul.f32 %v2502_v25, %v2441_v48  ;;  %v2636_v61 = vpop.permute.xlu0 %2635 }
 0x848   :  { %6759 = vmatpush.xpose.msk.msrb.mxu2 %vm670_vm6, %v2636_v61 }
 0x849   :  { %v2534_v16 = vmul.f32 %v2518_v34, %v2441_v48 }
 0x84a   :  { %v2443_v18 = vpop.f32.mrf.mxu0 }
 0x84b   :  { %v2444_v37 = vadd.f32 %v9633_v39, %v2443_v18  ;;  %v2550_v38 = vadd.f32 %v2534_v16, %v2441_v48 }
 0x84c   :  { %6760 = vmatpush.xpose.msk.msrb.mxu2 %vm670_vm6, %v2634_v8 }
 0x84d   :  { %v2503_v49 = vmul.f32 0.044715, %v2444_v37  ;;  %v2566_v50 = vmul.f32 0.7978846, %v2550_v38  ;;  %v2487_v20 = vmul.f32 0.5, %v2444_v37  ;;  %v8058_v38 = vld [vmem:[%s12379_s0 + $0x40] sm:$0xff] }
 0x84f   :  { %v2519_v11 = vmul.f32 %v2503_v49, %v2444_v37  ;;  %6761 = vmatmul.msk.f32.vlgmr.msrb.gmra.mxu2 %vm670_vm6, %v2613_v54  ;;  %7780 = vtanh.f32 %v2566_v50 }
 0x851   :  { %v2535_v2 = vmul.f32 %v2519_v11, %v2444_v37 }
 0x852   :  { %v2446_v62 = vpop.f32.mrf.mxu0 }
 0x853   :  { %v2447_v12 = vadd.f32 %v9633_v39, %v2446_v62  ;;  %v2551_v9 = vadd.f32 %v2535_v2, %v2444_v37 }
 0x855   :  { %v7781_v13 = vpop.eup %7780  ;;  %v2504_v4 = vmul.f32 0.044715, %v2447_v12  ;;  %v2567_v58 = vmul.f32 0.7978846, %v2551_v9  ;;  %v2488_v63 = vmul.f32 0.5, %v2447_v12 }
 0x856   :  { %v2598_v23 = vadd.f32 1.0, %v7781_v13 }
 0x857   :  { %v2520_v42 = vmul.f32 %v2504_v4, %v2447_v12  ;;  %7782 = vtanh.f32 %v2567_v58  ;;  %v8059_v58 = vld [vmem:[%s12379_s0 + $0x48] sm:$0xff] }
 0x858   :  { %v2614_v60 = vmul.f32 %v2598_v23, %v2486_v45 }
 0x859   :  { %v2536_v41 = vmul.f32 %v2520_v42, %v2447_v12 }
 0x85a   :  { %v2449_v57 = vpop.f32.mrf.mxu0  ;;  %6762 = vmatmul.msk.f32.gmra.mxu2 %vm670_vm6, %v2614_v60 }
 0x85b   :  { %v2450_v0 = vadd.f32 %v9633_v39, %v2449_v57  ;;  %v2552_v26 = vadd.f32 %v2536_v41, %v2447_v12 }
 0x85d   :  { %v7783_v27 = vpop.eup %7782  ;;  %v2505_v44 = vmul.f32 0.044715, %v2450_v0  ;;  %v2568_v40 = vmul.f32 0.7978846, %v2552_v26  ;;  %v2489_v24 = vmul.f32 0.5, %v2450_v0 }
 0x85e   :  { %v2599_v51 = vadd.f32 1.0, %v7783_v27  ;;  %v8060_v27 = vld [vmem:[%s12379_s0 + $0x50] sm:$0xff] }
 0x85f   :  { %v2521_v10 = vmul.f32 %v2505_v44, %v2450_v0  ;;  %7784 = vtanh.f32 %v2568_v40 }
 0x860   :  { %v2615_v21 = vmul.f32 %v2599_v51, %v2487_v20 }
 0x861   :  { %v2537_v46 = vmul.f32 %v2521_v10, %v2450_v0  ;;  %v8061_v10 = vld [vmem:[%s12379_s0 + $0x58] sm:$0xff] }
 0x862   :  { %v2452_v53 = vpop.f32.mrf.mxu0  ;;  %6763 = vmatmul.msk.f32.gmra.mxu2 %vm670_vm6, %v2615_v21 }
 0x863   :  { %v2453_v35 = vadd.f32 %v9633_v39, %v2452_v53  ;;  %v2553_v33 = vadd.f32 %v2537_v46, %v2450_v0 }
 0x865   :  { %v7785_v55 = vpop.eup %7784  ;;  %v2506_v29 = vmul.f32 0.044715, %v2453_v35  ;;  %v2569_v36 = vmul.f32 0.7978846, %v2553_v33  ;;  %v2490_v12 = vmul.f32 0.5, %v2453_v35 }
 0x866   :  { %v2600_v19 = vadd.f32 1.0, %v7785_v55 }
 0x867   :  { %v2522_v59 = vmul.f32 %v2506_v29, %v2453_v35  ;;  %7786 = vtanh.f32 %v2569_v36 }
 0x868   :  { %v2616_v14 = vmul.f32 %v2600_v19, %v2488_v63  ;;  %v8062_v63 = vld [vmem:[%s12379_s0 + $0x60] sm:$0xff] }
 0x869   :  { %v2538_v22 = vmul.f32 %v2522_v59, %v2453_v35 }
 0x86a   :  { %v2455_v6 = vpop.f32.mrf.mxu0  ;;  %6764 = vmatmul.msk.f32.gmra.mxu2 %vm670_vm6, %v2616_v14 }
 0x86b   :  { %v2456_v48 = vadd.f32 %v9633_v39, %v2455_v6  ;;  %v2554_v25 = vadd.f32 %v2538_v22, %v2453_v35 }
 0x86d   :  { %v7787_v5 = vpop.eup %7786  ;;  %v2507_v34 = vmul.f32 0.044715, %v2456_v48  ;;  %v2570_v61 = vmul.f32 0.7978846, %v2554_v25  ;;  %v2491_v41 = vmul.f32 0.5, %v2456_v48 }
 0x86e   :  { %v2601_v8 = vadd.f32 1.0, %v7787_v5  ;;  %v8063_v5 = vld [vmem:[%s12379_s0 + $0x68] sm:$0xff] }
 0x86f   :  { %v2523_v16 = vmul.f32 %v2507_v34, %v2456_v48  ;;  %7788 = vtanh.f32 %v2570_v61 }
 0x870   :  { %v2617_v18 = vmul.f32 %v2601_v8, %v2489_v24 }
 0x871   :  { %v1920_v52 = vpop.f32.mrf.mxu3  ;;  %v2539_v37 = vmul.f32 %v2523_v16, %v2456_v48 }
 0x872   :  { %v1952_v54 = vadd.f32 %v8058_v38, %v1920_v52  ;;  %6765 = vmatmul.msk.f32.gmra.mxu2 %vm670_vm6, %v2617_v18 }
 0x873   :  { %v2555_v49 = vadd.f32 %v2539_v37, %v2456_v48  ;;  %v8064_v37 = vld [vmem:[%s12379_s0 + $0x70] sm:$0xff] }
 0x874   :  { %v9670_v50 = vadd.f32 %v9352_v47, %v1952_v54 }
 0x875   :  { %v7789_v11 = vpop.eup %7788  ;;  %v2571_v2 = vmul.f32 0.7978846, %v2555_v49  ;;  %v8065_v49 = vld [vmem:[%s12380_s1 + $0x5] ss:$0 sm:$0xff] }
 0x876   :  { %v2004_v62 = vsel %vm59_vm0, %v9670_v50, 0.0  ;;  %v2602_v9 = vadd.f32 1.0, %v7789_v11 }
 0x877   :  { %2005 = vadd.xlane.f32.xlu2 %v2004_v62  ;;  %7790 = vtanh.f32 %v2571_v2 }
 0x878   :  { %v2618_v13 = vmul.f32 %v2602_v9, %v2490_v12 }
 0x879   :  { %v1923_v4 = vpop.f32.mrf.mxu3 }
 0x87a   :  { %v1953_v45 = vadd.f32 %v8059_v58, %v1923_v4  ;;  %6766 = vmatmul.msk.f32.gmra.mxu2 %vm670_vm6, %v2618_v13  ;;  %v8066_v4 = vld [vmem:[%s12379_s0 + $0x78] sm:$0xff] }
 0x87c   :  { %v9679_v23 = vadd.f32 %v9352_v47, %v1953_v45 }
 0x87d   :  { %v7791_v42 = vpop.eup %7790 }
 0x87e   :  { %v2007_v60 = vsel %vm59_vm0, %v9679_v23, 0.0  ;;  %v2603_v57 = vadd.f32 1.0, %v7791_v42 }
 0x87f   :  { %2008 = vadd.xlane.f32.xlu0 %v2007_v60 }
 0x880   :  { %v2619_v0 = vmul.f32 %v2603_v57, %v2491_v41 }
 0x882   :  { %6767 = vmatmul.msk.f32.gmra.mxu2 %vm670_vm6, %v2619_v0 }
 0x89a   :  { %v1926_v26 = vpop.f32.mrf.mxu3 }
 0x89b   :  { %v1954_v44 = vadd.f32 %v8060_v27, %v1926_v26 }
 0x89d   :  { %v9688_v40 = vadd.f32 %v9352_v47, %v1954_v44 }
 0x89f   :  { %v2010_v20 = vsel %vm59_vm0, %v9688_v40, 0.0 }
 0x8a0   :  { %2011 = vadd.xlane.f32.xlu1 %v2010_v20 }
 0x8a4   :  { %v1929_v51 = vpop.f32.mrf.mxu3 }
 0x8a5   :  { %v1955_v21 = vadd.f32 %v8061_v10, %v1929_v51 }
 0x8a7   :  { %v9696_v46 = vadd.f32 %v9352_v47, %v1955_v21  ;;  %v2458_v53 = vpop.f32.mrf.mxu0 }
 0x8a8   :  { %v2459_v35 = vadd.f32 %v9633_v39, %v2458_v53 }
 0x8a9   :  { %v2013_v33 = vsel %vm59_vm0, %v9696_v46, 0.0 }
 0x8aa   :  { %v2508_v55 = vmul.f32 0.044715, %v2459_v35  ;;  %2014 = vadd.xlane.f32.xlu2 %v2013_v33  ;;  %v2492_v16 = vmul.f32 0.5, %v2459_v35 }
 0x8ac   :  { %v2524_v29 = vmul.f32 %v2508_v55, %v2459_v35  ;;  %v1932_v36 = vpop.f32.mrf.mxu3 }
 0x8ad   :  { %v1956_v19 = vadd.f32 %v8062_v63, %v1932_v36 }
 0x8ae   :  { %v2540_v59 = vmul.f32 %v2524_v29, %v2459_v35 }
 0x8af   :  { %v9705_v14 = vadd.f32 %v9352_v47, %v1956_v19 }
 0x8b0   :  { %v2556_v22 = vadd.f32 %v2540_v59, %v2459_v35 }
 0x8b1   :  { %v2016_v6 = vsel %vm59_vm0, %v9705_v14, 0.0 }
 0x8b2   :  { %2017 = vadd.xlane.f32.xlu0 %v2016_v6  ;;  %v2572_v48 = vmul.f32 0.7978846, %v2556_v22 }
 0x8b4   :  { %v1935_v25 = vpop.f32.mrf.mxu3  ;;  %7792 = vtanh.f32 %v2572_v48 }
 0x8b5   :  { %v1957_v34 = vadd.f32 %v8063_v5, %v1935_v25 }
 0x8b7   :  { %v9713_v61 = vadd.f32 %v9352_v47, %v1957_v34  ;;  %v9775_v34 = vld [vmem:[%s12380_s1 + $0x7] ss:$0 sm:$0xff] }
 0x8b9   :  { %v2019_v24 = vsel %vm59_vm0, %v9713_v61, 0.0 }
 0x8ba   :  { %v7793_v8 = vpop.eup %7792  ;;  %2020 = vadd.xlane.f32.xlu1 %v2019_v24 }
 0x8bb   :  { %v2604_v18 = vadd.f32 1.0, %v7793_v8 }
 0x8bc   :  { %v1938_v52 = vpop.f32.mrf.mxu3 }
 0x8bd   :  { %v1958_v38 = vadd.f32 %v8064_v37, %v1938_v52  ;;  %v2620_v54 = vmul.f32 %v2604_v18, %v2492_v16 }
 0x8bf   :  { %v9723_v47 = vadd.f32 %v8065_v49, %v1958_v38  ;;  %6768 = vmatmul.msk.f32.gmra.mxu2 %vm670_vm6, %v2620_v54 }
 0x8c1   :  { %v2022_v11 = vsel %vm59_vm0, %v9723_v47, 0.0 }
 0x8c2   :  { %2023 = vadd.xlane.f32.xlu0 %v2022_v11 }
 0x8c4   :  { %v1941_v9 = vpop.f32.mrf.mxu3 }
 0x8c5   :  { %v1959_v58 = vadd.f32 %v8066_v4, %v1941_v9 }
 0x8c7   :  { %v9739_v41 = vadd.f32 %v8065_v49, %v1959_v58 }
 0x8c9   :  { %v2025_v26 = vsel %vm59_vm0, %v9739_v41, 0.0 }
 0x8d2   :  { %v2714_v44 = vpop.f32.mrf.mxu2 }
 0x8d3   :  { %v2762_v5 = vadd.f32 %v2714_v44, %v9357_v3 }
 0x8d5   :  { %v9780_v52 = vadd.f32 %v9775_v34, %v2762_v5 }
 0x8d7   :  { %v2815_v49 = vsel %vm59_vm0, %v9780_v52, 0.0 }
 0x8dd   :  { %v2717_v20 = vpop.f32.mrf.mxu2 }
 0x8de   :  { %v2763_v4 = vadd.f32 %v2717_v20, %v9394_v30 }
 0x8e5   :  { %v2720_v33 = vpop.f32.mrf.mxu2 }
 0x8e6   :  { %v2764_v38 = vadd.f32 %v2720_v33, %v9366_v31 }
 0x8ea   :  { %v2006_v2 = vpop.xlane.xlu2 %2005 }
 0x8eb   :  { %v2036_v62 = vmul.f32 %v2006_v2, %v12459_v1 }
 0x8ed   :  { %v9730_v12 = vsub.f32 %v9670_v50, %v2036_v62  ;;  %v9763_v59 = vpop.f32.mrf.mxu2  ;;  %v9793_v62 = vadd.f32 %v9775_v34, %v2764_v38 }
 0x8ef   :  { %v2068_v13 = vmul.f32 %v9730_v12, %v9730_v12 }
 0x8f1   :  { %v2100_v45 = vsel %vm59_vm0, %v2068_v13, 0.0 }
 0x8f2   :  { %2101 = vadd.xlane.f32.xlu2 %v2100_v45  ;;  %v2009_v42 = vpop.xlane.xlu0 %2008 }
 0x8f3   :  { %v2037_v60 = vmul.f32 %v2009_v42, %v12459_v1  ;;  %v2821_v42 = vsel %vm59_vm0, %v9793_v62, 0.0 }
 0x8f5   :  { %v9742_v57 = vsub.f32 %v9679_v23, %v2037_v60  ;;  %v2726_v18 = vpop.f32.mrf.mxu2  ;;  %v9806_v60 = vadd.f32 %v9775_v34, %v2763_v4 }
 0x8f7   :  { %v2069_v0 = vmul.f32 %v9742_v57, %v9742_v57  ;;  %v2818_v30 = vsel %vm59_vm0, %v9806_v60, 0.0 }
 0x8f9   :  { %v2103_v27 = vsel %vm59_vm0, %v2069_v0, 0.0 }
 0x8fa   :  { %2026 = vadd.xlane.f32.xlu2 %v2025_v26  ;;  %2104 = vadd.xlane.f32.xlu1 %v2103_v27  ;;  %v2766_v26 = vadd.f32 %v2726_v18, %v9404_v7 }
 0x8fc   :  { %v9817_v27 = vadd.f32 %v9775_v34, %v2766_v26 }
 0x8fd   :  { %v2729_v13 = vpop.f32.mrf.mxu2 }
 0x8fe   :  { %v2767_v58 = vadd.f32 %v2729_v13, %v9410_v15 }
 0x900   :  { %v9809_v0 = vadd.f32 %v9775_v34, %v2767_v58 }
 0x902   :  { %12460 = vst [vmem:[#allocation12_spill] sm:$0xff] %v9809_v0  ;;  %v2830_v15 = vsel %vm59_vm0, %v9809_v0, 0.0 }
 0x905   :  { %v2732_v44 = vpop.f32.mrf.mxu2 }
 0x906   :  { %v2768_v20 = vadd.f32 %v2732_v44, %v9420_v17 }
 0x908   :  { %v9823_v7 = vadd.f32 %v9775_v34, %v2768_v20 }
 0x913   :  { %v2012_v51 = vpop.xlane.xlu1 %2011 }
 0x914   :  { %v2038_v10 = vmul.f32 %v2012_v51, %v12459_v1  ;;  %v2827_v51 = vsel %vm59_vm0, %v9817_v27, 0.0 }
 0x916   :  { %v9751_v21 = vsub.f32 %v9688_v40, %v2038_v10  ;;  %v2833_v10 = vsel %vm59_vm0, %v9823_v7, 0.0 }
 0x918   :  { %v2070_v53 = vmul.f32 %v9751_v21, %v9751_v21 }
 0x91a   :  { %v2106_v35 = vsel %vm59_vm0, %v2070_v53, 0.0 }
 0x91b   :  { %2107 = vadd.xlane.f32.xlu0 %v2106_v35 }
 0x91d   :  { %v2015_v55 = vpop.xlane.xlu2 %2014 }
 0x91e   :  { %v2039_v29 = vmul.f32 %v2015_v55, %v12459_v1 }
 0x920   :  { %v9758_v36 = vsub.f32 %v9696_v46, %v2039_v29 }
 0x922   :  { %v2071_v63 = vmul.f32 %v9758_v36, %v9758_v36 }
 0x924   :  { %v2109_v19 = vsel %vm59_vm0, %v2071_v63, 0.0 }
 0x925   :  { %2110 = vadd.xlane.f32.xlu1 %v2109_v19  ;;  %v2018_v22 = vpop.xlane.xlu0 %2017 }
 0x926   :  { %v2040_v6 = vmul.f32 %v2018_v22, %v12459_v1 }
 0x928   :  { %v9767_v48 = vsub.f32 %v9705_v14, %v2040_v6 }
 0x92a   :  { %v2072_v25 = vmul.f32 %v9767_v48, %v9767_v48 }
 0x92c   :  { %v2112_v24 = vsel %vm59_vm0, %v2072_v25, 0.0 }
 0x92d   :  { %v2021_v8 = vpop.xlane.xlu1 %2020  ;;  %2113 = vadd.xlane.f32.xlu2 %v2112_v24 }
 0x92e   :  { %v2041_v16 = vmul.f32 %v2021_v8, %v12459_v1  ;;  %v2765_v8 = vadd.f32 %v9763_v59, %v9391_v43 }
 0x930   :  { %v9783_v37 = vsub.f32 %v9713_v61, %v2041_v16 }
 0x932   :  { %v2073_v3 = vmul.f32 %v9783_v37, %v9783_v37 }
 0x934   :  { %v2115_v54 = vsel %vm59_vm0, %v2073_v3, 0.0 }
 0x935   :  { %2116 = vadd.xlane.f32.xlu0 %v2115_v54  ;;  %v2024_v11 = vpop.xlane.xlu0 %2023  ;;  %2816 = vadd.xlane.f32.xlu2 %v2815_v49  ;;  %v9839_v54 = vadd.f32 %v9775_v34, %v2765_v8 }
 0x936   :  { %v2042_v2 = vmul.f32 %v2024_v11, %v12459_v1 }
 0x937   :  { %v2824_v43 = vsel %vm59_vm0, %v9839_v54, 0.0 }
 0x938   :  { %v9796_v9 = vsub.f32 %v9723_v47, %v2042_v2 }
 0x93a   :  { %v2074_v31 = vmul.f32 %v9796_v9, %v9796_v9 }
 0x93c   :  { %v2118_v45 = vsel %vm59_vm0, %v2074_v31, 0.0 }
 0x93d   :  { %2119 = vadd.xlane.f32.xlu1 %v2118_v45  ;;  %2822 = vadd.xlane.f32.xlu2 %v2821_v42 }
 0x945   :  { %2819 = vadd.xlane.f32.xlu1 %v2818_v30  ;;  %2831 = vadd.xlane.f32.xlu2 %v2830_v15 }
 0x94d   :  { %2828 = vadd.xlane.f32.xlu1 %v2827_v51 }
 0x955   :  { %2834 = vadd.xlane.f32.xlu1 %v2833_v10 }
 0x965   :  { %v2102_v53 = vpop.xlane.xlu2 %2101 }
 0x966   :  { %v2132_v35 = vmul.f32 %v2102_v53, %v12459_v1 }
 0x968   :  { %v2148_v33 = vadd.f32 1e-05, %v2132_v35 }
 0x96a   :  { %7794 = vrsqrt.f32 %v2148_v33  ;;  %vm2242_vm5 = vweird.f32 %v2148_v33 }
 0x96d   :  { %v2027_v55 = vpop.xlane.xlu2 %2026  ;;  %v2105_v29 = vpop.xlane.xlu1 %2104 }
 0x96e   :  { %v2043_v17 = vmul.f32 %v2027_v55, %v12459_v1  ;;  %v2133_v63 = vmul.f32 %v2105_v29, %v12459_v1 }
 0x970   :  { %v7795_v19 = vpop.eup %7794  ;;  %v9831_v22 = vsub.f32 %v9739_v41, %v2043_v17  ;;  %v2149_v6 = vadd.f32 1e-05, %v2133_v63 }
 0x971   :  { %v2237_v25 = vmul.f32 %v7795_v19, %v2148_v33  ;;  %vm2243_vm4 = vweird.f32 %v7795_v19 }
 0x972   :  { %7796 = vrsqrt.f32 %v2149_v6  ;;  %v2075_v5 = vmul.f32 %v9831_v22, %v9831_v22  ;;  %vm2244_vm7 = vmor %vm2242_vm5, %vm2243_vm4  ;;  %vm2252_vm9 = vweird.f32 %v2149_v6 }
 0x973   :  { %v2238_v24 = vmul.f32 %v7795_v19, %v2237_v25 }
 0x974   :  { %v2121_v16 = vsel %vm59_vm0, %v2075_v5, 0.0 }
 0x975   :  { %v2239_v18 = vmul.f32 0.5, %v2238_v24  ;;  %2122 = vadd.xlane.f32.xlu0 %v2121_v16 }
 0x977   :  { %v2240_v3 = vsub.f32 1.5, %v2239_v18 }
 0x978   :  { %v7797_v38 = vpop.eup %7796 }
 0x979   :  { %v2241_v49 = vmul.f32 %v7795_v19, %v2240_v3  ;;  %v2247_v11 = vmul.f32 %v7797_v38, %v2149_v6  ;;  %vm2253_vm8 = vweird.f32 %v7797_v38 }
 0x97a   :  { %vm2254_vm10 = vmor %vm2252_vm9, %vm2253_vm8 }
 0x97b   :  { %v2245_v2 = vsel %vm2244_vm7, %v7795_v19, %v2241_v49  ;;  %v2248_v13 = vmul.f32 %v7797_v38, %v2247_v11 }
 0x97c   :  { %v2324_v31 = vmul.f32 %v2245_v2, %v9730_v12 }
 0x97d   :  { %v2249_v59 = vmul.f32 0.5, %v2248_v13  ;;  %2825 = vadd.xlane.f32.xlu0 %v2824_v43 }
 0x97e   :  { %v2341_v4 = vmul.f32 %v9551_v32, %v2324_v31 }
 0x97f   :  { %v2250_v58 = vsub.f32 1.5, %v2249_v59 }
 0x980   :  { %v2358_v45 = vadd.f32 %v9556_v56, %v2341_v4 }
 0x981   :  { %v2251_v42 = vmul.f32 %v7797_v38, %v2250_v58 }
 0x982   :  { %6749 = vmatmul.msk.f32.gmra.mxu0 %vm59_vm0, %v2358_v45 }
 0x983   :  { %v2255_v26 = vsel %vm2254_vm10, %v7797_v38, %v2251_v42 }
 0x984   :  { %v2325_v30 = vmul.f32 %v2255_v26, %v9742_v57 }
 0x986   :  { %v2342_v12 = vmul.f32 %v9551_v32, %v2325_v30 }
 0x988   :  { %v2359_v15 = vadd.f32 %v9556_v56, %v2342_v12 }
 0x98a   :  { %6750 = vmatmul.msk.f32.gmra.mxu0 %vm59_vm0, %v2359_v15 }
 0x98e   :  { %v2108_v44 = vpop.xlane.xlu0 %2107 }
 0x98f   :  { %v2134_v20 = vmul.f32 %v2108_v44, %v12459_v1 }
 0x991   :  { %v2150_v51 = vadd.f32 1e-05, %v2134_v20 }
 0x993   :  { %7798 = vrsqrt.f32 %v2150_v51  ;;  %vm2262_vm13 = vweird.f32 %v2150_v51 }
 0x998   :  { %v2111_v10 = vpop.xlane.xlu1 %2110 }
 0x999   :  { %v7799_v53 = vpop.eup %7798  ;;  %v2135_v35 = vmul.f32 %v2111_v10, %v12459_v1 }
 0x99a   :  { %v2257_v33 = vmul.f32 %v7799_v53, %v2150_v51  ;;  %vm2263_vm12 = vweird.f32 %v7799_v53 }
 0x99b   :  { %v2151_v55 = vadd.f32 1e-05, %v2135_v35  ;;  %vm2264_vm14 = vmor %vm2262_vm13, %vm2263_vm12 }
 0x99c   :  { %v2258_v29 = vmul.f32 %v7799_v53, %v2257_v33 }
 0x99d   :  { %7800 = vrsqrt.f32 %v2151_v55  ;;  %vm2272_vm1 = vweird.f32 %v2151_v55 }
 0x99e   :  { %v2259_v57 = vmul.f32 0.5, %v2258_v29 }
 0x9a0   :  { %v2260_v17 = vsub.f32 1.5, %v2259_v57  ;;  %v2114_v63 = vpop.xlane.xlu2 %2113 }
 0x9a1   :  { %v2136_v19 = vmul.f32 %v2114_v63, %v12459_v1 }
 0x9a2   :  { %v2261_v6 = vmul.f32 %v7799_v53, %v2260_v17 }
 0x9a3   :  { %v7801_v25 = vpop.eup %7800  ;;  %v2152_v5 = vadd.f32 1e-05, %v2136_v19 }
 0x9a4   :  { %v2265_v24 = vsel %vm2264_vm14, %v7799_v53, %v2261_v6  ;;  %v2267_v8 = vmul.f32 %v7801_v25, %v2151_v55  ;;  %vm2273_vm15 = vweird.f32 %v7801_v25 }
 0x9a5   :  { %v2326_v16 = vmul.f32 %v2265_v24, %v9751_v21  ;;  %7802 = vrsqrt.f32 %v2152_v5  ;;  %v2735_v21 = vpop.f32.mrf.mxu2  ;;  %vm2274_vm2 = vmor %vm2272_vm1, %vm2273_vm15  ;;  %vm2282_vm4 = vweird.f32 %v2152_v5 }
 0x9a6   :  { %v2268_v18 = vmul.f32 %v7801_v25, %v2267_v8  ;;  %v2769_v15 = vadd.f32 %v2735_v21, %v9440_v28 }
 0x9a7   :  { %v2343_v3 = vmul.f32 %v9551_v32, %v2326_v16 }
 0x9a8   :  { %v2269_v38 = vmul.f32 0.5, %v2268_v18  ;;  %v2117_v49 = vpop.xlane.xlu0 %2116  ;;  %v2817_v11 = vpop.xlane.xlu2 %2816  ;;  %v9872_v17 = vadd.f32 %v9775_v34, %v2769_v15 }
 0x9a9   :  { %v2137_v2 = vmul.f32 %v2117_v49, %v12459_v1  ;;  %v2863_v13 = vmul.f32 %v2817_v11, %v12459_v1  ;;  %v2360_v31 = vadd.f32 %v9556_v56, %v2343_v3  ;;  %v9890_v49 = vld [vmem:[%s12380_s1 + $0x2] ss:$0 sm:$0xff] }
 0x9aa   :  { %v2270_v43 = vsub.f32 1.5, %v2269_v38  ;;  %12461 = vst [vmem:[#allocation11_spill] sm:$0xff] %v9872_v17  ;;  %v2836_v16 = vsel %vm59_vm0, %v9872_v17, 0.0 }
 0x9ab   :  { %v7803_v59 = vpop.eup %7802  ;;  %v2153_v4 = vadd.f32 1e-05, %v2137_v2  ;;  %v9860_v58 = vsub.f32 %v9780_v52, %v2863_v13  ;;  %6751 = vmatmul.msk.f32.gmra.mxu0 %vm59_vm0, %v2360_v31 }
 0x9ac   :  { %v2271_v45 = vmul.f32 %v7801_v25, %v2270_v43  ;;  %v2277_v42 = vmul.f32 %v7803_v59, %v2152_v5  ;;  %vm2283_vm3 = vweird.f32 %v7803_v59  ;;  %v9902_v43 = vld [vmem:[%s12380_s1 + $0x3] ss:$0 sm:$0xff] }
 0x9ad   :  { %7804 = vrsqrt.f32 %v2153_v4  ;;  %v2895_v26 = vmul.f32 %v9860_v58, %v9860_v58  ;;  %vm2284_vm5 = vmor %vm2282_vm4, %vm2283_vm3  ;;  %vm2292_vm8 = vweird.f32 %v2153_v4 }
 0x9ae   :  { %v2275_v30 = vsel %vm2274_vm2, %v7801_v25, %v2271_v45  ;;  %v2278_v12 = vmul.f32 %v7803_v59, %v2277_v42 }
 0x9af   :  { %v2327_v44 = vmul.f32 %v2275_v30, %v9758_v36  ;;  %v2911_v20 = vsel %vm59_vm0, %v2895_v26, 0.0 }
 0x9b0   :  { %v2279_v51 = vmul.f32 0.5, %v2278_v12  ;;  %v2120_v10 = vpop.xlane.xlu1 %2119  ;;  %v2823_v53 = vpop.xlane.xlu2 %2822  ;;  %2912 = vadd.xlane.f32.xlu0 %v2911_v20 }
 0x9b1   :  { %v2138_v35 = vmul.f32 %v2120_v10, %v12459_v1  ;;  %v2865_v33 = vmul.f32 %v2823_v53, %v12459_v1  ;;  %v2344_v55 = vmul.f32 %v9551_v32, %v2327_v44 }
 0x9b2   :  { %v2280_v29 = vsub.f32 1.5, %v2279_v51 }
 0x9b3   :  { %v7805_v57 = vpop.eup %7804  ;;  %v2154_v28 = vadd.f32 1e-05, %v2138_v35  ;;  %v9875_v36 = vsub.f32 %v9793_v62, %v2865_v33  ;;  %v2361_v63 = vadd.f32 %v9556_v56, %v2344_v55 }
 0x9b4   :  { %v2281_v19 = vmul.f32 %v7803_v59, %v2280_v29  ;;  %v2287_v6 = vmul.f32 %v7805_v57, %v2153_v4  ;;  %vm2293_vm7 = vweird.f32 %v7805_v57 }
 0x9b5   :  { %7806 = vrsqrt.f32 %v2154_v28  ;;  %6752 = vmatmul.msk.f32.gmra.mxu0 %vm59_vm0, %v2361_v63  ;;  %v2897_v32 = vmul.f32 %v9875_v36, %v9875_v36  ;;  %vm2294_vm9 = vmor %vm2292_vm8, %vm2293_vm7  ;;  %vm2302_vm12 = vweird.f32 %v2154_v28 }
 0x9b6   :  { %v2285_v25 = vsel %vm2284_vm5, %v7803_v59, %v2281_v19  ;;  %v2288_v24 = vmul.f32 %v7805_v57, %v2287_v6 }
 0x9b7   :  { %v2328_v34 = vmul.f32 %v2285_v25, %v9767_v48  ;;  %v2917_v8 = vsel %vm59_vm0, %v2897_v32, 0.0 }
 0x9b8   :  { %v2289_v56 = vmul.f32 0.5, %v2288_v24  ;;  %v2820_v18 = vpop.xlane.xlu1 %2819  ;;  %v2832_v5 = vpop.xlane.xlu2 %2831  ;;  %2918 = vadd.xlane.f32.xlu1 %v2917_v8  ;;  %2837 = vadd.xlane.f32.xlu0 %v2836_v16 }
 0x9b9   :  { %v2864_v3 = vmul.f32 %v2820_v18, %v12459_v1  ;;  %v2868_v38 = vmul.f32 %v2832_v5, %v12459_v1  ;;  %v2345_v48 = vmul.f32 %v9890_v49, %v2328_v34 }
 0x9ba   :  { %v2290_v11 = vsub.f32 1.5, %v2289_v56 }
 0x9bb   :  { %v7807_v2 = vpop.eup %7806  ;;  %v9894_v13 = vsub.f32 %v9806_v60, %v2864_v3  ;;  %v9897_v31 = vsub.f32 %v9809_v0, %v2868_v38  ;;  %v2362_v59 = vadd.f32 %v9902_v43, %v2345_v48 }
 0x9bc   :  { %v2291_v21 = vmul.f32 %v7805_v57, %v2290_v11  ;;  %v2297_v45 = vmul.f32 %v7807_v2, %v2154_v28  ;;  %vm2303_vm10 = vweird.f32 %v7807_v2 }
 0x9bd   :  { %6753 = vmatmul.msk.f32.gmra.mxu0 %vm59_vm0, %v2362_v59  ;;  %v2896_v42 = vmul.f32 %v9894_v13, %v9894_v13  ;;  %v2900_v26 = vmul.f32 %v9897_v31, %v9897_v31  ;;  %vm2304_vm13 = vmor %vm2302_vm12, %vm2303_vm10 }
 0x9be   :  { %v2295_v30 = vsel %vm2294_vm9, %v7805_v57, %v2291_v21  ;;  %v2298_v12 = vmul.f32 %v7807_v2, %v2297_v45 }
 0x9bf   :  { %v2329_v15 = vmul.f32 %v2295_v30, %v9783_v37  ;;  %v2914_v44 = vsel %vm59_vm0, %v2896_v42, 0.0  ;;  %v2926_v20 = vsel %vm59_vm0, %v2900_v26, 0.0 }
 0x9c0   :  { %v2299_v51 = vmul.f32 0.5, %v2298_v12  ;;  %v2829_v4 = vpop.xlane.xlu1 %2828  ;;  %2915 = vadd.xlane.f32.xlu2 %v2914_v44  ;;  %2927 = vadd.xlane.f32.xlu1 %v2926_v20 }
 0x9c1   :  { %v2867_v10 = vmul.f32 %v2829_v4, %v12459_v1  ;;  %v2346_v53 = vmul.f32 %v9890_v49, %v2329_v15 }
 0x9c2   :  { %v2300_v35 = vsub.f32 1.5, %v2299_v51 }
 0x9c3   :  { %v9916_v33 = vsub.f32 %v9817_v27, %v2867_v10  ;;  %v2363_v55 = vadd.f32 %v9902_v43, %v2346_v53 }
 0x9c4   :  { %v2301_v37 = vmul.f32 %v7807_v2, %v2300_v35 }
 0x9c5   :  { %6754 = vmatmul.msk.f32.gmra.mxu0 %vm59_vm0, %v2363_v55  ;;  %v2899_v29 = vmul.f32 %v9916_v33, %v9916_v33 }
 0x9c6   :  { %v2305_v57 = vsel %vm2304_vm13, %v7807_v2, %v2301_v37 }
 0x9c7   :  { %v2330_v63 = vmul.f32 %v2305_v57, %v9796_v9  ;;  %v2923_v19 = vsel %vm59_vm0, %v2899_v29, 0.0 }
 0x9c8   :  { %2924 = vadd.xlane.f32.xlu0 %v2923_v19  ;;  %v2835_v34 = vpop.xlane.xlu1 %2834 }
 0x9c9   :  { %v2347_v6 = vmul.f32 %v9890_v49, %v2330_v63  ;;  %v2869_v9 = vmul.f32 %v2835_v34, %v12459_v1 }
 0x9cb   :  { %v2364_v32 = vadd.f32 %v9902_v43, %v2347_v6  ;;  %v9936_v48 = vsub.f32 %v9823_v7, %v2869_v9  ;;  %v9971_v9 = vld [vmem:[%s12381_s2 + $0x40] sm:$0xff] }
 0x9cd   :  { %6755 = vmatmul.msk.f32.gmra.mxu0 %vm59_vm0, %v2364_v32  ;;  %v2901_v21 = vmul.f32 %v9936_v48, %v9936_v48 }
 0x9cf   :  { %v2929_v12 = vsel %vm59_vm0, %v2901_v21, 0.0 }
 0x9e8   :  { %v2123_v25 = vpop.xlane.xlu0 %2122 }
 0x9e9   :  { %v2139_v28 = vmul.f32 %v2123_v25, %v12459_v1  ;;  %v9952_v25 = vld [vmem:[%s12381_s2 + $0x70] sm:$0xff] }
 0x9ea   :  { %3268 = vmatpush.msrb.mxu1 %v9952_v25 }
 0x9eb   :  { %v2155_v24 = vadd.f32 1e-05, %v2139_v28 }
 0x9ed   :  { %7808 = vrsqrt.f32 %v2155_v24  ;;  %vm2312_vm15 = vweird.f32 %v2155_v24 }
 0x9f0   :  { %v2826_v8 = vpop.xlane.xlu0 %2825 }
 0x9f1   :  { %v2866_v16 = vmul.f32 %v2826_v8, %v12459_v1  ;;  %v9958_v8 = vld [vmem:[%s12381_s2 + $0x60] sm:$0xff] }
 0x9f2   :  { %3269 = vmatpush.msrb.mxu1 %v9958_v8 }
 0x9f3   :  { %v7809_v56 = vpop.eup %7808  ;;  %v9931_v18 = vsub.f32 %v9839_v54, %v2866_v16 }
 0x9f4   :  { %v2307_v5 = vmul.f32 %v7809_v56, %v2155_v24  ;;  %vm2313_vm14 = vweird.f32 %v7809_v56 }
 0x9f5   :  { %v2898_v3 = vmul.f32 %v9931_v18, %v9931_v18  ;;  %vm2314_vm1 = vmor %vm2312_vm15, %vm2313_vm14 }
 0x9f6   :  { %v2308_v38 = vmul.f32 %v7809_v56, %v2307_v5 }
 0x9f7   :  { %v2920_v11 = vsel %vm59_vm0, %v2898_v3, 0.0 }
 0x9f8   :  { %v2309_v2 = vmul.f32 0.5, %v2308_v38  ;;  %2921 = vadd.xlane.f32.xlu2 %v2920_v11 }
 0x9fa   :  { %v2310_v59 = vsub.f32 1.5, %v2309_v2 }
 0x9fc   :  { %v2311_v45 = vmul.f32 %v7809_v56, %v2310_v59 }
 0x9fe   :  { %v2315_v42 = vsel %vm2314_vm1, %v7809_v56, %v2311_v45  ;;  %v9964_v56 = vld [vmem:[%s12381_s2 + $0x50] sm:$0xff] }
 0x9ff   :  { %v2331_v26 = vmul.f32 %v2315_v42, %v9831_v22  ;;  %v2461_v30 = vpop.f32.mrf.mxu0  ;;  %3270 = vmatpush.msrb.mxu1 %v9964_v56 }
 0xa00   :  { %v2462_v15 = vadd.f32 %v9633_v39, %v2461_v30  ;;  %2930 = vadd.xlane.f32.xlu2 %v2929_v12 }
 0xa01   :  { %v2348_v44 = vmul.f32 %v9890_v49, %v2331_v26  ;;  %3271 = vmatpush.msrb.mxu1 %v9971_v9 }
 0xa02   :  { %v2509_v20 = vmul.f32 0.044715, %v2462_v15  ;;  %v2493_v49 = vmul.f32 0.5, %v2462_v15 }
 0xa03   :  { %v2365_v51 = vadd.f32 %v9902_v43, %v2348_v44 }
 0xa04   :  { %v2525_v4 = vmul.f32 %v2509_v20, %v2462_v15 }
 0xa05   :  { %6756 = vmatmul.msk.f32.gmra.mxu0 %vm59_vm0, %v2365_v51 }
 0xa06   :  { %v2541_v10 = vmul.f32 %v2525_v4, %v2462_v15 }
 0xa07   :  { %v2464_v53 = vpop.f32.mrf.mxu0 }
 0xa08   :  { %v2465_v35 = vadd.f32 %v9633_v39, %v2464_v53  ;;  %v2557_v55 = vadd.f32 %v2541_v10, %v2462_v15 }
 0xa0a   :  { %v2510_v22 = vmul.f32 0.044715, %v2465_v35  ;;  %v2573_v37 = vmul.f32 0.7978846, %v2557_v55  ;;  %v2494_v24 = vmul.f32 0.5, %v2465_v35 }
 0xa0c   :  { %v2526_v29 = vmul.f32 %v2510_v22, %v2465_v35  ;;  %7810 = vtanh.f32 %v2573_v37 }
 0xa0e   :  { %v2542_v57 = vmul.f32 %v2526_v29, %v2465_v35 }
 0xa10   :  { %v2558_v63 = vadd.f32 %v2542_v57, %v2465_v35 }
 0xa12   :  { %v7811_v19 = vpop.eup %7810  ;;  %v2574_v6 = vmul.f32 0.7978846, %v2558_v63 }
 0xa13   :  { %v2605_v32 = vadd.f32 1.0, %v7811_v19 }
 0xa14   :  { %7812 = vtanh.f32 %v2574_v6 }
 0xa15   :  { %v2621_v43 = vmul.f32 %v2605_v32, %v2493_v49 }
 0xa17   :  { %6769 = vmatmul.msk.f32.gmra.mxu2 %vm670_vm6, %v2621_v43 }
 0xa1a   :  { %v7813_v28 = vpop.eup %7812 }
 0xa1b   :  { %v2606_v34 = vadd.f32 1.0, %v7813_v28 }
 0xa1d   :  { %v2622_v16 = vmul.f32 %v2606_v34, %v2494_v24 }
 0xa1f   :  { %6770 = vmatmul.msk.f32.gmra.mxu2 %vm670_vm6, %v2622_v16 }
 0xa23   :  { %v2913_v5 = vpop.xlane.xlu0 %2912 }
 0xa24   :  { %v2959_v3 = vmul.f32 %v2913_v5, %v12459_v1 }
 0xa26   :  { %v2975_v38 = vadd.f32 1e-05, %v2959_v3 }
 0xa28   :  { %7814 = vrsqrt.f32 %v2975_v38  ;;  %v2467_v11 = vpop.f32.mrf.mxu0  ;;  %vm2997_vm3 = vweird.f32 %v2975_v38 }
 0xa29   :  { %v2468_v2 = vadd.f32 %v9633_v39, %v2467_v11 }
 0xa2b   :  { %v2511_v59 = vmul.f32 0.044715, %v2468_v2  ;;  %v2919_v21 = vpop.xlane.xlu1 %2918  ;;  %v2838_v45 = vpop.xlane.xlu0 %2837 }
 0xa2c   :  { %v2961_v26 = vmul.f32 %v2919_v21, %v12459_v1  ;;  %v2870_v30 = vmul.f32 %v2838_v45, %v12459_v1 }
 0xa2d   :  { %v2527_v12 = vmul.f32 %v2511_v59, %v2468_v2 }
 0xa2e   :  { %v7815_v15 = vpop.eup %7814  ;;  %v9980_v44 = vadd.f32 1e-05, %v2961_v26  ;;  %v9983_v20 = vsub.f32 %v9872_v17, %v2870_v30  ;;  %v10012_v26 = vld [vmem:[%s12380_s1 + $0x6] ss:$0 sm:$0xff] }
 0xa2f   :  { %v2992_v51 = vmul.f32 %v7815_v15, %v2975_v38  ;;  %v2543_v4 = vmul.f32 %v2527_v12, %v2468_v2  ;;  %vm2998_vm2 = vweird.f32 %v7815_v15  ;;  %v10006_v38 = vld [vmem:[%s12380_s1 + $0x9] ss:$0 sm:$0xff] }
 0xa30   :  { %7816 = vrsqrt.f32 %v9980_v44  ;;  %v2902_v10 = vmul.f32 %v9983_v20, %v9983_v20  ;;  %vm2999_vm4 = vmor %vm2997_vm3, %vm2998_vm2  ;;  %vm3017_vm10 = vweird.f32 %v9980_v44 }
 0xa31   :  { %v2993_v53 = vmul.f32 %v7815_v15, %v2992_v51  ;;  %v2559_v35 = vadd.f32 %v2543_v4, %v2468_v2 }
 0xa32   :  { %v2470_v55 = vpop.f32.mrf.mxu0  ;;  %v2932_v22 = vsel %vm59_vm0, %v2902_v10, 0.0 }
 0xa33   :  { %v2994_v29 = vmul.f32 0.5, %v2993_v53  ;;  %v2471_v57 = vadd.f32 %v9633_v39, %v2470_v55  ;;  %v2916_v63 = vpop.xlane.xlu2 %2915  ;;  %2933 = vadd.xlane.f32.xlu0 %v2932_v22  ;;  %v2575_v19 = vmul.f32 0.7978846, %v2559_v35  ;;  %v10000_v39 = vld [vmem:[%s12380_s1 + $0x8] ss:$0 sm:$0xff] }
 0xa34   :  { %v2960_v6 = vmul.f32 %v2916_v63, %v12459_v1 }
 0xa35   :  { %v2995_v49 = vsub.f32 1.5, %v2994_v29  ;;  %v2512_v32 = vmul.f32 0.044715, %v2471_v57  ;;  %7818 = vtanh.f32 %v2575_v19 }
 0xa36   :  { %v9993_v43 = vpop.eup %7816  ;;  %v2976_v28 = vadd.f32 1e-05, %v2960_v6 }
 0xa37   :  { %v2996_v24 = vmul.f32 %v7815_v15, %v2995_v49  ;;  %v3012_v34 = vmul.f32 %v9993_v43, %v9980_v44  ;;  %v2528_v16 = vmul.f32 %v2512_v32, %v2471_v57  ;;  %vm3018_vm7 = vweird.f32 %v9993_v43 }
 0xa38   :  { %7820 = vrsqrt.f32 %v2976_v28  ;;  %vm3007_vm8 = vweird.f32 %v2976_v28  ;;  %vm3019_vm12 = vmor %vm3017_vm10, %vm3018_vm7 }
 0xa39   :  { %v3000_v5 = vsel %vm2999_vm4, %v7815_v15, %v2996_v24  ;;  %v2544_v3 = vmul.f32 %v2528_v16, %v2471_v57  ;;  %v3013_v45 = vmul.f32 %v9993_v43, %v3012_v34 }
 0xa3a   :  { %v3151_v11 = vmul.f32 %v3000_v5, %v9860_v58  ;;  %v2473_v59 = vpop.f32.mrf.mxu0  ;;  %v2495_v58 = vmul.f32 0.5, %v2468_v2 }
 0xa3b   :  { %v7819_v21 = vpop.eup %7818  ;;  %v2474_v30 = vadd.f32 %v10012_v26, %v2473_v59  ;;  %v2560_v12 = vadd.f32 %v2544_v3, %v2471_v57  ;;  %v3014_v22 = vmul.f32 0.5, %v3013_v45 }
 0xa3c   :  { %v3168_v15 = vmul.f32 %v10000_v39, %v3151_v11  ;;  %v2607_v51 = vadd.f32 1.0, %v7819_v21 }
 0xa3d   :  { %v2513_v4 = vmul.f32 0.044715, %v2474_v30  ;;  %v2576_v10 = vmul.f32 0.7978846, %v2560_v12  ;;  %v3015_v32 = vsub.f32 1.5, %v3014_v22  ;;  %v2496_v12 = vmul.f32 0.5, %v2471_v57 }
 0xa3e   :  { %v7821_v53 = vpop.eup %7820  ;;  %v2623_v35 = vmul.f32 %v2607_v51, %v2495_v58  ;;  %v3185_v55 = vadd.f32 %v10006_v38, %v3168_v15 }
 0xa3f   :  { %v3002_v29 = vmul.f32 %v7821_v53, %v2976_v28  ;;  %v2529_v63 = vmul.f32 %v2513_v4, %v2474_v30  ;;  %7822 = vtanh.f32 %v2576_v10  ;;  %vm3008_vm5 = vweird.f32 %v7821_v53 }
 0xa40   :  { %6771 = vmatmul.msk.f32.gmra.mxu2 %vm670_vm6, %v2623_v35  ;;  %6789 = vmatmul.msk.f32.vlgmr.msrb.gmra.mxu1 %vm59_vm0, %v3185_v55  ;;  %v3016_v59 = vmul.f32 %v9993_v43, %v3015_v32  ;;  %vm3009_vm9 = vmor %vm3007_vm8, %vm3008_vm5 }
 0xa41   :  { %v3003_v19 = vmul.f32 %v7821_v53, %v3002_v29  ;;  %v2545_v6 = vmul.f32 %v2529_v63, %v2474_v30 }
 0xa42   :  { %v2476_v49 = vpop.f32.mrf.mxu0  ;;  %v3020_v55 = vsel %vm3019_vm12, %v9993_v43, %v3016_v59  ;;  %v2925_v59 = vpop.xlane.xlu0 %2924 }
 0xa43   :  { %v3004_v2 = vmul.f32 0.5, %v3003_v19  ;;  %v2477_v24 = vadd.f32 %v10012_v26, %v2476_v49  ;;  %v2561_v34 = vadd.f32 %v2545_v6, %v2474_v30  ;;  %v3153_v44 = vmul.f32 %v3020_v55, %v9875_v36 }
 0xa45   :  { %v3005_v16 = vsub.f32 1.5, %v3004_v2  ;;  %v2514_v5 = vmul.f32 0.044715, %v2477_v24  ;;  %v2577_v3 = vmul.f32 0.7978846, %v2561_v34  ;;  %v7823_v11 = vpop.eup %7822  ;;  %v3170_v2 = vmul.f32 %v10000_v39, %v3153_v44 }
 0xa46   :  { %v2608_v15 = vadd.f32 1.0, %v7823_v11  ;;  %v2498_v36 = vmul.f32 0.5, %v2477_v24 }
 0xa47   :  { %v3006_v21 = vmul.f32 %v7821_v53, %v3005_v16  ;;  %v2530_v45 = vmul.f32 %v2514_v5, %v2477_v24  ;;  %7824 = vtanh.f32 %v2577_v3  ;;  %v3187_v3 = vadd.f32 %v10006_v38, %v3170_v2 }
 0xa48   :  { %v2624_v35 = vmul.f32 %v2608_v15, %v2496_v12 }
 0xa49   :  { %v3010_v58 = vsel %vm3009_vm9, %v7821_v53, %v3006_v21  ;;  %v2546_v51 = vmul.f32 %v2530_v45, %v2477_v24  ;;  %v2963_v45 = vmul.f32 %v2925_v59, %v12459_v1 }
 0xa4a   :  { %v3152_v4 = vmul.f32 %v3010_v58, %v9894_v13  ;;  %v2479_v10 = vpop.f32.mrf.mxu0  ;;  %6772 = vmatmul.msk.f32.gmra.mxu2 %vm670_vm6, %v2624_v35  ;;  %v2497_v13 = vmul.f32 0.5, %v2474_v30 }
 0xa4b   :  { %v2480_v22 = vadd.f32 %v10012_v26, %v2479_v10  ;;  %v2562_v29 = vadd.f32 %v2546_v51, %v2477_v24  ;;  %v2928_v51 = vpop.xlane.xlu1 %2927 }
 0xa4c   :  { %v3169_v57 = vmul.f32 %v10000_v39, %v3152_v4  ;;  %v2979_v4 = vadd.f32 1e-05, %v2963_v45  ;;  %v2964_v24 = vmul.f32 %v2928_v51, %v12459_v1 }
 0xa4d   :  { %v2515_v28 = vmul.f32 0.044715, %v2480_v22  ;;  %v2578_v63 = vmul.f32 0.7978846, %v2562_v29  ;;  %v7825_v19 = vpop.eup %7824  ;;  %v2499_v12 = vmul.f32 0.5, %v2480_v22 }
 0xa4e   :  { %v3186_v53 = vadd.f32 %v10006_v38, %v3169_v57  ;;  %v2609_v49 = vadd.f32 1.0, %v7825_v19  ;;  %v2980_v10 = vadd.f32 1e-05, %v2964_v24  ;;  %vm3037_vm2 = vweird.f32 %v2979_v4 }
 0xa4f   :  { %v2531_v6 = vmul.f32 %v2515_v28, %v2480_v22  ;;  %7826 = vtanh.f32 %v2578_v63 }
 0xa50   :  { %6790 = vmatmul.msk.f32.gmra.mxu1 %vm59_vm0, %v3186_v53  ;;  %v2625_v43 = vmul.f32 %v2609_v49, %v2497_v13  ;;  %vm3047_vm5 = vweird.f32 %v2980_v10 }
 0xa51   :  { %v2547_v32 = vmul.f32 %v2531_v6, %v2480_v22 }
 0xa52   :  { %6773 = vmatmul.msk.f32.gmra.mxu2 %vm670_vm6, %v2625_v43 }
 0xa53   :  { %v2563_v34 = vadd.f32 %v2547_v32, %v2480_v22 }
 0xa55   :  { %v7827_v16 = vpop.eup %7826  ;;  %v2579_v5 = vmul.f32 0.7978846, %v2563_v34 }
 0xa56   :  { %v2610_v11 = vadd.f32 1.0, %v7827_v16 }
 0xa57   :  { %7828 = vtanh.f32 %v2579_v5 }
 0xa58   :  { %6791 = vmatmul.msk.f32.gmra.mxu1 %vm59_vm0, %v3187_v3  ;;  %v2626_v30 = vmul.f32 %v2610_v11, %v2498_v36  ;;  %7830 = vrsqrt.f32 %v2979_v4 }
 0xa59   :  { %7832 = vrsqrt.f32 %v2980_v10 }
 0xa5a   :  { %6774 = vmatmul.msk.f32.gmra.mxu2 %vm670_vm6, %v2626_v30 }
 0xa5d   :  { %v7829_v21 = vpop.eup %7828 }
 0xa5e   :  { %v2611_v15 = vadd.f32 1.0, %v7829_v21  ;;  %v7831_v55 = vpop.eup %7830 }
 0xa5f   :  { %v3032_v28 = vmul.f32 %v7831_v55, %v2979_v4  ;;  %v7833_v63 = vpop.eup %7832  ;;  %vm3038_vm14 = vweird.f32 %v7831_v55 }
 0xa60   :  { %v2627_v58 = vmul.f32 %v2611_v15, %v2499_v12  ;;  %v3042_v6 = vmul.f32 %v7833_v63, %v2980_v10  ;;  %vm3039_vm3 = vmor %vm3037_vm2, %vm3038_vm14  ;;  %vm3048_vm4 = vweird.f32 %v7833_v63 }
 0xa61   :  { %v3033_v22 = vmul.f32 %v7831_v55, %v3032_v28  ;;  %vm3049_vm7 = vmor %vm3047_vm5, %vm3048_vm4 }
 0xa62   :  { %6775 = vmatmul.msk.f32.gmra.mxu2 %vm670_vm6, %v2627_v58  ;;  %v3043_v2 = vmul.f32 %v7833_v63, %v3042_v6 }
 0xa63   :  { %v3034_v49 = vmul.f32 0.5, %v3033_v22 }
 0xa64   :  { %v3044_v36 = vmul.f32 0.5, %v3043_v2 }
 0xa65   :  { %v3035_v34 = vsub.f32 1.5, %v3034_v49 }
 0xa66   :  { %v3045_v15 = vsub.f32 1.5, %v3044_v36 }
 0xa67   :  { %v3036_v11 = vmul.f32 %v7831_v55, %v3035_v34 }
 0xa68   :  { %v3046_v22 = vmul.f32 %v7833_v63, %v3045_v15 }
 0xa69   :  { %v3040_v58 = vsel %vm3039_vm3, %v7831_v55, %v3036_v11 }
 0xa6a   :  { %v3155_v28 = vmul.f32 %v3040_v58, %v9916_v33 }
 0xa6b   :  { %v2922_v35 = vpop.xlane.xlu2 %2921 }
 0xa6c   :  { %v2962_v29 = vmul.f32 %v2922_v35, %v12459_v1  ;;  %v3172_v55 = vmul.f32 %v10000_v39, %v3155_v28 }
 0xa6e   :  { %v2978_v57 = vadd.f32 1e-05, %v2962_v29  ;;  %v3189_v33 = vadd.f32 %v10006_v38, %v3172_v55 }
 0xa70   :  { %7834 = vrsqrt.f32 %v2978_v57  ;;  %vm3027_vm15 = vweird.f32 %v2978_v57 }
 0xa73   :  { %v2931_v19 = vpop.xlane.xlu2 %2930 }
 0xa74   :  { %v2965_v44 = vmul.f32 %v2931_v19, %v12459_v1 }
 0xa76   :  { %v7835_v53 = vpop.eup %7834  ;;  %v2981_v13 = vadd.f32 1e-05, %v2965_v44  ;;  %v3050_v44 = vsel %vm3049_vm7, %v7833_v63, %v3046_v22 }
 0xa77   :  { %v3022_v43 = vmul.f32 %v7835_v53, %v2978_v57  ;;  %vm3028_vm13 = vweird.f32 %v7835_v53  ;;  %v3156_v49 = vmul.f32 %v3050_v44, %v9897_v31 }
 0xa78   :  { %7836 = vrsqrt.f32 %v2981_v13  ;;  %vm3029_vm1 = vmor %vm3027_vm15, %vm3028_vm13  ;;  %vm3057_vm9 = vweird.f32 %v2981_v13 }
 0xa79   :  { %v3023_v32 = vmul.f32 %v7835_v53, %v3022_v43  ;;  %v3173_v10 = vmul.f32 %v10000_v39, %v3156_v49 }
 0xa7b   :  { %v3024_v16 = vmul.f32 0.5, %v3023_v32  ;;  %v3190_v34 = vadd.f32 %v10006_v38, %v3173_v10 }
 0xa7d   :  { %v3025_v5 = vsub.f32 1.5, %v3024_v16 }
 0xa7e   :  { %v7837_v3 = vpop.eup %7836 }
 0xa7f   :  { %v3026_v30 = vmul.f32 %v7835_v53, %v3025_v5  ;;  %v3052_v59 = vmul.f32 %v7837_v3, %v2981_v13  ;;  %vm3058_vm8 = vweird.f32 %v7837_v3 }
 0xa80   :  { %vm3059_vm10 = vmor %vm3057_vm9, %vm3058_vm8 }
 0xa81   :  { %v3030_v21 = vsel %vm3029_vm1, %v7835_v53, %v3026_v30  ;;  %v3053_v51 = vmul.f32 %v7837_v3, %v3052_v59 }
 0xa82   :  { %v3154_v45 = vmul.f32 %v3030_v21, %v9931_v18  ;;  %v2482_v12 = vpop.f32.mrf.mxu0 }
 0xa83   :  { %v2483_v24 = vadd.f32 %v10012_v26, %v2482_v12  ;;  %v3054_v4 = vmul.f32 0.5, %v3053_v51 }
 0xa84   :  { %v3171_v35 = vmul.f32 %v10000_v39, %v3154_v45 }
 0xa85   :  { %v2516_v29 = vmul.f32 0.044715, %v2483_v24  ;;  %v3055_v26 = vsub.f32 1.5, %v3054_v4  ;;  %v2500_v16 = vmul.f32 0.5, %v2483_v24 }
 0xa86   :  { %v3188_v57 = vadd.f32 %v10006_v38, %v3171_v35 }
 0xa87   :  { %v2532_v19 = vmul.f32 %v2516_v29, %v2483_v24  ;;  %v3056_v43 = vmul.f32 %v7837_v3, %v3055_v26 }
 0xa88   :  { %6792 = vmatmul.msk.f32.gmra.mxu1 %vm59_vm0, %v3188_v57  ;;  %v10069_v57 = vld [vmem:[%s12380_s1 + $0xc] ss:$0 sm:$0xff] }
 0xa89   :  { %v2548_v18 = vmul.f32 %v2532_v19, %v2483_v24  ;;  %v3060_v32 = vsel %vm3059_vm10, %v7837_v3, %v3056_v43 }
 0xa8a   :  { %v3157_v63 = vmul.f32 %v3060_v32, %v9936_v48 }
 0xa8b   :  { %v2564_v53 = vadd.f32 %v2548_v18, %v2483_v24 }
 0xa8c   :  { %v3174_v36 = vmul.f32 %v10000_v39, %v3157_v63 }
 0xa8d   :  { %v2580_v6 = vmul.f32 0.7978846, %v2564_v53 }
 0xa8e   :  { %v3191_v13 = vadd.f32 %v10006_v38, %v3174_v36 }
 0xa8f   :  { %7838 = vtanh.f32 %v2580_v6 }
 0xa90   :  { %6793 = vmatmul.msk.f32.gmra.mxu1 %vm59_vm0, %v3189_v33 }
 0xa95   :  { %v7839_v2 = vpop.eup %7838 }
 0xa96   :  { %v2612_v5 = vadd.f32 1.0, %v7839_v2  ;;  %v8070_v2 = vld [vmem:[%s12380_s1 + $0x7] ss:$0 sm:$0xff] }
 0xa98   :  { %6794 = vmatmul.msk.f32.gmra.mxu1 %vm59_vm0, %v3190_v34  ;;  %v2628_v31 = vmul.f32 %v2612_v5, %v2500_v16 }
 0xa9a   :  { %6776 = vmatmul.msk.f32.gmra.mxu2 %vm670_vm6, %v2628_v31  ;;  %v2738_v6 = vpop.f32.mrf.mxu2 }
 0xa9b   :  { %v2770_v10 = vadd.f32 %v2738_v6, %v9670_v50 }
 0xa9d   :  { %v10100_v63 = vadd.f32 %v8070_v2, %v2770_v10 }
 0xa9f   :  { %12462 = vst [vmem:[#allocation6_spill] sm:$0xff] %v10100_v63  ;;  %v2839_v16 = vsel %vm59_vm0, %v10100_v63, 0.0 }
 0xaa0   :  { %6795 = vmatmul.msk.f32.gmra.mxu1 %vm59_vm0, %v3191_v13 }
 0xaa2   :  { %v2741_v33 = vpop.f32.mrf.mxu2 }
 0xaa6   :  { %v2934_v11 = vpop.xlane.xlu0 %2933 }
 0xaa7   :  { %v2966_v3 = vmul.f32 %v2934_v11, %v12459_v1 }
 0xaa9   :  { %v2982_v30 = vadd.f32 1e-05, %v2966_v3 }
 0xaab   :  { %7840 = vrsqrt.f32 %v2982_v30  ;;  %vm3067_vm13 = vweird.f32 %v2982_v30 }
 0xab1   :  { %v7841_v48 = vpop.eup %7840 }
 0xab2   :  { %v3062_v59 = vmul.f32 %v7841_v48, %v2982_v30  ;;  %vm3068_vm12 = vweird.f32 %v7841_v48 }
 0xab3   :  { %vm3069_vm14 = vmor %vm3067_vm13, %vm3068_vm12 }
 0xab4   :  { %v3063_v21 = vmul.f32 %v7841_v48, %v3062_v59 }
 0xab6   :  { %v3064_v45 = vmul.f32 0.5, %v3063_v21 }
 0xab8   :  { %v3065_v12 = vsub.f32 1.5, %v3064_v45 }
 0xaba   :  { %v3066_v15 = vmul.f32 %v7841_v48, %v3065_v12 }
 0xabc   :  { %v3070_v58 = vsel %vm3069_vm14, %v7841_v48, %v3066_v15 }
 0xabd   :  { %v3158_v51 = vmul.f32 %v3070_v58, %v9983_v20  ;;  %v10064_v29 = vpop.f32.mrf.mxu1 }
 0xabf   :  { %v3175_v24 = vmul.f32 %v10000_v39, %v3158_v51 }
 0xac1   :  { %v3192_v35 = vadd.f32 %v10006_v38, %v3175_v24  ;;  %v2771_v24 = vadd.f32 %v2741_v33, %v9679_v23  ;;  %v10151_v23 = vadd.f32 %v10069_v57, %v10064_v29 }
 0xac3   :  { %6796 = vmatmul.msk.f32.gmra.mxu1 %vm59_vm0, %v3192_v35  ;;  %v2744_v43 = vpop.f32.mrf.mxu2 }
 0xac4   :  { %v2772_v5 = vadd.f32 %v2744_v43, %v9688_v40 }
 0xac6   :  { %v10110_v50 = vadd.f32 %v8070_v2, %v2772_v5 }
 0xac8   :  { %12463 = vst [vmem:[#allocation9_spill] sm:$0xff] %v10110_v50  ;;  %v2845_v11 = vsel %vm59_vm0, %v10110_v50, 0.0 }
 0xacd   :  { %v3276_v28 = vpop.f32.mrf.mxu1  ;;  %v2747_v32 = vpop.f32.mrf.mxu2 }
 0xace   :  { %v10123_v45 = vadd.f32 %v10069_v57, %v3276_v28 }
 0xad5   :  { %v3279_v22 = vpop.f32.mrf.mxu1  ;;  %v2750_v36 = vpop.f32.mrf.mxu2 }
 0xad6   :  { %v10072_v4 = vadd.f32 %v10069_v57, %v3279_v22  ;;  %v2774_v13 = vadd.f32 %v2750_v36, %v9705_v14 }
 0xad8   :  { %3333 = vrot.lane.b32.xlu2 %v10072_v4, %s8106_s19  ;;  %v10115_v30 = vadd.f32 %v8070_v2, %v2774_v13  ;;  %v10177_v13 = vpack.i.bf16 %v10151_v23, %v10123_v45 }
 0xada   :  { %12464 = vst [vmem:[#allocation8_spill] sm:$0xff] %v10115_v30  ;;  %v2851_v48 = vsel %vm59_vm0, %v10115_v30, 0.0 }
 0xadd   :  { %v2753_v3 = vpop.f32.mrf.mxu2 }
 0xade   :  { %v2775_v40 = vadd.f32 %v2753_v3, %v9713_v61 }
 0xae0   :  { %v10120_v59 = vadd.f32 %v8070_v2, %v2775_v40 }
 0xae2   :  { %12465 = vst [vmem:[#allocation7_spill] sm:$0xff] %v10120_v59  ;;  %v2854_v12 = vsel %vm59_vm0, %v10120_v59, 0.0 }
 0xae5   :  { %v2756_v21 = vpop.f32.mrf.mxu2 }
 0xae6   :  { %v2776_v14 = vadd.f32 %v2756_v21, %v9723_v47  ;;  %v10138_v47 = vadd.f32 %v8070_v2, %v2771_v24 }
 0xae8   :  { %v10130_v61 = vadd.f32 %v8070_v2, %v2776_v14  ;;  %12468 = vst [vmem:[#allocation14_spill] sm:$0xff] %v10138_v47  ;;  %v2842_v22 = vsel %vm59_vm0, %v10138_v47, 0.0 }
 0xaea   :  { %12466 = vst [vmem:[#allocation10_spill] sm:$0xff] %v10130_v61  ;;  %v2857_v51 = vsel %vm59_vm0, %v10130_v61, 0.0 }
 0xb05   :  { %v3282_v20 = vpop.f32.mrf.mxu1 }
 0xb06   :  { %v10077_v19 = vadd.f32 %v10069_v57, %v3282_v20 }
 0xb08   :  { %3335 = vrot.lane.b32.xlu2 %v10077_v19, %s8106_s19 }
 0xb0d   :  { %v3285_v18 = vpop.f32.mrf.mxu1 }
 0xb0e   :  { %v10082_v55 = vadd.f32 %v10069_v57, %v3285_v18 }
 0xb10   :  { %3337 = vrot.lane.b32.xlu0 %v10082_v55, %s8106_s19 }
 0xb15   :  { %v3288_v44 = vpop.f32.mrf.mxu1 }
 0xb16   :  { %v10087_v26 = vadd.f32 %v10069_v57, %v3288_v44 }
 0xb18   :  { %3339 = vrot.lane.b32.xlu2 %v10087_v26, %s8106_s19  ;;  %v10171_v36 = vpack.i.bf16 %v10082_v55, %v10087_v26 }
 0xb1d   :  { %v3291_v53 = vpop.f32.mrf.mxu1  ;;  %v2759_v15 = vpop.f32.mrf.mxu2 }
 0xb1e   :  { %v10092_v49 = vadd.f32 %v10069_v57, %v3291_v53  ;;  %v2777_v58 = vadd.f32 %v2759_v15, %v9739_v41  ;;  %v2773_v41 = vadd.f32 %v2747_v32, %v9696_v46 }
 0xb20   :  { %3341 = vrot.lane.b32.xlu0 %v10092_v49, %s8106_s19  ;;  %v10136_v35 = vadd.f32 %v8070_v2, %v2777_v58  ;;  %v10145_v20 = vadd.f32 %v8070_v2, %v2773_v41 }
 0xb22   :  { %12467 = vst [vmem:[#allocation13_spill] sm:$0xff] %v10136_v35  ;;  %v2860_v28 = vsel %vm59_vm0, %v10136_v35, 0.0  ;;  %v2848_v18 = vsel %vm59_vm0, %v10145_v20, 0.0 }
 0xb23   :  { %12469 = vst [vmem:[#allocation15_spill] sm:$0xff] %v10145_v20 }
 0xb32   :  { %v3334_v44 = vpop.permute.xlu2 %3333 }
 0xb40   :  { %v3294_v34 = vpop.f32.mrf.mxu1 }
 0xb41   :  { %v10106_v31 = vadd.f32 %v10069_v57, %v3294_v34  ;;  %2840 = vadd.xlane.f32.xlu2 %v2839_v16 }
 0xb43   :  { %3343 = vrot.lane.b32.xlu1 %v10106_v31, %s8106_s19 }
 0xb4a   :  { %2846 = vadd.xlane.f32.xlu0 %v2845_v11 }
 0xb52   :  { %2852 = vadd.xlane.f32.xlu0 %v2851_v48 }
 0xb59   :  { %3331 = vrot.lane.b32.xlu2 %v10123_v45, %s8106_s19 }
 0xb5a   :  { %2855 = vadd.xlane.f32.xlu0 %v2854_v12 }
 0xb62   :  { %2858 = vadd.xlane.f32.xlu0 %v2857_v51  ;;  %v3336_v53 = vpop.permute.xlu2 %3335 }
 0xb6a   :  { %2861 = vadd.xlane.f32.xlu0 %v2860_v28 }
 0xb6d   :  { %2843 = vadd.xlane.f32.xlu1 %v2842_v22 }
 0xb72   :  { %v3340_v6 = vpop.permute.xlu2 %3339 }
 0xb82   :  { %2849 = vadd.xlane.f32.xlu2 %v2848_v18  ;;  %v3338_v33 = vpop.permute.xlu0 %3337 }
 0xb86   :  { %3329 = vrot.lane.b32.xlu1 %v10151_v23, %s8106_s19 }
 0xb92   :  { %v3342_v2 = vpop.permute.xlu0 %3341 }
 0xbb4   :  { %v2841_v43 = vpop.xlane.xlu2 %2840 }
 0xbb5   :  { %v2871_v46 = vmul.f32 %v2841_v43, %v12459_v1  ;;  %v3344_v10 = vpop.permute.xlu1 %3343 }
 0xbb6   :  { %6805 = vmatpush.xpose.msk.msrb.mxu3 %vm596_vm11, %v3344_v10 }
 0xbb7   :  { %v10158_v32 = vsub.f32 %v10100_v63, %v2871_v46 }
 0xbb9   :  { %v2903_v29 = vmul.f32 %v10158_v32, %v10158_v32 }
 0xbba   :  { %6806 = vmatpush.xpose.msk.msrb.mxu3 %vm596_vm11, %v3342_v2 }
 0xbbb   :  { %v2935_v34 = vsel %vm59_vm0, %v2903_v29, 0.0 }
 0xbbc   :  { %2936 = vadd.xlane.f32.xlu1 %v2935_v34  ;;  %v3332_v16 = vpop.permute.xlu2 %3331 }
 0xbbd   :  { %v2847_v5 = vpop.xlane.xlu0 %2846 }
 0xbbe   :  { %6807 = vmatpush.xpose.msk.msrb.mxu3 %vm596_vm11, %v3340_v6  ;;  %v2873_v48 = vmul.f32 %v2847_v5, %v12459_v1 }
 0xbc0   :  { %v10191_v15 = vsub.f32 %v10110_v50, %v2873_v48  ;;  %v10244_v48 = vpack.i.bf16 %v10092_v49, %v10106_v31 }
 0xbc2   :  { %6808 = vmatpush.xpose.msk.msrb.mxu3 %vm596_vm11, %v3338_v33  ;;  %v2905_v24 = vmul.f32 %v10191_v15, %v10191_v15 }
 0xbc4   :  { %v2941_v22 = vsel %vm59_vm0, %v2905_v24, 0.0 }
 0xbc5   :  { %v2853_v11 = vpop.xlane.xlu0 %2852 }
 0xbc6   :  { %6809 = vmatpush.xpose.msk.msrb.mxu3 %vm596_vm11, %v3336_v53  ;;  %v2875_v51 = vmul.f32 %v2853_v11, %v12459_v1 }
 0xbc8   :  { %v10200_v28 = vsub.f32 %v10115_v30, %v2875_v51 }
 0xbca   :  { %6810 = vmatpush.xpose.msk.msrb.mxu3 %vm596_vm11, %v3334_v44  ;;  %v2907_v44 = vmul.f32 %v10200_v28, %v10200_v28 }
 0xbcc   :  { %v2947_v43 = vsel %vm59_vm0, %v2907_v44, 0.0 }
 0xbcd   :  { %v2856_v12 = vpop.xlane.xlu0 %2855 }
 0xbce   :  { %6811 = vmatpush.xpose.msk.msrb.mxu3 %vm596_vm11, %v3332_v16  ;;  %v2876_v46 = vmul.f32 %v2856_v12, %v12459_v1 }
 0xbd0   :  { %v10223_v16 = vsub.f32 %v10120_v59, %v2876_v46 }
 0xbd5   :  { %7458 = vrot.lane.b32.xlu1 %v10171_v36, %s8109_s26  ;;  %v2859_v41 = vpop.xlane.xlu0 %2858 }
 0xbd6   :  { %v2877_v18 = vmul.f32 %v2859_v41, %v12459_v1 }
 0xbd8   :  { %v10210_v33 = vsub.f32 %v10130_v61, %v2877_v18 }
 0xbda   :  { %v2909_v34 = vmul.f32 %v10210_v33, %v10210_v33 }
 0xbdc   :  { %v2953_v11 = vsel %vm59_vm0, %v2909_v34, 0.0 }
 0xbdd   :  { %7468 = vrot.lane.b32.xlu1 %v10177_v13, %s8109_s26 }
 0xbe0   :  { %v2844_v3 = vpop.xlane.xlu1 %2843 }
 0xbe1   :  { %v2872_v40 = vmul.f32 %v2844_v3, %v12459_v1  ;;  %v2908_v3 = vmul.f32 %v10223_v16, %v10223_v16 }
 0xbe3   :  { %v10184_v21 = vsub.f32 %v10138_v47, %v2872_v40  ;;  %v2950_v40 = vsel %vm59_vm0, %v2908_v3, 0.0 }
 0xbe5   :  { %3625 = vrot.lane.b32.xlu1 %v10106_v31, %s8107_s20  ;;  %v2904_v14 = vmul.f32 %v10184_v21, %v10184_v21 }
 0xbe7   :  { %v2938_v58 = vsel %vm59_vm0, %v2904_v14, 0.0  ;;  %v10248_v14 = vpack.i.bf16 %v10072_v4, %v10077_v19 }
 0xbe8   :  { %2939 = vadd.xlane.f32.xlu2 %v2938_v58 }
 0xbed   :  { %3611 = vrot.lane.b32.xlu1 %v10151_v23, %s8107_s20 }
 0xbf0   :  { %2942 = vadd.xlane.f32.xlu2 %v2941_v22 }
 0xbf5   :  { %3599 = vrot.lane.b32.xlu1 %v10072_v4, %s8108_s21  ;;  %v2850_v53 = vpop.xlane.xlu2 %2849 }
 0xbf6   :  { %v2874_v6 = vmul.f32 %v2850_v53, %v12459_v1 }
 0xbf8   :  { %v10215_v10 = vsub.f32 %v10145_v20, %v2874_v6  ;;  %v3330_v2 = vpop.permute.xlu1 %3329  ;;  %2948 = vadd.xlane.f32.xlu2 %v2947_v43  ;;  %v2862_v43 = vpop.xlane.xlu0 %2861 }
 0xbf9   :  { %6812 = vmatpush.xpose.msk.msrb.mxu3 %vm596_vm11, %v3330_v2  ;;  %v2878_v46 = vmul.f32 %v2862_v43, %v12459_v1 }
 0xbfa   :  { %v2906_v29 = vmul.f32 %v10215_v10, %v10215_v10 }
 0xbfc   :  { %6813 = vmatmul.msk.f32.vlgmr.msrb.gmra.mxu3 %vm596_vm11, %v10151_v23  ;;  %v2944_v5 = vsel %vm59_vm0, %v2906_v29, 0.0  ;;  %v10288_v29 = vsub.f32 %v10136_v35, %v2878_v46 }
 0xbfd   :  { %3603 = vrot.lane.b32.xlu1 %v10082_v55, %s8108_s21  ;;  %2945 = vadd.xlane.f32.xlu0 %v2944_v5 }
 0xc00   :  { %2954 = vadd.xlane.f32.xlu2 %v2953_v11  ;;  %v2910_v11 = vmul.f32 %v10288_v29, %v10288_v29 }
 0xc02   :  { %v2956_v3 = vsel %vm59_vm0, %v2910_v11, 0.0 }
 0xc04   :  { %6814 = vmatmul.msk.f32.gmra.mxu3 %vm596_vm11, %v10123_v45 }
 0xc05   :  { %3607 = vrot.lane.b32.xlu1 %v10092_v49, %s8108_s21  ;;  %2951 = vadd.xlane.f32.xlu0 %v2950_v40 }
 0xc0c   :  { %6815 = vmatmul.msk.f32.gmra.mxu3 %vm596_vm11, %v10072_v4 }
 0xc14   :  { %6816 = vmatmul.msk.f32.gmra.mxu3 %vm596_vm11, %v10077_v19 }
 0xc18   :  { %7453 = vrot.lane.b32.xlu2 %v10244_v48, %s8109_s26 }
 0xc19   :  { %7463 = vrot.lane.b32.xlu0 %v10248_v14, %s8109_s26 }
 0xc1c   :  { %6817 = vmatmul.msk.f32.gmra.mxu3 %vm596_vm11, %v10082_v55 }
 0xc20   :  { %3623 = vrot.lane.b32.xlu2 %v10092_v49, %s8107_s20 }
 0xc21   :  { %3621 = vrot.lane.b32.xlu0 %v10087_v26, %s8107_s20 }
 0xc24   :  { %6818 = vmatmul.msk.f32.gmra.mxu3 %vm596_vm11, %v10087_v26 }
 0xc28   :  { %3595 = vrot.lane.b32.xlu2 %v10151_v23, %s8108_s21 }
 0xc29   :  { %3619 = vrot.lane.b32.xlu0 %v10082_v55, %s8107_s20 }
 0xc2c   :  { %6819 = vmatmul.msk.f32.gmra.mxu3 %vm596_vm11, %v10092_v49 }
 0xc2f   :  { %v2937_v12 = vpop.xlane.xlu1 %2936 }
 0xc30   :  { %v2967_v58 = vmul.f32 %v2937_v12, %v12459_v1  ;;  %3609 = vrot.lane.b32.xlu2 %v10106_v31, %s8108_s21 }
 0xc31   :  { %3617 = vrot.lane.b32.xlu0 %v10077_v19, %s8107_s20 }
 0xc32   :  { %v2983_v51 = vadd.f32 1e-05, %v2967_v58 }
 0xc34   :  { %7842 = vrsqrt.f32 %v2983_v51  ;;  %6820 = vmatmul.msk.f32.gmra.mxu3 %vm596_vm11, %v10106_v31  ;;  %vm3077_vm1 = vweird.f32 %v2983_v51 }
 0xc39   :  { %3615 = vrot.lane.b32.xlu0 %v10072_v4, %s8107_s20 }
 0xc3a   :  { %v7843_v55 = vpop.eup %7842 }
 0xc3b   :  { %v3072_v23 = vmul.f32 %v7843_v55, %v2983_v51  ;;  %vm3078_vm15 = vweird.f32 %v7843_v55 }
 0xc3c   :  { %vm3079_vm2 = vmor %vm3077_vm1, %vm3078_vm15 }
 0xc3d   :  { %v3073_v49 = vmul.f32 %v7843_v55, %v3072_v23 }
 0xc3f   :  { %v3074_v24 = vmul.f32 0.5, %v3073_v49 }
 0xc41   :  { %v3075_v22 = vsub.f32 1.5, %v3074_v24 }
 0xc43   :  { %v3076_v41 = vmul.f32 %v7843_v55, %v3075_v22 }
 0xc45   :  { %v3080_v18 = vsel %vm3079_vm2, %v7843_v55, %v3076_v41 }
 0xc46   :  { %v3159_v44 = vmul.f32 %v3080_v18, %v10158_v32 }
 0xc47   :  { %v10278_v53 = vpop.permute.xlu1 %7458 }
 0xc48   :  { %v3176_v6 = vmul.f32 %v10000_v39, %v3159_v44 }
 0xc4a   :  { %v3193_v31 = vadd.f32 %v10006_v38, %v3176_v6 }
 0xc4c   :  { %6797 = vmatmul.msk.f32.gmra.mxu1 %vm59_vm0, %v3193_v31 }
 0xc4f   :  { %v10283_v4 = vpop.permute.xlu1 %7468 }
 0xc57   :  { %v3626_v2 = vpop.permute.xlu1 %3625 }
 0xc58   :  { %6829 = vmatpush.xpose.msk.msra.mxu0 %vm596_vm11, %v3626_v2 }
 0xc5b   :  { %v2940_v32 = vpop.xlane.xlu2 %2939 }
 0xc5c   :  { %v2968_v34 = vmul.f32 %v2940_v32, %v12459_v1 }
 0xc5e   :  { %v2984_v5 = vadd.f32 1e-05, %v2968_v34 }
 0xc60   :  { %7844 = vrsqrt.f32 %v2984_v5  ;;  %vm3087_vm4 = vweird.f32 %v2984_v5 }
 0xc63   :  { %v2943_v40 = vpop.xlane.xlu2 %2942  ;;  %2957 = vadd.xlane.f32.xlu0 %v2956_v3 }
 0xc64   :  { %v2969_v12 = vmul.f32 %v2943_v40, %v12459_v1 }
 0xc66   :  { %v7845_v58 = vpop.eup %7844  ;;  %v2985_v51 = vadd.f32 1e-05, %v2969_v12 }
 0xc67   :  { %v3082_v55 = vmul.f32 %v7845_v58, %v2984_v5  ;;  %vm3088_vm3 = vweird.f32 %v7845_v58 }
 0xc68   :  { %7846 = vrsqrt.f32 %v2985_v51  ;;  %vm3089_vm5 = vmor %vm3087_vm4, %vm3088_vm3  ;;  %vm3097_vm8 = vweird.f32 %v2985_v51 }
 0xc69   :  { %v3083_v23 = vmul.f32 %v7845_v58, %v3082_v55 }
 0xc6b   :  { %v3084_v49 = vmul.f32 0.5, %v3083_v23  ;;  %v2949_v24 = vpop.xlane.xlu2 %2948 }
 0xc6c   :  { %v2971_v22 = vmul.f32 %v2949_v24, %v12459_v1 }
 0xc6d   :  { %v3085_v41 = vsub.f32 1.5, %v3084_v49 }
 0xc6e   :  { %v7847_v18 = vpop.eup %7846  ;;  %v10296_v44 = vadd.f32 1e-05, %v2971_v22 }
 0xc6f   :  { %v3086_v6 = vmul.f32 %v7845_v58, %v3085_v41  ;;  %v3092_v31 = vmul.f32 %v7847_v18, %v2985_v51  ;;  %vm3098_vm7 = vweird.f32 %v7847_v18  ;;  %v10318_v51 = vld [vmem:[%s12382_s3 + $0x20] sm:$0xff]  }
 0xc70   :  { %7848 = vrsqrt.f32 %v10296_v44  ;;  %v2946_v43 = vpop.xlane.xlu0 %2945  ;;  %vm3099_vm9 = vmor %vm3097_vm8, %vm3098_vm7  ;;  %vm3117_vm15 = vweird.f32 %v10296_v44 }
 0xc71   :  { %v3090_v46 = vsel %vm3089_vm5, %v7845_v58, %v3086_v6  ;;  %v3093_v2 = vmul.f32 %v7847_v18, %v3092_v31  ;;  %v2970_v32 = vmul.f32 %v2946_v43, %v12459_v1 }
 0xc72   :  { %v3160_v34 = vmul.f32 %v3090_v46, %v10184_v21 }
 0xc73   :  { %v3094_v11 = vmul.f32 0.5, %v3093_v2  ;;  %v2986_v3 = vadd.f32 1e-05, %v2970_v32  ;;  %v2955_v40 = vpop.xlane.xlu2 %2954 }
 0xc74   :  { %v2973_v12 = vmul.f32 %v2955_v40, %v12459_v1  ;;  %v3177_v55 = vmul.f32 %v10000_v39, %v3160_v34 }
 0xc75   :  { %v3095_v23 = vsub.f32 1.5, %v3094_v11  ;;  %7850 = vrsqrt.f32 %v2986_v3  ;;  %vm3107_vm12 = vweird.f32 %v2986_v3 }
 0xc76   :  { %v10303_v5 = vpop.eup %7848  ;;  %v3194_v49 = vadd.f32 %v10006_v38, %v3177_v55  ;;  %v10308_v21 = vadd.f32 1e-05, %v2973_v12 }
 0xc77   :  { %v3096_v58 = vmul.f32 %v7847_v18, %v3095_v23  ;;  %v3112_v24 = vmul.f32 %v10303_v5, %v10296_v44  ;;  %3613 = vrot.lane.b32.xlu0 %v10123_v45, %s8107_s20  ;;  %vm3118_vm13 = vweird.f32 %v10303_v5 }
 0xc78   :  { %6798 = vmatmul.msk.f32.gmra.mxu1 %vm59_vm0, %v3194_v49  ;;  %v2952_v22 = vpop.xlane.xlu0 %2951  ;;  %7852 = vrsqrt.f32 %v10308_v21  ;;  %vm3119_vm1 = vmor %vm3117_vm15, %vm3118_vm13  ;;  %vm3137_vm7 = vweird.f32 %v10308_v21 }
 0xc79   :  { %v3100_v41 = vsel %vm3099_vm9, %v7847_v18, %v3096_v58  ;;  %v3113_v6 = vmul.f32 %v10303_v5, %v3112_v24  ;;  %v2972_v31 = vmul.f32 %v2952_v22, %v12459_v1  ;;  %v10323_v18 = vunpack.c.l.bf16 %v10318_v51 }
 0xc7a   :  { %v3161_v43 = vmul.f32 %v3100_v41, %v10191_v15  ;;  %v7460_v24 = vunpack.i.l.bf16 %v10278_v53 }
 0xc7b   :  { %v7851_v46 = vpop.eup %7850  ;;  %v3114_v2 = vmul.f32 0.5, %v3113_v6  ;;  %v2988_v32 = vadd.f32 1e-05, %v2972_v31  ;;  %v7454_v34 = vpop.permute.xlu2 %7453  ;;  %v7461_v31 = vunpack.i.h.bf16 %v10278_v53 }
 0xc7c   :  { %v3102_v11 = vmul.f32 %v7851_v46, %v2986_v3  ;;  %v7455_v40 = vunpack.i.l.bf16 %v7454_v34  ;;  %v3178_v12 = vmul.f32 %v10000_v39, %v3161_v43  ;;  %v7456_v23 = vunpack.i.h.bf16 %v7454_v34 }
 0xc7d   :  { %7854 = vrsqrt.f32 %v2988_v32  ;;  %v3115_v49 = vsub.f32 1.5, %v3114_v2  ;;  %vm3108_vm10 = vweird.f32 %v7851_v46  ;;  %vm3127_vm3 = vweird.f32 %v2988_v32 }
 0xc7e   :  { %v3103_v55 = vmul.f32 %v7851_v46, %v3102_v11  ;;  %3562 = vmatpush.msra.mxu3 %v7455_v40  ;;  %v3195_v15 = vadd.f32 %v10006_v38, %v3178_v12  ;;  %v10333_v6 = vpop.eup %7852  ;;  %vm3109_vm14 = vmor %vm3107_vm12, %vm3108_vm10 }
 0xc7f   :  { %v3394_v58 = vpop.f32.mrf.mxu3  ;;  %3597 = vrot.lane.b32.xlu0 %v10123_v45, %s8108_s21  ;;  %v3116_v34 = vmul.f32 %v10303_v5, %v3115_v49  ;;  %v3132_v12 = vmul.f32 %v10333_v6, %v10308_v21  ;;  %vm3138_vm5 = vweird.f32 %v10333_v6 }
 0xc80   :  { %v3104_v22 = vmul.f32 0.5, %v3103_v55  ;;  %v10331_v41 = vadd.f32 %v10323_v18, %v3394_v58  ;;  %3563 = vmatpush.msra.mxu3 %v7456_v23  ;;  %6799 = vmatmul.msk.f32.gmra.mxu1 %vm59_vm0, %v3195_v15  ;;  %vm3139_vm8 = vmor %vm3137_vm7, %vm3138_vm5 }
 0xc81   :  { %v3120_v58 = vsel %vm3119_vm1, %v10303_v5, %v3116_v34  ;;  %v3133_v15 = vmul.f32 %v10333_v6, %v3132_v12  ;;  %v7470_v12 = vunpack.i.l.bf16 %v10283_v4 }
 0xc82   :  { %v3105_v43 = vsub.f32 1.5, %v3104_v22  ;;  %3564 = vmatpush.msra.mxu3 %v7460_v24  ;;  %v3418_v45 = vsel %vm670_vm6, %v10331_v41, -inf  ;;  %v7313_v22 = vld [vmem:[%s12382_s3 + $0x28] sm:$0xff]  }
 0xc83   :  { %v7855_v2 = vpop.eup %7854  ;;  %3419 = vmax.xlane.f32.xlu2 %v3418_v45  ;;  %v3624_v11 = vpop.permute.xlu2 %3623  ;;  %v10358_v45 = vunpack.c.l.bf16 %v7313_v22 }
 0xc84   :  { %v3106_v40 = vmul.f32 %v7851_v46, %v3105_v43  ;;  %v3122_v55 = vmul.f32 %v7855_v2, %v2988_v32  ;;  %3565 = vmatpush.msra.mxu3 %v7461_v31  ;;  %6830 = vmatpush.xpose.msk.msra.mxu0 %vm596_vm11, %v3624_v11  ;;  %v3163_v31 = vmul.f32 %v3120_v58, %v10200_v28  ;;  %vm3128_vm2 = vweird.f32 %v7855_v2 }
 0xc85   :  { %vm3129_vm4 = vmor %vm3127_vm3, %vm3128_vm2  ;;  %v7471_v32 = vunpack.i.h.bf16 %v10283_v4  ;;  %v10381_v4 = vunpack.c.h.bf16 %v7313_v22 }
 0xc86   :  { %v3110_v53 = vsel %vm3109_vm14, %v7851_v46, %v3106_v40  ;;  %v3123_v23 = vmul.f32 %v7855_v2, %v3122_v55  ;;  %v3180_v28 = vmul.f32 %v10000_v39, %v3163_v31 }
 0xc87   :  { %v3162_v3 = vmul.f32 %v3110_v53, %v10215_v10  ;;  %v10346_v49 = vpop.f32.mrf.mxu3  ;;  %3601 = vrot.lane.b32.xlu0 %v10077_v19, %s8108_s21  ;;  %v3134_v19 = vmul.f32 0.5, %v3133_v15 }
 0xc88   :  { %v3124_v24 = vmul.f32 0.5, %v3123_v23  ;;  %v3197_v15 = vadd.f32 %v10006_v38, %v3180_v28 }
 0xc89   :  { %v3179_v44 = vmul.f32 %v10000_v39, %v3162_v3  ;;  %v3135_v55 = vsub.f32 1.5, %v3134_v19  ;;  %v10369_v3 = vunpack.c.h.bf16 %v10318_v51 }
 0xc8a   :  { %v3125_v46 = vsub.f32 1.5, %v3124_v24 }
 0xc8b   :  { %v7464_v10 = vpop.permute.xlu0 %7463  ;;  %v3196_v43 = vadd.f32 %v10006_v38, %v3179_v44  ;;  %v3136_v24 = vmul.f32 %v10333_v6, %v3135_v55  ;;  %v10389_v38 = vld [vmem:[%s12380_s1 + $0x8] ss:$0 sm:$0xff] }
 0xc8c   :  { %v3126_v11 = vmul.f32 %v7855_v2, %v3125_v46  ;;  %v7465_v5 = vunpack.i.l.bf16 %v7464_v10  ;;  %v7466_v34 = vunpack.i.h.bf16 %v7464_v10  ;;  %v10402_v10 = vld [vmem:[%s12380_s1 + $0x9] ss:$0 sm:$0xff] }
 0xc8d   :  { %6800 = vmatmul.msk.f32.gmra.mxu1 %vm59_vm0, %v3196_v43  ;;  %v3140_v44 = vsel %vm3139_vm8, %v10333_v6, %v3136_v24 }
 0xc8e   :  { %3566 = vmatpush.msra.mxu3 %v7465_v5  ;;  %v3130_v53 = vsel %vm3129_vm4, %v7855_v2, %v3126_v11  ;;  %v7472_v2 = vpack.i.bf16 %v10369_v3, %v10323_v18  ;;  %v3165_v21 = vmul.f32 %v3140_v44, %v10210_v33  ;;  %v7314_v33 = vld [vmem:[%s12382_s3 + $0x30] sm:$0xff]  }
 0xc8f   :  { %v3400_v40 = vpop.f32.mrf.mxu3  ;;  %3605 = vrot.lane.b32.xlu0 %v10087_v26, %s8108_s21  ;;  %v3164_v26 = vmul.f32 %v3130_v53, %v10223_v16  ;;  %v10436_v24 = vunpack.c.l.bf16 %v7314_v33 }
 0xc90   :  { %v10366_v23 = vadd.f32 %v10358_v45, %v3400_v40  ;;  %3567 = vmatpush.msra.mxu3 %v7466_v34  ;;  %v3182_v19 = vmul.f32 %v10389_v38, %v3165_v21  ;;  %v10413_v34 = vunpack.c.h.bf16 %v7314_v33 }
 0xc91   :  { %v3181_v51 = vmul.f32 %v10389_v38, %v3164_v26 }
 0xc92   :  { %3568 = vmatpush.msra.mxu3 %v7470_v12  ;;  %v3424_v58 = vsel %vm670_vm6, %v10366_v23, -inf  ;;  %v3199_v5 = vadd.f32 %v10402_v10, %v3182_v19 }
 0xc93   :  { %3425 = vmax.xlane.f32.xlu1 %v3424_v58  ;;  %v3622_v39 = vpop.permute.xlu0 %3621  ;;  %v3198_v43 = vadd.f32 %v10402_v10, %v3181_v51 }
 0xc94   :  { %3569 = vmatpush.msra.mxu3 %v7471_v32  ;;  %6831 = vmatpush.xpose.msk.msra.mxu0 %vm596_vm11, %v3622_v39  ;;  %v7315_v32 = vld [vmem:[%s12382_s3 + $0x38] sm:$0xff]  }
 0xc95   :  { %6801 = vmatmul.msk.f32.gmra.mxu1 %vm59_vm0, %v3197_v15  ;;  %v10425_v58 = vunpack.c.h.bf16 %v7315_v32  ;;  %v10443_v44 = vunpack.c.l.bf16 %v7315_v32 }
 0xc97   :  { %v3403_v16 = vpop.f32.mrf.mxu3  ;;  %7473 = vrot.lane.b32.xlu0 %v7472_v2, %s8109_s26  ;;  %v10434_v2 = vadd.f32 %v10369_v3, %v10346_v49 }
 0xc98   :  { %v10394_v22 = vadd.f32 %v10381_v4, %v3403_v16 }
 0xc99   :  { %v3421_v16 = vsel %vm670_vm6, %v10434_v2, -inf }
 0xc9a   :  { %v3427_v46 = vsel %vm670_vm6, %v10394_v22, -inf }
 0xc9b   :  { %3428 = vmax.xlane.f32.xlu2 %v3427_v46  ;;  %v3620_v31 = vpop.permute.xlu0 %3619 }
 0xc9c   :  { %6832 = vmatpush.xpose.msk.msra.mxu0 %vm596_vm11, %v3620_v31 }
 0xc9d   :  { %6802 = vmatmul.msk.f32.gmra.mxu1 %vm59_vm0, %v3198_v43 }
 0xc9f   :  { %v3406_v6 = vpop.f32.mrf.mxu3 }
 0xca0   :  { %v10441_v51 = vadd.f32 %v10436_v24, %v3406_v6 }
 0xca2   :  { %v3430_v46 = vsel %vm670_vm6, %v10441_v51, -inf }
 0xca3   :  { %v3618_v11 = vpop.permute.xlu0 %3617 }
 0xca4   :  { %6833 = vmatpush.xpose.msk.msra.mxu0 %vm596_vm11, %v3618_v11  ;;  %v3612_v11 = vpop.permute.xlu1 %3611 }
 0xca5   :  { %6803 = vmatmul.msk.f32.gmra.mxu1 %vm59_vm0, %v3199_v5 }
 0xca7   :  { %v3409_v40 = vpop.f32.mrf.mxu3 }
 0xca8   :  { %v10417_v28 = vadd.f32 %v10413_v34, %v3409_v40 }
 0xcaa   :  { %v3433_v12 = vsel %vm670_vm6, %v10417_v28, -inf }
 0xcab   :  { %3434 = vmax.xlane.f32.xlu1 %v3433_v12  ;;  %v3616_v55 = vpop.permute.xlu0 %3615  ;;  %v3596_v12 = vpop.permute.xlu2 %3595 }
 0xcac   :  { %6834 = vmatpush.xpose.msk.msra.mxu0 %vm596_vm11, %v3616_v55 }
 0xcaf   :  { %v3412_v53 = vpop.f32.mrf.mxu3 }
 0xcb0   :  { %v10451_v49 = vadd.f32 %v10443_v44, %v3412_v53 }
 0xcb2   :  { %v3436_v43 = vsel %vm670_vm6, %v10451_v49, -inf }
 0xcb7   :  { %v3415_v26 = vpop.f32.mrf.mxu3 }
 0xcb8   :  { %v10428_v39 = vadd.f32 %v10425_v58, %v3415_v26 }
 0xcba   :  { %v3439_v15 = vsel %vm670_vm6, %v10428_v39, -inf }
 0xcbb   :  { %3440 = vmax.xlane.f32.xlu2 %v3439_v15  ;;  %v3600_v15 = vpop.permute.xlu1 %3599 }
 0xcc1   :  { %3422 = vmax.xlane.f32.xlu0 %v3421_v16 }
 0xcc9   :  { %v3297_v21 = vpop.f32.mrf.mxu1  ;;  %3431 = vmax.xlane.f32.xlu0 %v3430_v46 }
 0xcca   :  { %v10448_v31 = vadd.f32 %v10069_v57, %v3297_v21 }
 0xccc   :  { %4038 = vrot.lane.b32.xlu1 %v10448_v31, %s8106_s19 }
 0xcd1   :  { %3437 = vmax.xlane.f32.xlu0 %v3436_v43  ;;  %v3610_v43 = vpop.permute.xlu2 %3609 }
 0xcd6   :  { %v2958_v6 = vpop.xlane.xlu0 %2957 }
 0xcd7   :  { %v2974_v19 = vmul.f32 %v2958_v6, %v12459_v1 }
 0xcd9   :  { %v2990_v33 = vadd.f32 1e-05, %v2974_v19 }
 0xcdb   :  { %7856 = vrsqrt.f32 %v2990_v33  ;;  %vm3147_vm10 = vweird.f32 %v2990_v33 }
 0xce1   :  { %v7857_v5 = vpop.eup %7856 }
 0xce2   :  { %v3142_v40 = vmul.f32 %v7857_v5, %v2990_v33  ;;  %vm3148_vm9 = vweird.f32 %v7857_v5 }
 0xce3   :  { %vm3149_vm12 = vmor %vm3147_vm10, %vm3148_vm9 }
 0xce4   :  { %v3143_v55 = vmul.f32 %v7857_v5, %v3142_v40  ;;  %v3604_v40 = vpop.permute.xlu1 %3603 }
 0xce6   :  { %v3144_v32 = vmul.f32 0.5, %v3143_v55 }
 0xce8   :  { %v3145_v53 = vsub.f32 1.5, %v3144_v32 }
 0xce9   :  { %v3614_v26 = vpop.permute.xlu0 %3613 }
 0xcea   :  { %v3146_v16 = vmul.f32 %v7857_v5, %v3145_v53  ;;  %6835 = vmatpush.xpose.msk.msra.mxu0 %vm596_vm11, %v3614_v26 }
 0xcec   :  { %v3150_v46 = vsel %vm3149_vm12, %v7857_v5, %v3146_v16 }
 0xced   :  { %v3166_v21 = vmul.f32 %v3150_v46, %v10288_v29 }
 0xcee   :  { %6836 = vmatpush.xpose.msk.msra.mxu0 %vm596_vm11, %v3612_v11 }
 0xcef   :  { %v3183_v6 = vmul.f32 %v10389_v38, %v3166_v21  ;;  %v3608_v38 = vpop.permute.xlu1 %3607 }
 0xcf1   :  { %6837 = vmatmul.msk.f32.vlgmr.msra.gmra.mxu0 %vm596_vm11, %v3596_v12  ;;  %v3200_v19 = vadd.f32 %v10402_v10, %v3183_v6  ;;  %v3598_v29 = vpop.permute.xlu0 %3597 }
 0xcf3   :  { %6804 = vmatmul.msk.f32.gmra.mxu1 %vm59_vm0, %v3200_v19 }
 0xcf5   :  { %v3300_v55 = vpop.f32.mrf.mxu1 }
 0xcf6   :  { %v10466_v33 = vadd.f32 %v10069_v57, %v3300_v55  ;;  %v3420_v32 = vpop.xlane.xlu2 %3419 }
 0xcf7   :  { %v3442_v5 = vsub.f32 %v10331_v41, %v3420_v32 }
 0xcf8   :  { %4040 = vrot.lane.b32.xlu1 %v10466_v33, %s8106_s19 }
 0xcf9   :  { %v3450_v11 = vmul.f32 1.442695, %v3442_v5  ;;  %6838 = vmatmul.msk.f32.gmra.mxu0 %vm596_vm11, %v3598_v29  ;;  %v3602_v46 = vpop.permute.xlu0 %3601 }
 0xcfb   :  { %7858 = vpow2.f32 %v3450_v11 }
 0xcfd   :  { %v3303_v10 = vpop.f32.mrf.mxu1 }
 0xcfe   :  { %v10473_v12 = vadd.f32 %v10069_v57, %v3303_v10 }
 0xd00   :  { %4042 = vrot.lane.b32.xlu1 %v10473_v12, %s8106_s19 }
 0xd01   :  { %v10475_v53 = vpop.eup %7858  ;;  %6839 = vmatmul.msk.f32.gmra.mxu0 %vm596_vm11, %v3600_v15 }
 0xd02   :  { %v3466_v41 = vsel %vm670_vm6, %v10475_v53, 0.0 }
 0xd03   :  { %3467 = vadd.xlane.f32.xlu0 %v3466_v41 }
 0xd06   :  { %v3426_v26 = vpop.xlane.xlu1 %3425 }
 0xd07   :  { %v3444_v16 = vsub.f32 %v10366_v23, %v3426_v26  ;;  %v3606_v23 = vpop.permute.xlu0 %3605 }
 0xd09   :  { %v3454_v21 = vmul.f32 1.442695, %v3444_v16  ;;  %6840 = vmatmul.msk.f32.gmra.mxu0 %vm596_vm11, %v3602_v46 }
 0xd0a   :  { %v3306_v5 = vpop.f32.mrf.mxu1 }
 0xd0b   :  { %7860 = vpow2.f32 %v3454_v21 }
 0xd0e   :  { %v3429_v6 = vpop.xlane.xlu2 %3428 }
 0xd0f   :  { %v3445_v19 = vsub.f32 %v10394_v22, %v3429_v6  ;;  %v10502_v41 = vpop.permute.xlu0 %7473 }
 0xd11   :  { %v10485_v55 = vpop.eup %7860  ;;  %v3456_v32 = vmul.f32 1.442695, %v3445_v19  ;;  %6841 = vmatmul.msk.f32.gmra.mxu0 %vm596_vm11, %v3604_v40 }
 0xd12   :  { %v3472_v15 = vsel %vm670_vm6, %v10485_v55, 0.0  ;;  %v3309_v22 = vpop.f32.mrf.mxu1 }
 0xd13   :  { %7862 = vpow2.f32 %v3456_v32  ;;  %3473 = vadd.xlane.f32.xlu0 %v3472_v15  ;;  %v10497_v40 = vadd.f32 %v10069_v57, %v3309_v22 }
 0xd19   :  { %v10490_v29 = vpop.eup %7862  ;;  %6842 = vmatmul.msk.f32.gmra.mxu0 %vm596_vm11, %v3606_v23 }
 0xd1a   :  { %v3475_v11 = vsel %vm670_vm6, %v10490_v29, 0.0  ;;  %v3312_v10 = vpop.f32.mrf.mxu1 }
 0xd1b   :  { %3476 = vadd.xlane.f32.xlu2 %v3475_v11  ;;  %v10505_v26 = vadd.f32 %v10069_v57, %v3312_v10 }
 0xd21   :  { %6843 = vmatmul.msk.f32.gmra.mxu0 %vm596_vm11, %v3608_v38 }
 0xd22   :  { %v3315_v16 = vpop.f32.mrf.mxu1 }
 0xd23   :  { %v10510_v38 = vadd.f32 %v10069_v57, %v3315_v16  ;;  %v3435_v16 = vpop.xlane.xlu1 %3434 }
 0xd27   :  { %4046 = vrot.lane.b32.xlu0 %v10497_v40, %s8106_s19 }
 0xd29   :  { %6844 = vmatmul.msk.f32.gmra.mxu0 %vm596_vm11, %v3610_v43 }
 0xd2f   :  { %4048 = vrot.lane.b32.xlu0 %v10505_v26, %s8106_s19 }
 0xd34   :  { %v3423_v46 = vpop.xlane.xlu0 %3422 }
 0xd35   :  { %v3443_v21 = vsub.f32 %v10434_v2, %v3423_v46  ;;  %v10522_v2 = vadd.f32 %v10069_v57, %v3306_v5 }
 0xd37   :  { %v3452_v6 = vmul.f32 1.442695, %v3443_v21  ;;  %4050 = vrot.lane.b32.xlu0 %v10510_v38, %s8106_s19 }
 0xd39   :  { %7864 = vpow2.f32 %v3452_v6  ;;  %v3447_v6 = vsub.f32 %v10417_v28, %v3435_v16 }
 0xd3c   :  { %v3432_v43 = vpop.xlane.xlu0 %3431 }
 0xd3d   :  { %v3446_v19 = vsub.f32 %v10441_v51, %v3432_v43  ;;  %v12404_v43 = vunpack.i.h.bf16 %v10502_v41 }
 0xd3f   :  { %v7865_v32 = vpop.eup %7864  ;;  %v3458_v15 = vmul.f32 1.442695, %v3446_v19  ;;  %v3460_v19 = vmul.f32 1.442695, %v3447_v6 }
 0xd40   :  { %v3469_v23 = vsel %vm670_vm6, %v7865_v32, 0.0 }
 0xd41   :  { %7866 = vpow2.f32 %v3458_v15  ;;  %3470 = vadd.xlane.f32.xlu1 %v3469_v23 }
 0xd44   :  { %v3438_v10 = vpop.xlane.xlu0 %3437 }
 0xd45   :  { %v3448_v28 = vsub.f32 %v10451_v49, %v3438_v10  ;;  %v3441_v10 = vpop.xlane.xlu2 %3440 }
 0xd47   :  { %v10517_v11 = vpop.eup %7866 }
 0xd48   :  { %v3478_v22 = vsel %vm670_vm6, %v10517_v11, 0.0 }
 0xd49   :  { %3479 = vadd.xlane.f32.xlu2 %v3478_v22  ;;  %v7482_v22 = vpack.i.bf16 %v10413_v34, %v10436_v24 }
 0xd5a   :  { %4044 = vrot.lane.b32.xlu1 %v10522_v2, %s8106_s19 }
 0xd6e   :  { %v3708_v51 = vpop.f32.mrf.mxu0 }
 0xd70   :  { %v3318_v46 = vpop.f32.mrf.mxu1 }
 0xd71   :  { %v10527_v21 = vadd.f32 %v10069_v57, %v3318_v46  ;;  %v3462_v46 = vmul.f32 1.442695, %v3448_v28  ;;  %v7477_v28 = vpack.i.bf16 %v10381_v4, %v10358_v45 }
 0xd73   :  { %4052 = vrot.lane.b32.xlu2 %v10527_v21, %s8106_s19 }
 0xd76   :  { %v3711_v5 = vpop.f32.mrf.mxu0  ;;  %v3468_v15 = vpop.xlane.xlu0 %3467 }
 0xd77   :  { %v10535_v23 = vadd.f32 %v12404_v43, %v3711_v5  ;;  %7868 = vrcp.f32 %v3468_v15 }
 0xd78   :  { %7870 = vpow2.f32 %v3460_v19  ;;  %v3449_v19 = vsub.f32 %v10428_v39, %v3441_v10  ;;  %v7487_v39 = vpack.i.bf16 %v10425_v58, %v10443_v44 }
 0xd79   :  { %v3735_v57 = vsel %vm670_vm6, %v10535_v23, -inf  ;;  %7872 = vpow2.f32 %v3462_v46 }
 0xd7a   :  { %3736 = vmax.xlane.f32.xlu0 %v3735_v57 }
 0xd7b   :  { %7483 = vrot.lane.b32.xlu2 %v7482_v22, %s8109_s26  ;;  %v3464_v22 = vmul.f32 1.442695, %v3449_v19 }
 0xd7d   :  { %v7869_v16 = vpop.eup %7868  ;;  %7874 = vpow2.f32 %v3464_v22 }
 0xd7e   :  { %v3498_v6 = vmul.f32 %v7869_v16, %v10475_v53  ;;  %v10544_v37 = vpop.eup %7870  ;;  %v4039_v53 = vpop.permute.xlu1 %4038 }
 0xd7f   :  { %v3481_v5 = vsel %vm670_vm6, %v10544_v37, 0.0  ;;  %v10549_v15 = vpop.eup %7872 }
 0xd80   :  { %6821 = vmatmul.msk.f32.vlgmr.msra.gmra.mxu3 %vm670_vm6, %v3498_v6  ;;  %v3484_v49 = vsel %vm670_vm6, %v10549_v15, 0.0 }
 0xd83   :  { %v10554_v57 = vpop.eup %7874 }
 0xd84   :  { %3482 = vadd.xlane.f32.xlu1 %v3481_v5  ;;  %v3487_v46 = vsel %vm670_vm6, %v10554_v57, 0.0 }
 0xd86   :  { %v4041_v16 = vpop.permute.xlu1 %4040 }
 0xd8c   :  { %3485 = vadd.xlane.f32.xlu1 %v3484_v49  ;;  %v3474_v49 = vpop.xlane.xlu0 %3473 }
 0xd8e   :  { %v4043_v6 = vpop.permute.xlu1 %4042  ;;  %v3477_v22 = vpop.xlane.xlu2 %3476 }
 0xd99   :  { %v4047_v43 = vpop.permute.xlu0 %4046 }
 0xda1   :  { %v4049_v61 = vpop.permute.xlu0 %4048 }
 0xda4   :  { %3488 = vadd.xlane.f32.xlu2 %v3487_v46  ;;  %v3714_v46 = vpop.f32.mrf.mxu0 }
 0xda5   :  { %7478 = vrot.lane.b32.xlu1 %v7477_v28, %s8109_s26 }
 0xdb4   :  { %v3471_v5 = vpop.xlane.xlu1 %3470 }
 0xdb5   :  { %7876 = vrcp.f32 %v3471_v5  ;;  %v12409_v5 = vunpack.i.l.bf16 %v10502_v41 }
 0xdb6   :  { %7878 = vrcp.f32 %v3474_v49 }
 0xdb7   :  { %7880 = vrcp.f32 %v3477_v22 }
 0xdbb   :  { %v7877_v10 = vpop.eup %7876 }
 0xdbc   :  { %v3499_v19 = vmul.f32 %v7877_v10, %v7865_v32  ;;  %7488 = vrot.lane.b32.xlu2 %v7487_v39, %s8109_s26  ;;  %v7879_v42 = vpop.eup %7878  ;;  %v3480_v35 = vpop.xlane.xlu2 %3479  ;;  %v10570_v32 = vadd.f32 %v12409_v5, %v3708_v51 }
 0xdbd   :  { %v3500_v28 = vmul.f32 %v7879_v42, %v10485_v55  ;;  %v7881_v59 = vpop.eup %7880  ;;  %7882 = vrcp.f32 %v3480_v35  ;;  %v3717_v39 = vpop.f32.mrf.mxu0 }
 0xdbe   :  { %6822 = vmatmul.msk.f32.gmra.mxu3 %vm670_vm6, %v3499_v19  ;;  %v3501_v49 = vmul.f32 %v7881_v59, %v10490_v29  ;;  %v3732_v42 = vsel %vm670_vm6, %v10570_v32, -inf  ;;  %v4051_v19 = vpop.permute.xlu0 %4050 }
 0xdc3   :  { %v7883_v55 = vpop.eup %7882 }
 0xdc4   :  { %v3502_v51 = vmul.f32 %v7883_v55, %v10517_v11 }
 0xdc5   :  { %v3720_v35 = vpop.f32.mrf.mxu0 }
 0xdc6   :  { %6823 = vmatmul.msk.f32.gmra.mxu3 %vm670_vm6, %v3500_v28 }
 0xdcc   :  { %v4045_v11 = vpop.permute.xlu1 %4044 }
 0xdcd   :  { %v4053_v10 = vpop.permute.xlu2 %4052 }
 0xdce   :  { %6824 = vmatmul.msk.f32.gmra.mxu3 %vm670_vm6, %v3501_v49 }
 0xdcf   :  { %6861 = vmatpush.xpose.msk.msrb.mxu3 %vm596_vm11, %v4053_v10  ;;  %3733 = vmax.xlane.f32.xlu1 %v3732_v42  ;;  %v3723_v42 = vpop.f32.mrf.mxu0 }
 0xdd3   :  { %6862 = vmatpush.xpose.msk.msrb.mxu3 %vm596_vm11, %v4051_v19 }
 0xdd5   :  { %v10579_v22 = vpop.permute.xlu2 %7483 }
 0xdd6   :  { %v12412_v59 = vunpack.i.l.bf16 %v10579_v22  ;;  %6825 = vmatmul.msk.f32.gmra.mxu3 %vm670_vm6, %v3502_v51 }
 0xdd7   :  { %6863 = vmatpush.xpose.msk.msrb.mxu3 %vm596_vm11, %v4049_v61  ;;  %v10597_v61 = vpack.i.bf16 %v10510_v38, %v10527_v21 }
 0xdd8   :  { %v10586_v29 = vadd.f32 %v12412_v59, %v3720_v35 }
 0xdda   :  { %v3744_v28 = vsel %vm670_vm6, %v10586_v29, -inf }
 0xddb   :  { %6864 = vmatpush.xpose.msk.msrb.mxu3 %vm596_vm11, %v4047_v43  ;;  %3745 = vmax.xlane.f32.xlu1 %v3744_v28 }
 0xddf   :  { %6865 = vmatpush.xpose.msk.msrb.mxu3 %vm596_vm11, %v4045_v11 }
 0xde3   :  { %6866 = vmatpush.xpose.msk.msrb.mxu3 %vm596_vm11, %v4043_v6 }
 0xde7   :  { %6867 = vmatpush.xpose.msk.msrb.mxu3 %vm596_vm11, %v4041_v16 }
 0xdeb   :  { %6868 = vmatpush.xpose.msk.msrb.mxu3 %vm596_vm11, %v4039_v53 }
 0xdf4   :  { %7493 = vrot.lane.b32.xlu1 %v10597_v61, %s8109_s26 }
 0xdf7   :  { %v3483_v49 = vpop.xlane.xlu1 %3482 }
 0xdf8   :  { %7884 = vrcp.f32 %v3483_v49 }
 0xdfc   :  { %7518 = vrot.lane.b32.xlu1 %v10248_v14, %s8110_s29 }
 0xdfe   :  { %v7885_v43 = vpop.eup %7884 }
 0xdff   :  { %v3486_v10 = vpop.xlane.xlu1 %3485  ;;  %v3503_v6 = vmul.f32 %v7885_v43, %v10544_v37 }
 0xe00   :  { %7886 = vrcp.f32 %v3486_v10  ;;  %v3726_v10 = vpop.f32.mrf.mxu0 }
 0xe01   :  { %6826 = vmatmul.msk.f32.gmra.mxu3 %vm670_vm6, %v3503_v6 }
 0xe04   :  { %7528 = vrot.lane.b32.xlu1 %v10177_v13, %s8110_s29 }
 0xe06   :  { %v7887_v53 = vpop.eup %7886 }
 0xe07   :  { %v3504_v16 = vmul.f32 %v7887_v53, %v10549_v15  ;;  %v12411_v15 = vunpack.i.h.bf16 %v10579_v22 }
 0xe09   :  { %6827 = vmatmul.msk.f32.gmra.mxu3 %vm670_vm6, %v3504_v16 }
 0xe17   :  { %v3489_v55 = vpop.xlane.xlu2 %3488  ;;  %v10609_v19 = vpop.permute.xlu1 %7478 }
 0xe18   :  { %7888 = vrcp.f32 %v3489_v55  ;;  %v12413_v14 = vunpack.i.h.bf16 %v10609_v19  ;;  %v12414_v37 = vunpack.i.l.bf16 %v10609_v19  ;;  %v3737_v55 = vpop.xlane.xlu0 %3736 }
 0xe1a   :  { %v10615_v51 = vadd.f32 %v12413_v14, %v3717_v39  ;;  %v10619_v13 = vadd.f32 %v12414_v37, %v3714_v46  ;;  %v10632_v46 = vadd.f32 %v12411_v15, %v3723_v42  ;;  %v10663_v42 = vpack.i.bf16 %v10473_v12, %v10522_v2 }
 0xe1c   :  { %v3741_v35 = vsel %vm670_vm6, %v10615_v51, -inf  ;;  %v3738_v28 = vsel %vm670_vm6, %v10619_v13, -inf  ;;  %v3747_v16 = vsel %vm670_vm6, %v10632_v46, -inf }
 0xe1d   :  { %3742 = vmax.xlane.f32.xlu2 %v3741_v35  ;;  %3739 = vmax.xlane.f32.xlu0 %v3738_v28  ;;  %v3757_v35 = vsub.f32 %v10535_v23, %v3737_v55 }
 0xe1e   :  { %v7889_v11 = vpop.eup %7888 }
 0xe1f   :  { %v10626_v49 = vpop.permute.xlu2 %7488  ;;  %v3505_v39 = vmul.f32 %v7889_v11, %v10554_v57  ;;  %v10653_v57 = vpack.i.bf16 %v10497_v40, %v10505_v26 }
 0xe20   :  { %v12408_v43 = vunpack.i.l.bf16 %v10626_v49  ;;  %v12410_v23 = vunpack.i.h.bf16 %v10626_v49 }
 0xe21   :  { %6828 = vmatmul.msk.f32.gmra.mxu3 %vm670_vm6, %v3505_v39  ;;  %v3766_v39 = vmul.f32 1.442695, %v3757_v35  ;;  %v3729_v35 = vpop.f32.mrf.mxu0 }
 0xe22   :  { %v10637_v6 = vadd.f32 %v12408_v43, %v3726_v10  ;;  %v10677_v10 = vpop.f32.mrf.mxu3 }
 0xe24   :  { %v3750_v53 = vsel %vm670_vm6, %v10637_v6, -inf }
 0xe25   :  { %3751 = vmax.xlane.f32.xlu2 %v3750_v53  ;;  %3748 = vmax.xlane.f32.xlu0 %v3747_v16 }
 0xe29   :  { %6869 = vmatmul.msk.f32.vlgmr.msrb.gmra.mxu3 %vm596_vm11, %v10448_v31 }
 0xe31   :  { %6870 = vmatmul.msk.f32.gmra.mxu3 %vm596_vm11, %v10466_v33 }
 0xe39   :  { %7498 = vrot.lane.b32.xlu0 %v10244_v48, %s8110_s29  ;;  %6871 = vmatmul.msk.f32.gmra.mxu3 %vm596_vm11, %v10473_v12 }
 0xe3d   :  { %7503 = vrot.lane.b32.xlu2 %v10653_v57, %s8109_s26 }
 0xe41   :  { %7508 = vrot.lane.b32.xlu0 %v10171_v36, %s8110_s29  ;;  %6872 = vmatmul.msk.f32.gmra.mxu3 %vm596_vm11, %v10522_v2 }
 0xe42   :  { %v3734_v48 = vpop.xlane.xlu1 %3733 }
 0xe43   :  { %v3756_v36 = vsub.f32 %v10570_v32, %v3734_v48 }
 0xe45   :  { %7513 = vrot.lane.b32.xlu2 %v10663_v42, %s8109_s26  ;;  %v3764_v28 = vmul.f32 1.442695, %v3756_v36  ;;  %v10686_v36 = vpop.f32.mrf.mxu3 }
 0xe47   :  { %7890 = vpow2.f32 %v3764_v28 }
 0xe48   :  { %7892 = vpow2.f32 %v3766_v39  ;;  %v10692_v39 = vadd.f32 %v12410_v23, %v3729_v35 }
 0xe49   :  { %6873 = vmatmul.msk.f32.gmra.mxu3 %vm596_vm11, %v10497_v40 }
 0xe4d   :  { %v10679_v16 = vpop.eup %7890 }
 0xe4e   :  { %v3746_v11 = vpop.xlane.xlu1 %3745  ;;  %v10681_v48 = vpop.eup %7892  ;;  %v3780_v55 = vsel %vm670_vm6, %v10679_v16, 0.0 }
 0xe4f   :  { %v3783_v28 = vsel %vm670_vm6, %v10681_v48, 0.0 }
 0xe51   :  { %6874 = vmatmul.msk.f32.gmra.mxu3 %vm596_vm11, %v10505_v26 }
 0xe59   :  { %6875 = vmatmul.msk.f32.gmra.mxu3 %vm596_vm11, %v10510_v38 }
 0xe61   :  { %6876 = vmatmul.msk.f32.gmra.mxu3 %vm596_vm11, %v10527_v21 }
 0xe66   :  { %v7494_v53 = vpop.permute.xlu1 %7493 }
 0xe67   :  { %v7495_v43 = vunpack.i.l.bf16 %v7494_v53  ;;  %v7496_v32 = vunpack.i.h.bf16 %v7494_v53  ;;  %v10696_v53 = vpop.f32.mrf.mxu3 }
 0xe69   :  { %4271 = vmatpush.msrb.mxu0 %v7495_v43  ;;  %v3753_v43 = vsel %vm670_vm6, %v10692_v39, -inf }
 0xe6b   :  { %3781 = vadd.xlane.f32.xlu0 %v3780_v55  ;;  %4272 = vmatpush.msrb.mxu0 %v7496_v32  ;;  %v10702_v32 = vpack.i.bf16 %v10448_v31, %v10466_v33 }
 0xe6e   :  { %3784 = vadd.xlane.f32.xlu2 %v3783_v28 }
 0xe6f   :  { %v10698_v5 = vpop.f32.mrf.mxu3 }
 0xe73   :  { %3754 = vmax.xlane.f32.xlu0 %v3753_v43  ;;  %v3760_v43 = vsub.f32 %v10586_v29, %v3746_v11 }
 0xe75   :  { %v3772_v14 = vmul.f32 1.442695, %v3760_v43 }
 0xe77   :  { %v10706_v55 = vpop.f32.mrf.mxu3 }
 0xe84   :  { %v10709_v15 = vpop.f32.mrf.mxu3 }
 0xe87   :  { %7523 = vrot.lane.b32.xlu0 %v10702_v32, %s8109_s26 }
 0xe8c   :  { %v10715_v63 = vpop.f32.mrf.mxu3 }
 0xe90   :  { %v3743_v28 = vpop.xlane.xlu2 %3742  ;;  %v3740_v35 = vpop.xlane.xlu0 %3739 }
 0xe91   :  { %v3759_v23 = vsub.f32 %v10615_v51, %v3743_v28 }
 0xe93   :  { %v3770_v59 = vmul.f32 1.442695, %v3759_v23 }
 0xe95   :  { %7894 = vpow2.f32 %v3770_v59  ;;  %v3758_v59 = vsub.f32 %v10619_v13, %v3740_v35 }
 0xe96   :  { %7896 = vpow2.f32 %v3772_v14 }
 0xe98   :  { %v3752_v37 = vpop.xlane.xlu2 %3751  ;;  %v3749_v30 = vpop.xlane.xlu0 %3748 }
 0xe99   :  { %v3761_v20 = vsub.f32 %v10632_v46, %v3749_v30  ;;  %v3762_v17 = vsub.f32 %v10637_v6, %v3752_v37  ;;  %v3768_v46 = vmul.f32 1.442695, %v3758_v59 }
 0xe9b   :  { %v10713_v50 = vpop.eup %7894  ;;  %v3774_v47 = vmul.f32 1.442695, %v3761_v20  ;;  %v3776_v29 = vmul.f32 1.442695, %v3762_v17 }
 0xe9c   :  { %v3789_v51 = vsel %vm670_vm6, %v10713_v50, 0.0  ;;  %v10721_v23 = vpop.eup %7896 }
 0xe9d   :  { %3790 = vadd.xlane.f32.xlu2 %v3789_v51  ;;  %7898 = vpow2.f32 %v3774_v47  ;;  %v3792_v37 = vsel %vm670_vm6, %v10721_v23, 0.0 }
 0xe9e   :  { %7900 = vpow2.f32 %v3776_v29 }
 0xe9f   :  { %7902 = vpow2.f32 %v3768_v46 }
 0xea0   :  { %v7504_v11 = vpop.permute.xlu2 %7503 }
 0xea1   :  { %v7505_v30 = vunpack.i.l.bf16 %v7504_v11  ;;  %v7506_v28 = vunpack.i.h.bf16 %v7504_v11 }
 0xea3   :  { %4273 = vmatpush.msrb.mxu0 %v7505_v30  ;;  %v10723_v20 = vpop.eup %7898 }
 0xea4   :  { %v10725_v14 = vpop.f32.mrf.mxu3  ;;  %v3795_v47 = vsel %vm670_vm6, %v10723_v20, 0.0  ;;  %v10731_v6 = vpop.eup %7900 }
 0xea5   :  { %3793 = vadd.xlane.f32.xlu2 %v3792_v37  ;;  %4274 = vmatpush.msrb.mxu0 %v7506_v28  ;;  %v10733_v29 = vpop.eup %7902  ;;  %v3798_v11 = vsel %vm670_vm6, %v10731_v6, 0.0  ;;  %v7519_v28 = vpop.permute.xlu1 %7518 }
 0xea6   :  { %3796 = vadd.xlane.f32.xlu1 %v3795_v47  ;;  %v3786_v46 = vsel %vm670_vm6, %v10733_v29, 0.0 }
 0xea8   :  { %v7514_v17 = vpop.permute.xlu2 %7513 }
 0xea9   :  { %v7515_v13 = vunpack.i.l.bf16 %v7514_v17  ;;  %v7516_v35 = vunpack.i.h.bf16 %v7514_v17 }
 0xeab   :  { %v7499_v43 = vpop.permute.xlu0 %7498  ;;  %4275 = vmatpush.msrb.mxu0 %v7515_v13 }
 0xeac   :  { %v7500_v51 = vunpack.i.l.bf16 %v7499_v43  ;;  %v4103_v59 = vpop.f32.mrf.mxu3  ;;  %v7501_v30 = vunpack.i.h.bf16 %v7499_v43  ;;  %v7520_v43 = vunpack.i.l.bf16 %v7519_v28 }
 0xead   :  { %4276 = vmatpush.msrb.mxu0 %v7516_v35  ;;  %v10740_v47 = vadd.f32 %v10323_v18, %v4103_v59  ;;  %v7521_v18 = vunpack.i.h.bf16 %v7519_v28 }
 0xeae   :  { %3799 = vadd.xlane.f32.xlu1 %v3798_v11  ;;  %3876 = vmatpush.msra.mxu2 %v7500_v51  ;;  %v7529_v11 = vpop.permute.xlu1 %7528 }
 0xeaf   :  { %v4127_v51 = vsel %vm670_vm6, %v10740_v47, -inf  ;;  %v7530_v59 = vunpack.i.l.bf16 %v7529_v11 }
 0xeb0   :  { %3877 = vmatpush.msra.mxu2 %v7501_v30 }
 0xeb1   :  { %3787 = vadd.xlane.f32.xlu0 %v3786_v46  ;;  %v7531_v46 = vunpack.i.h.bf16 %v7529_v11 }
 0xeb3   :  { %v7509_v37 = vpop.permute.xlu0 %7508 }
 0xeb4   :  { %v7510_v17 = vunpack.i.l.bf16 %v7509_v37  ;;  %v4106_v13 = vpop.f32.mrf.mxu3  ;;  %v7511_v0 = vunpack.i.h.bf16 %v7509_v37 }
 0xeb5   :  { %v10743_v1 = vadd.f32 %v10369_v3, %v4106_v13 }
 0xeb6   :  { %3878 = vmatpush.msra.mxu2 %v7510_v17 }
 0xeb7   :  { %v4130_v35 = vsel %vm670_vm6, %v10743_v1, -inf }
 0xeb8   :  { %3879 = vmatpush.msra.mxu2 %v7511_v0  ;;  %4131 = vmax.xlane.f32.xlu2 %v4130_v35 }
 0xeb9   :  { %4128 = vmax.xlane.f32.xlu0 %v4127_v51 }
 0xeba   :  { %3880 = vmatpush.msra.mxu2 %v7520_v43 }
 0xebc   :  { %3881 = vmatpush.msra.mxu2 %v7521_v18  ;;  %v4109_v30 = vpop.f32.mrf.mxu3 }
 0xebd   :  { %v10750_v3 = vadd.f32 %v10358_v45, %v4109_v30 }
 0xebe   :  { %3882 = vmatpush.msra.mxu2 %v7530_v59 }
 0xebf   :  { %v4133_v37 = vsel %vm670_vm6, %v10750_v3, -inf }
 0xec0   :  { %3883 = vmatpush.msra.mxu2 %v7531_v46  ;;  %4134 = vmax.xlane.f32.xlu1 %v4133_v37 }
 0xec4   :  { %v4112_v0 = vpop.f32.mrf.mxu3 }
 0xec5   :  { %v10755_v17 = vadd.f32 %v10381_v4, %v4112_v0 }
 0xec7   :  { %v4136_v28 = vsel %vm670_vm6, %v10755_v17, -inf }
 0xec8   :  { %4137 = vmax.xlane.f32.xlu1 %v4136_v28 }
 0xecc   :  { %v4115_v35 = vpop.f32.mrf.mxu3 }
 0xecd   :  { %4334 = vrot.lane.b32.xlu0 %v10527_v21, %s8107_s20  ;;  %v10774_v30 = vadd.f32 %v10436_v24, %v4115_v35 }
 0xecf   :  { %v4139_v46 = vsel %vm670_vm6, %v10774_v30, -inf }
 0xed0   :  { %4332 = vrot.lane.b32.xlu2 %v10510_v38, %s8107_s20 }
 0xed4   :  { %v4118_v11 = vpop.f32.mrf.mxu3 }
 0xedc   :  { %v4121_v37 = vpop.f32.mrf.mxu3 }
 0xede   :  { %v3782_v45 = vpop.xlane.xlu0 %3781 }
 0xedf   :  { %7904 = vrcp.f32 %v3782_v45  ;;  %v10784_v45 = vadd.f32 %v10443_v44, %v4121_v37 }
 0xee1   :  { %4328 = vrot.lane.b32.xlu1 %v10497_v40, %s8107_s20  ;;  %v3785_v13 = vpop.xlane.xlu2 %3784 }
 0xee2   :  { %7906 = vrcp.f32 %v3785_v13 }
 0xee4   :  { %v4124_v24 = vpop.f32.mrf.mxu3 }
 0xee5   :  { %v7905_v43 = vpop.eup %7904  ;;  %v10789_v35 = vadd.f32 %v10425_v58, %v4124_v24 }
 0xee6   :  { %v3812_v4 = vmul.f32 %v7905_v43, %v10679_v16  ;;  %v3755_v59 = vpop.xlane.xlu0 %3754  ;;  %v10777_v16 = vadd.f32 %v10413_v34, %v4118_v11  ;;  %v4145_v34 = vsel %vm670_vm6, %v10784_v45, -inf }
 0xee7   :  { %v4148_v43 = vsel %vm670_vm6, %v10789_v35, -inf }
 0xee8   :  { %6845 = vmatmul.msk.f32.vlgmr.msra.gmra.mxu2 %vm670_vm6, %v3812_v4  ;;  %v7907_v51 = vpop.eup %7906 }
 0xee9   :  { %4326 = vrot.lane.b32.xlu1 %v10522_v2, %s8107_s20  ;;  %v3813_v18 = vmul.f32 %v7907_v51, %v10681_v48  ;;  %v4142_v48 = vsel %vm670_vm6, %v10777_v16, -inf  ;;  %v3763_v51 = vsub.f32 %v10692_v39, %v3755_v59 }
 0xef0   :  { %6846 = vmatmul.msk.f32.gmra.mxu2 %vm670_vm6, %v3813_v18 }
 0xef1   :  { %4324 = vrot.lane.b32.xlu1 %v10473_v12, %s8107_s20 }
 0xef7   :  { %4140 = vmax.xlane.f32.xlu0 %v4139_v46  ;;  %v3778_v46 = vmul.f32 1.442695, %v3763_v51 }
 0xef9   :  { %v7524_v0 = vpop.permute.xlu0 %7523  ;;  %4143 = vmax.xlane.f32.xlu2 %v4142_v48 }
 0xefa   :  { %v7525_v28 = vunpack.i.l.bf16 %v7524_v0  ;;  %v7526_v13 = vunpack.i.h.bf16 %v7524_v0 }
 0xefc   :  { %4277 = vmatpush.msrb.mxu0 %v7525_v28 }
 0xefe   :  { %4278 = vmatpush.msrb.mxu0 %v7526_v13 }
 0xf01   :  { %4146 = vmax.xlane.f32.xlu2 %v4145_v34 }
 0xf09   :  { %4149 = vmax.xlane.f32.xlu2 %v4148_v43 }
 0xf0b   :  { %4330 = vrot.lane.b32.xlu0 %v10505_v26, %s8107_s20 }
 0xf10   :  { %v3791_v44 = vpop.xlane.xlu2 %3790 }
 0xf18   :  { %v3794_v11 = vpop.xlane.xlu2 %3793 }
 0xf19   :  { %v3797_v4 = vpop.xlane.xlu1 %3796 }
 0xf21   :  { %v3800_v58 = vpop.xlane.xlu1 %3799 }
 0xf24   :  { %v3788_v18 = vpop.xlane.xlu0 %3787 }
 0xf25   :  { %7908 = vrcp.f32 %v3788_v18 }
 0xf26   :  { %7910 = vpow2.f32 %v3778_v46 }
 0xf27   :  { %7912 = vrcp.f32 %v3791_v44 }
 0xf2b   :  { %v7909_v37 = vpop.eup %7908  ;;  %v4132_v48 = vpop.xlane.xlu2 %4131 }
 0xf2c   :  { %v4152_v0 = vsub.f32 %v10743_v1, %v4132_v48  ;;  %v4129_v28 = vpop.xlane.xlu0 %4128  ;;  %v3814_v13 = vmul.f32 %v7909_v37, %v10733_v29  ;;  %v10800_v59 = vpop.eup %7910 }
 0xf2d   :  { %v4151_v34 = vsub.f32 %v10740_v47, %v4129_v28  ;;  %v7913_v43 = vpop.eup %7912  ;;  %v3801_v1 = vsel %vm670_vm6, %v10800_v59, 0.0 }
 0xf2e   :  { %v4161_v24 = vmul.f32 1.442695, %v4152_v0  ;;  %6847 = vmatmul.msk.f32.gmra.mxu2 %vm670_vm6, %v3814_v13  ;;  %v3815_v29 = vmul.f32 %v7913_v43, %v10713_v50 }
 0xf2f   :  { %v4159_v39 = vmul.f32 1.442695, %v4151_v34 }
 0xf30   :  { %7914 = vpow2.f32 %v4161_v24 }
 0xf31   :  { %7916 = vpow2.f32 %v4159_v39 }
 0xf32   :  { %7918 = vrcp.f32 %v3794_v11 }
 0xf33   :  { %v4135_v44 = vpop.xlane.xlu1 %4134 }
 0xf34   :  { %v4153_v51 = vsub.f32 %v10750_v3, %v4135_v44 }
 0xf35   :  { %3802 = vadd.xlane.f32.xlu0 %v3801_v1 }
 0xf36   :  { %v10806_v47 = vpop.eup %7914  ;;  %v4163_v18 = vmul.f32 1.442695, %v4153_v51  ;;  %6848 = vmatmul.msk.f32.gmra.mxu2 %vm670_vm6, %v3815_v29 }
 0xf37   :  { %v10809_v46 = vpop.eup %7916  ;;  %v4178_v37 = vsel %vm670_vm6, %v10806_v47, 0.0 }
 0xf38   :  { %7920 = vpow2.f32 %v4163_v18  ;;  %4179 = vadd.xlane.f32.xlu2 %v4178_v37  ;;  %v4175_v3 = vsel %vm670_vm6, %v10809_v46, 0.0  ;;  %v7919_v11 = vpop.eup %7918 }
 0xf39   :  { %4176 = vadd.xlane.f32.xlu1 %v4175_v3  ;;  %7922 = vrcp.f32 %v3797_v4  ;;  %v3816_v0 = vmul.f32 %v7919_v11, %v10721_v23 }
 0xf3b   :  { %v4138_v50 = vpop.xlane.xlu1 %4137 }
 0xf3c   :  { %v4154_v48 = vsub.f32 %v10755_v17, %v4138_v50  ;;  %v4333_v17 = vpop.permute.xlu2 %4332 }
 0xf3e   :  { %v10817_v28 = vpop.eup %7920  ;;  %v4165_v13 = vmul.f32 1.442695, %v4154_v48  ;;  %6849 = vmatmul.msk.f32.gmra.mxu2 %vm670_vm6, %v3816_v0 }
 0xf3f   :  { %v4335_v34 = vpop.permute.xlu0 %4334  ;;  %v4181_v24 = vsel %vm670_vm6, %v10817_v28, 0.0  ;;  %v7923_v4 = vpop.eup %7922 }
 0xf40   :  { %7924 = vpow2.f32 %v4165_v13  ;;  %6885 = vmatpush.xpose.msk.msra.mxu0 %vm596_vm11, %v4335_v34  ;;  %7324 = vmatpush.xpose.msk.msrb.mxu2 %vm596_vm11, %v4335_v34  ;;  %v3817_v23 = vmul.f32 %v7923_v4, %v10723_v20  ;;  %v12470_v20 = vpack.i.bf16 %v9958_v8, %v9952_v25 }
 0xf41   :  { %4182 = vadd.xlane.f32.xlu1 %v4181_v24  ;;  %7926 = vrcp.f32 %v3800_v58 }
 0xf44   :  { %6886 = vmatpush.xpose.msk.msra.mxu0 %vm596_vm11, %v4333_v17  ;;  %7325 = vmatpush.xpose.msk.msrb.mxu2 %vm596_vm11, %v4333_v17 }
 0xf46   :  { %v10827_v39 = vpop.eup %7924  ;;  %6850 = vmatmul.msk.f32.gmra.mxu2 %vm670_vm6, %v3817_v23 }
 0xf47   :  { %v4184_v43 = vsel %vm670_vm6, %v10827_v39, 0.0  ;;  %v7927_v44 = vpop.eup %7926 }
 0xf48   :  { %4185 = vadd.xlane.f32.xlu2 %v4184_v43  ;;  %v3818_v58 = vmul.f32 %v7927_v44, %v10731_v6 }
 0xf49   :  { %4306 = vrot.lane.b32.xlu0 %v10466_v33, %s8108_s21 }
 0xf4e   :  { %6851 = vmatmul.msk.f32.gmra.mxu2 %vm670_vm6, %v3818_v58 }
 0xf51   :  { %4314 = vrot.lane.b32.xlu0 %v10505_v26, %s8108_s21 }
 0xf53   :  { %v4329_v8 = vpop.permute.xlu1 %4328 }
 0xf59   :  { %7533 = vrot.lane.b32.xlu0 %v12470_v20, %s8111_s8 }
 0xf5a   :  { %4322 = vrot.lane.b32.xlu1 %v10466_v33, %s8107_s20 }
 0xf6a   :  { %v4141_v51 = vpop.xlane.xlu0 %4140 }
 0xf6b   :  { %v4155_v1 = vsub.f32 %v10774_v30, %v4141_v51  ;;  %v10845_v29 = vpop.f32.mrf.mxu2 }
 0xf6c   :  { %v4144_v18 = vpop.xlane.xlu2 %4143 }
 0xf6d   :  { %v4167_v6 = vmul.f32 1.442695, %v4155_v1  ;;  %v4156_v37 = vsub.f32 %v10777_v16, %v4144_v18 }
 0xf6f   :  { %7928 = vpow2.f32 %v4167_v6  ;;  %v4169_v3 = vmul.f32 1.442695, %v4156_v37  ;;  %v12471_v37 = vpack.i.bf16 %v9971_v9, %v9964_v56 }
 0xf71   :  { %7930 = vpow2.f32 %v4169_v3 }
 0xf73   :  { %v3888_v26 = vpop.f32.mrf.mxu2 }
 0xf74   :  { %v4147_v11 = vpop.xlane.xlu2 %4146  ;;  %3919 = vrot.lane.b32.xlu0 %v3888_v26, %s8112_s9 }
 0xf75   :  { %v10849_v25 = vpop.eup %7928  ;;  %v4157_v33 = vsub.f32 %v10784_v45, %v4147_v11  ;;  %v4327_v45 = vpop.permute.xlu1 %4326 }
 0xf76   :  { %v4187_v30 = vsel %vm670_vm6, %v10849_v25, 0.0 }
 0xf77   :  { %v4171_v50 = vmul.f32 1.442695, %v4157_v33  ;;  %4188 = vadd.xlane.f32.xlu2 %v4187_v30  ;;  %v10854_v48 = vpop.eup %7930 }
 0xf78   :  { %v4190_v34 = vsel %vm670_vm6, %v10854_v48, 0.0 }
 0xf79   :  { %7932 = vpow2.f32 %v4171_v50 }
 0xf7c   :  { %v4150_v16 = vpop.xlane.xlu2 %4149 }
 0xf7d   :  { %v4158_v0 = vsub.f32 %v10789_v35, %v4150_v16  ;;  %v4331_v13 = vpop.permute.xlu0 %4330  ;;  %v4325_v43 = vpop.permute.xlu1 %4324 }
 0xf7e   :  { %6887 = vmatpush.xpose.msk.msra.mxu0 %vm596_vm11, %v4331_v13  ;;  %7326 = vmatpush.xpose.msk.msrb.mxu2 %vm596_vm11, %v4331_v13 }
 0xf7f   :  { %v4173_v24 = vmul.f32 1.442695, %v4158_v0  ;;  %4191 = vadd.xlane.f32.xlu2 %v4190_v34  ;;  %v10861_v4 = vpop.eup %7932 }
 0xf80   :  { %v4193_v35 = vsel %vm670_vm6, %v10861_v4, 0.0 }
 0xf81   :  { %7934 = vpow2.f32 %v4173_v24 }
 0xf82   :  { %6888 = vmatpush.xpose.msk.msra.mxu0 %vm596_vm11, %v4329_v8  ;;  %7327 = vmatpush.xpose.msk.msrb.mxu2 %vm596_vm11, %v4329_v8 }
 0xf84   :  { %4194 = vadd.xlane.f32.xlu1 %v4193_v35 }
 0xf86   :  { %6889 = vmatpush.xpose.msk.msra.mxu0 %vm596_vm11, %v4327_v45  ;;  %7328 = vmatpush.xpose.msk.msrb.mxu2 %vm596_vm11, %v4327_v45 }
 0xf87   :  { %v10869_v17 = vpop.eup %7934 }
 0xf88   :  { %v4196_v23 = vsel %vm670_vm6, %v10869_v17, 0.0 }
 0xf89   :  { %4197 = vadd.xlane.f32.xlu2 %v4196_v23 }
 0xf8a   :  { %6890 = vmatpush.xpose.msk.msra.mxu0 %vm596_vm11, %v4325_v43  ;;  %7329 = vmatpush.xpose.msk.msrb.mxu2 %vm596_vm11, %v4325_v43 }
 0xf9d   :  { %4304 = vrot.lane.b32.xlu1 %v10448_v31, %s8108_s21 }
 0xfa1   :  { %4320 = vrot.lane.b32.xlu2 %v10448_v31, %s8107_s20 }
 0xfa5   :  { %4308 = vrot.lane.b32.xlu1 %v10473_v12, %s8108_s21 }
 0xfa8   :  { %v3803_v44 = vpop.xlane.xlu0 %3802 }
 0xfa9   :  { %7936 = vrcp.f32 %v3803_v44  ;;  %4312 = vrot.lane.b32.xlu2 %v10497_v40, %s8108_s21 }
 0xfab   :  { %v4180_v51 = vpop.xlane.xlu2 %4179 }
 0xfac   :  { %v4177_v58 = vpop.xlane.xlu1 %4176 }
 0xfad   :  { %7938 = vrcp.f32 %v4177_v58  ;;  %4310 = vrot.lane.b32.xlu1 %v10522_v2, %s8108_s21 }
 0xfae   :  { %7940 = vrcp.f32 %v4180_v51 }
 0xfaf   :  { %v7937_v20 = vpop.eup %7936 }
 0xfb0   :  { %v3819_v1 = vmul.f32 %v7937_v20, %v10800_v59 }
 0xfb1   :  { %v3891_v18 = vpop.f32.mrf.mxu2  ;;  %4318 = vrot.lane.b32.xlu2 %v10527_v21, %s8108_s21 }
 0xfb2   :  { %6852 = vmatmul.msk.f32.gmra.mxu2 %vm670_vm6, %v3819_v1 }
 0xfb3   :  { %v7939_v31 = vpop.eup %7938 }
 0xfb4   :  { %v4207_v12 = vmul.f32 %v7939_v31, %v10809_v46  ;;  %v4183_v40 = vpop.xlane.xlu1 %4182  ;;  %v7941_v2 = vpop.eup %7940 }
 0xfb5   :  { %4316 = vrot.lane.b32.xlu1 %v10510_v38, %s8108_s21  ;;  %7942 = vrcp.f32 %v4183_v40  ;;  %v4208_v21 = vmul.f32 %v7941_v2, %v10806_v47 }
 0xfb6   :  { %6877 = vmatmul.msk.f32.vlgmr.msrb.gmra.mxu0 %vm670_vm6, %v4207_v12 }
 0xfb9   :  { %v3894_v6 = vpop.f32.mrf.mxu2  ;;  %3917 = vrot.lane.b32.xlu2 %v10845_v29, %s8112_s9 }
 0xfbb   :  { %v4307_v59 = vpop.permute.xlu0 %4306  ;;  %v4186_v38 = vpop.xlane.xlu2 %4185 }
 0xfbc   :  { %v7943_v46 = vpop.eup %7942  ;;  %7944 = vrcp.f32 %v4186_v38 }
 0xfbd   :  { %7538 = vrot.lane.b32.xlu1 %v12471_v37, %s8111_s8  ;;  %v4209_v29 = vmul.f32 %v7943_v46, %v10817_v28 }
 0xfbe   :  { %6878 = vmatmul.msk.f32.gmra.mxu0 %vm670_vm6, %v4208_v21 }
 0xfc1   :  { %v3897_v3 = vpop.f32.mrf.mxu2  ;;  %3923 = vrot.lane.b32.xlu2 %v3894_v6, %s8112_s9 }
 0xfc2   :  { %v7945_v47 = vpop.eup %7944 }
 0xfc3   :  { %v4315_v26 = vpop.permute.xlu0 %4314  ;;  %v4210_v9 = vmul.f32 %v7945_v47, %v10827_v39 }
 0xfc5   :  { %3921 = vrot.lane.b32.xlu1 %v3891_v18, %s8112_s9 }
 0xfc6   :  { %6879 = vmatmul.msk.f32.gmra.mxu0 %vm670_vm6, %v4209_v29 }
 0xfc9   :  { %v3900_v11 = vpop.f32.mrf.mxu2 }
 0xfcb   :  { %v7534_v8 = vpop.permute.xlu0 %7533 }
 0xfcc   :  { %v4323_v56 = vpop.permute.xlu1 %4322  ;;  %v7535_v33 = vunpack.i.l.bf16 %v7534_v8  ;;  %v7536_v30 = vunpack.i.h.bf16 %v7534_v8 }
 0xfcd   :  { %3925 = vrot.lane.b32.xlu1 %v3897_v3, %s8112_s9  ;;  %6891 = vmatpush.xpose.msk.msra.mxu0 %vm596_vm11, %v4323_v56 }
 0xfce   :  { %7330 = vmatpush.xpose.msk.msrb.mxu2 %vm596_vm11, %v4323_v56  ;;  %6880 = vmatmul.msk.f32.gmra.mxu0 %vm670_vm6, %v4210_v9 }
 0xfcf   :  { %4001 = vmatpush.msra.mxu1 %v7535_v33  ;;  %4662 = vmatpush.msra.mxu3 %v7535_v33 }
 0xfd1   :  { %v3903_v28 = vpop.f32.mrf.mxu2  ;;  %4002 = vmatpush.msra.mxu1 %v7536_v30  ;;  %4663 = vmatpush.msra.mxu3 %v7536_v30 }
 0xfd2   :  { %3929 = vrot.lane.b32.xlu0 %v3903_v28, %s8112_s9  ;;  %v12473_v28 = vunpack.i.l.bf16 %v10609_v19 }
 0xfd5   :  { %3927 = vrot.lane.b32.xlu1 %v3900_v11, %s8112_s9 }
 0xfe6   :  { %v3920_v2 = vpop.permute.xlu0 %3919 }
 0xfe7   :  { %v3942_v6 = vsel %vm596_vm11, %v10686_v36, %v3920_v2 }
 0xfea   :  { %v4189_v39 = vpop.xlane.xlu2 %4188 }
 0xfeb   :  { %7946 = vrcp.f32 %v4189_v39 }
 0xff1   :  { %v7947_v50 = vpop.eup %7946 }
 0xff2   :  { %v4192_v16 = vpop.xlane.xlu2 %4191  ;;  %v4211_v0 = vmul.f32 %v7947_v50, %v10849_v25 }
 0xff3   :  { %7948 = vrcp.f32 %v4192_v16 }
 0xff4   :  { %6881 = vmatmul.msk.f32.gmra.mxu0 %vm670_vm6, %v4211_v0 }
 0xff7   :  { %v4195_v13 = vpop.xlane.xlu1 %4194 }
 0xff8   :  { %7950 = vrcp.f32 %v4195_v13  ;;  %v12474_v13 = vunpack.i.h.bf16 %v10609_v19 }
 0xff9   :  { %v7949_v34 = vpop.eup %7948 }
 0xffa   :  { %v4212_v45 = vmul.f32 %v7949_v34, %v10854_v48 }
 0xffc   :  { %6882 = vmatmul.msk.f32.gmra.mxu0 %vm670_vm6, %v4212_v45  ;;  %v4198_v24 = vpop.xlane.xlu2 %4197 }
 0xffd   :  { %7952 = vrcp.f32 %v4198_v24 }
 0xffe   :  { %v7951_v35 = vpop.eup %7950 }
 0xfff   :  { %v4213_v23 = vmul.f32 %v7951_v35, %v10861_v4  ;;  %v12475_v35 = vunpack.i.l.bf16 %v10579_v22 }
0x1003   :  { %v7953_v25 = vpop.eup %7952 }
0x1004   :  { %6883 = vmatmul.msk.f32.gmra.mxu0 %vm670_vm6, %v4213_v23  ;;  %v4321_v43 = vpop.permute.xlu2 %4320  ;;  %v4214_v44 = vmul.f32 %v7953_v25, %v10869_v17 }
0x1005   :  { %6892 = vmatpush.xpose.msk.msra.mxu0 %vm596_vm11, %v4321_v43  ;;  %7331 = vmatpush.xpose.msk.msrb.mxu2 %vm596_vm11, %v4321_v43 }
0x1008   :  { %6894 = vmatmul.msk.f32.vlgmr.msrb.gmra.mxu2 %vm596_vm11, %v4307_v59 }
0x100c   :  { %6884 = vmatmul.msk.f32.gmra.mxu0 %vm670_vm6, %v4214_v44  ;;  %v4313_v4 = vpop.permute.xlu2 %4312 }
0x100f   :  { %v4305_v48 = vpop.permute.xlu1 %4304 }
0x1014   :  { %6893 = vmatmul.msk.f32.vlgmr.msra.gmra.mxu0 %vm596_vm11, %v4305_v48  ;;  %v4319_v51 = vpop.permute.xlu2 %4318  ;;  %v12476_v48 = vunpack.i.h.bf16 %v10579_v22  ;;  %v12478_v22 = vunpack.i.l.bf16 %v10626_v49 }
0x1017   :  { %v4309_v58 = vpop.permute.xlu1 %4308 }
0x1018   :  { %6895 = vmatmul.msk.f32.gmra.mxu2 %vm596_vm11, %v4309_v58 }
0x101c   :  { %v3918_v17 = vpop.permute.xlu2 %3917 }
0x101d   :  { %v3941_v40 = vsel %vm596_vm11, %v10677_v10, %v3918_v17 }
0x101f   :  { %v4311_v20 = vpop.permute.xlu1 %4310 }
0x1020   :  { %6896 = vmatmul.msk.f32.gmra.mxu2 %vm596_vm11, %v4311_v20  ;;  %v12477_v20 = vunpack.i.l.bf16 %v10502_v41 }
0x1024   :  { %v3924_v10 = vpop.permute.xlu2 %3923 }
0x1025   :  { %v3944_v37 = vsel %vm596_vm11, %v10698_v5, %v3924_v10 }
0x1027   :  { %v4317_v1 = vpop.permute.xlu1 %4316 }
0x1028   :  { %6897 = vmatmul.msk.f32.gmra.mxu2 %vm596_vm11, %v4313_v4 }
0x102f   :  { %v7539_v18 = vpop.permute.xlu1 %7538 }
0x1030   :  { %v7541_v31 = vunpack.i.h.bf16 %v7539_v18  ;;  %v7540_v12 = vunpack.i.l.bf16 %v7539_v18  ;;  %6898 = vmatmul.msk.f32.gmra.mxu2 %vm596_vm11, %v4315_v26 }
0x1032   :  { %4003 = vmatpush.msra.mxu1 %v7540_v12  ;;  %4664 = vmatpush.msra.mxu3 %v7540_v12 }
0x1033   :  { %v10951_v5 = vpop.f32.mrf.mxu0 }
0x1034   :  { %4004 = vmatpush.msra.mxu1 %v7541_v31  ;;  %4665 = vmatpush.msra.mxu3 %v7541_v31 }
0x1035   :  { %6853 = vmatmul.msk.f32.vlgmr.msra.gmra.mxu1 %vm59_vm0, %v3941_v40 }
0x1037   :  { %v3922_v59 = vpop.permute.xlu1 %3921 }
0x1038   :  { %6899 = vmatmul.msk.f32.gmra.mxu2 %vm596_vm11, %v4317_v1  ;;  %v3943_v21 = vsel %vm596_vm11, %v10696_v53, %v3922_v59 }
0x103b   :  { %v10953_v29 = vpop.f32.mrf.mxu0 }
0x103d   :  { %6854 = vmatmul.msk.f32.gmra.mxu1 %vm59_vm0, %v3942_v6 }
0x103f   :  { %v3926_v38 = vpop.permute.xlu1 %3925 }
0x1040   :  { %6900 = vmatmul.msk.f32.gmra.mxu2 %vm596_vm11, %v4319_v51  ;;  %v3945_v36 = vsel %vm596_vm11, %v10706_v55, %v3926_v38  ;;  %v3906_v55 = vpop.f32.mrf.mxu2 }
0x1043   :  { %v10955_v47 = vpop.f32.mrf.mxu0 }
0x1044   :  { %v3930_v53 = vpop.permute.xlu0 %3929 }
0x1045   :  { %6855 = vmatmul.msk.f32.gmra.mxu1 %vm59_vm0, %v3943_v21  ;;  %v3947_v26 = vsel %vm596_vm11, %v10715_v63, %v3930_v53 }
0x1047   :  { %v3928_v46 = vpop.permute.xlu1 %3927 }
0x1048   :  { %v3946_v3 = vsel %vm596_vm11, %v10709_v15, %v3928_v46  ;;  %v12472_v15 = vunpack.i.h.bf16 %v10502_v41 }
0x104b   :  { %v10957_v11 = vpop.f32.mrf.mxu0 }
0x104d   :  { %6856 = vmatmul.msk.f32.gmra.mxu1 %vm59_vm0, %v3944_v37 }
0x1055   :  { %6857 = vmatmul.msk.f32.gmra.mxu1 %vm59_vm0, %v3945_v36 }
0x105d   :  { %6858 = vmatmul.msk.f32.gmra.mxu1 %vm59_vm0, %v3946_v3 }
0x1065   :  { %6859 = vmatmul.msk.f32.gmra.mxu1 %vm59_vm0, %v3947_v26 }
0x1071   :  { %v10962_v33 = vpop.f32.mrf.mxu0 }
0x1079   :  { %v10964_v63 = vpop.f32.mrf.mxu0 }
0x1081   :  { %v10969_v16 = vpop.f32.mrf.mxu0 }
0x1089   :  { %v10978_v43 = vpop.f32.mrf.mxu0 }
0x108b   :  { %v4388_v8 = vpop.f32.mrf.mxu2 }
0x108c   :  { %v4389_v56 = vadd.f32 %v12472_v15, %v4388_v8 }
0x108e   :  { %v4412_v9 = vsel %vm670_vm6, %v4389_v56, -inf }
0x108f   :  { %4413 = vmax.xlane.f32.xlu2 %v4412_v9  ;;  %v11034_v9 = vld [vmem:[%s12380_s1 + $0xd] ss:$0 sm:$0xff] }
0x1091   :  { %v4385_v4 = vpop.f32.mrf.mxu0 }
0x1092   :  { %v10987_v51 = vadd.f32 %v12477_v20, %v4385_v4 }
0x1094   :  { %v4409_v1 = vsel %vm670_vm6, %v10987_v51, -inf }
0x109b   :  { %v4391_v30 = vpop.f32.mrf.mxu2 }
0x109c   :  { %v4392_v39 = vadd.f32 %v12473_v28, %v4391_v30 }
0x109e   :  { %v4415_v50 = vsel %vm670_vm6, %v4392_v39, -inf }
0x109f   :  { %4416 = vmax.xlane.f32.xlu1 %v4415_v50 }
0x10a3   :  { %v4394_v0 = vpop.f32.mrf.mxu2 }
0x10a4   :  { %v4395_v34 = vadd.f32 %v12474_v13, %v4394_v0 }
0x10a6   :  { %v4418_v45 = vsel %vm670_vm6, %v4395_v34, -inf }
0x10a7   :  { %4419 = vmax.xlane.f32.xlu2 %v4418_v45 }
0x10ab   :  { %v4397_v24 = vpop.f32.mrf.mxu2 }
0x10ac   :  { %v10976_v23 = vadd.f32 %v12475_v35, %v4397_v24 }
0x10ae   :  { %v4421_v25 = vsel %vm670_vm6, %v10976_v23, -inf }
0x10af   :  { %4422 = vmax.xlane.f32.xlu1 %v4421_v25 }
0x10b2   :  { %v11004_v31 = vpop.f32.mrf.mxu1 }
0x10b3   :  { %v4400_v44 = vpop.f32.mrf.mxu2 }
0x10b4   :  { %v4401_v58 = vadd.f32 %v12476_v48, %v4400_v44 }
0x10b6   :  { %v4424_v19 = vsel %vm670_vm6, %v4401_v58, -inf }
0x10b7   :  { %4425 = vmax.xlane.f32.xlu0 %v4424_v19 }
0x10bb   :  { %v4403_v41 = vpop.f32.mrf.mxu2 }
0x10bc   :  { %v11002_v18 = vadd.f32 %v12478_v22, %v4403_v41 }
0x10be   :  { %v4427_v12 = vsel %vm670_vm6, %v11002_v18, -inf }
0x10bf   :  { %3931 = vrot.lane.b32.xlu2 %v3906_v55, %s8112_s9  ;;  %4410 = vmax.xlane.f32.xlu0 %v4409_v1 }
0x10c8   :  { %7543 = vrot.lane.b32.xlu1 %v10597_v61, %s8110_s29  ;;  %v4406_v61 = vpop.f32.mrf.mxu2 }
0x10d0   :  { %7548 = vrot.lane.b32.xlu1 %v10653_v57, %s8110_s29  ;;  %v12479_v57 = vunpack.i.h.bf16 %v10626_v49 }
0x10d2   :  { %v11010_v17 = vadd.f32 %v12479_v57, %v4406_v61 }
0x10d3   :  { %7553 = vrot.lane.b32.xlu0 %v10663_v42, %s8110_s29 }
0x10d4   :  { %v4430_v42 = vsel %vm670_vm6, %v11010_v17, -inf }
0x10db   :  { %7558 = vrot.lane.b32.xlu0 %v10702_v32, %s8110_s29  ;;  %v11014_v32 = vpop.f32.mrf.mxu1 }
0x10e3   :  { %v11016_v40 = vpop.f32.mrf.mxu1 }
0x10e8   :  { %4428 = vmax.xlane.f32.xlu2 %v4427_v12 }
0x10eb   :  { %v11018_v59 = vpop.f32.mrf.mxu1 }
0x10f0   :  { %4431 = vmax.xlane.f32.xlu2 %v4430_v42 }
0x10f3   :  { %v4018_v37 = vpop.f32.mrf.mxu1 }
0x10f4   :  { %v4695_v15 = vadd.f32 %v4018_v37, %v9817_v27 }
0x10f6   :  { %v11037_v30 = vadd.f32 %v11034_v9, %v4695_v15 }
0x10fb   :  { %v11024_v3 = vpop.f32.mrf.mxu1 }
0x1102   :  { %v4414_v2 = vpop.xlane.xlu2 %4413 }
0x1103   :  { %v4434_v6 = vsub.f32 %v4389_v56, %v4414_v2 }
0x1105   :  { %v4443_v21 = vmul.f32 1.442695, %v4434_v6 }
0x1107   :  { %7954 = vpow2.f32 %v4443_v21 }
0x110d   :  { %v11020_v10 = vpop.eup %7954 }
0x110e   :  { %v4460_v49 = vsel %vm670_vm6, %v11020_v10, 0.0 }
0x110f   :  { %4461 = vadd.xlane.f32.xlu2 %v4460_v49 }
0x1112   :  { %v4417_v38 = vpop.xlane.xlu1 %4416 }
0x1113   :  { %v4435_v36 = vsub.f32 %v4392_v39, %v4417_v38  ;;  %v4024_v39 = vpop.f32.mrf.mxu1 }
0x1114   :  { %v4697_v0 = vadd.f32 %v4024_v39, %v9823_v7 }
0x1115   :  { %v4445_v46 = vmul.f32 1.442695, %v4435_v36 }
0x1116   :  { %v11050_v45 = vadd.f32 %v11034_v9, %v4697_v0 }
0x1117   :  { %7956 = vpow2.f32 %v4445_v46 }
0x1118   :  { %v4745_v25 = vsel %vm59_vm0, %v11050_v45, 0.0 }
0x111a   :  { %v4420_v53 = vpop.xlane.xlu2 %4419 }
0x111b   :  { %v4436_v26 = vsub.f32 %v4395_v34, %v4420_v53  ;;  %v4739_v34 = vsel %vm59_vm0, %v11037_v30, 0.0 }
0x111d   :  { %v11026_v55 = vpop.eup %7956  ;;  %v4447_v8 = vmul.f32 1.442695, %v4436_v26 }
0x111e   :  { %v4463_v56 = vsel %vm670_vm6, %v11026_v55, 0.0 }
0x111f   :  { %7958 = vpow2.f32 %v4447_v8  ;;  %4464 = vadd.xlane.f32.xlu0 %v4463_v56 }
0x1122   :  { %v3932_v28 = vpop.permute.xlu2 %3931  ;;  %v4423_v7 = vpop.xlane.xlu1 %4422 }
0x1123   :  { %v3948_v50 = vsel %vm596_vm11, %v10725_v14, %v3932_v28  ;;  %v4437_v4 = vsub.f32 %v10976_v23, %v4423_v7 }
0x1124   :  { %6860 = vmatmul.msk.f32.gmra.mxu1 %vm59_vm0, %v3948_v50  ;;  %v4691_v50 = vadd.f32 %v11004_v31, %v9780_v52 }
0x1125   :  { %v11042_v27 = vpop.eup %7958 }
0x1126   :  { %v4466_v13 = vsel %vm670_vm6, %v11042_v27, 0.0 }
0x1127   :  { %4467 = vadd.xlane.f32.xlu2 %v4466_v13  ;;  %4740 = vadd.xlane.f32.xlu0 %v4739_v34  ;;  %v11077_v13 = vadd.f32 %v11034_v9, %v4691_v50  ;;  %v4692_v34 = vadd.f32 %v11014_v32, %v9806_v60  ;;  %v4694_v60 = vadd.f32 %v11018_v59, %v9839_v54  ;;  %v12480_v32 = vld [vmem:[#allocation12_spill] sm:$0xff] }
0x1129   :  { %v4727_v52 = vsel %vm59_vm0, %v11077_v13, 0.0  ;;  %v11090_v31 = vadd.f32 %v11034_v9, %v4692_v34 }
0x112a   :  { %v4426_v24 = vpop.xlane.xlu0 %4425 }
0x112b   :  { %v4438_v35 = vsub.f32 %v4401_v58, %v4426_v24  ;;  %v4449_v58 = vmul.f32 1.442695, %v4437_v4 }
0x112d   :  { %v4451_v14 = vmul.f32 1.442695, %v4438_v35 }
0x112f   :  { %7960 = vpow2.f32 %v4451_v14  ;;  %4746 = vadd.xlane.f32.xlu0 %v4745_v25  ;;  %v11104_v25 = vadd.f32 %v11034_v9, %v4694_v60 }
0x1131   :  { %v4736_v54 = vsel %vm59_vm0, %v11104_v25, 0.0 }
0x1132   :  { %v4411_v44 = vpop.xlane.xlu0 %4410 }
0x1133   :  { %v4433_v48 = vsub.f32 %v10987_v51, %v4411_v44 }
0x1135   :  { %v11055_v19 = vpop.eup %7960  ;;  %v4441_v20 = vmul.f32 1.442695, %v4433_v48 }
0x1136   :  { %v4472_v1 = vsel %vm670_vm6, %v11055_v19, 0.0 }
0x1137   :  { %7962 = vpow2.f32 %v4441_v20  ;;  %4473 = vadd.xlane.f32.xlu2 %v4472_v1 }
0x1138   :  { %7964 = vpow2.f32 %v4449_v58 }
0x113a   :  { %v7544_v41 = vpop.permute.xlu1 %7543 }
0x113b   :  { %v7545_v22 = vunpack.i.l.bf16 %v7544_v41  ;;  %v7546_v61 = vunpack.i.h.bf16 %v7544_v41 }
0x113d   :  { %v11060_v12 = vpop.eup %7962  ;;  %4553 = vmatpush.msrb.mxu1 %v7545_v22 }
0x113e   :  { %v4457_v51 = vsel %vm670_vm6, %v11060_v12, 0.0  ;;  %v11064_v57 = vpop.eup %7964 }
0x113f   :  { %4458 = vadd.xlane.f32.xlu1 %v4457_v51  ;;  %4554 = vmatpush.msrb.mxu1 %v7546_v61  ;;  %v4469_v49 = vsel %vm670_vm6, %v11064_v57, 0.0 }
0x1142   :  { %v7549_v23 = vpop.permute.xlu1 %7548 }
0x1143   :  { %v7550_v42 = vunpack.i.l.bf16 %v7549_v23  ;;  %v7551_v2 = vunpack.i.h.bf16 %v7549_v23 }
0x1145   :  { %v7554_v6 = vpop.permute.xlu0 %7553  ;;  %4555 = vmatpush.msrb.mxu1 %v7550_v42 }
0x1146   :  { %v7555_v21 = vunpack.i.l.bf16 %v7554_v6  ;;  %v7556_v37 = vunpack.i.h.bf16 %v7554_v6 }
0x1147   :  { %4470 = vadd.xlane.f32.xlu1 %v4469_v49  ;;  %4556 = vmatpush.msrb.mxu1 %v7551_v2 }
0x1149   :  { %4557 = vmatpush.msrb.mxu1 %v7555_v21 }
0x114b   :  { %4558 = vmatpush.msrb.mxu1 %v7556_v37 }
0x114d   :  { %v7559_v38 = vpop.permute.xlu0 %7558 }
0x114e   :  { %v7560_v36 = vunpack.i.l.bf16 %v7559_v38  ;;  %v7561_v46 = vunpack.i.h.bf16 %v7559_v38  ;;  %v12481_v38 = vld [vmem:[#allocation5_spill] sm:$0xff] }
0x1150   :  { %4559 = vmatpush.msrb.mxu1 %v7560_v36 }
0x1152   :  { %4560 = vmatpush.msrb.mxu1 %v7561_v46 }
0x115b   :  { %v4429_v53 = vpop.xlane.xlu2 %4428 }
0x115c   :  { %v4439_v26 = vsub.f32 %v11002_v18, %v4429_v53 }
0x115e   :  { %v4453_v8 = vmul.f32 1.442695, %v4439_v26 }
0x1160   :  { %7966 = vpow2.f32 %v4453_v8 }
0x1163   :  { %v4432_v15 = vpop.xlane.xlu2 %4431 }
0x1164   :  { %v4440_v56 = vsub.f32 %v11010_v17, %v4432_v15  ;;  %v4693_v17 = vadd.f32 %v11016_v40, %v9793_v62  ;;  %v4696_v62 = vadd.f32 %v11024_v3, %v12480_v32  ;;  %v4730_v40 = vsel %vm59_vm0, %v11090_v31, 0.0 }
0x1166   :  { %v11070_v28 = vpop.eup %7966  ;;  %v4455_v39 = vmul.f32 1.442695, %v4440_v56  ;;  %v11093_v35 = vadd.f32 %v11034_v9, %v4693_v17  ;;  %v11107_v7 = vadd.f32 %v11034_v9, %v4696_v62 }
0x1167   :  { %v4475_v0 = vsel %vm670_vm6, %v11070_v28, 0.0 }
0x1168   :  { %7968 = vpow2.f32 %v4455_v39  ;;  %4476 = vadd.xlane.f32.xlu1 %v4475_v0  ;;  %v4733_v14 = vsel %vm59_vm0, %v11093_v35, 0.0  ;;  %v4742_v59 = vsel %vm59_vm0, %v11107_v7, 0.0 }
0x116e   :  { %v11079_v18 = vpop.eup %7968 }
0x116f   :  { %v4478_v24 = vsel %vm670_vm6, %v11079_v18, 0.0 }
0x1170   :  { %4479 = vadd.xlane.f32.xlu2 %v4478_v24  ;;  %4728 = vadd.xlane.f32.xlu1 %v4727_v52 }
0x1178   :  { %4731 = vadd.xlane.f32.xlu2 %v4730_v40  ;;  %4734 = vadd.xlane.f32.xlu1 %v4733_v14 }
0x1180   :  { %4737 = vadd.xlane.f32.xlu2 %v4736_v54  ;;  %4743 = vadd.xlane.f32.xlu1 %v4742_v59 }
0x1182   :  { %v4462_v44 = vpop.xlane.xlu2 %4461 }
0x1192   :  { %v4465_v20 = vpop.xlane.xlu0 %4464 }
0x119a   :  { %v4468_v41 = vpop.xlane.xlu2 %4467  ;;  %v4741_v50 = vpop.xlane.xlu0 %4740 }
0x11a1   :  { %v4027_v53 = vpop.f32.mrf.mxu1 }
0x11aa   :  { %v4474_v42 = vpop.xlane.xlu2 %4473 }
0x11b2   :  { %v4459_v3 = vpop.xlane.xlu1 %4458 }
0x11b3   :  { %7970 = vrcp.f32 %v4459_v3 }
0x11b4   :  { %7972 = vrcp.f32 %v4462_v44 }
0x11b5   :  { %7974 = vrcp.f32 %v4465_v20 }
0x11b6   :  { %7976 = vrcp.f32 %v4468_v41 }
0x11b9   :  { %v7971_v48 = vpop.eup %7970 }
0x11ba   :  { %v4489_v4 = vmul.f32 %v7971_v48, %v11060_v12  ;;  %v7973_v1 = vpop.eup %7972  ;;  %v4471_v51 = vpop.xlane.xlu1 %4470 }
0x11bb   :  { %v4490_v58 = vmul.f32 %v7973_v1, %v11020_v10  ;;  %v7975_v22 = vpop.eup %7974  ;;  %7978 = vrcp.f32 %v4471_v51 }
0x11bc   :  { %6901 = vmatmul.msk.f32.vlgmr.msrb.gmra.mxu1 %vm670_vm6, %v4489_v4  ;;  %v4491_v61 = vmul.f32 %v7975_v22, %v11026_v55  ;;  %v7977_v23 = vpop.eup %7976  ;;  %7980 = vrcp.f32 %v4474_v42 }
0x11bd   :  { %v4492_v12 = vmul.f32 %v7977_v23, %v11042_v27 }
0x11c1   :  { %v7979_v2 = vpop.eup %7978 }
0x11c2   :  { %v4493_v10 = vmul.f32 %v7979_v2, %v11064_v57  ;;  %v7981_v21 = vpop.eup %7980 }
0x11c3   :  { %v4494_v55 = vmul.f32 %v7981_v21, %v11055_v19  ;;  %v12482_v19 = vld [vmem:[#allocation11_spill] sm:$0xff] }
0x11c4   :  { %6902 = vmatmul.msk.f32.gmra.mxu1 %vm670_vm6, %v4490_v58  ;;  %v4698_v15 = vadd.f32 %v4027_v53, %v12482_v19 }
0x11c6   :  { %v11145_v60 = vadd.f32 %v11034_v9, %v4698_v15 }
0x11c8   :  { %v4748_v48 = vsel %vm59_vm0, %v11145_v60, 0.0 }
0x11cc   :  { %6903 = vmatmul.msk.f32.gmra.mxu1 %vm670_vm6, %v4491_v61  ;;  %v4747_v61 = vpop.xlane.xlu0 %4746 }
0x11cd   :  { %v4781_v23 = vmul.f32 %v4747_v61, %v12481_v38 }
0x11cf   :  { %v11178_v42 = vsub.f32 %v11050_v45, %v4781_v23 }
0x11d4   :  { %6904 = vmatmul.msk.f32.gmra.mxu1 %vm670_vm6, %v4492_v12 }
0x11db   :  { %v4477_v6 = vpop.xlane.xlu1 %4476 }
0x11dc   :  { %6905 = vmatmul.msk.f32.gmra.mxu1 %vm670_vm6, %v4493_v10  ;;  %7982 = vrcp.f32 %v4477_v6  ;;  %v4813_v10 = vmul.f32 %v11178_v42, %v11178_v42 }
0x11de   :  { %v4841_v6 = vsel %vm59_vm0, %v4813_v10, 0.0 }
0x11e2   :  { %v7983_v46 = vpop.eup %7982 }
0x11e3   :  { %v4480_v49 = vpop.xlane.xlu2 %4479  ;;  %v4729_v37 = vpop.xlane.xlu1 %4728  ;;  %v4495_v8 = vmul.f32 %v7983_v46, %v11070_v28  ;;  %v4779_v28 = vmul.f32 %v4741_v50, %v12481_v38  ;;  %v11194_v46 = vld [vmem:[%s12381_s2 + $0x68] sm:$0xff] }
0x11e4   :  { %v4775_v36 = vmul.f32 %v4729_v37, %v12481_v38  ;;  %6906 = vmatmul.msk.f32.gmra.mxu1 %vm670_vm6, %v4494_v55  ;;  %7984 = vrcp.f32 %v4480_v49 }
0x11e5   :  { %v11155_v59 = vsub.f32 %v11037_v30, %v4779_v28 }
0x11e6   :  { %v11127_v27 = vsub.f32 %v11077_v13, %v4775_v36  ;;  %v6920_v36 = vld [vmem:[%s12381_s2 + $0x78] sm:$0xff] }
0x11e7   :  { %v4811_v1 = vmul.f32 %v11155_v59, %v11155_v59  ;;  %5179 = vmatpush.msrb.mxu0 %v6920_v36 }
0x11e8   :  { %v4807_v57 = vmul.f32 %v11127_v27, %v11127_v27 }
0x11e9   :  { %v4835_v51 = vsel %vm59_vm0, %v4811_v1, 0.0  ;;  %5180 = vmatpush.msrb.mxu0 %v11194_v46 }
0x11ea   :  { %v4823_v26 = vsel %vm59_vm0, %v4807_v57, 0.0  ;;  %v7985_v52 = vpop.eup %7984  ;;  %v11200_v57 = vld [vmem:[%s12381_s2 + $0x58] sm:$0xff] }
0x11eb   :  { %v4732_v56 = vpop.xlane.xlu2 %4731  ;;  %v4735_v39 = vpop.xlane.xlu1 %4734  ;;  %4824 = vadd.xlane.f32.xlu2 %v4823_v26  ;;  %v4496_v54 = vmul.f32 %v7985_v52, %v11079_v18  ;;  %5181 = vmatpush.msrb.mxu0 %v11200_v57  ;;  %v11207_v26 = vld [vmem:[%s12381_s2 + $0x48] sm:$0xff] }
0x11ec   :  { %v4776_v0 = vmul.f32 %v4732_v56, %v12481_v38  ;;  %v4777_v34 = vmul.f32 %v4735_v39, %v12481_v38  ;;  %6907 = vmatmul.msk.f32.gmra.mxu1 %vm670_vm6, %v4495_v8 }
0x11ed   :  { %5182 = vmatpush.msrb.mxu0 %v11207_v26 }
0x11ee   :  { %v11138_v17 = vsub.f32 %v11090_v31, %v4776_v0  ;;  %v11141_v24 = vsub.f32 %v11093_v35, %v4777_v34 }
0x11f0   :  { %v4808_v32 = vmul.f32 %v11138_v17, %v11138_v17  ;;  %v4809_v62 = vmul.f32 %v11141_v24, %v11141_v24 }
0x11f2   :  { %v4826_v40 = vsel %vm59_vm0, %v4808_v32, 0.0  ;;  %v4829_v14 = vsel %vm59_vm0, %v4809_v62, 0.0 }
0x11f3   :  { %v4738_v3 = vpop.xlane.xlu2 %4737  ;;  %4827 = vadd.xlane.f32.xlu1 %v4826_v40  ;;  %v4744_v44 = vpop.xlane.xlu1 %4743  ;;  %4830 = vadd.xlane.f32.xlu0 %v4829_v14 }
0x11f4   :  { %v4778_v4 = vmul.f32 %v4738_v3, %v12481_v38  ;;  %4749 = vadd.xlane.f32.xlu2 %v4748_v48  ;;  %6908 = vmatmul.msk.f32.gmra.mxu1 %vm670_vm6, %v4496_v54  ;;  %v4780_v18 = vmul.f32 %v4744_v44, %v12481_v38 }
0x11f6   :  { %v11162_v20 = vsub.f32 %v11104_v25, %v4778_v4  ;;  %v11170_v41 = vsub.f32 %v11107_v7, %v4780_v18 }
0x11f8   :  { %v4810_v58 = vmul.f32 %v11162_v20, %v11162_v20  ;;  %v4812_v12 = vmul.f32 %v11170_v41, %v11170_v41 }
0x11fa   :  { %v4832_v22 = vsel %vm59_vm0, %v4810_v58, 0.0  ;;  %v4838_v2 = vsel %vm59_vm0, %v4812_v12, 0.0 }
0x11fb   :  { %4833 = vadd.xlane.f32.xlu1 %v4832_v22 }
0x11fc   :  { %4836 = vadd.xlane.f32.xlu2 %v4835_v51 }
0x1203   :  { %4839 = vadd.xlane.f32.xlu1 %v4838_v2 }
0x120b   :  { %4842 = vadd.xlane.f32.xlu1 %v4841_v6 }
0x1239   :  { %v4562_v21 = vpop.f32.mrf.mxu1 }
0x123a   :  { %4594 = vrot.lane.b32.xlu0 %v4562_v21, %s8112_s9 }
0x1241   :  { %v4565_v55 = vpop.f32.mrf.mxu1 }
0x1242   :  { %4596 = vrot.lane.b32.xlu2 %v4565_v55, %s8112_s9 }
0x1249   :  { %v4568_v49 = vpop.f32.mrf.mxu1 }
0x124a   :  { %4598 = vrot.lane.b32.xlu1 %v4568_v49, %s8112_s9  ;;  %v11236_v49 = vld [vmem:[%s12380_s1 + $0xa] ss:$0 sm:$0xff] }
0x1251   :  { %v4571_v37 = vpop.f32.mrf.mxu1 }
0x1252   :  { %4600 = vrot.lane.b32.xlu2 %v4571_v37, %s8112_s9 }
0x1259   :  { %v4574_v53 = vpop.f32.mrf.mxu1 }
0x125a   :  { %4602 = vrot.lane.b32.xlu2 %v4574_v53, %s8112_s9 }
0x125e   :  { %v4825_v8 = vpop.xlane.xlu2 %4824 }
0x125f   :  { %v4871_v19 = vmul.f32 %v4825_v8, %v12481_v38 }
0x1261   :  { %v4887_v15 = vadd.f32 1e-05, %v4871_v19  ;;  %v4577_v56 = vpop.f32.mrf.mxu1  ;;  %v11244_v19 = vld [vmem:[%s12380_s1 + $0xb] ss:$0 sm:$0xff] }
0x1262   :  { %4604 = vrot.lane.b32.xlu1 %v4577_v56, %s8112_s9 }
0x1263   :  { %7986 = vrsqrt.f32 %v4887_v15  ;;  %vm4909_vm14 = vweird.f32 %v4887_v15 }
0x1266   :  { %v4828_v39 = vpop.xlane.xlu1 %4827  ;;  %v4831_v50 = vpop.xlane.xlu0 %4830 }
0x1267   :  { %v4872_v0 = vmul.f32 %v4828_v39, %v12481_v38  ;;  %v4873_v34 = vmul.f32 %v4831_v50, %v12481_v38  ;;  %v4750_v52 = vpop.xlane.xlu2 %4749 }
0x1268   :  { %v4782_v28 = vmul.f32 %v4750_v52, %v12481_v38 }
0x1269   :  { %v7987_v32 = vpop.eup %7986  ;;  %v4888_v62 = vadd.f32 1e-05, %v4872_v0  ;;  %v11215_v40 = vadd.f32 1e-05, %v4873_v34  ;;  %v4580_v14 = vpop.f32.mrf.mxu1 }
0x126a   :  { %v4904_v54 = vmul.f32 %v7987_v32, %v4887_v15  ;;  %v11218_v3 = vsub.f32 %v11145_v60, %v4782_v28  ;;  %4606 = vrot.lane.b32.xlu2 %v4580_v14, %s8112_s9  ;;  %vm4910_vm13 = vweird.f32 %v7987_v32 }
0x126b   :  { %7988 = vrsqrt.f32 %v4888_v62  ;;  %vm4911_vm15 = vmor %vm4909_vm14, %vm4910_vm13  ;;  %vm4919_vm2 = vweird.f32 %v4888_v62  ;;  %vm4929_vm5 = vweird.f32 %v11215_v40 }
0x126c   :  { %v4905_v44 = vmul.f32 %v7987_v32, %v4904_v54  ;;  %7990 = vrsqrt.f32 %v11215_v40  ;;  %v4814_v48 = vmul.f32 %v11218_v3, %v11218_v3 }
0x126e   :  { %v4906_v4 = vmul.f32 0.5, %v4905_v44  ;;  %v4834_v18 = vpop.xlane.xlu1 %4833  ;;  %v4844_v1 = vsel %vm59_vm0, %v4814_v48, 0.0 }
0x126f   :  { %v4874_v58 = vmul.f32 %v4834_v18, %v12481_v38  ;;  %v4837_v22 = vpop.xlane.xlu2 %4836  ;;  %4845 = vadd.xlane.f32.xlu0 %v4844_v1 }
0x1270   :  { %v4907_v61 = vsub.f32 1.5, %v4906_v4  ;;  %v4875_v51 = vmul.f32 %v4837_v22, %v12481_v38 }
0x1271   :  { %v7989_v23 = vpop.eup %7988  ;;  %v11227_v12 = vadd.f32 1e-05, %v4874_v58  ;;  %v4583_v2 = vpop.f32.mrf.mxu1 }
0x1272   :  { %v7991_v10 = vpop.eup %7990  ;;  %v4908_v6 = vmul.f32 %v7987_v32, %v4907_v61  ;;  %v4914_v21 = vmul.f32 %v7989_v23, %v4888_v62  ;;  %v11229_v55 = vadd.f32 1e-05, %v4875_v51  ;;  %4608 = vrot.lane.b32.xlu1 %v4583_v2, %s8112_s9  ;;  %5386 = vrot.lane.b32.xlu2 %v6920_v36, %s8109_s26  ;;  %vm4920_vm1 = vweird.f32 %v7989_v23 }
0x1273   :  { %v4924_v37 = vmul.f32 %v7991_v10, %v11215_v40  ;;  %7992 = vrsqrt.f32 %v11227_v12  ;;  %vm4930_vm3 = vweird.f32 %v7991_v10  ;;  %vm4921_vm4 = vmor %vm4919_vm2, %vm4920_vm1  ;;  %vm4939_vm9 = vweird.f32 %v11227_v12 }
0x1274   :  { %v4912_v53 = vsel %vm4911_vm15, %v7987_v32, %v4908_v6  ;;  %v4915_v8 = vmul.f32 %v7989_v23, %v4914_v21  ;;  %7994 = vrsqrt.f32 %v11229_v55  ;;  %vm4931_vm7 = vmor %vm4929_vm5, %vm4930_vm3  ;;  %vm4949_vm13 = vweird.f32 %v11229_v55 }
0x1275   :  { %v5063_v36 = vmul.f32 %v4912_v53, %v11127_v27  ;;  %v4925_v15 = vmul.f32 %v7991_v10, %v4924_v37 }
0x1276   :  { %v4916_v56 = vmul.f32 0.5, %v4915_v8  ;;  %v4840_v39 = vpop.xlane.xlu1 %4839 }
0x1277   :  { %v5080_v50 = vmul.f32 %v11236_v49, %v5063_v36  ;;  %v4926_v0 = vmul.f32 0.5, %v4925_v15  ;;  %v4876_v34 = vmul.f32 %v4840_v39, %v12481_v38 }
0x1278   :  { %v4917_v52 = vsub.f32 1.5, %v4916_v56 }
0x1279   :  { %v7993_v28 = vpop.eup %7992  ;;  %v5097_v32 = vadd.f32 %v11244_v19, %v5080_v50  ;;  %v4927_v14 = vsub.f32 1.5, %v4926_v0  ;;  %v11250_v54 = vadd.f32 1e-05, %v4876_v34 }
0x127a   :  { %v7995_v44 = vpop.eup %7994  ;;  %v4918_v48 = vmul.f32 %v7989_v23, %v4917_v52  ;;  %v4934_v27 = vmul.f32 %v7993_v28, %v11227_v12  ;;  %5384 = vrot.lane.b32.xlu1 %v11194_v46, %s8109_s26  ;;  %5382 = vrot.lane.b32.xlu2 %v11200_v57, %s8109_s26  ;;  %vm4940_vm8 = vweird.f32 %v7993_v28 }
0x127b   :  { %v4928_v4 = vmul.f32 %v7991_v10, %v4927_v14  ;;  %v4944_v18 = vmul.f32 %v7995_v44, %v11229_v55  ;;  %7996 = vrsqrt.f32 %v11250_v54  ;;  %6921 = vmatmul.msk.f32.vlgmr.msrb.gmra.mxu0 %vm59_vm0, %v5097_v32  ;;  %vm4941_vm10 = vmor %vm4939_vm9, %vm4940_vm8  ;;  %vm4950_vm12 = vweird.f32 %v7995_v44 }
0x127c   :  { %v4922_v1 = vsel %vm4921_vm4, %v7989_v23, %v4918_v48  ;;  %v4935_v62 = vmul.f32 %v7993_v28, %v4934_v27  ;;  %vm4951_vm14 = vmor %vm4949_vm13, %vm4950_vm12  ;;  %vm4959_vm1 = vweird.f32 %v11250_v54 }
0x127d   :  { %v5064_v58 = vmul.f32 %v4922_v1, %v11138_v17  ;;  %v4932_v22 = vsel %vm4931_vm7, %v7991_v10, %v4928_v4  ;;  %v4945_v61 = vmul.f32 %v7995_v44, %v4944_v18 }
0x127e   :  { %v4936_v46 = vmul.f32 0.5, %v4935_v62  ;;  %v4843_v51 = vpop.xlane.xlu1 %4842  ;;  %v5065_v37 = vmul.f32 %v4932_v22, %v11141_v24 }
0x127f   :  { %v4877_v57 = vmul.f32 %v4843_v51, %v12481_v38  ;;  %v5081_v2 = vmul.f32 %v11236_v49, %v5064_v58  ;;  %v4946_v8 = vmul.f32 0.5, %v4945_v61 }
0x1280   :  { %v4937_v6 = vsub.f32 1.5, %v4936_v46  ;;  %v5082_v10 = vmul.f32 %v11236_v49, %v5065_v37 }
0x1281   :  { %v7997_v21 = vpop.eup %7996  ;;  %v4893_v53 = vadd.f32 1e-05, %v4877_v57  ;;  %v5098_v23 = vadd.f32 %v11244_v19, %v5081_v2  ;;  %v4947_v36 = vsub.f32 1.5, %v4946_v8 }
0x1282   :  { %v4938_v40 = vmul.f32 %v7993_v28, %v4937_v6  ;;  %v4954_v17 = vmul.f32 %v7997_v21, %v11250_v54  ;;  %v5099_v50 = vadd.f32 %v11244_v19, %v5082_v10  ;;  %vm4960_vm15 = vweird.f32 %v7997_v21 }
0x1283   :  { %7998 = vrsqrt.f32 %v4893_v53  ;;  %6922 = vmatmul.msk.f32.gmra.mxu0 %vm59_vm0, %v5098_v23  ;;  %5380 = vrot.lane.b32.xlu0 %v11207_v26, %s8109_s26  ;;  %v4948_v0 = vmul.f32 %v7995_v44, %v4947_v36  ;;  %vm4961_vm2 = vmor %vm4959_vm1, %vm4960_vm15  ;;  %vm4969_vm4 = vweird.f32 %v4893_v53 }
0x1284   :  { %v4942_v24 = vsel %vm4941_vm10, %v7993_v28, %v4938_v40  ;;  %v4955_v15 = vmul.f32 %v7997_v21, %v4954_v17 }
0x1285   :  { %v5066_v39 = vmul.f32 %v4942_v24, %v11162_v20  ;;  %v4952_v12 = vsel %vm4951_vm14, %v7995_v44, %v4948_v0  ;;  %v11323_v0 = vld [vmem:[%s12380_s1 + $0xe] ss:$0 sm:$0xff] }
0x1286   :  { %v4956_v34 = vmul.f32 0.5, %v4955_v15  ;;  %v5067_v14 = vmul.f32 %v4952_v12, %v11155_v59 }
0x1287   :  { %v5083_v26 = vmul.f32 %v11236_v49, %v5066_v39 }
0x1288   :  { %v4957_v28 = vsub.f32 1.5, %v4956_v34  ;;  %v5084_v55 = vmul.f32 %v11236_v49, %v5067_v14 }
0x1289   :  { %v7999_v56 = vpop.eup %7998  ;;  %v5100_v20 = vadd.f32 %v11244_v19, %v5083_v26 }
0x128a   :  { %v4964_v52 = vmul.f32 %v7999_v56, %v4893_v53  ;;  %v4958_v48 = vmul.f32 %v7997_v21, %v4957_v28  ;;  %v5101_v1 = vadd.f32 %v11244_v19, %v5084_v55  ;;  %vm4970_vm3 = vweird.f32 %v7999_v56 }
0x128b   :  { %6923 = vmatmul.msk.f32.gmra.mxu0 %vm59_vm0, %v5099_v50  ;;  %vm4971_vm5 = vmor %vm4969_vm4, %vm4970_vm3 }
0x128c   :  { %v4965_v32 = vmul.f32 %v7999_v56, %v4964_v52  ;;  %v4962_v4 = vsel %vm4961_vm2, %v7997_v21, %v4958_v48 }
0x128d   :  { %v5068_v44 = vmul.f32 %v4962_v4, %v11170_v41 }
0x128e   :  { %v4966_v27 = vmul.f32 0.5, %v4965_v32 }
0x128f   :  { %v5085_v59 = vmul.f32 %v11236_v49, %v5068_v44 }
0x1290   :  { %v4967_v18 = vsub.f32 1.5, %v4966_v27 }
0x1291   :  { %v5102_v22 = vadd.f32 %v11244_v19, %v5085_v59 }
0x1292   :  { %v4968_v62 = vmul.f32 %v7999_v56, %v4967_v18 }
0x1293   :  { %6924 = vmatmul.msk.f32.gmra.mxu0 %vm59_vm0, %v5100_v20 }
0x1294   :  { %v4972_v58 = vsel %vm4971_vm5, %v7999_v56, %v4968_v62 }
0x1295   :  { %v5069_v54 = vmul.f32 %v4972_v58, %v11178_v42 }
0x1297   :  { %v5086_v46 = vmul.f32 %v11236_v49, %v5069_v54 }
0x1299   :  { %v5103_v41 = vadd.f32 %v11244_v19, %v5086_v46 }
0x129b   :  { %6925 = vmatmul.msk.f32.gmra.mxu0 %vm59_vm0, %v5101_v1 }
0x129c   :  { %v4597_v57 = vpop.permute.xlu2 %4596 }
0x129d   :  { %v4619_v42 = vsel %vm596_vm11, %v10953_v29, %v4597_v57 }
0x12a3   :  { %6926 = vmatmul.msk.f32.gmra.mxu0 %vm59_vm0, %v5102_v22 }
0x12ab   :  { %6927 = vmatmul.msk.f32.gmra.mxu0 %vm59_vm0, %v5103_v41 }
0x12ac   :  { %v4595_v61 = vpop.permute.xlu0 %4594  ;;  %v4601_v21 = vpop.permute.xlu2 %4600 }
0x12ad   :  { %v4618_v51 = vsel %vm596_vm11, %v10951_v5, %v4595_v61  ;;  %v4621_v37 = vsel %vm596_vm11, %v10957_v11, %v4601_v21 }
0x12ae   :  { %6909 = vmatmul.msk.f32.vlgmr.msra.gmra.mxu3 %vm59_vm0, %v4618_v51 }
0x12b4   :  { %v4603_v5 = vpop.permute.xlu2 %4602 }
0x12b5   :  { %v4622_v53 = vsel %vm596_vm11, %v10962_v33, %v4603_v5 }
0x12b6   :  { %6910 = vmatmul.msk.f32.gmra.mxu3 %vm59_vm0, %v4619_v42 }
0x12bc   :  { %v4599_v2 = vpop.permute.xlu1 %4598 }
0x12bd   :  { %v4620_v6 = vsel %vm596_vm11, %v10955_v47, %v4599_v2 }
0x12be   :  { %6911 = vmatmul.msk.f32.gmra.mxu3 %vm59_vm0, %v4620_v6 }
0x12c4   :  { %v4607_v47 = vpop.permute.xlu2 %4606 }
0x12c5   :  { %v4624_v40 = vsel %vm596_vm11, %v10969_v16, %v4607_v47 }
0x12c6   :  { %6912 = vmatmul.msk.f32.gmra.mxu3 %vm59_vm0, %v4621_v37 }
0x12cc   :  { %v5387_v8 = vpop.permute.xlu2 %5386 }
0x12cd   :  { %6937 = vmatpush.xpose.msk.msra.mxu2 %vm670_vm6, %v5387_v8 }
0x12ce   :  { %6913 = vmatmul.msk.f32.gmra.mxu3 %vm59_vm0, %v4622_v53 }
0x12d4   :  { %v4605_v29 = vpop.permute.xlu1 %4604  ;;  %v5383_v15 = vpop.permute.xlu2 %5382 }
0x12d5   :  { %v4623_v23 = vsel %vm596_vm11, %v10964_v63, %v4605_v29 }
0x12d6   :  { %6914 = vmatmul.msk.f32.gmra.mxu3 %vm59_vm0, %v4623_v23 }
0x12de   :  { %6915 = vmatmul.msk.f32.gmra.mxu3 %vm59_vm0, %v4624_v40 }
0x12e2   :  { %v4846_v11 = vpop.xlane.xlu0 %4845 }
0x12e3   :  { %v4878_v17 = vmul.f32 %v4846_v11, %v12481_v38 }
0x12e4   :  { %v4609_v33 = vpop.permute.xlu1 %4608 }
0x12e5   :  { %v4894_v10 = vadd.f32 1e-05, %v4878_v17  ;;  %v4625_v24 = vsel %vm596_vm11, %v10978_v43, %v4609_v33 }
0x12e6   :  { %6916 = vmatmul.msk.f32.gmra.mxu3 %vm59_vm0, %v4625_v24 }
0x12e7   :  { %8000 = vrsqrt.f32 %v4894_v10  ;;  %vm4979_vm11 = vweird.f32 %v4894_v10 }
0x12ec   :  { %v5385_v63 = vpop.permute.xlu1 %5384 }
0x12ed   :  { %v8001_v36 = vpop.eup %8000  ;;  %6938 = vmatpush.xpose.msk.msra.mxu2 %vm670_vm6, %v5385_v63 }
0x12ee   :  { %v4974_v16 = vmul.f32 %v8001_v36, %v4894_v10  ;;  %vm4980_vm7 = vweird.f32 %v8001_v36 }
0x12ef   :  { %vm4981_vm8 = vmor %vm4979_vm11, %vm4980_vm7 }
0x12f0   :  { %v4975_v56 = vmul.f32 %v8001_v36, %v4974_v16 }
0x12f1   :  { %6939 = vmatpush.xpose.msk.msra.mxu2 %vm670_vm6, %v5383_v15 }
0x12f2   :  { %v4976_v39 = vmul.f32 0.5, %v4975_v56 }
0x12f4   :  { %v4977_v50 = vsub.f32 1.5, %v4976_v39 }
0x12f5   :  { %v5381_v43 = vpop.permute.xlu0 %5380 }
0x12f6   :  { %v4978_v34 = vmul.f32 %v8001_v36, %v4977_v50  ;;  %6940 = vmatpush.xpose.msk.msra.mxu2 %vm670_vm6, %v5381_v43 }
0x12f8   :  { %v4982_v52 = vsel %vm4981_vm8, %v8001_v36, %v4978_v34  ;;  %v5184_v26 = vpop.f32.mrf.mxu0 }
0x12f9   :  { %v5070_v12 = vmul.f32 %v4982_v52, %v11218_v3  ;;  %v5185_v28 = vadd.f32 %v11323_v0, %v5184_v26 }
0x12fb   :  { %v5248_v32 = vmul.f32 0.044715, %v5185_v28  ;;  %v5087_v14 = vmul.f32 %v11236_v49, %v5070_v12  ;;  %v5232_v61 = vmul.f32 0.5, %v5185_v28 }
0x12fd   :  { %v5264_v20 = vmul.f32 %v5248_v32, %v5185_v28  ;;  %v5104_v48 = vadd.f32 %v11244_v19, %v5087_v14 }
0x12ff   :  { %v5280_v27 = vmul.f32 %v5264_v20, %v5185_v28  ;;  %6928 = vmatmul.msk.f32.gmra.mxu0 %vm59_vm0, %v5104_v48 }
0x1300   :  { %v5187_v55 = vpop.f32.mrf.mxu0 }
0x1301   :  { %v5296_v4 = vadd.f32 %v5280_v27, %v5185_v28  ;;  %v5188_v18 = vadd.f32 %v11323_v0, %v5187_v55 }
0x1303   :  { %v5312_v44 = vmul.f32 0.7978846, %v5296_v4  ;;  %v5249_v1 = vmul.f32 0.044715, %v5188_v18  ;;  %v5233_v23 = vmul.f32 0.5, %v5188_v18 }
0x1305   :  { %8002 = vtanh.f32 %v5312_v44  ;;  %v5265_v62 = vmul.f32 %v5249_v1, %v5188_v18 }
0x1307   :  { %v5281_v3 = vmul.f32 %v5265_v62, %v5188_v18 }
0x1308   :  { %v5190_v59 = vpop.f32.mrf.mxu0 }
0x1309   :  { %v5191_v58 = vadd.f32 %v11323_v0, %v5190_v59  ;;  %v5297_v54 = vadd.f32 %v5281_v3, %v5188_v18 }
0x130b   :  { %v8003_v22 = vpop.eup %8002  ;;  %v5250_v46 = vmul.f32 0.044715, %v5191_v58  ;;  %v5313_v41 = vmul.f32 0.7978846, %v5297_v54  ;;  %v5234_v16 = vmul.f32 0.5, %v5191_v58 }
0x130c   :  { %v5344_v51 = vadd.f32 1.0, %v8003_v22 }
0x130d   :  { %v5266_v57 = vmul.f32 %v5250_v46, %v5191_v58  ;;  %8004 = vtanh.f32 %v5313_v41 }
0x130e   :  { %v5360_v42 = vmul.f32 %v5344_v51, %v5232_v61  ;;  %v12483_v61 = vld [vmem:[#allocation6_spill] sm:$0xff] }
0x130f   :  { %v5282_v2 = vmul.f32 %v5266_v57, %v5191_v58 }
0x1310   :  { %v5193_v6 = vpop.f32.mrf.mxu0  ;;  %6941 = vmatmul.msk.f32.vlgmr.msra.gmra.mxu2 %vm670_vm6, %v5360_v42 }
0x1311   :  { %v5194_v21 = vadd.f32 %v11323_v0, %v5193_v6  ;;  %v5298_v37 = vadd.f32 %v5282_v2, %v5191_v58 }
0x1313   :  { %v8005_v5 = vpop.eup %8004  ;;  %v5251_v53 = vmul.f32 0.044715, %v5194_v21  ;;  %v5314_v29 = vmul.f32 0.7978846, %v5298_v37  ;;  %v5235_v32 = vmul.f32 0.5, %v5194_v21 }
0x1314   :  { %v5345_v47 = vadd.f32 1.0, %v8005_v5 }
0x1315   :  { %v5267_v40 = vmul.f32 %v5251_v53, %v5194_v21  ;;  %8006 = vtanh.f32 %v5314_v29  ;;  %v12484_v29 = vld [vmem:[#allocation14_spill] sm:$0xff] }
0x1316   :  { %v5361_v11 = vmul.f32 %v5345_v47, %v5233_v23 }
0x1317   :  { %v5283_v8 = vmul.f32 %v5267_v40, %v5194_v21 }
0x1318   :  { %v5196_v17 = vpop.f32.mrf.mxu0  ;;  %6942 = vmatmul.msk.f32.gmra.mxu2 %vm670_vm6, %v5361_v11 }
0x1319   :  { %v5197_v33 = vadd.f32 %v11323_v0, %v5196_v17  ;;  %v5299_v10 = vadd.f32 %v5283_v8, %v5194_v21 }
0x131b   :  { %v8007_v24 = vpop.eup %8006  ;;  %v5252_v63 = vmul.f32 0.044715, %v5197_v33  ;;  %v5315_v36 = vmul.f32 0.7978846, %v5299_v10  ;;  %v5236_v3 = vmul.f32 0.5, %v5197_v33 }
0x131c   :  { %v5346_v15 = vadd.f32 1.0, %v8007_v24  ;;  %v12485_v24 = vld [vmem:[#allocation9_spill] sm:$0xff] }
0x131d   :  { %v5268_v56 = vmul.f32 %v5252_v63, %v5197_v33  ;;  %8008 = vtanh.f32 %v5315_v36 }
0x131e   :  { %v5362_v39 = vmul.f32 %v5346_v15, %v5234_v16 }
0x131f   :  { %v5284_v50 = vmul.f32 %v5268_v56, %v5197_v33  ;;  %v12486_v56 = vld [vmem:[#allocation15_spill] sm:$0xff] }
0x1320   :  { %v5199_v43 = vpop.f32.mrf.mxu0  ;;  %6943 = vmatmul.msk.f32.gmra.mxu2 %vm670_vm6, %v5362_v39 }
0x1321   :  { %v5200_v34 = vadd.f32 %v11323_v0, %v5199_v43  ;;  %v5300_v52 = vadd.f32 %v5284_v50, %v5197_v33 }
0x1323   :  { %v8009_v26 = vpop.eup %8008  ;;  %v5253_v12 = vmul.f32 0.044715, %v5200_v34  ;;  %v5316_v28 = vmul.f32 0.7978846, %v5300_v52  ;;  %v5237_v6 = vmul.f32 0.5, %v5200_v34  ;;  %v12487_v52 = vld [vmem:[#allocation8_spill] sm:$0xff] }
0x1324   :  { %v5347_v14 = vadd.f32 1.0, %v8009_v26 }
0x1325   :  { %v5269_v20 = vmul.f32 %v5253_v12, %v5200_v34  ;;  %8010 = vtanh.f32 %v5316_v28 }
0x1326   :  { %v5363_v48 = vmul.f32 %v5347_v14, %v5235_v32  ;;  %v12488_v14 = vld [vmem:[#allocation7_spill] sm:$0xff] }
0x1327   :  { %v5285_v27 = vmul.f32 %v5269_v20, %v5200_v34 }
0x1328   :  { %v5202_v55 = vpop.f32.mrf.mxu0  ;;  %6944 = vmatmul.msk.f32.gmra.mxu2 %vm670_vm6, %v5363_v48 }
0x1329   :  { %v5203_v4 = vadd.f32 %v11323_v0, %v5202_v55  ;;  %v5301_v18 = vadd.f32 %v5285_v27, %v5200_v34 }
0x132b   :  { %v8011_v44 = vpop.eup %8010  ;;  %v5254_v1 = vmul.f32 0.044715, %v5203_v4  ;;  %v5317_v62 = vmul.f32 0.7978846, %v5301_v18  ;;  %v5238_v11 = vmul.f32 0.5, %v5203_v4 }
0x132c   :  { %v5348_v59 = vadd.f32 1.0, %v8011_v44  ;;  %v5546_v44 = vld [vmem:[%s12383_s4 + $0x18] sm:$0xff] }
0x132d   :  { %v5270_v58 = vmul.f32 %v5254_v1, %v5203_v4  ;;  %8012 = vtanh.f32 %v5317_v62  ;;  %v8073_v1 = vld [vmem:[%s12380_s1 + $0xd] ss:$0 sm:$0xff]  ;;  %5609 = vmatpush.msra.mxu1 %v5546_v44 }
0x132e   :  { %v5364_v54 = vmul.f32 %v5348_v59, %v5236_v3  ;;  %v5545_v3 = vld [vmem:[%s12383_s4 + $0x10] sm:$0xff]  ;;  %v5544_v59 = vld [vmem:[%s12383_s4 + $0x8] sm:$0xff] }
0x132f   :  { %v5286_v22 = vmul.f32 %v5270_v58, %v5203_v4  ;;  %5610 = vmatpush.msra.mxu1 %v5545_v3  ;;  %v5543_v58 = vld [vmem:[%s12383_s4] sm:$0xff] }
0x1330   :  { %6945 = vmatmul.msk.f32.gmra.mxu2 %vm670_vm6, %v5364_v54 }
0x1331   :  { %v4667_v46 = vpop.f32.mrf.mxu3  ;;  %v5302_v41 = vadd.f32 %v5286_v22, %v5203_v4  ;;  %v12489_v4 = vld [vmem:[#allocation10_spill] sm:$0xff]  ;;  %5611 = vmatpush.msra.mxu1 %v5544_v59 }
0x1332   :  { %v4699_v51 = vadd.f32 %v4667_v46, %v12483_v61 }
0x1333   :  { %v8013_v57 = vpop.eup %8012  ;;  %v5318_v42 = vmul.f32 0.7978846, %v5302_v41  ;;  %5612 = vmatpush.msra.mxu1 %v5543_v58 }
0x1334   :  { %v11344_v2 = vadd.f32 %v11034_v9, %v4699_v51  ;;  %v5349_v21 = vadd.f32 1.0, %v8013_v57 }
0x1335   :  { %8014 = vtanh.f32 %v5318_v42 }
0x1336   :  { %v4751_v37 = vsel %vm59_vm0, %v11344_v2, 0.0  ;;  %v5365_v5 = vmul.f32 %v5349_v21, %v5237_v6 }
0x1337   :  { %4752 = vadd.xlane.f32.xlu1 %v4751_v37  ;;  %v11404_v37 = vld [vmem:[%s12380_s1 + $0xf] ss:$0 sm:$0xff] }
0x1338   :  { %6946 = vmatmul.msk.f32.gmra.mxu2 %vm670_vm6, %v5365_v5 }
0x1339   :  { %v4670_v53 = vpop.f32.mrf.mxu3 }
0x133a   :  { %v4700_v23 = vadd.f32 %v4670_v53, %v12484_v29 }
0x133b   :  { %v8015_v47 = vpop.eup %8014 }
0x133c   :  { %v11351_v40 = vadd.f32 %v11034_v9, %v4700_v23  ;;  %v5350_v8 = vadd.f32 1.0, %v8015_v47 }
0x133e   :  { %v4754_v17 = vsel %vm59_vm0, %v11351_v40, 0.0  ;;  %v5366_v33 = vmul.f32 %v5350_v8, %v5238_v11 }
0x133f   :  { %4755 = vadd.xlane.f32.xlu2 %v4754_v17 }
0x1340   :  { %6947 = vmatmul.msk.f32.gmra.mxu2 %vm670_vm6, %v5366_v33 }
0x1341   :  { %v4673_v10 = vpop.f32.mrf.mxu3 }
0x1342   :  { %v4701_v63 = vadd.f32 %v4673_v10, %v12485_v24 }
0x1344   :  { %v11358_v36 = vadd.f32 %v11034_v9, %v4701_v63 }
0x1346   :  { %v4757_v16 = vsel %vm59_vm0, %v11358_v36, 0.0 }
0x1347   :  { %4758 = vadd.xlane.f32.xlu0 %v4757_v16 }
0x1349   :  { %v4676_v15 = vpop.f32.mrf.mxu3 }
0x134a   :  { %v4702_v39 = vadd.f32 %v4676_v15, %v12486_v56 }
0x134c   :  { %v11364_v50 = vadd.f32 %v11034_v9, %v4702_v39 }
0x134e   :  { %v4760_v43 = vsel %vm59_vm0, %v11364_v50, 0.0 }
0x134f   :  { %4761 = vadd.xlane.f32.xlu2 %v4760_v43 }
0x1351   :  { %v4679_v34 = vpop.f32.mrf.mxu3 }
0x1352   :  { %v4703_v26 = vadd.f32 %v4679_v34, %v12487_v52 }
0x1354   :  { %v11370_v12 = vadd.f32 %v11034_v9, %v4703_v26 }
0x1356   :  { %v4763_v28 = vsel %vm59_vm0, %v11370_v12, 0.0 }
0x1357   :  { %4764 = vadd.xlane.f32.xlu1 %v4763_v28 }
0x1359   :  { %v4682_v32 = vpop.f32.mrf.mxu3 }
0x135a   :  { %v4704_v20 = vadd.f32 %v4682_v32, %v12488_v14 }
0x135c   :  { %v11376_v48 = vadd.f32 %v11034_v9, %v4704_v20 }
0x135e   :  { %v4766_v27 = vsel %vm59_vm0, %v11376_v48, 0.0 }
0x135f   :  { %4767 = vadd.xlane.f32.xlu2 %v4766_v27 }
0x1361   :  { %v4685_v55 = vpop.f32.mrf.mxu3 }
0x1362   :  { %v4705_v18 = vadd.f32 %v4685_v55, %v12489_v4 }
0x1364   :  { %v11387_v62 = vadd.f32 %v8073_v1, %v4705_v18 }
0x1366   :  { %v4769_v9 = vsel %vm59_vm0, %v11387_v62, 0.0 }
0x1367   :  { %4770 = vadd.xlane.f32.xlu0 %v4769_v9 }
0x137c   :  { %v5205_v54 = vpop.f32.mrf.mxu0 }
0x137d   :  { %v5206_v22 = vadd.f32 %v11323_v0, %v5205_v54 }
0x137f   :  { %v5255_v46 = vmul.f32 0.044715, %v5206_v22  ;;  %v5239_v6 = vmul.f32 0.5, %v5206_v22 }
0x1381   :  { %v5271_v41 = vmul.f32 %v5255_v46, %v5206_v22 }
0x1383   :  { %v5287_v61 = vmul.f32 %v5271_v41, %v5206_v22 }
0x1385   :  { %v5303_v51 = vadd.f32 %v5287_v61, %v5206_v22 }
0x1387   :  { %v5319_v57 = vmul.f32 0.7978846, %v5303_v51 }
0x1389   :  { %8016 = vtanh.f32 %v5319_v57 }
0x138f   :  { %v8017_v42 = vpop.eup %8016 }
0x1390   :  { %v5351_v21 = vadd.f32 1.0, %v8017_v42 }
0x1392   :  { %v5367_v5 = vmul.f32 %v5351_v21, %v5239_v6 }
0x1393   :  { %v5461_v53 = vpop.f32.mrf.mxu2 }
0x1394   :  { %v5509_v29 = vadd.f32 %v5461_v53, %v11077_v13  ;;  %6948 = vmatmul.msk.f32.gmra.mxu2 %vm670_vm6, %v5367_v5 }
0x1396   :  { %v5527_v23 = vadd.f32 %v11404_v37, %v5509_v29 }
0x1398   :  { %6957 = vmatmul.msk.f32.vlgmr.msra.gmra.mxu1 %vm59_vm0, %v5527_v23 }
0x139b   :  { %v5464_v47 = vpop.f32.mrf.mxu2 }
0x139c   :  { %v5510_v11 = vadd.f32 %v5464_v47, %v11090_v31  ;;  %v4688_v31 = vpop.f32.mrf.mxu3 }
0x139e   :  { %v5528_v8 = vadd.f32 %v11404_v37, %v5510_v11 }
0x13a0   :  { %6958 = vmatmul.msk.f32.gmra.mxu1 %vm59_vm0, %v5528_v8 }
0x13a3   :  { %v5467_v17 = vpop.f32.mrf.mxu2 }
0x13a4   :  { %v5511_v33 = vadd.f32 %v5467_v17, %v11093_v35  ;;  %v12490_v35 = vld [vmem:[#allocation13_spill] sm:$0xff] }
0x13a5   :  { %v4706_v43 = vadd.f32 %v4688_v31, %v12490_v35 }
0x13a6   :  { %v5529_v10 = vadd.f32 %v11404_v37, %v5511_v33 }
0x13a7   :  { %v11429_v32 = vadd.f32 %v8073_v1, %v4706_v43 }
0x13a8   :  { %6959 = vmatmul.msk.f32.gmra.mxu1 %vm59_vm0, %v5529_v10 }
0x13a9   :  { %v4772_v4 = vsel %vm59_vm0, %v11429_v32, 0.0 }
0x13aa   :  { %v4753_v13 = vpop.xlane.xlu1 %4752 }
0x13ab   :  { %v4783_v24 = vmul.f32 %v4753_v13, %v12481_v38  ;;  %v5470_v63 = vpop.f32.mrf.mxu2 }
0x13ac   :  { %v5512_v16 = vadd.f32 %v5470_v63, %v11104_v25 }
0x13ad   :  { %v11419_v15 = vsub.f32 %v11344_v2, %v4783_v24 }
0x13ae   :  { %v5530_v56 = vadd.f32 %v11404_v37, %v5512_v16 }
0x13af   :  { %v4815_v39 = vmul.f32 %v11419_v15, %v11419_v15 }
0x13b0   :  { %6960 = vmatmul.msk.f32.gmra.mxu1 %vm59_vm0, %v5530_v56 }
0x13b1   :  { %v4847_v34 = vsel %vm59_vm0, %v4815_v39, 0.0 }
0x13b2   :  { %v4756_v52 = vpop.xlane.xlu2 %4755  ;;  %4848 = vadd.xlane.f32.xlu1 %v4847_v34 }
0x13b3   :  { %v4784_v26 = vmul.f32 %v4756_v52, %v12481_v38  ;;  %v5473_v25 = vpop.f32.mrf.mxu2 }
0x13b4   :  { %v5513_v28 = vadd.f32 %v5473_v25, %v11037_v30 }
0x13b5   :  { %v11432_v14 = vsub.f32 %v11351_v40, %v4784_v26 }
0x13b6   :  { %v5531_v20 = vadd.f32 %v11404_v37, %v5513_v28 }
0x13b7   :  { %v4816_v27 = vmul.f32 %v11432_v14, %v11432_v14 }
0x13b8   :  { %6961 = vmatmul.msk.f32.gmra.mxu1 %vm59_vm0, %v5531_v20 }
0x13b9   :  { %v4850_v55 = vsel %vm59_vm0, %v4816_v27, 0.0 }
0x13ba   :  { %v4759_v18 = vpop.xlane.xlu0 %4758  ;;  %4851 = vadd.xlane.f32.xlu2 %v4850_v55  ;;  %4773 = vadd.xlane.f32.xlu1 %v4772_v4 }
0x13bb   :  { %v4785_v30 = vmul.f32 %v4759_v18, %v12481_v38  ;;  %v5476_v44 = vpop.f32.mrf.mxu2 }
0x13bc   :  { %v5514_v1 = vadd.f32 %v5476_v44, %v11107_v7 }
0x13bd   :  { %v11444_v9 = vsub.f32 %v11358_v36, %v4785_v30 }
0x13be   :  { %v5532_v3 = vadd.f32 %v11404_v37, %v5514_v1 }
0x13bf   :  { %v4817_v59 = vmul.f32 %v11444_v9, %v11444_v9 }
0x13c0   :  { %6962 = vmatmul.msk.f32.gmra.mxu1 %vm59_vm0, %v5532_v3 }
0x13c1   :  { %v4853_v58 = vsel %vm59_vm0, %v4817_v59, 0.0 }
0x13c2   :  { %4854 = vadd.xlane.f32.xlu0 %v4853_v58  ;;  %v4762_v54 = vpop.xlane.xlu2 %4761 }
0x13c3   :  { %v4786_v22 = vmul.f32 %v4762_v54, %v12481_v38  ;;  %v5479_v46 = vpop.f32.mrf.mxu2 }
0x13c4   :  { %v5515_v41 = vadd.f32 %v5479_v46, %v11050_v45 }
0x13c5   :  { %v11454_v7 = vsub.f32 %v11364_v50, %v4786_v22 }
0x13c6   :  { %v5533_v61 = vadd.f32 %v11404_v37, %v5515_v41 }
0x13c7   :  { %v4818_v51 = vmul.f32 %v11454_v7, %v11454_v7 }
0x13c8   :  { %6963 = vmatmul.msk.f32.gmra.mxu1 %vm59_vm0, %v5533_v61 }
0x13c9   :  { %v4856_v57 = vsel %vm59_vm0, %v4818_v51, 0.0 }
0x13ca   :  { %4857 = vadd.xlane.f32.xlu2 %v4856_v57  ;;  %v4765_v42 = vpop.xlane.xlu1 %4764 }
0x13cb   :  { %v4787_v6 = vmul.f32 %v4765_v42, %v12481_v38 }
0x13cd   :  { %v11463_v21 = vsub.f32 %v11370_v12, %v4787_v6 }
0x13cf   :  { %v4819_v45 = vmul.f32 %v11463_v21, %v11463_v21 }
0x13d1   :  { %v4859_v5 = vsel %vm59_vm0, %v4819_v45, 0.0 }
0x13d2   :  { %v4768_v53 = vpop.xlane.xlu2 %4767  ;;  %4860 = vadd.xlane.f32.xlu1 %v4859_v5 }
0x13d3   :  { %v4788_v29 = vmul.f32 %v4768_v53, %v12481_v38 }
0x13d5   :  { %v11470_v23 = vsub.f32 %v11376_v48, %v4788_v29 }
0x13d7   :  { %v4820_v47 = vmul.f32 %v11470_v23, %v11470_v23 }
0x13d9   :  { %v4862_v11 = vsel %vm59_vm0, %v4820_v47, 0.0 }
0x13da   :  { %v4771_v8 = vpop.xlane.xlu0 %4770  ;;  %4863 = vadd.xlane.f32.xlu0 %v4862_v11 }
0x13db   :  { %v4789_v17 = vmul.f32 %v4771_v8, %v12481_v38 }
0x13dd   :  { %v11477_v33 = vsub.f32 %v11387_v62, %v4789_v17 }
0x13df   :  { %v4821_v10 = vmul.f32 %v11477_v33, %v11477_v33 }
0x13e1   :  { %v4865_v13 = vsel %vm59_vm0, %v4821_v10, 0.0 }
0x13e2   :  { %4866 = vadd.xlane.f32.xlu2 %v4865_v13 }
0x1415   :  { %v11482_v24 = vpop.f32.mrf.mxu1 }
0x1417   :  { %v5482_v63 = vpop.f32.mrf.mxu2 }
0x1418   :  { %v5516_v16 = vadd.f32 %v5482_v63, %v11145_v60 }
0x141a   :  { %v5534_v31 = vadd.f32 %v11404_v37, %v5516_v16  ;;  %v11513_v16 = vld [vmem:[%s12380_s1 + $0x10] ss:$0 sm:$0xff] }
0x141c   :  { %6964 = vmatmul.msk.f32.gmra.mxu1 %vm59_vm0, %v5534_v31 }
0x141d   :  { %v11487_v56 = vpop.f32.mrf.mxu1 }
0x1425   :  { %v11489_v39 = vpop.f32.mrf.mxu1  ;;  %v4849_v35 = vpop.xlane.xlu1 %4848 }
0x1426   :  { %v4879_v43 = vmul.f32 %v4849_v35, %v12481_v38 }
0x1428   :  { %v4895_v34 = vadd.f32 1e-05, %v4879_v43 }
0x142a   :  { %8018 = vrsqrt.f32 %v4895_v34  ;;  %vm4989_vm10 = vweird.f32 %v4895_v34 }
0x142d   :  { %v4852_v52 = vpop.xlane.xlu2 %4851  ;;  %v11492_v26 = vpop.f32.mrf.mxu1 }
0x142e   :  { %v4880_v25 = vmul.f32 %v4852_v52, %v12481_v38  ;;  %v4774_v28 = vpop.xlane.xlu1 %4773  ;;  %v11519_v52 = vld [vmem:[%s12380_s1 + $0x11] ss:$0 sm:$0xff] }
0x142f   :  { %v4790_v60 = vmul.f32 %v4774_v28, %v12481_v38 }
0x1430   :  { %v8019_v20 = vpop.eup %8018  ;;  %v4896_v27 = vadd.f32 1e-05, %v4880_v25 }
0x1431   :  { %v4984_v55 = vmul.f32 %v8019_v20, %v4895_v34  ;;  %v11497_v4 = vsub.f32 %v11429_v32, %v4790_v60  ;;  %vm4990_vm9 = vweird.f32 %v8019_v20 }
0x1432   :  { %8020 = vrsqrt.f32 %v4896_v27  ;;  %vm4991_vm12 = vmor %vm4989_vm10, %vm4990_vm9  ;;  %vm4999_vm14 = vweird.f32 %v4896_v27 }
0x1433   :  { %v4985_v18 = vmul.f32 %v8019_v20, %v4984_v55  ;;  %v4822_v30 = vmul.f32 %v11497_v4, %v11497_v4 }
0x1435   :  { %v4986_v44 = vmul.f32 0.5, %v4985_v18  ;;  %v4855_v1 = vpop.xlane.xlu0 %4854  ;;  %v11501_v3 = vpop.f32.mrf.mxu1  ;;  %v4868_v59 = vsel %vm59_vm0, %v4822_v30, 0.0 }
0x1436   :  { %v4881_v58 = vmul.f32 %v4855_v1, %v12481_v38  ;;  %4869 = vadd.xlane.f32.xlu1 %v4868_v59  ;;  %v5624_v59 = vadd.f32 %v11513_v16, %v11492_v26 }
0x1437   :  { %v4987_v54 = vsub.f32 1.5, %v4986_v44 }
0x1438   :  { %v8021_v22 = vpop.eup %8020  ;;  %v4897_v46 = vadd.f32 1e-05, %v4881_v58  ;;  %vm5666_vm7 = vcmp.ge.f32.partialorder %v5624_v59, 0.0 }
0x1439   :  { %v4988_v41 = vmul.f32 %v8019_v20, %v4987_v54  ;;  %v4994_v61 = vmul.f32 %v8021_v22, %v4896_v27  ;;  %vm5000_vm13 = vweird.f32 %v8021_v22 }
0x143a   :  { %8022 = vrsqrt.f32 %v4897_v46  ;;  %vm5001_vm15 = vmor %vm4999_vm14, %vm5000_vm13  ;;  %vm5009_vm3 = vweird.f32 %v4897_v46 }
0x143b   :  { %v4992_v51 = vsel %vm4991_vm12, %v8019_v20, %v4988_v41  ;;  %v4995_v57 = vmul.f32 %v8021_v22, %v4994_v61  ;;  %v5621_v61 = vadd.f32 %v11513_v16, %v11489_v39 }
0x143c   :  { %v5071_v42 = vmul.f32 %v4992_v51, %v11419_v15 }
0x143d   :  { %v4996_v6 = vmul.f32 0.5, %v4995_v57  ;;  %v4858_v45 = vpop.xlane.xlu2 %4857  ;;  %v5629_v5 = vpop.f32.mrf.mxu1  ;;  %v5683_v57 = vmul.f32 %v11519_v52, %v5624_v59  ;;  %vm5665_vm10 = vcmp.ge.f32.partialorder %v5621_v61, 0.0 }
0x143e   :  { %v4882_v53 = vmul.f32 %v4858_v45, %v12481_v38  ;;  %v5088_v29 = vmul.f32 %v11236_v49, %v5071_v42  ;;  %v5630_v25 = vadd.f32 %v11513_v16, %v5629_v5 }
0x143f   :  { %v4997_v47 = vsub.f32 1.5, %v4996_v6 }
0x1440   :  { %v8023_v11 = vpop.eup %8022  ;;  %v4898_v8 = vadd.f32 1e-05, %v4882_v53  ;;  %v5105_v17 = vadd.f32 %v11244_v19, %v5088_v29  ;;  %v5685_v58 = vmul.f32 %v11519_v52, %v5630_v25  ;;  %vm5668_vm5 = vcmp.ge.f32.partialorder %v5630_v25, 0.0 }
0x1441   :  { %v4998_v10 = vmul.f32 %v8021_v22, %v4997_v47  ;;  %v5004_v13 = vmul.f32 %v8023_v11, %v4897_v46  ;;  %vm5010_vm1 = vweird.f32 %v8023_v11 }
0x1442   :  { %8024 = vrsqrt.f32 %v4898_v8  ;;  %6929 = vmatmul.msk.f32.gmra.mxu0 %vm59_vm0, %v5105_v17  ;;  %vm5011_vm4 = vmor %vm5009_vm3, %vm5010_vm1  ;;  %v11539_v42 = vsel %vm5668_vm5, %v5630_v25, %v5685_v58  ;;  %vm5019_vm8 = vweird.f32 %v4898_v8  ;;  %v5682_v17 = vmul.f32 %v11519_v52, %v5621_v61  ;;  %v11578_v58 = vld [vmem:[%s12380_s1 + $0xb] ss:$0 sm:$0xff] }
0x1443   :  { %v5002_v15 = vsel %vm5001_vm15, %v8021_v22, %v4998_v10  ;;  %v5005_v63 = vmul.f32 %v8023_v11, %v5004_v13  ;;  %v11549_v10 = vsel %vm5666_vm7, %v5624_v59, %v5683_v57 }
0x1444   :  { %v5072_v31 = vmul.f32 %v5002_v15, %v11432_v14 }
0x1445   :  { %v5006_v35 = vmul.f32 0.5, %v5005_v63  ;;  %v5632_v43 = vpop.f32.mrf.mxu1  ;;  %v4861_v34 = vpop.xlane.xlu1 %4860 }
0x1446   :  { %v5633_v28 = vadd.f32 %v11513_v16, %v5632_v43  ;;  %v4883_v60 = vmul.f32 %v4861_v34, %v12481_v38  ;;  %v5089_v20 = vmul.f32 %v11236_v49, %v5072_v31 }
0x1447   :  { %v5007_v27 = vsub.f32 1.5, %v5006_v35  ;;  %v11556_v35 = vsel %vm5665_vm10, %v5621_v61, %v5682_v17  ;;  %v5627_v17 = vadd.f32 %v11513_v16, %v11501_v3 }
0x1448   :  { %v8025_v55 = vpop.eup %8024  ;;  %vm5669_vm2 = vcmp.ge.f32.partialorder %v5633_v28, 0.0  ;;  %v5686_v14 = vmul.f32 %v11519_v52, %v5633_v28  ;;  %v4899_v18 = vadd.f32 1e-05, %v4883_v60  ;;  %v5106_v30 = vadd.f32 %v11244_v19, %v5089_v20 }
0x1449   :  { %v5008_v44 = vmul.f32 %v8023_v11, %v5007_v27  ;;  %v5014_v1 = vmul.f32 %v8025_v55, %v4898_v8  ;;  %vm5020_vm11 = vweird.f32 %v8025_v55 }
0x144a   :  { %v11530_v54 = vsel %vm5669_vm2, %v5633_v28, %v5686_v14  ;;  %8026 = vrsqrt.f32 %v4899_v18  ;;  %6930 = vmatmul.msk.f32.gmra.mxu0 %vm59_vm0, %v5106_v30  ;;  %vm5021_vm9 = vmor %vm5019_vm8, %vm5020_vm11  ;;  %vm5029_vm14 = vweird.f32 %v4899_v18  ;;  %vm5667_vm8 = vcmp.ge.f32.partialorder %v5627_v17, 0.0 }
0x144b   :  { %v5012_v22 = vsel %vm5011_vm4, %v8023_v11, %v5008_v44  ;;  %v5015_v41 = vmul.f32 %v8025_v55, %v5014_v1  ;;  %5774 = vrot.lane.b32.xlu2 %v11530_v54, %s8109_s26  ;;  %v5615_v11 = vadd.f32 %v11513_v16, %v11482_v24 }
0x144c   :  { %v5073_v46 = vmul.f32 %v5012_v22, %v11444_v9 }
0x144d   :  { %v5016_v26 = vmul.f32 0.5, %v5015_v41  ;;  %v4864_v51 = vpop.xlane.xlu0 %4863  ;;  %v5680_v24 = vmul.f32 %v11519_v52, %v5615_v11  ;;  %vm5663_vm12 = vcmp.ge.f32.partialorder %v5615_v11, 0.0 }
0x144e   :  { %v4884_v6 = vmul.f32 %v4864_v51, %v12481_v38  ;;  %v5090_v45 = vmul.f32 %v11236_v49, %v5073_v46 }
0x144f   :  { %v5017_v5 = vsub.f32 1.5, %v5016_v26  ;;  %5772 = vrot.lane.b32.xlu1 %v11539_v42, %s8109_s26 }
0x1450   :  { %v8027_v9 = vpop.eup %8026  ;;  %v4900_v53 = vadd.f32 1e-05, %v4884_v6  ;;  %v5107_v39 = vadd.f32 %v11244_v19, %v5090_v45 }
0x1451   :  { %v5018_v29 = vmul.f32 %v8025_v55, %v5017_v5  ;;  %v5024_v47 = vmul.f32 %v8027_v9, %v4899_v18  ;;  %vm5030_vm13 = vweird.f32 %v8027_v9 }
0x1452   :  { %8028 = vrsqrt.f32 %v4900_v53  ;;  %6931 = vmatmul.msk.f32.gmra.mxu0 %vm59_vm0, %v5107_v39  ;;  %vm5031_vm15 = vmor %vm5029_vm14, %vm5030_vm13  ;;  %vm5039_vm2 = vweird.f32 %v4900_v53 }
0x1453   :  { %v5022_v13 = vsel %vm5021_vm9, %v8025_v55, %v5018_v29  ;;  %v5025_v15 = vmul.f32 %v8027_v9, %v5024_v47  ;;  %5768 = vrot.lane.b32.xlu2 %v11549_v10, %s8109_s26  ;;  %v11563_v55 = vsel %vm5663_vm12, %v5615_v11, %v5680_v24 }
0x1454   :  { %v5074_v8 = vmul.f32 %v5022_v13, %v11454_v7 }
0x1455   :  { %v5026_v63 = vmul.f32 0.5, %v5025_v15  ;;  %v4867_v31 = vpop.xlane.xlu2 %4866  ;;  %v5618_v15 = vadd.f32 %v11513_v16, %v11487_v56 }
0x1456   :  { %v4885_v43 = vmul.f32 %v4867_v31, %v12481_v38  ;;  %v5091_v34 = vmul.f32 %v11236_v49, %v5074_v8 }
0x1457   :  { %v5027_v25 = vsub.f32 1.5, %v5026_v63  ;;  %5766 = vrot.lane.b32.xlu1 %v11556_v35, %s8109_s26  ;;  %v5681_v63 = vmul.f32 %v11519_v52, %v5618_v15  ;;  %vm5664_vm9 = vcmp.ge.f32.partialorder %v5618_v15, 0.0 }
0x1458   :  { %v8029_v28 = vpop.eup %8028  ;;  %v4901_v60 = vadd.f32 1e-05, %v4885_v43  ;;  %v5108_v7 = vadd.f32 %v11244_v19, %v5091_v34  ;;  %v11572_v19 = vld [vmem:[%s12380_s1 + $0xa] ss:$0 sm:$0xff] }
0x1459   :  { %v5028_v20 = vmul.f32 %v8027_v9, %v5027_v25  ;;  %v5034_v27 = vmul.f32 %v8029_v28, %v4900_v53  ;;  %vm5040_vm1 = vweird.f32 %v8029_v28  ;;  %v11615_v43 = vsel %vm5664_vm9, %v5618_v15, %v5681_v63 }
0x145a   :  { %8030 = vrsqrt.f32 %v4901_v60  ;;  %6932 = vmatmul.msk.f32.gmra.mxu0 %vm59_vm0, %v5108_v7  ;;  %vm5041_vm3 = vmor %vm5039_vm2, %vm5040_vm1  ;;  %vm5049_vm5 = vweird.f32 %v4901_v60 }
0x145b   :  { %v5032_v49 = vsel %vm5031_vm15, %v8027_v9, %v5028_v20  ;;  %v5035_v14 = vmul.f32 %v8029_v28, %v5034_v27  ;;  %5762 = vrot.lane.b32.xlu2 %v11563_v55, %s8109_s26 }
0x145c   :  { %v5075_v30 = vmul.f32 %v5032_v49, %v11463_v21 }
0x145d   :  { %v5036_v44 = vmul.f32 0.5, %v5035_v14 }
0x145e   :  { %v5092_v18 = vmul.f32 %v11572_v19, %v5075_v30 }
0x145f   :  { %v5037_v1 = vsub.f32 1.5, %v5036_v44 }
0x1460   :  { %v8031_v59 = vpop.eup %8030  ;;  %v5109_v22 = vadd.f32 %v11578_v58, %v5092_v18 }
0x1461   :  { %v5038_v41 = vmul.f32 %v8029_v28, %v5037_v1  ;;  %v5044_v21 = vmul.f32 %v8031_v59, %v4901_v60  ;;  %vm5050_vm4 = vweird.f32 %v8031_v59 }
0x1462   :  { %6933 = vmatmul.msk.f32.gmra.mxu0 %vm59_vm0, %v5109_v22  ;;  %vm5051_vm7 = vmor %vm5049_vm5, %vm5050_vm4 }
0x1463   :  { %v5042_v46 = vsel %vm5041_vm3, %v8029_v28, %v5038_v41  ;;  %v5045_v61 = vmul.f32 %v8031_v59, %v5044_v21 }
0x1464   :  { %v5076_v26 = vmul.f32 %v5042_v46, %v11470_v23 }
0x1465   :  { %v5046_v51 = vmul.f32 0.5, %v5045_v61 }
0x1466   :  { %v5093_v57 = vmul.f32 %v11572_v19, %v5076_v26 }
0x1467   :  { %v5047_v6 = vsub.f32 1.5, %v5046_v51 }
0x1468   :  { %v5110_v45 = vadd.f32 %v11578_v58, %v5093_v57 }
0x1469   :  { %v5048_v5 = vmul.f32 %v8031_v59, %v5047_v6 }
0x146a   :  { %6934 = vmatmul.msk.f32.gmra.mxu0 %vm59_vm0, %v5110_v45 }
0x146b   :  { %v5052_v9 = vsel %vm5051_vm7, %v8031_v59, %v5048_v5 }
0x146c   :  { %v5077_v53 = vmul.f32 %v5052_v9, %v11477_v33  ;;  %v5684_v33 = vmul.f32 %v11519_v52, %v5627_v17 }
0x146e   :  { %v5094_v39 = vmul.f32 %v11572_v19, %v5077_v53  ;;  %v11605_v8 = vsel %vm5667_vm8, %v5627_v17, %v5684_v33 }
0x1470   :  { %v5111_v29 = vadd.f32 %v11578_v58, %v5094_v39 }
0x1472   :  { %6935 = vmatmul.msk.f32.gmra.mxu0 %vm59_vm0, %v5111_v29 }
0x1499   :  { %v5635_v23 = vpop.f32.mrf.mxu1 }
0x149a   :  { %v5636_v47 = vadd.f32 %v11513_v16, %v5635_v23 }
0x149c   :  { %vm5670_vm11 = vcmp.ge.f32.partialorder %v5636_v47, 0.0  ;;  %v5687_v11 = vmul.f32 %v11519_v52, %v5636_v47 }
0x149e   :  { %v11594_v13 = vsel %vm5670_vm11, %v5636_v47, %v5687_v11 }
0x149f   :  { %5776 = vrot.lane.b32.xlu0 %v11594_v13, %s8109_s26  ;;  %7013 = vmatpush.xpose.msk.msra.mxu0 %vm670_vm6, %v11594_v13 }
0x14a3   :  { %7014 = vmatpush.xpose.msk.msra.mxu0 %vm670_vm6, %v11530_v54 }
0x14a7   :  { %5770 = vrot.lane.b32.xlu0 %v11605_v8, %s8109_s26  ;;  %7015 = vmatpush.xpose.msk.msra.mxu0 %vm670_vm6, %v11539_v42 }
0x14a9   :  { %v4870_v3 = vpop.xlane.xlu1 %4869 }
0x14aa   :  { %v4886_v31 = vmul.f32 %v4870_v3, %v12481_v38 }
0x14ab   :  { %7016 = vmatpush.xpose.msk.msra.mxu0 %vm670_vm6, %v11605_v8 }
0x14ac   :  { %v4902_v24 = vadd.f32 1e-05, %v4886_v31 }
0x14ae   :  { %8032 = vrsqrt.f32 %v4902_v24  ;;  %vm5059_vm12 = vweird.f32 %v4902_v24 }
0x14af   :  { %5764 = vrot.lane.b32.xlu0 %v11615_v43, %s8109_s26  ;;  %7017 = vmatpush.xpose.msk.msra.mxu0 %vm670_vm6, %v11549_v10 }
0x14b3   :  { %7018 = vmatpush.xpose.msk.msra.mxu0 %vm670_vm6, %v11556_v35 }
0x14b4   :  { %v8033_v56 = vpop.eup %8032 }
0x14b5   :  { %v5054_v34 = vmul.f32 %v8033_v56, %v4902_v24  ;;  %vm5060_vm10 = vweird.f32 %v8033_v56 }
0x14b6   :  { %vm5061_vm13 = vmor %vm5059_vm12, %vm5060_vm10 }
0x14b7   :  { %v5055_v38 = vmul.f32 %v8033_v56, %v5054_v34  ;;  %7019 = vmatpush.xpose.msk.msra.mxu0 %vm670_vm6, %v11615_v43 }
0x14b9   :  { %v5056_v25 = vmul.f32 0.5, %v5055_v38 }
0x14bb   :  { %v5057_v28 = vsub.f32 1.5, %v5056_v25  ;;  %7020 = vmatpush.xpose.msk.msra.mxu0 %vm670_vm6, %v11563_v55 }
0x14bd   :  { %v5058_v60 = vmul.f32 %v8033_v56, %v5057_v28 }
0x14bf   :  { %v5062_v7 = vsel %vm5061_vm13, %v8033_v56, %v5058_v60  ;;  %v5208_v20 = vpop.f32.mrf.mxu0 }
0x14c0   :  { %v5078_v27 = vmul.f32 %v5062_v7, %v11497_v4  ;;  %v5209_v49 = vadd.f32 %v11323_v0, %v5208_v20 }
0x14c2   :  { %v5256_v14 = vmul.f32 0.044715, %v5209_v49  ;;  %v5095_v30 = vmul.f32 %v11572_v19, %v5078_v27 }
0x14c4   :  { %v5272_v44 = vmul.f32 %v5256_v14, %v5209_v49  ;;  %v5112_v18 = vadd.f32 %v11578_v58, %v5095_v30  ;;  %v5240_v58 = vmul.f32 0.5, %v5209_v49 }
0x14c6   :  { %v5288_v1 = vmul.f32 %v5272_v44, %v5209_v49  ;;  %6936 = vmatmul.msk.f32.gmra.mxu0 %vm59_vm0, %v5112_v18 }
0x14c7   :  { %v5211_v59 = vpop.f32.mrf.mxu0 }
0x14c8   :  { %v5212_v22 = vadd.f32 %v11323_v0, %v5211_v59  ;;  %v5304_v41 = vadd.f32 %v5288_v1, %v5209_v49 }
0x14ca   :  { %v5257_v21 = vmul.f32 0.044715, %v5212_v22  ;;  %v5320_v46 = vmul.f32 0.7978846, %v5304_v41  ;;  %v5241_v15 = vmul.f32 0.5, %v5212_v22 }
0x14cc   :  { %v5273_v61 = vmul.f32 %v5257_v21, %v5212_v22  ;;  %8034 = vtanh.f32 %v5320_v46 }
0x14ce   :  { %v5289_v4 = vmul.f32 %v5273_v61, %v5212_v22 }
0x14cf   :  { %v5214_v26 = vpop.f32.mrf.mxu0 }
0x14d0   :  { %v5215_v51 = vadd.f32 %v11323_v0, %v5214_v26  ;;  %v5305_v57 = vadd.f32 %v5289_v4, %v5212_v22 }
0x14d2   :  { %v8035_v19 = vpop.eup %8034  ;;  %v5258_v6 = vmul.f32 0.044715, %v5215_v51  ;;  %v5321_v45 = vmul.f32 0.7978846, %v5305_v57  ;;  %v5242_v7 = vmul.f32 0.5, %v5215_v51 }
0x14d3   :  { %v5352_v5 = vadd.f32 1.0, %v8035_v19 }
0x14d4   :  { %v5274_v9 = vmul.f32 %v5258_v6, %v5215_v51  ;;  %8036 = vtanh.f32 %v5321_v45 }
0x14d5   :  { %v5368_v53 = vmul.f32 %v5352_v5, %v5240_v58 }
0x14d6   :  { %v5290_v39 = vmul.f32 %v5274_v9, %v5215_v51 }
0x14d7   :  { %v5217_v29 = vpop.f32.mrf.mxu0  ;;  %6949 = vmatmul.msk.f32.gmra.mxu2 %vm670_vm6, %v5368_v53 }
0x14d8   :  { %v5218_v23 = vadd.f32 %v11323_v0, %v5217_v29  ;;  %v5306_v47 = vadd.f32 %v5290_v39, %v5215_v51  ;;  %v8076_v51 = vld [vmem:[%s12380_s1 + $0xe] ss:$0 sm:$0xff] }
0x14da   :  { %v8037_v11 = vpop.eup %8036  ;;  %v5259_v17 = vmul.f32 0.044715, %v5218_v23  ;;  %v5322_v33 = vmul.f32 0.7978846, %v5306_v47  ;;  %v5243_v41 = vmul.f32 0.5, %v5218_v23 }
0x14db   :  { %v5353_v3 = vadd.f32 1.0, %v8037_v11 }
0x14dc   :  { %v5275_v63 = vmul.f32 %v5259_v17, %v5218_v23  ;;  %8038 = vtanh.f32 %v5322_v33 }
0x14dd   :  { %v5369_v31 = vmul.f32 %v5353_v3, %v5241_v15 }
0x14de   :  { %v5291_v24 = vmul.f32 %v5275_v63, %v5218_v23 }
0x14df   :  { %v5220_v56 = vpop.f32.mrf.mxu0  ;;  %6950 = vmatmul.msk.f32.gmra.mxu2 %vm670_vm6, %v5369_v31 }
0x14e0   :  { %v5221_v34 = vadd.f32 %v11323_v0, %v5220_v56  ;;  %v5307_v38 = vadd.f32 %v5291_v24, %v5218_v23  ;;  %v5775_v56 = vpop.permute.xlu2 %5774 }
0x14e2   :  { %v8039_v25 = vpop.eup %8038  ;;  %v5260_v28 = vmul.f32 0.044715, %v5221_v34  ;;  %v5323_v60 = vmul.f32 0.7978846, %v5307_v38  ;;  %v5244_v58 = vmul.f32 0.5, %v5221_v34 }
0x14e3   :  { %v5354_v20 = vadd.f32 1.0, %v8039_v25 }
0x14e4   :  { %v5276_v27 = vmul.f32 %v5260_v28, %v5221_v34  ;;  %8040 = vtanh.f32 %v5323_v60 }
0x14e5   :  { %v5370_v49 = vmul.f32 %v5354_v20, %v5242_v7  ;;  %v11658_v20 = vld [vmem:[%s12383_s4 + $0x20] sm:$0xff] }
0x14e6   :  { %v5292_v14 = vmul.f32 %v5276_v27, %v5221_v34  ;;  %v11669_v27 = vld [vmem:[%s12383_s4 + $0x28] sm:$0xff] }
0x14e7   :  { %v5223_v30 = vpop.f32.mrf.mxu0  ;;  %6951 = vmatmul.msk.f32.gmra.mxu2 %vm670_vm6, %v5370_v49 }
0x14e8   :  { %v5224_v44 = vadd.f32 %v11323_v0, %v5223_v30  ;;  %v5308_v18 = vadd.f32 %v5292_v14, %v5221_v34  ;;  %v5773_v34 = vpop.permute.xlu1 %5772  ;;  %v5769_v25 = vpop.permute.xlu2 %5768 }
0x14ea   :  { %v8041_v1 = vpop.eup %8040  ;;  %v5261_v59 = vmul.f32 0.044715, %v5224_v44  ;;  %v5324_v22 = vmul.f32 0.7978846, %v5308_v18  ;;  %v5245_v11 = vmul.f32 0.5, %v5224_v44 }
0x14eb   :  { %v5355_v21 = vadd.f32 1.0, %v8041_v1  ;;  %v11688_v1 = vld [vmem:[%s12383_s4 + $0x30] sm:$0xff] }
0x14ec   :  { %v5277_v46 = vmul.f32 %v5261_v59, %v5224_v44  ;;  %8042 = vtanh.f32 %v5324_v22 }
0x14ed   :  { %v5371_v61 = vmul.f32 %v5355_v21, %v5243_v41  ;;  %v11699_v41 = vld [vmem:[%s12383_s4 + $0x38] sm:$0xff] }
0x14ee   :  { %v5293_v4 = vmul.f32 %v5277_v46, %v5224_v44 }
0x14ef   :  { %v5226_v26 = vpop.f32.mrf.mxu0  ;;  %6952 = vmatmul.msk.f32.gmra.mxu2 %vm670_vm6, %v5371_v61 }
0x14f0   :  { %v5227_v57 = vadd.f32 %v8076_v51, %v5226_v26  ;;  %v5309_v19 = vadd.f32 %v5293_v4, %v5224_v44  ;;  %v5767_v28 = vpop.permute.xlu1 %5766  ;;  %v5763_v7 = vpop.permute.xlu2 %5762 }
0x14f2   :  { %v8043_v0 = vpop.eup %8042  ;;  %v5262_v6 = vmul.f32 0.044715, %v5227_v57  ;;  %v5325_v45 = vmul.f32 0.7978846, %v5309_v19  ;;  %v5246_v3 = vmul.f32 0.5, %v5227_v57 }
0x14f3   :  { %v5356_v5 = vadd.f32 1.0, %v8043_v0 }
0x14f4   :  { %v5278_v9 = vmul.f32 %v5262_v6, %v5227_v57  ;;  %8044 = vtanh.f32 %v5325_v45  ;;  %v11725_v6 = vld [vmem:[%s12383_s4 + $0x40] sm:$0xff] }
0x14f5   :  { %v5372_v53 = vmul.f32 %v5356_v5, %v5244_v58  ;;  %v11739_v5 = vld [vmem:[%s12383_s4 + $0x48] sm:$0xff] }
0x14f6   :  { %v5294_v39 = vmul.f32 %v5278_v9, %v5227_v57 }
0x14f7   :  { %6953 = vmatmul.msk.f32.gmra.mxu2 %vm670_vm6, %v5372_v53 }
0x14f8   :  { %v5310_v29 = vadd.f32 %v5294_v39, %v5227_v57 }
0x14fa   :  { %v8045_v23 = vpop.eup %8044  ;;  %v5326_v47 = vmul.f32 0.7978846, %v5310_v29 }
0x14fb   :  { %v5357_v17 = vadd.f32 1.0, %v8045_v23 }
0x14fc   :  { %8046 = vtanh.f32 %v5326_v47 }
0x14fd   :  { %v5373_v33 = vmul.f32 %v5357_v17, %v5245_v11 }
0x14ff   :  { %6954 = vmatmul.msk.f32.gmra.mxu2 %vm670_vm6, %v5373_v33 }
0x1502   :  { %v8047_v15 = vpop.eup %8046 }
0x1503   :  { %v5358_v63 = vadd.f32 1.0, %v8047_v15 }
0x1505   :  { %v5374_v31 = vmul.f32 %v5358_v63, %v5246_v3 }
0x1507   :  { %6955 = vmatmul.msk.f32.gmra.mxu2 %vm670_vm6, %v5374_v31 }
0x1511   :  { %v5777_v24 = vpop.permute.xlu0 %5776 }
0x1512   :  { %6973 = vmatpush.xpose.msk.msrb.mxu3 %vm59_vm0, %v5777_v24 }
0x1516   :  { %6974 = vmatpush.xpose.msk.msrb.mxu3 %vm59_vm0, %v5775_v56 }
0x1519   :  { %v5771_v38 = vpop.permute.xlu0 %5770 }
0x151a   :  { %6975 = vmatpush.xpose.msk.msrb.mxu3 %vm59_vm0, %v5773_v34 }
0x151e   :  { %6976 = vmatpush.xpose.msk.msrb.mxu3 %vm59_vm0, %v5771_v38 }
0x1521   :  { %v5765_v60 = vpop.permute.xlu0 %5764 }
0x1522   :  { %6977 = vmatpush.xpose.msk.msrb.mxu3 %vm59_vm0, %v5769_v25 }
0x1526   :  { %6978 = vmatpush.xpose.msk.msrb.mxu3 %vm59_vm0, %v5767_v28  ;;  %v7081_v28 = vld [vmem:[%s12384_s5 + $0x70] sm:$0xf] }
0x152a   :  { %6979 = vmatpush.xpose.msk.msrb.mxu3 %vm59_vm0, %v5765_v60 }
0x152e   :  { %6980 = vmatpush.xpose.msk.msrb.mxu3 %vm59_vm0, %v5763_v7  ;;  %v7073_v7 = vld [vmem:[%s12384_s5 + $0x60] sm:$0xf] }
0x1531   :  { %6981 = vmatmul.msk.f32.vlgmr.msrb.gmra.mxu3 %vm59_vm0, %v11658_v20 }
0x1532   :  { %6983 = vmatpush.xpose.msk.msra.mxu3 %vm670_vm6, %v11594_v13 }
0x1536   :  { %6984 = vmatpush.xpose.msk.msra.mxu3 %vm670_vm6, %v11530_v54 }
0x1539   :  { %6982 = vmatmul.msk.f32.gmra.mxu3 %vm59_vm0, %v11669_v27 }
0x153a   :  { %6985 = vmatpush.xpose.msk.msra.mxu3 %vm670_vm6, %v11539_v42 }
0x153e   :  { %6986 = vmatpush.xpose.msk.msra.mxu3 %vm670_vm6, %v11605_v8 }
0x1542   :  { %6987 = vmatpush.xpose.msk.msra.mxu3 %vm670_vm6, %v11549_v10 }
0x1543   :  { %v5229_v49 = vpop.f32.mrf.mxu0 }
0x1544   :  { %v5230_v14 = vadd.f32 %v8076_v51, %v5229_v49  ;;  %v7250_v49 = vld [vmem:[%s12384_s5 + $0x64] sm:$0xf0] }
0x1546   :  { %6988 = vmatpush.xpose.msk.msra.mxu3 %vm670_vm6, %v11556_v35  ;;  %v5263_v30 = vmul.f32 0.044715, %v5230_v14  ;;  %v5247_v46 = vmul.f32 0.5, %v5230_v14 }
0x1548   :  { %v5279_v44 = vmul.f32 %v5263_v30, %v5230_v14  ;;  %v11833_v30 = vor.u32 %v7250_v49, %v7073_v7  ;;  %v7033_v7 = vld [vmem:[%s12384_s5 + $0x10] sm:$0xf]  ;;  %v7240_v49 = vld [vmem:[%s12384_s5 + $0x14] sm:$0xf0] }
0x154a   :  { %6989 = vmatpush.xpose.msk.msra.mxu3 %vm670_vm6, %v11615_v43  ;;  %v5295_v18 = vmul.f32 %v5279_v44, %v5230_v14  ;;  %v7248_v44 = vld [vmem:[%s12384_s5 + $0x54] sm:$0xf0] }
0x154c   :  { %v5311_v59 = vadd.f32 %v5295_v18, %v5230_v14  ;;  %v7065_v14 = vld [vmem:[%s12384_s5 + $0x50] sm:$0xf]  ;;  %v7251_v18 = vld [vmem:[%s12384_s5 + $0x74] sm:$0xf] }
0x154e   :  { %6990 = vmatpush.xpose.msk.msra.mxu3 %vm670_vm6, %v11563_v55  ;;  %v5327_v22 = vmul.f32 0.7978846, %v5311_v59  ;;  %v7083_v59 = vld [vmem:[%s12384_s5 + $0x78] sm:$0xf0] }
0x1550   :  { %8048 = vtanh.f32 %v5327_v22  ;;  %v11845_v22 = vor.u32 %v7248_v44, %v7065_v14 }
0x1551   :  { %6991 = vmatmul.msk.f32.vlgmr.msra.gmra.mxu3 %vm670_vm6, %v11688_v1 }
0x1552   :  { %6993 = vmatpush.xpose.msk.msrb.mxu3 %vm670_vm6, %v11594_v13 }
0x1556   :  { %6994 = vmatpush.xpose.msk.msrb.mxu3 %vm670_vm6, %v11530_v54  ;;  %v8049_v21 = vpop.eup %8048 }
0x1557   :  { %v5359_v61 = vadd.f32 1.0, %v8049_v21  ;;  %v11847_v21 = vor.u32 %v7251_v18, %v7083_v59  ;;  %v7043_v18 = vld [vmem:[%s12384_s5 + $0x28] sm:$0xf0]  ;;  %v7169_v59 = vld [vmem:[%s12384_s5 + $0x120] sm:$0xf] }
0x1559   :  { %6992 = vmatmul.msk.f32.gmra.mxu3 %vm670_vm6, %v11699_v41  ;;  %v5375_v4 = vmul.f32 %v5359_v61, %v5247_v46  ;;  %v7249_v46 = vld [vmem:[%s12384_s5 + $0x64] sm:$0xf]  ;;  %v7075_v61 = vld [vmem:[%s12384_s5 + $0x68] sm:$0xf0]  ;;  %6231 = vmatpush.bf16.msrb.mxu0 %v11847_v21 }
0x155a   :  { %6995 = vmatpush.xpose.msk.msrb.mxu3 %vm670_vm6, %v11539_v42  ;;  %v5485_v26 = vpop.f32.mrf.mxu2 }
0x155b   :  { %v5517_v51 = vadd.f32 %v5485_v26, %v11344_v2  ;;  %6956 = vmatmul.msk.f32.gmra.mxu2 %vm670_vm6, %v5375_v4  ;;  %v7057_v4 = vld [vmem:[%s12384_s5 + $0x40] sm:$0xf]  ;;  %v7246_v26 = vld [vmem:[%s12384_s5 + $0x44] sm:$0xf0] }
0x155d   :  { %v5535_v57 = vadd.f32 %v11404_v37, %v5517_v51 }
0x155e   :  { %6996 = vmatpush.xpose.msk.msrb.mxu3 %vm670_vm6, %v11605_v8 }
0x155f   :  { %6965 = vmatmul.msk.f32.gmra.mxu1 %vm59_vm0, %v5535_v57  ;;  %v11862_v57 = vor.u32 %v7249_v46, %v7075_v61  ;;  %v7274_v46 = vld [vmem:[%s12384_s5 + $0x124] sm:$0xf0] }
0x1561   :  { %6232 = vmatpush.bf16.msrb.mxu0 %v11862_v57 }
0x1562   :  { %6997 = vmatpush.xpose.msk.msrb.mxu3 %vm670_vm6, %v11549_v10  ;;  %v5488_v19 = vpop.f32.mrf.mxu2 }
0x1563   :  { %v5518_v0 = vadd.f32 %v5488_v19, %v11351_v40 }
0x1565   :  { %v5536_v2 = vadd.f32 %v11404_v37, %v5518_v0  ;;  %v7247_v0 = vld [vmem:[%s12384_s5 + $0x54] sm:$0xf] }
0x1566   :  { %6998 = vmatpush.xpose.msk.msrb.mxu3 %vm670_vm6, %v11556_v35 }
0x1567   :  { %6966 = vmatmul.msk.f32.gmra.mxu1 %vm59_vm0, %v5536_v2  ;;  %v7067_v2 = vld [vmem:[%s12384_s5 + $0x58] sm:$0xf0] }
0x156a   :  { %6999 = vmatpush.xpose.msk.msrb.mxu3 %vm670_vm6, %v11615_v43  ;;  %v5491_v45 = vpop.f32.mrf.mxu2 }
0x156b   :  { %v5519_v40 = vadd.f32 %v5491_v45, %v11358_v36 }
0x156d   :  { %v5537_v58 = vadd.f32 %v11404_v37, %v5519_v40  ;;  %v11872_v40 = vor.u32 %v7246_v26, %v7057_v4  ;;  %v11955_v26 = vor.u32 %v7240_v49, %v7033_v7 }
0x156e   :  { %7000 = vmatpush.xpose.msk.msrb.mxu3 %vm670_vm6, %v11563_v55 }
0x156f   :  { %6967 = vmatmul.msk.f32.gmra.mxu1 %vm59_vm0, %v5537_v58  ;;  %v7049_v58 = vld [vmem:[%s12384_s5 + $0x30] sm:$0xf] }
0x1571   :  { %7001 = vmatmul.msk.f32.vlgmr.msrb.gmra.mxu3 %vm670_vm6, %v11725_v6 }
0x1572   :  { %7003 = vmatpush.xpose.msk.msra.mxu3 %vm670_vm6, %v11594_v13  ;;  %v5494_v13 = vpop.f32.mrf.mxu2 }
0x1573   :  { %v5520_v36 = vadd.f32 %v5494_v13, %v11364_v50  ;;  %v7244_v13 = vld [vmem:[%s12384_s5 + $0x34] sm:$0xf0] }
0x1575   :  { %v5538_v9 = vadd.f32 %v11404_v37, %v5520_v36 }
0x1576   :  { %7004 = vmatpush.xpose.msk.msra.mxu3 %vm670_vm6, %v11530_v54 }
0x1577   :  { %6968 = vmatmul.msk.f32.gmra.mxu1 %vm59_vm0, %v5538_v9  ;;  %v11882_v9 = vor.u32 %v7247_v0, %v7067_v2  ;;  %v7267_v2 = vld [vmem:[%s12384_s5 + $0xf4] sm:$0xf] }
0x1579   :  { %7002 = vmatmul.msk.f32.gmra.mxu3 %vm670_vm6, %v11739_v5  ;;  %6233 = vmatpush.bf16.msrb.mxu0 %v11882_v9 }
0x157a   :  { %7005 = vmatpush.xpose.msk.msra.mxu3 %vm670_vm6, %v11539_v42  ;;  %v5497_v54 = vpop.f32.mrf.mxu2 }
0x157b   :  { %v5521_v53 = vadd.f32 %v5497_v54, %v11370_v12  ;;  %v11766_v12 = vld [vmem:[%s12383_s4 + $0x50] sm:$0xff]  ;;  %v7245_v54 = vld [vmem:[%s12384_s5 + $0x44] sm:$0xf] }
0x157d   :  { %v5539_v42 = vadd.f32 %v11404_v37, %v5521_v53  ;;  %v7059_v53 = vld [vmem:[%s12384_s5 + $0x48] sm:$0xf0] }
0x157e   :  { %7006 = vmatpush.xpose.msk.msra.mxu3 %vm670_vm6, %v11605_v8 }
0x157f   :  { %6969 = vmatmul.msk.f32.gmra.mxu1 %vm59_vm0, %v5539_v42  ;;  %v7177_v42 = vld [vmem:[%s12384_s5 + $0x130] sm:$0xf] }
0x1582   :  { %7007 = vmatpush.xpose.msk.msra.mxu3 %vm670_vm6, %v11549_v10  ;;  %v5500_v50 = vpop.f32.mrf.mxu2 }
0x1583   :  { %v5522_v8 = vadd.f32 %v5500_v50, %v11376_v48  ;;  %v7276_v50 = vld [vmem:[%s12384_s5 + $0x134] sm:$0xf0] }
0x1585   :  { %v5540_v39 = vadd.f32 %v11404_v37, %v5522_v8 }
0x1586   :  { %7008 = vmatpush.xpose.msk.msra.mxu3 %vm670_vm6, %v11556_v35 }
0x1587   :  { %6970 = vmatmul.msk.f32.gmra.mxu1 %vm59_vm0, %v5540_v39 }
0x158a   :  { %7009 = vmatpush.xpose.msk.msra.mxu3 %vm670_vm6, %v11615_v43  ;;  %v5503_v10 = vpop.f32.mrf.mxu2  ;;  %v11776_v43 = vld [vmem:[%s12383_s4 + $0x58] sm:$0xff] }
0x158b   :  { %v5523_v35 = vadd.f32 %v5503_v10, %v11387_v62  ;;  %v11791_v62 = vld [vmem:[%s12383_s4 + $0x68] sm:$0xff]  ;;  %v11900_v10 = vor.u32 %v7244_v13, %v7049_v58  ;;  %v7239_v58 = vld [vmem:[%s12384_s5 + $0x14] sm:$0xf] }
0x158d   :  { %v5541_v48 = vadd.f32 %v11404_v37, %v5523_v35  ;;  %v11902_v35 = vor.u32 %v7276_v50, %v7177_v42  ;;  %v7272_v42 = vld [vmem:[%s12384_s5 + $0x114] sm:$0xf0] }
0x158e   :  { %7010 = vmatpush.xpose.msk.msra.mxu3 %vm670_vm6, %v11563_v55  ;;  %v11784_v55 = vld [vmem:[%s12383_s4 + $0x60] sm:$0xff] }
0x158f   :  { %6971 = vmatmul.msk.f32.gmra.mxu1 %vm59_vm0, %v5541_v48  ;;  %7021 = vmatmul.msk.f32.vlgmr.msra.gmra.mxu0 %vm670_vm6, %v11784_v55  ;;  %v7041_v48 = vld [vmem:[%s12384_s5 + $0x20] sm:$0xf] }
0x1591   :  { %7011 = vmatmul.msk.f32.vlgmr.msra.gmra.mxu3 %vm670_vm6, %v11766_v12 }
0x1592   :  { %6221 = vmatpush.bf16.msrb.mxu3 %v11902_v35 }
0x1597   :  { %7022 = vmatmul.msk.f32.gmra.mxu0 %vm670_vm6, %v11791_v62 }
0x1599   :  { %7012 = vmatmul.msk.f32.gmra.mxu3 %vm670_vm6, %v11776_v43 }
0x15b4   :  { %v11795_v29 = vpop.f32.mrf.mxu3 }
0x15bc   :  { %v11797_v23 = vpop.f32.mrf.mxu3 }
0x15d4   :  { %v5864_v47 = vpop.f32.mrf.mxu3 }
0x15dc   :  { %v5867_v11 = vpop.f32.mrf.mxu3  ;;  %v11800_v33 = vpop.f32.mrf.mxu1 }
0x15dd   :  { %v7562_v17 = vpack.i.bf16 %v5867_v11, %v5864_v47  ;;  %v7242_v47 = vld [vmem:[%s12384_s5 + $0x24] sm:$0xf0]  ;;  %v5639_v44 = vadd.f32 %v11513_v16, %v11800_v33  ;;  %v11957_v33 = vor.u32 %v7274_v46, %v7169_v59 }
0x15de   :  { %v5506_v15 = vpop.f32.mrf.mxu2 }
0x15df   :  { %7563 = vrot.lane.b32.xlu1 %v7562_v17, %s8109_s26  ;;  %v5524_v3 = vadd.f32 %v5506_v15, %v11429_v32  ;;  %v11913_v17 = vor.u32 %v7245_v54, %v7059_v53  ;;  %6222 = vmatpush.bf16.msrb.mxu3 %v11957_v33  ;;  %v7035_v54 = vld [vmem:[%s12384_s5 + $0x18] sm:$0xf0]  ;;  %v7161_v53 = vld [vmem:[%s12384_s5 + $0x110] sm:$0xf]  ;;  %vm5671_vm2 = vcmp.ge.f32.partialorder %v5639_v44, 0.0 }
0x15e1   :  { %v5542_v63 = vadd.f32 %v11404_v37, %v5524_v3  ;;  %v7252_v37 = vld [vmem:[%s12384_s5 + $0x74] sm:$0xf0]  ;;  %v7243_v3 = vld [vmem:[%s12384_s5 + $0x34] sm:$0xf]  ;;  %6234 = vmatpush.bf16.msrb.mxu0 %v11913_v17 }
0x15e2   :  { %v11821_v32 = vor.u32 %v7252_v37, %v7081_v28  ;;  %v11925_v37 = vor.u32 %v7242_v47, %v7041_v48  ;;  %v11998_v47 = vor.u32 %v7272_v42, %v7161_v53  ;;  %v7131_v42 = vld [vmem:[%s12384_s5 + $0xd8] sm:$0xf0] }
0x15e3   :  { %6972 = vmatmul.msk.f32.gmra.mxu1 %vm59_vm0, %v5542_v63  ;;  %v7051_v63 = vld [vmem:[%s12384_s5 + $0x38] sm:$0xf0] }
0x15e4   :  { %v11805_v31 = vpop.f32.mrf.mxu1  ;;  %6189 = vmatpush.bf16.msrb.mxu2 %v11821_v32  ;;  %v11935_v14 = vor.u32 %v7243_v3, %v7051_v63  ;;  %6223 = vmatpush.bf16.msrb.mxu3 %v11998_v47  ;;  %v7153_v3 = vld [vmem:[%s12384_s5 + $0x100] sm:$0xf]  ;;  %v7270_v63 = vld [vmem:[%s12384_s5 + $0x104] sm:$0xf0] }
0x15e5   :  { %v12024_v7 = vor.u32 %v7270_v63, %v7153_v3  ;;  %v7261_v63 = vld [vmem:[%s12384_s5 + $0xc4] sm:$0xf] }
0x15e6   :  { %6235 = vmatpush.bf16.msrb.mxu0 %v11935_v14 }
0x15e8   :  { %6190 = vmatpush.bf16.msrb.mxu2 %v11833_v30  ;;  %6224 = vmatpush.bf16.msrb.mxu3 %v12024_v7 }
0x15ec   :  { %v11807_v24 = vpop.f32.mrf.mxu1  ;;  %6191 = vmatpush.bf16.msrb.mxu2 %v11845_v22 }
0x15ed   :  { %v5645_v50 = vadd.f32 %v11513_v16, %v11807_v24  ;;  %v7139_v24 = vld [vmem:[%s12384_s5 + $0xe8] sm:$0xf0] }
0x15ef   :  { %vm5673_vm3 = vcmp.ge.f32.partialorder %v5645_v50, 0.0 }
0x15f0   :  { %6192 = vmatpush.bf16.msrb.mxu2 %v11872_v40 }
0x15f4   :  { %v5647_v56 = vpop.f32.mrf.mxu1  ;;  %v11809_v34 = vpop.f32.mrf.mxu3  ;;  %6193 = vmatpush.bf16.msrb.mxu2 %v11900_v10 }
0x15f5   :  { %v5648_v8 = vadd.f32 %v11513_v16, %v5647_v56 }
0x15f7   :  { %v5691_v56 = vmul.f32 %v11519_v52, %v5648_v8  ;;  %vm5674_vm15 = vcmp.ge.f32.partialorder %v5648_v8, 0.0 }
0x15f8   :  { %6194 = vmatpush.bf16.msrb.mxu2 %v11925_v37 }
0x15f9   :  { %v11951_v61 = vsel %vm5674_vm15, %v5648_v8, %v5691_v56 }
0x15fc   :  { %v11811_v38 = vpop.f32.mrf.mxu1  ;;  %v11813_v25 = vpop.f32.mrf.mxu3  ;;  %6195 = vmatpush.bf16.msrb.mxu2 %v11955_v26 }
0x1604   :  { %v5653_v60 = vpop.f32.mrf.mxu1 }
0x1605   :  { %v5654_v28 = vadd.f32 %v11513_v16, %v5653_v60  ;;  %v7241_v60 = vld [vmem:[%s12384_s5 + $0x24] sm:$0xf] }
0x1606   :  { %v11968_v0 = vor.u32 %v7241_v60, %v7043_v18 }
0x1607   :  { %v5693_v4 = vmul.f32 %v11519_v52, %v5654_v28  ;;  %vm5676_vm1 = vcmp.ge.f32.partialorder %v5654_v28, 0.0 }
0x1608   :  { %12491 = vst [vmem:[#allocation12_spill] sm:$0xff] %v11968_v0  ;;  %6236 = vmatpush.bf16.msrb.mxu0 %v11968_v0 }
0x1609   :  { %v11993_v8 = vsel %vm5676_vm1, %v5654_v28, %v5693_v4  ;;  %v5690_v28 = vmul.f32 %v11519_v52, %v5645_v50  ;;  %v7273_v4 = vld [vmem:[%s12384_s5 + $0x124] sm:$0xf] }
0x160b   :  { %v12039_v59 = vsel %vm5673_vm3, %v5645_v50, %v5690_v28  ;;  %v7269_v50 = vld [vmem:[%s12384_s5 + $0x104] sm:$0xf]  ;;  %v7123_v28 = vld [vmem:[%s12384_s5 + $0xc8] sm:$0xf0] }
0x160c   :  { %v5656_v19 = vpop.f32.mrf.mxu1  ;;  %v5957_v13 = vpop.f32.mrf.mxu0 }
0x160d   :  { %v5657_v45 = vadd.f32 %v11513_v16, %v5656_v19  ;;  %v7238_v19 = vld [vmem:[%s12384_s5 + $0x4] sm:$0xf0]  ;;  %v7265_v16 = vld [vmem:[%s12384_s5 + $0xe4] sm:$0xf] }
0x160e   :  { %v12029_v49 = vor.u32 %v7265_v16, %v7139_v24  ;;  %v7155_v16 = vld [vmem:[%s12384_s5 + $0x108] sm:$0xf0] }
0x160f   :  { %vm5677_vm14 = vcmp.ge.f32.partialorder %v5657_v45, 0.0  ;;  %v5694_v36 = vmul.f32 %v11519_v52, %v5657_v45  ;;  %v12088_v3 = vor.u32 %v7269_v50, %v7155_v16  ;;  %v7145_v16 = vld [vmem:[%s12384_s5 + $0xf0] sm:$0xf] }
0x1611   :  { %v11897_v39 = vsel %vm5677_vm14, %v5657_v45, %v5694_v36  ;;  %v7147_v45 = vld [vmem:[%s12384_s5 + $0xf8] sm:$0xf0]  ;;  %v5688_v36 = vmul.f32 %v11519_v52, %v5639_v44  ;;  %v7275_v52 = vld [vmem:[%s12384_s5 + $0x134] sm:$0xf] }
0x1612   :  { %6297 = vrot.lane.b32.xlu1 %v11897_v39, %s8109_s26 }
0x1613   :  { %v12020_v56 = vsel %vm5671_vm2, %v5639_v44, %v5688_v36  ;;  %v7179_v44 = vld [vmem:[%s12384_s5 + $0x138] sm:$0xf0]  ;;  %v7027_v36 = vld [vmem:[%s12384_s5 + $0x8] sm:$0xf0] }
0x1614   :  { %v5926_v51 = vpop.f32.mrf.mxu3  ;;  %v5960_v60 = vpop.f32.mrf.mxu0  ;;  %v12041_v46 = vor.u32 %v7275_v52, %v7179_v44  ;;  %v7259_v52 = vld [vmem:[%s12384_s5 + $0xb4] sm:$0xf]  ;;  %v7115_v44 = vld [vmem:[%s12384_s5 + $0xb8] sm:$0xf0] }
0x1615   :  { %v5985_v18 = vpack.c.bf16 %v5960_v60, %v5957_v13  ;;  %v7237_v13 = vld [vmem:[%s12384_s5 + $0x4] sm:$0xf]  ;;  %v12099_v60 = vor.u32 %v7261_v63, %v7123_v28  ;;  %v7268_v63 = vld [vmem:[%s12384_s5 + $0xf4] sm:$0xf0] }
0x1616   :  { %6263 = vmatpush.bf16.msra.mxu3 %v12041_v46  ;;  %v12075_v53 = vor.u32 %v7237_v13, %v7027_v36  ;;  %v7255_v13 = vld [vmem:[%s12384_s5 + $0x94] sm:$0xf]  ;;  %v7099_v36 = vld [vmem:[%s12384_s5 + $0x98] sm:$0xf0] }
0x1617   :  { %7183 = vmatmul.msk.bf16.vlgmr.msrb.gmra.mxu3 %vm670_vm6, %v5985_v18 }
0x1618   :  { %12493 = vst [vmem:[#allocation11_spill] sm:$0xff] %v12075_v53 }
0x161a   :  { %6291 = vrot.lane.b32.xlu1 %v11951_v61, %s8109_s26 }
0x161c   :  { %v5929_v11 = vpop.f32.mrf.mxu3 }
0x161d   :  { %v7567_v15 = vpack.i.bf16 %v5929_v11, %v5926_v51  ;;  %v7025_v51 = vld [vmem:[%s12384_s5] sm:$0xf]  ;;  %v12002_v11 = vor.u32 %v7267_v2, %v7147_v45  ;;  %v7271_v2 = vld [vmem:[%s12384_s5 + $0x114] sm:$0xf]  ;;  %v7163_v45 = vld [vmem:[%s12384_s5 + $0x118] sm:$0xf0] }
0x161e   :  { %v11996_v48 = vor.u32 %v7238_v19, %v7025_v51  ;;  %v7171_v51 = vld [vmem:[%s12384_s5 + $0x128] sm:$0xf0] }
0x161f   :  { %7568 = vrot.lane.b32.xlu0 %v7567_v15, %s8109_s26  ;;  %v12005_v15 = vor.u32 %v7239_v58, %v7035_v54  ;;  %v12054_v19 = vor.u32 %v7273_v4, %v7171_v51  ;;  %v12063_v58 = vor.u32 %v7271_v2, %v7163_v45  ;;  %v7263_v54 = vld [vmem:[%s12384_s5 + $0xd4] sm:$0xf]  ;;  %v12108_v4 = vor.u32 %v7259_v52, %v7115_v44  ;;  %v7257_v51 = vld [vmem:[%s12384_s5 + $0xa4] sm:$0xf]  ;;  %v7107_v2 = vld [vmem:[%s12384_s5 + $0xa8] sm:$0xf0] }
0x1620   :  { %6196 = vmatpush.bf16.msrb.mxu2 %v11996_v48  ;;  %v12086_v24 = vor.u32 %v7263_v54, %v7131_v42  ;;  %v12118_v45 = vor.u32 %v7257_v51, %v7107_v2  ;;  %v12127_v54 = vor.u32 %v7255_v13, %v7099_v36  ;;  %v7091_v42 = vld [vmem:[%s12384_s5 + $0x88] sm:$0xf0]  ;;  %v12145_v52 = vor.u32 %v7268_v63, %v7145_v16  ;;  %v7137_v36 = vld [vmem:[%s12384_s5 + $0xe0] sm:$0xf] }
0x1621   :  { %12492 = vst [vmem:[#allocation5_spill] sm:$0xff] %v12005_v15  ;;  %6237 = vmatpush.bf16.msrb.mxu0 %v12005_v15  ;;  %6264 = vmatpush.bf16.msra.mxu3 %v12054_v19  ;;  %v7097_v15 = vld [vmem:[%s12384_s5 + $0x90] sm:$0xf] }
0x1622   :  { %6285 = vrot.lane.b32.xlu1 %v12020_v56, %s8109_s26  ;;  %6203 = vmatpush.bf16.msrb.mxu1 %v12145_v52 }
0x1624   :  { %6245 = vmatpush.bf16.msra.mxu2 %v12002_v11 }
0x1625   :  { %6265 = vmatpush.bf16.msra.mxu3 %v12063_v58  ;;  %6238 = vmatpush.bf16.msrb.mxu0 %v12075_v53 }
0x1627   :  { %6295 = vrot.lane.b32.xlu0 %v11993_v8, %s8109_s26 }
0x1628   :  { %6246 = vmatpush.bf16.msra.mxu2 %v12029_v49 }
0x1629   :  { %6266 = vmatpush.bf16.msra.mxu3 %v12088_v3 }
0x162c   :  { %6247 = vmatpush.bf16.msra.mxu2 %v12086_v24  ;;  %7184 = vmatmul.msk.bf16.vlgmr.msra.gmra.mxu3 %vm670_vm6, %v5985_v18  ;;  %v7253_v18 = vld [vmem:[%s12384_s5 + $0x84] sm:$0xf] }
0x162d   :  { %v12136_v50 = vor.u32 %v7253_v18, %v7091_v42  ;;  %v7266_v18 = vld [vmem:[%s12384_s5 + $0xe4] sm:$0xf0] }
0x162e   :  { %v12158_v16 = vor.u32 %v7266_v18, %v7137_v36 }
0x162f   :  { %6289 = vrot.lane.b32.xlu0 %v12039_v59, %s8109_s26 }
0x1630   :  { %6248 = vmatpush.bf16.msra.mxu2 %v12099_v60  ;;  %6204 = vmatpush.bf16.msrb.mxu1 %v12158_v16 }
0x1634   :  { %6249 = vmatpush.bf16.msra.mxu2 %v12108_v4 }
0x1638   :  { %6250 = vmatpush.bf16.msra.mxu2 %v12118_v45 }
0x163c   :  { %6251 = vmatpush.bf16.msra.mxu2 %v12127_v54 }
0x1640   :  { %6252 = vmatpush.bf16.msra.mxu2 %v12136_v50 }
0x1651   :  { %v7564_v28 = vpop.permute.xlu1 %7563 }
0x1652   :  { %v7566_v44 = vunpack.i.h.bf16 %v7564_v28  ;;  %v7565_v51 = vunpack.i.l.bf16 %v7564_v28  ;;  %v7121_v28 = vld [vmem:[%s12384_s5 + $0xc0] sm:$0xf] }
0x1654   :  { %v5980_v2 = vsel %vm670_vm6, %v11797_v23, %v7566_v44  ;;  %v5979_v13 = vsel %vm670_vm6, %v11795_v29, %v7565_v51  ;;  %v7129_v23 = vld [vmem:[%s12384_s5 + $0xd0] sm:$0xf]  ;;  %v7264_v29 = vld [vmem:[%s12384_s5 + $0xd4] sm:$0xf0]  ;;  %v7262_v44 = vld [vmem:[%s12384_s5 + $0xc4] sm:$0xf0] }
0x1655   :  { %v5983_v42 = vpack.c.bf16 %v5980_v2, %v5979_v13  ;;  %v12167_v63 = vor.u32 %v7264_v29, %v7129_v23  ;;  %v12176_v51 = vor.u32 %v7262_v44, %v7121_v28  ;;  %v7113_v2 = vld [vmem:[%s12384_s5 + $0xb0] sm:$0xf]  ;;  %v7260_v13 = vld [vmem:[%s12384_s5 + $0xb4] sm:$0xf0]  ;;  %v7105_v29 = vld [vmem:[%s12384_s5 + $0xa0] sm:$0xf] }
0x1656   :  { %v12185_v36 = vor.u32 %v7260_v13, %v7113_v2  ;;  %v7258_v28 = vld [vmem:[%s12384_s5 + $0xa4] sm:$0xf0]  ;;  %v8078_v2 = vld [vmem:[%s12380_s1 + $0x11] ss:$0 sm:$0xff] }
0x1657   :  { %6197 = vmatmul.bf16.vlgmr.msrb.gmra.mxu2 %v5983_v42  ;;  %6239 = vmatmul.bf16.vlgmr.msrb.gmra.mxu0 %v5983_v42  ;;  %v8077_v42 = vld [vmem:[%s12380_s1 + $0x10] ss:$0 sm:$0xff]  ;;  %v12197_v44 = vor.u32 %v7258_v28, %v7105_v29  ;;  %v7256_v29 = vld [vmem:[%s12384_s5 + $0x94] sm:$0xf0] }
0x1658   :  { %6205 = vmatpush.bf16.msrb.mxu1 %v12167_v63  ;;  %v12216_v28 = vor.u32 %v7256_v29, %v7097_v15  ;;  %v5642_v29 = vadd.f32 %v8077_v42, %v11805_v31 }
0x165a   :  { %vm5672_vm7 = vcmp.ge.f32.partialorder %v5642_v29, 0.0 }
0x165c   :  { %6206 = vmatpush.bf16.msrb.mxu1 %v12176_v51 }
0x1660   :  { %v5659_v18 = vpop.f32.mrf.mxu1  ;;  %6207 = vmatpush.bf16.msrb.mxu1 %v12185_v36 }
0x1661   :  { %v5660_v23 = vadd.f32 %v8077_v42, %v5659_v18  ;;  %v5651_v18 = vadd.f32 %v8077_v42, %v11811_v38 }
0x1663   :  { %vm5678_vm4 = vcmp.ge.f32.partialorder %v5660_v23, 0.0  ;;  %v5695_v13 = vmul.f32 %v8078_v2, %v5660_v23  ;;  %v5692_v38 = vmul.f32 %v8078_v2, %v5651_v18  ;;  %vm5675_vm5 = vcmp.ge.f32.partialorder %v5651_v18, 0.0 }
0x1664   :  { %6208 = vmatpush.bf16.msrb.mxu1 %v12197_v44 }
0x1665   :  { %v12203_v53 = vsel %vm5678_vm4, %v5660_v23, %v5695_v13  ;;  %v7089_v23 = vld [vmem:[%s12384_s5 + $0x80] sm:$0xf]  ;;  %v7254_v13 = vld [vmem:[%s12384_s5 + $0x84] sm:$0xf0]  ;;  %v12236_v0 = vsel %vm5675_vm5, %v5651_v18, %v5692_v38  ;;  %s8113_s5 = smov [#allocation2]  }
0x1666   :  { %6299 = vrot.lane.b32.xlu2 %v12203_v53, %s8109_s26  ;;  %7195 = vmatpush.xpose.msk.msrb.mxu3 %vm670_vm6, %v12203_v53  ;;  %v7090_v15 = vor.u32 %v7254_v13, %v7089_v23  ;;  %v5689_v23 = vmul.f32 %v8078_v2, %v5642_v29 }
0x1667   :  { %7205 = vmatpush.xpose.msk.msra.mxu0 %vm670_vm6, %v12203_v53  ;;  %7215 = vmatpush.xpose.msk.msrb.mxu2 %vm670_vm6, %v12203_v53 }
0x1668   :  { %6209 = vmatpush.bf16.msrb.mxu1 %v12216_v28  ;;  %v12252_v31 = vsel %vm5672_vm7, %v5642_v29, %v5689_v23 }
0x166a   :  { %7196 = vmatpush.xpose.msk.msrb.mxu3 %vm670_vm6, %v11897_v39 }
0x166b   :  { %7206 = vmatpush.xpose.msk.msra.mxu0 %vm670_vm6, %v11897_v39  ;;  %7216 = vmatpush.xpose.msk.msrb.mxu2 %vm670_vm6, %v11897_v39 }
0x166c   :  { %6210 = vmatpush.bf16.msrb.mxu1 %v7090_v15 }
0x166e   :  { %6293 = vrot.lane.b32.xlu2 %v12236_v0, %s8109_s26  ;;  %7197 = vmatpush.xpose.msk.msrb.mxu3 %vm670_vm6, %v11993_v8 }
0x166f   :  { %7207 = vmatpush.xpose.msk.msra.mxu0 %vm670_vm6, %v11993_v8  ;;  %7217 = vmatpush.xpose.msk.msrb.mxu2 %vm670_vm6, %v11993_v8 }
0x1672   :  { %7198 = vmatpush.xpose.msk.msrb.mxu3 %vm670_vm6, %v12236_v0 }
0x1673   :  { %7208 = vmatpush.xpose.msk.msra.mxu0 %vm670_vm6, %v12236_v0  ;;  %7218 = vmatpush.xpose.msk.msrb.mxu2 %vm670_vm6, %v12236_v0 }
0x1676   :  { %6287 = vrot.lane.b32.xlu2 %v12252_v31, %s8109_s26  ;;  %7199 = vmatpush.xpose.msk.msrb.mxu3 %vm670_vm6, %v11951_v61 }
0x1677   :  { %7209 = vmatpush.xpose.msk.msra.mxu0 %vm670_vm6, %v11951_v61  ;;  %7219 = vmatpush.xpose.msk.msrb.mxu2 %vm670_vm6, %v11951_v61 }
0x167a   :  { %7200 = vmatpush.xpose.msk.msrb.mxu3 %vm670_vm6, %v12039_v59 }
0x167b   :  { %7210 = vmatpush.xpose.msk.msra.mxu0 %vm670_vm6, %v12039_v59  ;;  %7220 = vmatpush.xpose.msk.msrb.mxu2 %vm670_vm6, %v12039_v59 }
0x167e   :  { %7201 = vmatpush.xpose.msk.msrb.mxu3 %vm670_vm6, %v12252_v31 }
0x167f   :  { %7211 = vmatpush.xpose.msk.msra.mxu0 %vm670_vm6, %v12252_v31  ;;  %7221 = vmatpush.xpose.msk.msrb.mxu2 %vm670_vm6, %v12252_v31 }
0x1682   :  { %7202 = vmatpush.xpose.msk.msrb.mxu3 %vm670_vm6, %v12020_v56 }
0x1683   :  { %7212 = vmatpush.xpose.msk.msra.mxu0 %vm670_vm6, %v12020_v56  ;;  %7222 = vmatpush.xpose.msk.msrb.mxu2 %vm670_vm6, %v12020_v56 }
0x1685   :  { %7203 = vmatmul.msk.f32.vlgmr.msrb.gmra.mxu3 %vm670_vm6, %v11688_v1 }
0x1686   :  { %6506 = vmatpush.bf16.msra.mxu3 %v11821_v32  ;;  %7213 = vmatmul.msk.f32.vlgmr.msra.gmra.mxu0 %vm670_vm6, %v11725_v6 }
0x1687   :  { %6520 = vmatpush.bf16.msrb.mxu0 %v12145_v52 }
0x168a   :  { %6507 = vmatpush.bf16.msra.mxu3 %v11833_v30 }
0x168b   :  { %6521 = vmatpush.bf16.msrb.mxu0 %v12158_v16 }
0x168d   :  { %7204 = vmatmul.msk.f32.gmra.mxu3 %vm670_vm6, %v11699_v41  ;;  %v6298_v41 = vpop.permute.xlu1 %6297 }
0x168e   :  { %6508 = vmatpush.bf16.msra.mxu3 %v11845_v22  ;;  %7214 = vmatmul.msk.f32.gmra.mxu0 %vm670_vm6, %v11739_v5 }
0x168f   :  { %6522 = vmatpush.bf16.msrb.mxu0 %v12167_v63 }
0x1691   :  { %v7569_v42 = vpop.permute.xlu0 %7568 }
0x1692   :  { %v7571_v2 = vunpack.i.h.bf16 %v7569_v42  ;;  %v7570_v18 = vunpack.i.l.bf16 %v7569_v42  ;;  %6509 = vmatpush.bf16.msra.mxu3 %v11872_v40 }
0x1693   :  { %6523 = vmatpush.bf16.msrb.mxu0 %v12176_v51 }
0x1694   :  { %v5982_v38 = vsel %vm670_vm6, %v11813_v25, %v7571_v2  ;;  %v5981_v32 = vsel %vm670_vm6, %v11809_v34, %v7570_v18 }
0x1695   :  { %v5984_v52 = vpack.c.bf16 %v5982_v38, %v5981_v32 }
0x1696   :  { %6510 = vmatpush.bf16.msra.mxu3 %v11900_v10 }
0x1697   :  { %6211 = vmatmul.bf16.vlgmr.msrb.gmra.mxu1 %v5984_v52  ;;  %6253 = vmatmul.bf16.vlgmr.msra.gmra.mxu2 %v5984_v52 }
0x1698   :  { %6538 = vmatpush.bf16.msra.mxu2 %v11902_v35  ;;  %6524 = vmatpush.bf16.msrb.mxu0 %v12185_v36 }
0x1699   :  { %v6296_v6 = vpop.permute.xlu0 %6295 }
0x169a   :  { %6511 = vmatpush.bf16.msra.mxu3 %v11925_v37  ;;  %v6226_v30 = vpop.f32.mrf.mxu3 }
0x169c   :  { %6539 = vmatpush.bf16.msra.mxu2 %v11957_v33  ;;  %6525 = vmatpush.bf16.msrb.mxu0 %v12197_v44 }
0x169e   :  { %6512 = vmatpush.bf16.msra.mxu3 %v11955_v26 }
0x16a0   :  { %6540 = vmatpush.bf16.msra.mxu2 %v11998_v47  ;;  %6526 = vmatpush.bf16.msrb.mxu0 %v12216_v28 }
0x16a2   :  { %6513 = vmatpush.bf16.msra.mxu3 %v11996_v48  ;;  %v6228_v22 = vpop.f32.mrf.mxu3 }
0x16a4   :  { %6541 = vmatpush.bf16.msra.mxu2 %v12024_v7  ;;  %6527 = vmatpush.bf16.msrb.mxu0 %v7090_v15 }
0x16a6   :  { %6580 = vmatpush.bf16.msrb.mxu3 %v12041_v46 }
0x16a7   :  { %7223 = vmatmul.msk.f32.vlgmr.msrb.gmra.mxu2 %vm670_vm6, %v11766_v12  ;;  %v6292_v12 = vpop.permute.xlu1 %6291 }
0x16a8   :  { %6562 = vmatpush.bf16.msrb.mxu2 %v12002_v11 }
0x16aa   :  { %6581 = vmatpush.bf16.msrb.mxu3 %v12054_v19 }
0x16ac   :  { %6563 = vmatpush.bf16.msrb.mxu2 %v12029_v49 }
0x16ae   :  { %6582 = vmatpush.bf16.msrb.mxu3 %v12063_v58 }
0x16af   :  { %7224 = vmatmul.msk.f32.gmra.mxu2 %vm670_vm6, %v11776_v43  ;;  %v6290_v43 = vpop.permute.xlu0 %6289  ;;  %v6286_v25 = vpop.permute.xlu1 %6285 }
0x16b0   :  { %6564 = vmatpush.bf16.msrb.mxu2 %v12086_v24 }
0x16b2   :  { %6583 = vmatpush.bf16.msrb.mxu3 %v12088_v3 }
0x16b4   :  { %6565 = vmatpush.bf16.msrb.mxu2 %v12099_v60 }
0x16b8   :  { %6566 = vmatpush.bf16.msrb.mxu2 %v12108_v4 }
0x16bc   :  { %6567 = vmatpush.bf16.msrb.mxu2 %v12118_v45 }
0x16c0   :  { %6568 = vmatpush.bf16.msrb.mxu2 %v12127_v54  ;;  %v6300_v1 = vpop.permute.xlu2 %6299 }
0x16c1   :  { %7185 = vmatpush.xpose.msk.msra.mxu1 %vm59_vm0, %v6300_v1 }
0x16c4   :  { %6569 = vmatpush.bf16.msrb.mxu2 %v12136_v50 }
0x16c5   :  { %7186 = vmatpush.xpose.msk.msra.mxu1 %vm59_vm0, %v6298_v41 }
0x16c8   :  { %v6294_v5 = vpop.permute.xlu2 %6293 }
0x16c9   :  { %7187 = vmatpush.xpose.msk.msra.mxu1 %vm59_vm0, %v6296_v6 }
0x16cd   :  { %7188 = vmatpush.xpose.msk.msra.mxu1 %vm59_vm0, %v6294_v5 }
0x16d0   :  { %v6288_v34 = vpop.permute.xlu2 %6287 }
0x16d1   :  { %7189 = vmatpush.xpose.msk.msra.mxu1 %vm59_vm0, %v6292_v12 }
0x16d5   :  { %7190 = vmatpush.xpose.msk.msra.mxu1 %vm59_vm0, %v6290_v43 }
0x16d9   :  { %7191 = vmatpush.xpose.msk.msra.mxu1 %vm59_vm0, %v6288_v34 }
0x16dd   :  { %7192 = vmatpush.xpose.msk.msra.mxu1 %vm59_vm0, %v6286_v25 }
0x16e0   :  { %7193 = vmatmul.msk.f32.vlgmr.msra.gmra.mxu1 %vm59_vm0, %v11658_v20  ;;  %v6268_v20 = vpop.f32.mrf.mxu3 }
0x16e1   :  { %7225 = vmatpush.xpose.msk.msrb.mxu1 %vm670_vm6, %v12203_v53 }
0x16e5   :  { %7226 = vmatpush.xpose.msk.msrb.mxu1 %vm670_vm6, %v11897_v39 }
0x16e8   :  { %7194 = vmatmul.msk.f32.gmra.mxu1 %vm59_vm0, %v11669_v27  ;;  %v6198_v27 = vpop.f32.mrf.mxu2  ;;  %v6270_v40 = vpop.f32.mrf.mxu3 }
0x16e9   :  { %7227 = vmatpush.xpose.msk.msrb.mxu1 %vm670_vm6, %v11993_v8 }
0x16ed   :  { %7228 = vmatpush.xpose.msk.msrb.mxu1 %vm670_vm6, %v12236_v0 }
0x16f0   :  { %v6200_v10 = vpop.f32.mrf.mxu2 }
0x16f1   :  { %7229 = vmatpush.xpose.msk.msrb.mxu1 %vm670_vm6, %v11951_v61  ;;  %v6240_v61 = vpop.f32.mrf.mxu0 }
0x16f5   :  { %7230 = vmatpush.xpose.msk.msrb.mxu1 %vm670_vm6, %v12039_v59 }
0x16f9   :  { %7231 = vmatpush.xpose.msk.msrb.mxu1 %vm670_vm6, %v12252_v31  ;;  %v6242_v47 = vpop.f32.mrf.mxu0 }
0x16fd   :  { %7232 = vmatpush.xpose.msk.msrb.mxu1 %vm670_vm6, %v12020_v56 }
0x1700   :  { %7233 = vmatmul.msk.f32.vlgmr.msrb.gmra.mxu1 %vm670_vm6, %v11784_v55  ;;  %v12494_v55 = vld [vmem:[#allocation12_spill] sm:$0xff] }
0x1701   :  { %6548 = vmatpush.bf16.msra.mxu1 %v11847_v21 }
0x1703   :  { %v6412_v24 = vpop.f32.mrf.mxu0 }
0x1705   :  { %6549 = vmatpush.bf16.msra.mxu1 %v11862_v57 }
0x1708   :  { %7234 = vmatmul.msk.f32.gmra.mxu1 %vm670_vm6, %v11791_v62  ;;  %v6381_v39 = vpop.f32.mrf.mxu3  ;;  %v12495_v62 = vld [vmem:[#allocation5_spill] sm:$0xff] }
0x1709   :  { %6550 = vmatpush.bf16.msra.mxu1 %v11882_v9 }
0x170b   :  { %v6415_v16 = vpop.f32.mrf.mxu0 }
0x170d   :  { %6551 = vmatpush.bf16.msra.mxu1 %v11913_v17 }
0x1710   :  { %v6384_v57 = vpop.f32.mrf.mxu3 }
0x1711   :  { %6552 = vmatpush.bf16.msra.mxu1 %v11935_v14  ;;  %v7572_v26 = vpack.i.bf16 %v6384_v57, %v6381_v39  ;;  %v12496_v14 = vld [vmem:[#allocation11_spill] sm:$0xff] }
0x1713   :  { %7573 = vrot.lane.b32.xlu0 %v7572_v26, %s8109_s26 }
0x1714   :  { %v6212_v35 = vpop.f32.mrf.mxu1 }
0x1715   :  { %v6213_v21 = vadd.f32 %v6212_v35, %v6198_v27  ;;  %6553 = vmatpush.bf16.msra.mxu1 %v12494_v55 }
0x1717   :  { %v6227_v37 = vadd.f32 %v6226_v30, %v6213_v21 }
0x1719   :  { %6273 = vst [vmem:[#allocation2] sm:$0xff] %v6227_v37  ;;  %6554 = vmatpush.bf16.msra.mxu1 %v12495_v62 }
0x171a   :  { %v6254_v33 = vpop.f32.mrf.mxu2 }
0x171b   :  { %v6255_v9 = vadd.f32 %v6254_v33, %v6240_v61 }
0x171c   :  { %v6214_v0 = vpop.f32.mrf.mxu1 }
0x171d   :  { %v6269_v17 = vadd.f32 %v6268_v20, %v6255_v9  ;;  %v6215_v8 = vadd.f32 %v6214_v0, %v6200_v10  ;;  %6555 = vmatpush.bf16.msra.mxu1 %v12496_v14 }
0x171f   :  { %6274 = vst [vmem:[#allocation2 + $0x8] sm:$0xff] %v6269_v17  ;;  %v6229_v48 = vadd.f32 %v6228_v22, %v6215_v8 }
0x1721   :  { %6275 = vst [vmem:[#allocation2 + $0x10] sm:$0xff] %v6229_v48 }
0x1722   :  { %v6256_v11 = vpop.f32.mrf.mxu2 }
0x1723   :  { %v6257_v56 = vadd.f32 %v6256_v11, %v6242_v47 }
0x1725   :  { %v6271_v7 = vadd.f32 %v6270_v40, %v6257_v56 }
0x1727   :  { %6276 = vst [vmem:[#allocation2 + $0x18] sm:$0xff] %v6271_v7 }
0x172a   :  { %v6443_v49 = vpop.f32.mrf.mxu2 }
0x1732   :  { %v6446_v59 = vpop.f32.mrf.mxu2 }
0x1733   :  { %v7577_v46 = vpack.i.bf16 %v6446_v59, %v6443_v49 }
0x1735   :  { %7578 = vrot.lane.b32.xlu2 %v7577_v46, %s8109_s26  ;;  %s6599_s26 = sshll.u32 %s8113_s5, 4  ;;  %s6600_s26 = int_to_ptr.vmem [resolvable:$true] %s6599_s26 }
0x175d   :  { %v6334_v19 = vpop.f32.mrf.mxu1 }
0x1765   :  { %v6337_v58 = vpop.f32.mrf.mxu1 }
0x177d   :  { %v6474_v53 = vpop.f32.mrf.mxu1 }
0x1785   :  { %v6477_v3 = vpop.f32.mrf.mxu1  ;;  %v7574_v4 = vpop.permute.xlu0 %7573 }
0x1786   :  { %v6502_v60 = vpack.c.bf16 %v6477_v3, %v6474_v53  ;;  %v7576_v45 = vunpack.i.h.bf16 %v7574_v4  ;;  %v7575_v54 = vunpack.i.l.bf16 %v7574_v4 }
0x1788   :  { %7235 = vmatmul.msk.bf16.vlgmr.msra.gmra.mxu2 %vm670_vm6, %v6502_v60  ;;  %v6497_v36 = vsel %vm670_vm6, %v6337_v58, %v7576_v45  ;;  %v6496_v44 = vsel %vm670_vm6, %v6334_v19, %v7575_v54 }
0x1789   :  { %v6500_v28 = vpack.c.bf16 %v6497_v36, %v6496_v44 }
0x178b   :  { %6514 = vmatmul.bf16.vlgmr.msra.gmra.mxu3 %v6500_v28  ;;  %6556 = vmatmul.bf16.vlgmr.msra.gmra.mxu1 %v6500_v28 }
0x178f   :  { %v7579_v50 = vpop.permute.xlu2 %7578 }
0x1790   :  { %v7581_v63 = vunpack.i.h.bf16 %v7579_v50  ;;  %v7580_v51 = vunpack.i.l.bf16 %v7579_v50 }
0x1792   :  { %v6498_v13 = vsel %vm670_vm6, %v6412_v24, %v7580_v51  ;;  %v6499_v15 = vsel %vm670_vm6, %v6415_v16, %v7581_v63 }
0x1793   :  { %v6501_v29 = vpack.c.bf16 %v6499_v15, %v6498_v13 }
0x1795   :  { %6528 = vmatmul.bf16.vlgmr.msrb.gmra.mxu0 %v6501_v29 }
0x1798   :  { %6570 = vmatmul.bf16.vlgmr.msrb.gmra.mxu2 %v6501_v29 }
0x179b   :  { %7236 = vmatmul.msk.bf16.vlgmr.msrb.gmra.mxu3 %vm670_vm6, %v6502_v60 }
0x1808   :  { %v6557_v5 = vpop.f32.mrf.mxu1 }
0x180b   :  { %v6543_v23 = vpop.f32.mrf.mxu2 }
0x180e   :  { %v6515_v42 = vpop.f32.mrf.mxu3 }
0x1810   :  { %v6559_v30 = vpop.f32.mrf.mxu1 }
0x1812   :  { %v6529_v31 = vpop.f32.mrf.mxu0 }
0x1813   :  { %v6530_v2 = vadd.f32 %v6529_v31, %v6515_v42  ;;  %v6545_v18 = vpop.f32.mrf.mxu2 }
0x1815   :  { %v6544_v38 = vadd.f32 %v6543_v23, %v6530_v2 }
0x1816   :  { %v6517_v32 = vpop.f32.mrf.mxu3 }
0x1817   :  { %6591 = vst [vmem:[#allocation2 + $0x20] sm:$0xff] %v6544_v38 }
0x181a   :  { %v6531_v52 = vpop.f32.mrf.mxu0 }
0x181b   :  { %v6532_v1 = vadd.f32 %v6531_v52, %v6517_v32  ;;  %v6571_v41 = vpop.f32.mrf.mxu2 }
0x181c   :  { %v6572_v12 = vadd.f32 %v6571_v41, %v6557_v5 }
0x181d   :  { %v6546_v6 = vadd.f32 %v6545_v18, %v6532_v1 }
0x181e   :  { %v6585_v43 = vpop.f32.mrf.mxu3 }
0x181f   :  { %6593 = vst [vmem:[#allocation2 + $0x30] sm:$0xff] %v6546_v6  ;;  %v6586_v34 = vadd.f32 %v6585_v43, %v6572_v12 }
0x1821   :  { %6592 = vst [vmem:[#allocation2 + $0x28] sm:$0xff] %v6586_v34 }
0x1823   :  { %v6573_v25 = vpop.f32.mrf.mxu2 }
0x1824   :  { %v6574_v22 = vadd.f32 %v6573_v25, %v6559_v30 }
0x1826   :  { %v6587_v20 = vpop.f32.mrf.mxu3 }
0x1827   :  { %v6588_v27 = vadd.f32 %v6587_v20, %v6574_v22 }
0x1829   :  { %6594 = vst [vmem:[#allocation2 + $0x38] sm:$0xff] %v6588_v27 }
0x182a   :  { %6607 = dma.vmem_to_hbm [thread:$0]  %s6600_s26, 1024, %s6602_s17, [#allocation3], %s8114_s18, %s8114_s18, %s8112_s9  }
0x182b   :  { %8103 = dma.done.wait [#allocation3], 1024  }
0x182c   :  { %8104 = vsyncadd [#allocation3], 4294966272 }
0x182d   :  { %6612 = vsyncpa [#allocation3], 1 }

</bundles_post_ra>
